<compile_context>
chip_gen: v5e
topology: v5e:2x2
jax: 0.10.0
libtpu: 0.0.40
codegen_flags: <defaults>
</compile_context>

<pallas_src>
import functools
import numpy as np
import jax
import jax.numpy as jnp
from jax.experimental import pallas as pl
from jax.experimental.pallas import tpu as pltpu

NGF, NC, NZ = 4, 3, 25          # ngf, nc, nz from the PyTorch module
NZ_PAD = 32                     # latent contraction dim padded to a clean sublane multiple
EPS = 1e-5                      # BatchNorm2d default eps

H1, H2, H3 = 4, 8, 16           # spatial sizes after each ConvTranspose2d
C1, C2 = NGF * 8, NGF * 4       # 32, 16
HW3 = H3 * H3                   # 256


def _ss_pad(crop_size):
    ss = crop_size * crop_size
    return ss, ((ss + 127) // 128) * 128


# ------------------------------- fused kernel -------------------------------

def _generator_kernel(z_ref, m1_ref, p1_ref, bc1_ref, g1_ref, b1_ref,
                      p2_ref, bc2_ref, g2_ref, b2_ref,
                      m2_hbm, m3_hbm, kint_hbm,
                      o_ref,
                      m2_v, m3_v, kint_v, dma_sem):
    """Entire Generator forward for one (small) batch; activations stay in vregs/VMEM."""
    n = z_ref.shape[0]

    # Kick off the big weight pulls immediately; wait right before each consumer.
    cp_m2 = pltpu.make_async_copy(m2_hbm, m2_v, dma_sem.at[0])
    cp_m3 = pltpu.make_async_copy(m3_hbm, m3_v, dma_sem.at[1])
    cp_ki = pltpu.make_async_copy(kint_hbm, kint_v, dma_sem.at[2])
    cp_m2.start()
    cp_m3.start()
    cp_ki.start()

    def bn_relu(x, pool, bcast, gamma, beta):
        # x: (N, C*HW) f32, channel-major columns.  Train-mode (biased) per-channel batch stats
        # via tiny bf16 indicator matmuls (entries 0/1/2^-k are exact in bf16).  The mean and
        # mean-square rows (and the scale/shift rows) are stacked so each indicator matrix is
        # streamed through the MXU once, not twice.  No reshapes, no narrow masked stores.
        rowmean = jnp.mean(x, axis=0, keepdims=True)                                 # (1, C*HW)
        rowmeansq = jnp.mean(x * x, axis=0, keepdims=True)
        stats = jnp.concatenate([rowmean, rowmeansq], axis=0).astype(jnp.bfloat16)   # (2, C*HW)
        pooled = jnp.dot(stats, pool, preferred_element_type=jnp.float32)            # (2, C)
        mean_c = pooled[0:1, :]
        var_c = jnp.maximum(pooled[1:2, :] - mean_c * mean_c, 0.0)
        scale_c = gamma * jax.lax.rsqrt(var_c + EPS)                                 # (1, C)
        shift_c = beta - mean_c * scale_c
        coeff = jnp.concatenate([scale_c, shift_c], axis=0).astype(jnp.bfloat16)     # (2, C)
        sb = jnp.dot(coeff, bcast, preferred_element_type=jnp.float32)               # (2, C*HW)
        return jnp.maximum(x * sb[0:1, :] + sb[1:2, :], 0.0)

    # block 1: ConvTranspose2d(25->32, k4, s1, p0) as matmul, BN, ReLU           -> (N, 32*4*4)
    x1 = jnp.dot(z_ref[...].astype(jnp.bfloat16), m1_ref[...],
                 preferred_element_type=jnp.float32)
    x1 = bn_relu(x1, p1_ref[...], bc1_ref[...], g1_ref[...], b1_ref[...])

    # block 2: ConvTranspose2d(32->16, k4, s2, p1) as matmul, BN, ReLU           -> (N, 16*8*8)
    cp_m2.wait()
    x2 = jnp.dot(x1.astype(jnp.bfloat16), m2_v[...],
                 preferred_element_type=jnp.float32)
    x2 = bn_relu(x2, p2_ref[...], bc2_ref[...], g2_ref[...], b2_ref[...])

    # block 3: ConvTranspose2d(16->3, k4, s2, p1) as matmul, Tanh                -> (N, 3*16*16)
    cp_m3.wait()
    x3 = jnp.tanh(jnp.dot(x2.astype(jnp.bfloat16), m3_v[...],
                          preferred_element_type=jnp.float32)).astype(jnp.bfloat16)

    # bilinear resize (align_corners=False): channels don't mix, so restack (N, 3*256) into
    # (3N, 256) channel-major rows and stream the shared (256, S*S) Kronecker matrix through the
    # MXU exactly once.  All slice/store offsets are multiples of 128 lanes.
    cp_ki.wait()
    x3s = jnp.concatenate([x3[:, c * HW3:(c + 1) * HW3] for c in range(NC)], axis=0)  # (3N, 256)
    y = jnp.dot(x3s, kint_v[...], preferred_element_type=jnp.float32)                 # (3N, ssp)
    ssp = o_ref.shape[1] // NC
    for c in range(NC):                                    # static unroll, NC = 3
        o_ref[:, c * ssp:(c + 1) * ssp] = y[c * n:(c + 1) * n, :]


# ----------------------- parameter / matrix construction --------------------

def conv_transpose_as_matrix(w, ih, iw, stride, pad):
    """Dense matrix for ConvTranspose2d (no bias).  w: (Cin, Cout, KH, KW).
    Rows indexed (cin, ih, iw); columns indexed (cout, oh, ow)  (channel-major == NCHW flatten)."""
    cin, cout, kh, kw = w.shape
    oh = (ih - 1) * stride - 2 * pad + kh
    ow = (iw - 1) * stride - 2 * pad + kw
    m = np.zeros((cin, ih, iw, cout, oh, ow), dtype=np.float32)
    for i in range(ih):
        for j in range(iw):
            for a in range(kh):
                for b in range(kw):
                    y = i * stride - pad + a
                    x = j * stride - pad + b
                    if 0 <= y < oh and 0 <= x < ow:
                        m[:, i, j, :, y, x] += w[:, :, a, b]
    return m.reshape(cin * ih * iw, cout * oh * ow), oh, ow


def bilinear_matrix(in_size, out_size):
    """1-D interpolation weights matching F.interpolate(mode='bilinear', align_corners=False)."""
    a = np.zeros((out_size, in_size), dtype=np.float32)
    scale = in_size / out_size
    for o in range(out_size):
        src = max((o + 0.5) * scale - 0.5, 0.0)
        i0 = min(int(np.floor(src)), in_size - 1)
        i1 = i0 + 1 if i0 < in_size - 1 else i0
        l1 = src - i0
        a[o, i0] += 1.0 - l1
        a[o, i1] += l1
    return a


def _pool_bcast(c, hw):
    """bcast[c', (c,h,w)] = 1{c'==c};  pool = bcast.T / hw  (per-channel mean over the HW block)."""
    bcast = np.kron(np.eye(c, dtype=np.float32), np.ones((1, hw), np.float32))   # (C, C*HW)
    pool = bcast.T / float(hw)                                                   # (C*HW, C)
    return pool, bcast


def build_params(key, crop_size):
    k1, k2, k3 = jax.random.split(key, 3)
    # ConvTranspose2d weights, PyTorch layout (Cin, Cout, KH, KW); deterministic synthetic init.
    w1 = np.asarray(0.05 * jax.random.normal(k1, (NZ, C1, 4, 4), jnp.float32))
    w2 = np.asarray(0.05 * jax.random.normal(k2, (C1, C2, 4, 4), jnp.float32))
    w3 = np.asarray(0.05 * jax.random.normal(k3, (C2, NC, 4, 4), jnp.float32))

    m1, h1, _ = conv_transpose_as_matrix(w1, 1, 1, 1, 0)        # (25, 32*4*4)
    m1 = np.pad(m1, ((0, NZ_PAD - NZ), (0, 0)))                 # zero rows for the padded latent
    m2, h2, _ = conv_transpose_as_matrix(w2, h1, h1, 2, 1)      # (512, 16*8*8)
    m3, h3, w3sz = conv_transpose_as_matrix(w3, h2, h2, 2, 1)   # (1024, 3*16*16)
    assert (h1, h2, h3) == (H1, H2, H3)

    # Separable bilinear resize: one (16*16, S*S) matrix shared by all channels, columns padded
    # to a multiple of 128 lanes so every output store is unmasked.
    ss, ssp = _ss_pad(crop_size)
    ah = bilinear_matrix(h3, crop_size)                         # (S, 16)
    aw = bilinear_matrix(w3sz, crop_size)                       # (S, 16)
    kinterp = np.einsum('oh,pw->hwop', ah, aw).reshape(h3 * w3sz, ss)
    if ssp != ss:
        kinterp = np.pad(kinterp, ((0, 0), (0, ssp - ss)))

    p1, bc1 = _pool_bcast(C1, h1 * h1)
    p2, bc2 = _pool_bcast(C2, h2 * h2)

    return dict(
        # matmul weights in bf16 (f32 MXU accumulation inside the kernel)
        m1=jnp.asarray(m1, jnp.bfloat16), m2=jnp.asarray(m2, jnp.bfloat16),
        m3=jnp.asarray(m3, jnp.bfloat16), kinterp=jnp.asarray(kinterp, jnp.bfloat16),
        # BN indicator matrices in bf16: entries are 0, 1, 1/16, 1/64 -> exact in bf16.
        p1=jnp.asarray(p1, jnp.bfloat16), bc1=jnp.asarray(bc1, jnp.bfloat16),
        p2=jnp.asarray(p2, jnp.bfloat16), bc2=jnp.asarray(bc2, jnp.bfloat16),
        # BatchNorm2d default init: weight=1, bias=0
        g1=jnp.ones((1, C1), jnp.float32), b1=jnp.zeros((1, C1), jnp.float32),
        g2=jnp.ones((1, C2), jnp.float32), b2=jnp.zeros((1, C2), jnp.float32),
    )


# ------------------------------ forward pass ---------------------------------

def _vmem():
    return pl.BlockSpec(memory_space=pltpu.MemorySpace.VMEM)


def _hbm():
    return pl.BlockSpec(memory_space=pl.ANY)


def _fused_call(z_pad, params, crop_size):
    n = z_pad.shape[0]
    ss, ssp = _ss_pad(crop_size)
    mm_flops = 2 * n * (NZ_PAD * C1 * H1 * H1
                        + C1 * H1 * H1 * C2 * H2 * H2
                        + C2 * H2 * H2 * NC * HW3
                        + NC * HW3 * ssp)
    bn_flops = 2 * 2 * 2 * (C1 * H1 * H1 * C1 + C2 * H2 * H2 * C2)
    weight_bytes = 2 * (NZ_PAD * C1 * H1 * H1 + C1 * H1 * H1 * C2 * H2 * H2
                        + C2 * H2 * H2 * NC * HW3 + HW3 * ssp
                        + 2 * C1 * H1 * H1 * C1 + 2 * C2 * H2 * H2 * C2)
    io_bytes = 4 * n * (NZ_PAD + NC * ssp) + 4 * 4 * (C1 + C2)
    cost = pl.CostEstimate(
        flops=int(mm_flops + bn_flops),
        transcendentals=int(n * NC * HW3 + 2 * (C1 + C2)),
        bytes_accessed=int(weight_bytes + io_bytes),
    )
    return pl.pallas_call(
        _generator_kernel,
        out_shape=jax.ShapeDtypeStruct((n, NC * ssp), jnp.float32),
        in_specs=[_vmem()] * 10 + [_hbm()] * 3,
        out_specs=_vmem(),
        scratch_shapes=[
            pltpu.VMEM((C1 * H1 * H1, C2 * H2 * H2), jnp.bfloat16),   # m2      (512, 1024)
            pltpu.VMEM((C2 * H2 * H2, NC * HW3), jnp.bfloat16),       # m3      (1024, 768)
            pltpu.VMEM((HW3, ssp), jnp.bfloat16),                     # kinterp (256, ssp)
            pltpu.SemaphoreType.DMA((3,)),
        ],
        cost_estimate=cost,
        compiler_params=pltpu.CompilerParams(vmem_limit_bytes=8 * 1024 * 1024),
    )(z_pad,
      params["m1"], params["p1"], params["bc1"], params["g1"], params["b1"],
      params["p2"], params["bc2"], params["g2"], params["b2"],
      params["m2"], params["m3"], params["kinterp"])


def generator_forward(x_nchw, params, crop_size):
    n = x_nchw.shape[0]
    ss, ssp = _ss_pad(crop_size)
    z = x_nchw.reshape(n, NZ).astype(jnp.float32)      # H=W=1 so NCHW flatten == channels
    z = jnp.pad(z, ((0, 0), (0, NZ_PAD - NZ)))         # pad contraction dim 25 -> 32
    out2d = _fused_call(z, params, crop_size)          # (N, NC*ssp), NCHW-flattened columns
    out = out2d.reshape(n, NC, ssp)[:, :, :ss]         # strip lane padding (no-op at crop 32)
    return out.reshape(n, NC, crop_size, crop_size)    # free row-major split, no transpose


if __name__ == "__main__":
    crop_size = 32                      # args.crop_size
    key = jax.random.PRNGKey(0)
    kx, kp = jax.random.split(key)
    x = jax.random.normal(kx, (2, NZ, 1, 1), jnp.float32)   # NCHW latent, like PyTorch
    params = build_params(kp, crop_size)

    fwd = jax.jit(functools.partial(generator_forward, crop_size=crop_size))
    out = jax.block_until_ready(fwd(x, params))
    assert out.shape == (2, NC, crop_size, crop_size), out.shape
    assert bool(jnp.all(jnp.isfinite(out)))
    print("KERNEL_OK")
</pallas_src>

<mosaic_0001>
module attributes {stable_mosaic.version = 11 : i64} {
  func.func @_generator_kernel(%arg0: memref<2x32xf32, #tpu.memory_space<vmem>>, %arg1: memref<32x512xbf16, #tpu.memory_space<vmem>>, %arg2: memref<512x32xbf16, #tpu.memory_space<vmem>>, %arg3: memref<32x512xbf16, #tpu.memory_space<vmem>>, %arg4: memref<1x32xf32, #tpu.memory_space<vmem>>, %arg5: memref<1x32xf32, #tpu.memory_space<vmem>>, %arg6: memref<1024x16xbf16, #tpu.memory_space<vmem>>, %arg7: memref<16x1024xbf16, #tpu.memory_space<vmem>>, %arg8: memref<1x16xf32, #tpu.memory_space<vmem>>, %arg9: memref<1x16xf32, #tpu.memory_space<vmem>>, %arg10: memref<512x1024xbf16, #tpu.memory_space<any>>, %arg11: memref<1024x768xbf16, #tpu.memory_space<any>>, %arg12: memref<256x1024xbf16, #tpu.memory_space<any>>, %arg13: memref<2x3072xf32, #tpu.memory_space<vmem>>, %arg14: memref<512x1024xbf16, #tpu.memory_space<vmem>>, %arg15: memref<1024x768xbf16, #tpu.memory_space<vmem>>, %arg16: memref<256x1024xbf16, #tpu.memory_space<vmem>>, %arg17: memref<3x!tpu.dma_semaphore, #tpu.memory_space<semaphore_mem>>) attributes {dimension_semantics = [], scalar_prefetch = 0 : i64, scratch_operands = 4 : i64, tpu.core_type = #tpu.core_type<tc>} {
    %c0_i32 = arith.constant 0 : i32
    %0 = tpu.memref_slice %arg17[%c0_i32] : memref<3x!tpu.dma_semaphore, #tpu.memory_space<semaphore_mem>> -> memref<1x!tpu.dma_semaphore, #tpu.memory_space<semaphore_mem>>
    %1 = tpu.memref_squeeze %0 : memref<1x!tpu.dma_semaphore, #tpu.memory_space<semaphore_mem>> -> memref<!tpu.dma_semaphore, #tpu.memory_space<semaphore_mem>>
    tpu.enqueue_dma source(%arg10 : memref<512x1024xbf16, #tpu.memory_space<any>>) target(%arg14 : memref<512x1024xbf16, #tpu.memory_space<vmem>>) target_semaphore(%1 : memref<!tpu.dma_semaphore, #tpu.memory_space<semaphore_mem>>)
    %c1_i32 = arith.constant 1 : i32
    %2 = tpu.memref_slice %arg17[%c1_i32] : memref<3x!tpu.dma_semaphore, #tpu.memory_space<semaphore_mem>> -> memref<1x!tpu.dma_semaphore, #tpu.memory_space<semaphore_mem>>
    %3 = tpu.memref_squeeze %2 : memref<1x!tpu.dma_semaphore, #tpu.memory_space<semaphore_mem>> -> memref<!tpu.dma_semaphore, #tpu.memory_space<semaphore_mem>>
    tpu.enqueue_dma source(%arg11 : memref<1024x768xbf16, #tpu.memory_space<any>>) target(%arg15 : memref<1024x768xbf16, #tpu.memory_space<vmem>>) target_semaphore(%3 : memref<!tpu.dma_semaphore, #tpu.memory_space<semaphore_mem>>)
    %c2_i32 = arith.constant 2 : i32
    %4 = tpu.memref_slice %arg17[%c2_i32] : memref<3x!tpu.dma_semaphore, #tpu.memory_space<semaphore_mem>> -> memref<1x!tpu.dma_semaphore, #tpu.memory_space<semaphore_mem>>
    %5 = tpu.memref_squeeze %4 : memref<1x!tpu.dma_semaphore, #tpu.memory_space<semaphore_mem>> -> memref<!tpu.dma_semaphore, #tpu.memory_space<semaphore_mem>>
    tpu.enqueue_dma source(%arg12 : memref<256x1024xbf16, #tpu.memory_space<any>>) target(%arg16 : memref<256x1024xbf16, #tpu.memory_space<vmem>>) target_semaphore(%5 : memref<!tpu.dma_semaphore, #tpu.memory_space<semaphore_mem>>)
    %c0 = arith.constant 0 : index
    %c0_0 = arith.constant 0 : index
    %6 = vector.load %arg0[%c0, %c0_0] : memref<2x32xf32, #tpu.memory_space<vmem>>, vector<2x32xf32>
    %7 = arith.truncf %6 : vector<2x32xf32> to vector<2x32xbf16>
    %c0_1 = arith.constant 0 : index
    %c0_2 = arith.constant 0 : index
    %8 = vector.load %arg1[%c0_1, %c0_2] : memref<32x512xbf16, #tpu.memory_space<vmem>>, vector<32x512xbf16>
    %cst = arith.constant dense<0.000000e+00> : vector<2x512xf32>
    %9 = tpu.matmul %7, %8, %cst {dimension_numbers = #tpu.dot_dimension_numbers<[1], [0], [0], [1], [0, 0, 1, 1], [], []>} : vector<2x32xbf16>, vector<32x512xbf16>, vector<2x512xf32> -> vector<2x512xf32>
    %c0_3 = arith.constant 0 : index
    %c0_4 = arith.constant 0 : index
    %10 = vector.load %arg2[%c0_3, %c0_4] : memref<512x32xbf16, #tpu.memory_space<vmem>>, vector<512x32xbf16>
    %c0_5 = arith.constant 0 : index
    %c0_6 = arith.constant 0 : index
    %11 = vector.load %arg3[%c0_5, %c0_6] : memref<32x512xbf16, #tpu.memory_space<vmem>>, vector<32x512xbf16>
    %c0_7 = arith.constant 0 : index
    %c0_8 = arith.constant 0 : index
    %12 = vector.load %arg4[%c0_7, %c0_8] : memref<1x32xf32, #tpu.memory_space<vmem>>, vector<1x32xf32>
    %c0_9 = arith.constant 0 : index
    %c0_10 = arith.constant 0 : index
    %13 = vector.load %arg5[%c0_9, %c0_10] : memref<1x32xf32, #tpu.memory_space<vmem>>, vector<1x32xf32>
    %cst_11 = arith.constant dense<0.000000e+00> : vector<512xf32>
    %14 = vector.multi_reduction <add>, %9, %cst_11 [0] : vector<2x512xf32> to vector<512xf32>
    %15 = vector.shape_cast %14 : vector<512xf32> to vector<1x512xf32>
    %cst_12 = arith.constant 2.000000e+00 : f32
    %16 = vector.broadcast %cst_12 : f32 to vector<1x512xf32>
    %17 = arith.divf %15, %16 : vector<1x512xf32>
    %18 = arith.mulf %9, %9 : vector<2x512xf32>
    %cst_13 = arith.constant dense<0.000000e+00> : vector<512xf32>
    %19 = vector.multi_reduction <add>, %18, %cst_13 [0] : vector<2x512xf32> to vector<512xf32>
    %20 = vector.shape_cast %19 : vector<512xf32> to vector<1x512xf32>
    %cst_14 = arith.constant 2.000000e+00 : f32
    %21 = vector.broadcast %cst_14 : f32 to vector<1x512xf32>
    %22 = arith.divf %20, %21 : vector<1x512xf32>
    %23 = tpu.concatenate %17, %22 in 0 : vector<1x512xf32>, vector<1x512xf32> -> vector<2x512xf32>
    %24 = arith.truncf %23 : vector<2x512xf32> to vector<2x512xbf16>
    %cst_15 = arith.constant dense<0.000000e+00> : vector<2x32xf32>
    %25 = tpu.matmul %24, %10, %cst_15 {dimension_numbers = #tpu.dot_dimension_numbers<[1], [0], [0], [1], [0, 0, 1, 1], [], []>} : vector<2x512xbf16>, vector<512x32xbf16>, vector<2x32xf32> -> vector<2x32xf32>
    %26 = vector.extract_strided_slice %25 {offsets = [0, 0], sizes = [1, 32], strides = [1, 1]} : vector<2x32xf32> to vector<1x32xf32>
    %27 = vector.extract_strided_slice %25 {offsets = [1, 0], sizes = [1, 32], strides = [1, 1]} : vector<2x32xf32> to vector<1x32xf32>
    %28 = arith.mulf %26, %26 : vector<1x32xf32>
    %29 = arith.subf %27, %28 : vector<1x32xf32>
    %cst_16 = arith.constant 0.000000e+00 : f32
    %30 = vector.broadcast %cst_16 : f32 to vector<1x32xf32>
    %31 = arith.maximumf %29, %30 : vector<1x32xf32>
    %cst_17 = arith.constant 9.99999974E-6 : f32
    %32 = vector.broadcast %cst_17 : f32 to vector<1x32xf32>
    %33 = arith.addf %31, %32 : vector<1x32xf32>
    %34 = math.rsqrt %33 : vector<1x32xf32>
    %35 = arith.mulf %12, %34 : vector<1x32xf32>
    %36 = arith.mulf %26, %35 : vector<1x32xf32>
    %37 = arith.subf %13, %36 : vector<1x32xf32>
    %38 = tpu.concatenate %35, %37 in 0 : vector<1x32xf32>, vector<1x32xf32> -> vector<2x32xf32>
    %39 = arith.truncf %38 : vector<2x32xf32> to vector<2x32xbf16>
    %cst_18 = arith.constant dense<0.000000e+00> : vector<2x512xf32>
    %40 = tpu.matmul %39, %11, %cst_18 {dimension_numbers = #tpu.dot_dimension_numbers<[1], [0], [0], [1], [0, 0, 1, 1], [], []>} : vector<2x32xbf16>, vector<32x512xbf16>, vector<2x512xf32> -> vector<2x512xf32>
    %41 = vector.extract_strided_slice %40 {offsets = [0, 0], sizes = [1, 512], strides = [1, 1]} : vector<2x512xf32> to vector<1x512xf32>
    %42 = vector.broadcast %41 : vector<1x512xf32> to vector<2x512xf32>
    %43 = arith.mulf %9, %42 : vector<2x512xf32>
    %44 = vector.extract_strided_slice %40 {offsets = [1, 0], sizes = [1, 512], strides = [1, 1]} : vector<2x512xf32> to vector<1x512xf32>
    %45 = vector.broadcast %44 : vector<1x512xf32> to vector<2x512xf32>
    %46 = arith.addf %43, %45 : vector<2x512xf32>
    %cst_19 = arith.constant 0.000000e+00 : f32
    %47 = vector.broadcast %cst_19 : f32 to vector<2x512xf32>
    %48 = arith.maximumf %46, %47 : vector<2x512xf32>
    %c0_i32_20 = arith.constant 0 : i32
    %49 = tpu.memref_slice %arg17[%c0_i32_20] : memref<3x!tpu.dma_semaphore, #tpu.memory_space<semaphore_mem>> -> memref<1x!tpu.dma_semaphore, #tpu.memory_space<semaphore_mem>>
    %50 = tpu.memref_squeeze %49 : memref<1x!tpu.dma_semaphore, #tpu.memory_space<semaphore_mem>> -> memref<!tpu.dma_semaphore, #tpu.memory_space<semaphore_mem>>
    tpu.wait_dma2 semaphore(%50 : memref<!tpu.dma_semaphore, #tpu.memory_space<semaphore_mem>>) src(%arg10 : memref<512x1024xbf16, #tpu.memory_space<any>>) dst(%arg14 : memref<512x1024xbf16, #tpu.memory_space<vmem>>)
    %51 = arith.truncf %48 : vector<2x512xf32> to vector<2x512xbf16>
    %c0_21 = arith.constant 0 : index
    %c0_22 = arith.constant 0 : index
    %52 = vector.load %arg14[%c0_21, %c0_22] : memref<512x1024xbf16, #tpu.memory_space<vmem>>, vector<512x1024xbf16>
    %cst_23 = arith.constant dense<0.000000e+00> : vector<2x1024xf32>
    %53 = tpu.matmul %51, %52, %cst_23 {dimension_numbers = #tpu.dot_dimension_numbers<[1], [0], [0], [1], [0, 0, 1, 1], [], []>} : vector<2x512xbf16>, vector<512x1024xbf16>, vector<2x1024xf32> -> vector<2x1024xf32>
    %c0_24 = arith.constant 0 : index
    %c0_25 = arith.constant 0 : index
    %54 = vector.load %arg6[%c0_24, %c0_25] : memref<1024x16xbf16, #tpu.memory_space<vmem>>, vector<1024x16xbf16>
    %c0_26 = arith.constant 0 : index
    %c0_27 = arith.constant 0 : index
    %55 = vector.load %arg7[%c0_26, %c0_27] : memref<16x1024xbf16, #tpu.memory_space<vmem>>, vector<16x1024xbf16>
    %c0_28 = arith.constant 0 : index
    %c0_29 = arith.constant 0 : index
    %56 = vector.load %arg8[%c0_28, %c0_29] : memref<1x16xf32, #tpu.memory_space<vmem>>, vector<1x16xf32>
    %c0_30 = arith.constant 0 : index
    %c0_31 = arith.constant 0 : index
    %57 = vector.load %arg9[%c0_30, %c0_31] : memref<1x16xf32, #tpu.memory_space<vmem>>, vector<1x16xf32>
    %cst_32 = arith.constant dense<0.000000e+00> : vector<1024xf32>
    %58 = vector.multi_reduction <add>, %53, %cst_32 [0] : vector<2x1024xf32> to vector<1024xf32>
    %59 = vector.shape_cast %58 : vector<1024xf32> to vector<1x1024xf32>
    %cst_33 = arith.constant 2.000000e+00 : f32
    %60 = vector.broadcast %cst_33 : f32 to vector<1x1024xf32>
    %61 = arith.divf %59, %60 : vector<1x1024xf32>
    %62 = arith.mulf %53, %53 : vector<2x1024xf32>
    %cst_34 = arith.constant dense<0.000000e+00> : vector<1024xf32>
    %63 = vector.multi_reduction <add>, %62, %cst_34 [0] : vector<2x1024xf32> to vector<1024xf32>
    %64 = vector.shape_cast %63 : vector<1024xf32> to vector<1x1024xf32>
    %cst_35 = arith.constant 2.000000e+00 : f32
    %65 = vector.broadcast %cst_35 : f32 to vector<1x1024xf32>
    %66 = arith.divf %64, %65 : vector<1x1024xf32>
    %67 = tpu.concatenate %61, %66 in 0 : vector<1x1024xf32>, vector<1x1024xf32> -> vector<2x1024xf32>
    %68 = arith.truncf %67 : vector<2x1024xf32> to vector<2x1024xbf16>
    %cst_36 = arith.constant dense<0.000000e+00> : vector<2x16xf32>
    %69 = tpu.matmul %68, %54, %cst_36 {dimension_numbers = #tpu.dot_dimension_numbers<[1], [0], [0], [1], [0, 0, 1, 1], [], []>} : vector<2x1024xbf16>, vector<1024x16xbf16>, vector<2x16xf32> -> vector<2x16xf32>
    %70 = vector.extract_strided_slice %69 {offsets = [0, 0], sizes = [1, 16], strides = [1, 1]} : vector<2x16xf32> to vector<1x16xf32>
    %71 = vector.extract_strided_slice %69 {offsets = [1, 0], sizes = [1, 16], strides = [1, 1]} : vector<2x16xf32> to vector<1x16xf32>
    %72 = arith.mulf %70, %70 : vector<1x16xf32>
    %73 = arith.subf %71, %72 : vector<1x16xf32>
    %cst_37 = arith.constant 0.000000e+00 : f32
    %74 = vector.broadcast %cst_37 : f32 to vector<1x16xf32>
    %75 = arith.maximumf %73, %74 : vector<1x16xf32>
    %cst_38 = arith.constant 9.99999974E-6 : f32
    %76 = vector.broadcast %cst_38 : f32 to vector<1x16xf32>
    %77 = arith.addf %75, %76 : vector<1x16xf32>
    %78 = math.rsqrt %77 : vector<1x16xf32>
    %79 = arith.mulf %56, %78 : vector<1x16xf32>
    %80 = arith.mulf %70, %79 : vector<1x16xf32>
    %81 = arith.subf %57, %80 : vector<1x16xf32>
    %82 = tpu.concatenate %79, %81 in 0 : vector<1x16xf32>, vector<1x16xf32> -> vector<2x16xf32>
    %83 = arith.truncf %82 : vector<2x16xf32> to vector<2x16xbf16>
    %cst_39 = arith.constant dense<0.000000e+00> : vector<2x1024xf32>
    %84 = tpu.matmul %83, %55, %cst_39 {dimension_numbers = #tpu.dot_dimension_numbers<[1], [0], [0], [1], [0, 0, 1, 1], [], []>} : vector<2x16xbf16>, vector<16x1024xbf16>, vector<2x1024xf32> -> vector<2x1024xf32>
    %85 = vector.extract_strided_slice %84 {offsets = [0, 0], sizes = [1, 1024], strides = [1, 1]} : vector<2x1024xf32> to vector<1x1024xf32>
    %86 = vector.broadcast %85 : vector<1x1024xf32> to vector<2x1024xf32>
    %87 = arith.mulf %53, %86 : vector<2x1024xf32>
    %88 = vector.extract_strided_slice %84 {offsets = [1, 0], sizes = [1, 1024], strides = [1, 1]} : vector<2x1024xf32> to vector<1x1024xf32>
    %89 = vector.broadcast %88 : vector<1x1024xf32> to vector<2x1024xf32>
    %90 = arith.addf %87, %89 : vector<2x1024xf32>
    %cst_40 = arith.constant 0.000000e+00 : f32
    %91 = vector.broadcast %cst_40 : f32 to vector<2x1024xf32>
    %92 = arith.maximumf %90, %91 : vector<2x1024xf32>
    %c1_i32_41 = arith.constant 1 : i32
    %93 = tpu.memref_slice %arg17[%c1_i32_41] : memref<3x!tpu.dma_semaphore, #tpu.memory_space<semaphore_mem>> -> memref<1x!tpu.dma_semaphore, #tpu.memory_space<semaphore_mem>>
    %94 = tpu.memref_squeeze %93 : memref<1x!tpu.dma_semaphore, #tpu.memory_space<semaphore_mem>> -> memref<!tpu.dma_semaphore, #tpu.memory_space<semaphore_mem>>
    tpu.wait_dma2 semaphore(%94 : memref<!tpu.dma_semaphore, #tpu.memory_space<semaphore_mem>>) src(%arg11 : memref<1024x768xbf16, #tpu.memory_space<any>>) dst(%arg15 : memref<1024x768xbf16, #tpu.memory_space<vmem>>)
    %95 = arith.truncf %92 : vector<2x1024xf32> to vector<2x1024xbf16>
    %c0_42 = arith.constant 0 : index
    %c0_43 = arith.constant 0 : index
    %96 = vector.load %arg15[%c0_42, %c0_43] : memref<1024x768xbf16, #tpu.memory_space<vmem>>, vector<1024x768xbf16>
    %cst_44 = arith.constant dense<0.000000e+00> : vector<2x768xf32>
    %97 = tpu.matmul %95, %96, %cst_44 {dimension_numbers = #tpu.dot_dimension_numbers<[1], [0], [0], [1], [0, 0, 1, 1], [], []>} : vector<2x1024xbf16>, vector<1024x768xbf16>, vector<2x768xf32> -> vector<2x768xf32>
    %98 = math.tanh %97 : vector<2x768xf32>
    %99 = arith.truncf %98 : vector<2x768xf32> to vector<2x768xbf16>
    %c2_i32_45 = arith.constant 2 : i32
    %100 = tpu.memref_slice %arg17[%c2_i32_45] : memref<3x!tpu.dma_semaphore, #tpu.memory_space<semaphore_mem>> -> memref<1x!tpu.dma_semaphore, #tpu.memory_space<semaphore_mem>>
    %101 = tpu.memref_squeeze %100 : memref<1x!tpu.dma_semaphore, #tpu.memory_space<semaphore_mem>> -> memref<!tpu.dma_semaphore, #tpu.memory_space<semaphore_mem>>
    tpu.wait_dma2 semaphore(%101 : memref<!tpu.dma_semaphore, #tpu.memory_space<semaphore_mem>>) src(%arg12 : memref<256x1024xbf16, #tpu.memory_space<any>>) dst(%arg16 : memref<256x1024xbf16, #tpu.memory_space<vmem>>)
    %102 = vector.extract_strided_slice %99 {offsets = [0, 0], sizes = [2, 256], strides = [1, 1]} : vector<2x768xbf16> to vector<2x256xbf16>
    %103 = vector.extract_strided_slice %99 {offsets = [0, 256], sizes = [2, 256], strides = [1, 1]} : vector<2x768xbf16> to vector<2x256xbf16>
    %104 = vector.extract_strided_slice %99 {offsets = [0, 512], sizes = [2, 256], strides = [1, 1]} : vector<2x768xbf16> to vector<2x256xbf16>
    %105 = tpu.concatenate %102, %103, %104 in 0 : vector<2x256xbf16>, vector<2x256xbf16>, vector<2x256xbf16> -> vector<6x256xbf16>
    %c0_46 = arith.constant 0 : index
    %c0_47 = arith.constant 0 : index
    %106 = vector.load %arg16[%c0_46, %c0_47] : memref<256x1024xbf16, #tpu.memory_space<vmem>>, vector<256x1024xbf16>
    %cst_48 = arith.constant dense<0.000000e+00> : vector<6x1024xf32>
    %107 = tpu.matmul %105, %106, %cst_48 {dimension_numbers = #tpu.dot_dimension_numbers<[1], [0], [0], [1], [0, 0, 1, 1], [], []>} : vector<6x256xbf16>, vector<256x1024xbf16>, vector<6x1024xf32> -> vector<6x1024xf32>
    %108 = vector.extract_strided_slice %107 {offsets = [0, 0], sizes = [2, 1024], strides = [1, 1]} : vector<6x1024xf32> to vector<2x1024xf32>
    %c0_49 = arith.constant 0 : index
    %c0_50 = arith.constant 0 : index
    %109 = vector.load %arg13[%c0_49, %c0_50] : memref<2x3072xf32, #tpu.memory_space<vmem>>, vector<2x1024xf32>
    tpu.vector_store %arg13[%c0_49, %c0_50], %108 {strides = array<i32>} : memref<2x3072xf32, #tpu.memory_space<vmem>>, vector<2x1024xf32>,
    %110 = vector.extract_strided_slice %107 {offsets = [2, 0], sizes = [2, 1024], strides = [1, 1]} : vector<6x1024xf32> to vector<2x1024xf32>
    %c0_51 = arith.constant 0 : index
    %c1024 = arith.constant 1024 : index
    %111 = vector.load %arg13[%c0_51, %c1024] : memref<2x3072xf32, #tpu.memory_space<vmem>>, vector<2x1024xf32>
    tpu.vector_store %arg13[%c0_51, %c1024], %110 {strides = array<i32>} : memref<2x3072xf32, #tpu.memory_space<vmem>>, vector<2x1024xf32>,
    %112 = vector.extract_strided_slice %107 {offsets = [4, 0], sizes = [2, 1024], strides = [1, 1]} : vector<6x1024xf32> to vector<2x1024xf32>
    %c0_52 = arith.constant 0 : index
    %c2048 = arith.constant 2048 : index
    %113 = vector.load %arg13[%c0_52, %c2048] : memref<2x3072xf32, #tpu.memory_space<vmem>>, vector<2x1024xf32>
    tpu.vector_store %arg13[%c0_52, %c2048], %112 {strides = array<i32>} : memref<2x3072xf32, #tpu.memory_space<vmem>>, vector<2x1024xf32>,
    return
  }
}

</mosaic_0001>

<bundles_post_ra>
// kernel: generator_forward.1
= control target key start
LH: loop header
LB: loop body
LE: loop exit
PB: predicated region body
PF: predicated region fallthrough
CT: control target
= control target key end

     0   :  { %18 = vsyncpa [#allocation7], 0  ;;  %s13396_s0 = inlined_call_operand.vmem [shape: f32[2,32], index: 0, kind: input, shape index: {}]   ;;  %s13397_s1 = inlined_call_operand.hbm [shape: bf16[32,512], index: 1, kind: input, shape index: {}]   ;;  %s13398_s2 = inlined_call_operand.vmem [shape: bf16[512,32], index: 2, kind: input, shape index: {}]   ;;  %s13399_s3 = inlined_call_operand.hbm [shape: bf16[32,512], index: 3, kind: input, shape index: {}]   ;;  %s13400_s4 = inlined_call_operand.hbm [shape: f32[1,32], index: 4, kind: input, shape index: {}]   ;;  %s13401_s5 = inlined_call_operand.hbm [shape: f32[1,32], index: 5, kind: input, shape index: {}]   ;;  %s13402_s6 = inlined_call_operand.vmem [shape: bf16[1024,16], index: 6, kind: input, shape index: {}]   ;;  %s13403_s7 = inlined_call_operand.hbm [shape: bf16[16,1024], index: 7, kind: input, shape index: {}]   ;;  %s13404_s8 = inlined_call_operand.hbm [shape: f32[1,16], index: 8, kind: input, shape index: {}]   ;;  %s13405_s9 = inlined_call_operand.hbm [shape: f32[1,16], index: 9, kind: input, shape index: {}]   ;;  %s13406_s10 = inlined_call_operand.hbm [shape: bf16[512,1024], index: 10, kind: input, shape index: {}]   ;;  %s13407_s11 = inlined_call_operand.hbm [shape: bf16[1024,768], index: 11, kind: input, shape index: {}]   ;;  %s13408_s12 = inlined_call_operand.hbm [shape: bf16[256,1024], index: 12, kind: input, shape index: {}]   ;;  %s13409_s13 = inlined_call_operand.vmem [shape: f32[2,3072], index: 13, kind: output, shape index: {}]  }
   0x1   :  { %19 = vsyncpa [#allocation9], 0 }
   0x2   :  { %20 = vsyncpa [#allocation12], 0 }
   0x3   :  { %21 = vsyncpa [#allocation15], 0  ;;  %s43_s27 = sshll.u32 %s13399_s3, 4  ;;  %s12583_s28 = smov [#allocation8]   ;;  %s44_s27 = int_to_ptr.hbm [resolvable:$true] %s43_s27 }
   0x4   :  { %s45_s29 = sshll.u32 %s12583_s28, 4  ;;  %s68_s15 = sshll.u32 %s13401_s5, 4  ;;  %s46_s29 = int_to_ptr.vmem [resolvable:$true] %s45_s29  ;;  %s69_s15 = int_to_ptr.hbm [resolvable:$true] %s68_s15 }
   0x5   :  { %s12584_s16 = smov 256   ;;  %s12585_s17 = smov 16  }
   0x6   :  { %51 = dma.hbm_to_vmem [thread:$0]  %s44_s27, 1024, %s46_s29, [#allocation9], %s12584_s16, %s12584_s16, %s12585_s17  }
   0x7   :  { %s12586_s18 = smov [#allocation11]   ;;  %s94_s22 = sshll.u32 %s13404_s8, 4  ;;  %s95_s22 = int_to_ptr.hbm [resolvable:$true] %s94_s22 }
   0x8   :  { %s70_s19 = sshll.u32 %s12586_s18, 4  ;;  %s28_s24 = sshll.u32 %s13397_s1, 4  ;;  %s71_s19 = int_to_ptr.vmem [resolvable:$true] %s70_s19  ;;  %s29_s24 = int_to_ptr.hbm [resolvable:$true] %s28_s24 }
   0x9   :  { %73 = dma.hbm_to_vmem [thread:$0]  %s69_s15, 16, %s71_s19, [#allocation12]  }
   0xa   :  { %s12587_s25 = smov [#allocation14]   ;;  %s12588_s5 = smov [#allocation6]  }
   0xb   :  { %s96_s26 = sshll.u32 %s12587_s25, 4  ;;  %s30_s27 = sshll.u32 %s12588_s5, 4  ;;  %s97_s26 = int_to_ptr.vmem [resolvable:$true] %s96_s26  ;;  %s31_s27 = int_to_ptr.vmem [resolvable:$true] %s30_s27 }
   0xc   :  { %99 = dma.hbm_to_vmem [thread:$0]  %s95_s22, 16, %s97_s26, [#allocation15]  }
   0xd   :  { %s57_s30 = sshll.u32 %s13400_s4, 4  ;;  %s80_s15 = sshll.u32 %s13403_s7, 4  ;;  %s58_s30 = int_to_ptr.hbm [resolvable:$true] %s57_s30  ;;  %s81_s15 = int_to_ptr.hbm [resolvable:$true] %s80_s15 }
   0xe   :  { %36 = dma.hbm_to_vmem [thread:$0]  %s29_s24, 1024, %s31_s27, [#allocation7], %s12584_s16, %s12584_s16, %s12585_s17  }
   0xf   :  { %s12589_s18 = smov [#allocation10]   ;;  %s12590_s19 = smov [#allocation13]  }
  0x10   :  { %s59_s1 = sshll.u32 %s12589_s18, 4  ;;  %s82_s20 = sshll.u32 %s12590_s19, 4  ;;  %s60_s1 = int_to_ptr.vmem [resolvable:$true] %s59_s1  ;;  %s83_s20 = int_to_ptr.vmem [resolvable:$true] %s82_s20 }
  0x11   :  { %62 = dma.hbm_to_vmem [thread:$0]  %s58_s30, 16, %s60_s1, [#allocation9]  }
  0x12   :  { %s12591_s21 = smov 512   ;;  %s12592_s22 = smov 32  }
  0x13   :  { %88 = dma.hbm_to_vmem [thread:$0]  %s81_s15, 1024, %s83_s20, [#allocation12], %s12591_s21, %s12591_s21, %s12592_s22  }
  0x14   :  { %s105_s23 = sshll.u32 %s13405_s9, 4  ;;  %s12593_s16 = smov [#allocation16]   ;;  %s106_s23 = int_to_ptr.hbm [resolvable:$true] %s105_s23 }
  0x15   :  { %s107_s17 = sshll.u32 %s12593_s16, 4  ;;  %s108_s17 = int_to_ptr.vmem [resolvable:$true] %s107_s17 }
  0x16   :  { %110 = dma.hbm_to_vmem [thread:$0]  %s106_s23, 16, %s108_s17, [#allocation15]  }
  0x17   :  { %12569 = dma.done.wait [#allocation7], 1024  }
  0x18   :  { %12570 = vsyncadd [#allocation7], 4294966272 }
  0x19   :  { %12571 = dma.done.wait [#allocation9], 1040  }
  0x1a   :  { %12572 = vsyncadd [#allocation9], 4294966256 }
  0x1b   :  { %12573 = dma.done.wait [#allocation12], 1040  }
  0x1c   :  { %12574 = vsyncadd [#allocation12], 4294966256 }
  0x1d   :  { %12575 = dma.done.wait [#allocation15], 32  }
  0x1e   :  { %12576 = vsyncadd [#allocation15], 4294967264  ;;  %v7855_v0 = vld [vmem:[#allocation6 + $0x20] sm:$0xf]  ;;  %v11414_v1 = vld [vmem:[#allocation6 + $0x2c] sm:$0xf0] }
  0x1f   :  { %v11412_v2 = vld [vmem:[#allocation6 + $0x24] sm:$0xf]  ;;  %v7856_v3 = vor.u32 %v11414_v1, %v7855_v0  ;;  %v7857_v4 = vld [vmem:[#allocation6 + $0x30] sm:$0xf0]  ;;  %v7863_v5 = vld [vmem:[#allocation6 + $0x28] sm:$0xf] }
  0x20   :  { %v11415_v6 = vld [vmem:[#allocation6 + $0x34] sm:$0xf0]  ;;  %v7860_v7 = vor.u32 %v11412_v2, %v7857_v4  ;;  %v11413_v9 = vld [vmem:[#allocation6 + $0x2c] sm:$0xf]  ;;  %v7865_v10 = vld [vmem:[#allocation6 + $0x38] sm:$0xf0] }
  0x21   :  { %v7864_v8 = vor.u32 %v11415_v6, %v7863_v5  ;;  %v7839_v11 = vld [vmem:[#allocation6] sm:$0xf]  ;;  %241 = vmatpush.bf16.msra.mxu0 %v7856_v3  ;;  %v7868_v12 = vor.u32 %v11413_v9, %v7865_v10  ;;  %v11410_v13 = vld [vmem:[#allocation6 + $0xc] sm:$0xf0]  ;;  %v11408_v14 = vld [vmem:[#allocation6 + $0x4] sm:$0xf] }
  0x22   :  { %v7841_v15 = vld [vmem:[#allocation6 + $0x10] sm:$0xf0]  ;;  %254 = vmatpush.bf16.msra.mxu1 %v7860_v7  ;;  %v7840_v16 = vor.u32 %v11410_v13, %v7839_v11  ;;  %v7847_v18 = vld [vmem:[#allocation6 + $0x8] sm:$0xf]  ;;  %v11411_v19 = vld [vmem:[#allocation6 + $0x14] sm:$0xf0] }
  0x23   :  { %267 = vmatpush.bf16.msra.mxu2 %v7864_v8  ;;  %v7844_v17 = vor.u32 %v11408_v14, %v7841_v15  ;;  %v11409_v20 = vld [vmem:[#allocation6 + $0xc] sm:$0xf]  ;;  %280 = vmatpush.bf16.msra.mxu3 %v7868_v12  ;;  %v7848_v21 = vor.u32 %v11411_v19, %v7847_v18  ;;  %v7849_v22 = vld [vmem:[#allocation6 + $0x18] sm:$0xf0]  ;;  %v181_v23 = vld [vmem:[%s13396_s0] sm:$0x3] }
  0x24   :  { %v11423_v24 = vld [vmem:[%s13398_s2 + $0x38] sm:$0xff]  ;;  %v7852_v25 = vor.u32 %v11409_v20, %v7849_v22  ;;  %v182_v26 = vpack.c.bf16 %v181_v23, %v181_v23  ;;  %vm231_vm0 = vcmask 261120   ;;  %v11422_v29 = vld [vmem:[%s13398_s2 + $0x30] sm:$0xff]  ;;  %v11421_v32 = vld [vmem:[%s13398_s2 + $0x28] sm:$0xff]  ;;  %v12594_v46 = vmov 2.0   ;;  %s147_s20 = sshll.u32 %s13406_s10, 4  ;;  %s148_s20 = int_to_ptr.hbm [resolvable:$true] %s147_s20 }
  0x25   :  { %v11431_v27 = vld [vmem:[%s13398_s2 + $0x78] sm:$0xff]  ;;  %242 = vmatpush.bf16.msra.mxu0 %v7840_v16  ;;  %v11430_v31 = vld [vmem:[%s13398_s2 + $0x70] sm:$0xff]  ;;  %v11429_v33 = vld [vmem:[%s13398_s2 + $0x68] sm:$0xff]  ;;  %12311 = vrcp.f32 %v12594_v46  ;;  %vm361_vm1 = vcmask 1041408   ;;  %vm437_vm3 = vcmask 1040384   ;;  %s12595_s21 = smov [#allocation2]  }
  0x26   :  { %255 = vmatpush.bf16.msra.mxu1 %v7844_v17  ;;  %v11439_v28 = vld [vmem:[%s13398_s2 + $0xb8] sm:$0xff]  ;;  %v11438_v34 = vld [vmem:[%s13398_s2 + $0xb0] sm:$0xff]  ;;  %v11420_v36 = vld [vmem:[%s13398_s2 + $0x20] sm:$0xff]  ;;  %s149_s22 = sshll.u32 %s12595_s21, 4  ;;  %s161_s23 = sshll.u32 %s13407_s11, 4  ;;  %s150_s22 = int_to_ptr.vmem [resolvable:$true] %s149_s22  ;;  %s162_s23 = int_to_ptr.hbm [resolvable:$true] %s161_s23 }
  0x27   :  { %268 = vmatpush.bf16.msra.mxu2 %v7848_v21  ;;  %281 = vmatpush.bf16.msra.mxu3 %v7852_v25  ;;  %v11447_v30 = vld [vmem:[%s13398_s2 + $0xf8] sm:$0xff]  ;;  %v11446_v35 = vld [vmem:[%s13398_s2 + $0xf0] sm:$0xff]  ;;  %v11428_v37 = vld [vmem:[%s13398_s2 + $0x60] sm:$0xff]  ;;  %152 = dma.hbm_to_vmem [thread:$0]  %s148_s20, 32768, %s150_s22, [#allocation5] }
  0x28   :  { %7869 = vmatmul.msk.bf16.vlgmr.msra.gmra.mxu0 %vm231_vm0, %v182_v26  ;;  %v11437_v38 = vld [vmem:[%s13398_s2 + $0xa8] sm:$0xff]  ;;  %v11419_v40 = vld [vmem:[%s13398_s2 + $0x18] sm:$0xff]  ;;  %v11436_v42 = vld [vmem:[%s13398_s2 + $0xa0] sm:$0xff]  ;;  %s12596_s16 = smov [#allocation3]   ;;  %s175_s24 = sshll.u32 %s13408_s12, 4  ;;  %s176_s24 = int_to_ptr.hbm [resolvable:$true] %s175_s24 }
  0x29   :  { %638 = vmatpush.bf16.msrb.mxu0 %v11423_v24  ;;  %7870 = vmatmul.msk.bf16.vlgmr.msra.gmra.mxu1 %vm231_vm0, %v182_v26  ;;  %v11445_v39 = vld [vmem:[%s13398_s2 + $0xe8] sm:$0xff]  ;;  %v11427_v41 = vld [vmem:[%s13398_s2 + $0x58] sm:$0xff]  ;;  %v11444_v43 = vld [vmem:[%s13398_s2 + $0xe0] sm:$0xff]  ;;  %s163_s17 = sshll.u32 %s12596_s16, 4  ;;  %s12597_s10 = smov [#allocation4]   ;;  %s164_s17 = int_to_ptr.vmem [resolvable:$true] %s163_s17 }
  0x2a   :  { %651 = vmatpush.bf16.msrb.mxu1 %v11431_v27  ;;  %7871 = vmatmul.msk.bf16.vlgmr.msra.gmra.mxu2 %vm231_vm0, %v182_v26  ;;  %v11418_v44 = vld [vmem:[%s13398_s2 + $0x10] sm:$0xff]  ;;  %v11435_v47 = vld [vmem:[%s13398_s2 + $0x98] sm:$0xff]  ;;  %v11417_v49 = vld [vmem:[%s13398_s2 + $0x8] sm:$0xff]  ;;  %166 = dma.hbm_to_vmem [thread:$0]  %s162_s23, 49152, %s164_s17, [#allocation5 + $0x1] }
  0x2b   :  { %7872 = vmatmul.msk.bf16.vlgmr.msra.gmra.mxu3 %vm231_vm0, %v182_v26  ;;  %664 = vmatpush.bf16.msrb.mxu2 %v11439_v28  ;;  %v11426_v45 = vld [vmem:[%s13398_s2 + $0x50] sm:$0xff]  ;;  %v11443_v48 = vld [vmem:[%s13398_s2 + $0xd8] sm:$0xff]  ;;  %v11425_v50 = vld [vmem:[%s13398_s2 + $0x48] sm:$0xff]  ;;  %v12312_v53 = vpop.eup %12311  ;;  %s177_s25 = sshll.u32 %s12597_s10, 4  ;;  %s178_s25 = int_to_ptr.vmem [resolvable:$true] %s177_s25 }
  0x2c   :  { %677 = vmatpush.bf16.msrb.mxu3 %v11447_v30  ;;  %v11434_v51 = vld [vmem:[%s13398_s2 + $0x90] sm:$0xff]  ;;  %v11416_v54 = vld [vmem:[%s13398_s2] sm:$0xff]  ;;  %v11433_v56 = vld [vmem:[%s13398_s2 + $0x88] sm:$0xff]  ;;  %v391_v58 = vmul.f32 2.0, %v12312_v53  ;;  %vm395_vm2 = vweird.f32 %v12312_v53  ;;  %180 = dma.hbm_to_vmem [thread:$0]  %s176_s24, 16384, %s178_s25, [#allocation5 + $0x2] }
  0x2d   :  { %639 = vmatpush.bf16.msrb.mxu0 %v11422_v29  ;;  %v11442_v52 = vld [vmem:[%s13398_s2 + $0xd0] sm:$0xff]  ;;  %v11424_v55 = vld [vmem:[%s13398_s2 + $0x40] sm:$0xff]  ;;  %v11441_v57 = vld [vmem:[%s13398_s2 + $0xc8] sm:$0xff] }
  0x2e   :  { %652 = vmatpush.bf16.msrb.mxu1 %v11430_v31  ;;  %v11432_v59 = vld [vmem:[%s13398_s2 + $0x80] sm:$0xff]  ;;  %v392_v61 = vsub.f32 1.0, %v391_v58 }
  0x2f   :  { %665 = vmatpush.bf16.msrb.mxu2 %v11438_v34  ;;  %v11440_v60 = vld [vmem:[%s13398_s2 + $0xc0] sm:$0xff] }
  0x30   :  { %678 = vmatpush.bf16.msrb.mxu3 %v11446_v35  ;;  %v393_v62 = vmul.f32 %v12312_v53, %v392_v61 }
  0x31   :  { %640 = vmatpush.bf16.msrb.mxu0 %v11421_v32 }
  0x32   :  { %653 = vmatpush.bf16.msrb.mxu1 %v11429_v33  ;;  %v394_v8 = vadd.f32 %v12312_v53, %v393_v62 }
  0x33   :  { %666 = vmatpush.bf16.msrb.mxu2 %v11437_v38 }
  0x34   :  { %679 = vmatpush.bf16.msrb.mxu3 %v11445_v39  ;;  %v12808_v19 = vsel %vm395_vm2, %v12312_v53, %v394_v8 }
  0x35   :  { %641 = vmatpush.bf16.msrb.mxu0 %v11420_v36 }
  0x36   :  { %654 = vmatpush.bf16.msrb.mxu1 %v11428_v37 }
  0x37   :  { %667 = vmatpush.bf16.msrb.mxu2 %v11436_v42 }
  0x38   :  { %680 = vmatpush.bf16.msrb.mxu3 %v11444_v43 }
  0x39   :  { %642 = vmatpush.bf16.msrb.mxu0 %v11419_v40 }
  0x3a   :  { %655 = vmatpush.bf16.msrb.mxu1 %v11427_v41 }
  0x3b   :  { %668 = vmatpush.bf16.msrb.mxu2 %v11435_v47 }
  0x3c   :  { %681 = vmatpush.bf16.msrb.mxu3 %v11443_v48 }
  0x3d   :  { %643 = vmatpush.bf16.msrb.mxu0 %v11418_v44 }
  0x3e   :  { %656 = vmatpush.bf16.msrb.mxu1 %v11426_v45 }
  0x3f   :  { %669 = vmatpush.bf16.msrb.mxu2 %v11434_v51 }
  0x40   :  { %682 = vmatpush.bf16.msrb.mxu3 %v11442_v52 }
  0x41   :  { %644 = vmatpush.bf16.msrb.mxu0 %v11417_v49 }
  0x42   :  { %657 = vmatpush.bf16.msrb.mxu1 %v11425_v50 }
  0x43   :  { %670 = vmatpush.bf16.msrb.mxu2 %v11433_v56 }
  0x44   :  { %683 = vmatpush.bf16.msrb.mxu3 %v11441_v57 }
  0x45   :  { %645 = vmatpush.bf16.msrb.mxu0 %v11416_v54 }
  0x46   :  { %658 = vmatpush.bf16.msrb.mxu1 %v11424_v55 }
  0x47   :  { %671 = vmatpush.bf16.msrb.mxu2 %v11432_v59 }
  0x48   :  { %684 = vmatpush.bf16.msrb.mxu3 %v11440_v60 }
  0xa5   :  { %v12792_v63 = vpop.f32.mrf.mxu0 }
  0xa6   :  { %v362_v0 = vsel %vm361_vm1, %v12792_v63, 0.0  ;;  %v401_v1 = vmul.f32 %v12792_v63, %v12792_v63  ;;  %v12798_v2 = vpop.f32.mrf.mxu1 }
  0xa7   :  { %v363_v3 = vrot.slane %v362_v0, 4  ;;  %v369_v4 = vsel %vm361_vm1, %v12798_v2, 0.0  ;;  %v402_v5 = vmul.f32 %v12798_v2, %v12798_v2 }
  0xa8   :  { %v405_v6 = vsel %vm361_vm1, %v401_v1, 0.0  ;;  %v370_v7 = vrot.slane %v369_v4, 4 }
  0xa9   :  { %v364_v9 = vadd.f32 %v363_v3, %v362_v0  ;;  %v406_v10 = vrot.slane %v405_v6, 4  ;;  %v412_v11 = vsel %vm361_vm1, %v402_v5, 0.0 }
  0xaa   :  { %v371_v12 = vadd.f32 %v370_v7, %v369_v4  ;;  %v413_v13 = vrot.slane %v412_v11, 4 }
  0xab   :  { %v365_v14 = vrot.slane %v364_v9, 2  ;;  %v407_v15 = vadd.f32 %v406_v10, %v405_v6 }
  0xac   :  { %v372_v16 = vrot.slane %v371_v12, 2  ;;  %v414_v17 = vadd.f32 %v413_v13, %v412_v11 }
  0xad   :  { %v12806_v18 = vpop.f32.mrf.mxu2  ;;  %v366_v20 = vadd.f32 %v365_v14, %v364_v9  ;;  %v408_v21 = vrot.slane %v407_v15, 2  ;;  %v246_v25 = vpop.f32.mrf.mxu0 }
  0xae   :  { %v376_v22 = vsel %vm361_vm1, %v12806_v18, 0.0  ;;  %v403_v23 = vmul.f32 %v12806_v18, %v12806_v18  ;;  %v12814_v24 = vpop.f32.mrf.mxu3  ;;  %v373_v26 = vadd.f32 %v372_v16, %v371_v12  ;;  %v415_v27 = vrot.slane %v414_v17, 2  ;;  %v259_v30 = vpop.f32.mrf.mxu1 }
  0xaf   :  { %v377_v28 = vrot.slane %v376_v22, 4  ;;  %v383_v29 = vsel %vm361_vm1, %v12814_v24, 0.0  ;;  %v367_v31 = vrot.slane %v366_v20, 1  ;;  %v409_v32 = vadd.f32 %v408_v21, %v407_v15 }
  0xb0   :  { %v419_v33 = vsel %vm361_vm1, %v403_v23, 0.0  ;;  %v384_v34 = vrot.slane %v383_v29, 4  ;;  %v374_v35 = vrot.slane %v373_v26, 1  ;;  %v416_v36 = vadd.f32 %v415_v27, %v414_v17 }
  0xb1   :  { %v378_v37 = vadd.f32 %v377_v28, %v376_v22  ;;  %v420_v38 = vrot.slane %v419_v33, 4  ;;  %v368_v39 = vadd.f32 %v367_v31, %v366_v20  ;;  %v410_v40 = vrot.slane %v409_v32, 1 }
  0xb2   :  { %v385_v41 = vadd.f32 %v384_v34, %v383_v29  ;;  %v404_v42 = vmul.f32 %v12814_v24, %v12814_v24  ;;  %v375_v43 = vadd.f32 %v374_v35, %v373_v26  ;;  %v417_v44 = vrot.slane %v416_v36, 1 }
  0xb3   :  { %v379_v45 = vrot.slane %v378_v37, 2  ;;  %v421_v46 = vadd.f32 %v420_v38, %v419_v33  ;;  %v411_v47 = vadd.f32 %v410_v40, %v409_v32  ;;  %v397_v50 = vmul.f32 %v12808_v19, %v368_v39 }
  0xb4   :  { %v386_v48 = vrot.slane %v385_v41, 2  ;;  %v426_v49 = vsel %vm361_vm1, %v404_v42, 0.0  ;;  %v418_v51 = vadd.f32 %v417_v44, %v416_v36  ;;  %v398_v59 = vmul.f32 %v12808_v19, %v375_v43  ;;  %v11455_v42 = vld [vmem:[#allocation8 + $0x34] sm:$0xf0]  ;;  %v11453_v43 = vld [vmem:[#allocation8 + $0x2c] sm:$0xf] }
  0xb5   :  { %v380_v52 = vadd.f32 %v379_v45, %v378_v37  ;;  %v422_v53 = vrot.slane %v421_v46, 2  ;;  %v427_v54 = vrot.slane %v426_v49, 4  ;;  %v272_v55 = vpop.f32.mrf.mxu2  ;;  %v433_v58 = vmul.f32 %v411_v47, %v12808_v19  ;;  %v8019_v47 = vld [vmem:[#allocation8 + $0x20] sm:$0xf] }
  0xb6   :  { %v387_v56 = vadd.f32 %v386_v48, %v385_v41  ;;  %v285_v57 = vpop.f32.mrf.mxu3  ;;  %v434_v0 = vmul.f32 %v418_v51, %v12808_v19  ;;  %v8027_v41 = vld [vmem:[#allocation8 + $0x28] sm:$0xf]  ;;  %v8021_v51 = vld [vmem:[#allocation8 + $0x30] sm:$0xf0]  ;;  %v11451_v55 = vld [vmem:[#allocation8 + $0x14] sm:$0xf0] }
  0xb7   :  { %v381_v60 = vrot.slane %v380_v52, 1  ;;  %v423_v61 = vadd.f32 %v422_v53, %v421_v46  ;;  %v428_v62 = vadd.f32 %v427_v54, %v426_v49  ;;  %v438_v3 = vsel %vm437_vm3, %v397_v50, %v433_v58  ;;  %v8029_v46 = vld [vmem:[#allocation8 + $0x38] sm:$0xf0]  ;;  %v11454_v49 = vld [vmem:[#allocation8 + $0x2c] sm:$0xf0] }
  0xb8   :  { %v388_v1 = vrot.slane %v387_v56, 1  ;;  %v442_v7 = vpack.c.bf16 %v438_v3, %v438_v3  ;;  %v439_v8 = vsel %vm437_vm3, %v398_v59, %v434_v0  ;;  %v8028_v45 = vor.u32 %v11455_v42, %v8027_v41  ;;  %v11452_v50 = vld [vmem:[#allocation8 + $0x24] sm:$0xf]  ;;  %v8011_v54 = vld [vmem:[#allocation8 + $0x8] sm:$0xf] }
  0xb9   :  { %v382_v4 = vadd.f32 %v381_v60, %v380_v52  ;;  %v424_v5 = vrot.slane %v423_v61, 1  ;;  %v429_v6 = vrot.slane %v428_v62, 2  ;;  %v443_v11 = vpack.c.bf16 %v439_v8, %v439_v8  ;;  %v8013_v58 = vld [vmem:[#allocation8 + $0x18] sm:$0xf0]  ;;  %v8003_v59 = vld [vmem:[#allocation8] sm:$0xf] }
  0xba   :  { %646 = vmatmul.bf16.vlgmr.msrb.gmra.mxu0 %v442_v7  ;;  %v389_v12 = vadd.f32 %v388_v1, %v387_v56  ;;  %v8032_v48 = vor.u32 %v11453_v43, %v8029_v46  ;;  %795 = vmatpush.bf16.msra.mxu2 %v8028_v45  ;;  %v8020_v52 = vor.u32 %v11454_v49, %v8019_v47  ;;  %v11449_v56 = vld [vmem:[#allocation8 + $0xc] sm:$0xf]  ;;  %v11450_v60 = vld [vmem:[#allocation8 + $0xc] sm:$0xf0]  ;;  %v11448_v0 = vld [vmem:[#allocation8 + $0x4] sm:$0xf] }
  0xbb   :  { %v425_v9 = vadd.f32 %v424_v5, %v423_v61  ;;  %v430_v10 = vadd.f32 %v429_v6, %v428_v62  ;;  %659 = vmatmul.bf16.vlgmr.msrb.gmra.mxu1 %v443_v11  ;;  %v399_v14 = vmul.f32 %v12808_v19, %v382_v4  ;;  %v8024_v53 = vor.u32 %v11452_v50, %v8021_v51  ;;  %v8005_v1 = vld [vmem:[#allocation8 + $0x10] sm:$0xf0]  ;;  %v359_v11 = vld [vmem:[#allocation10] sm:$0x1] }
  0xbc   :  { %v400_v21 = vmul.f32 %v12808_v19, %v389_v12  ;;  %808 = vmatpush.bf16.msra.mxu3 %v8032_v48  ;;  %769 = vmatpush.bf16.msra.mxu0 %v8020_v52  ;;  %v8012_v57 = vor.u32 %v11451_v55, %v8011_v54  ;;  %v8016_v61 = vor.u32 %v11449_v56, %v8013_v58 }
  0xbd   :  { %v431_v13 = vrot.slane %v430_v10, 1  ;;  %v435_v15 = vmul.f32 %v425_v9, %v12808_v19  ;;  %782 = vmatpush.bf16.msra.mxu1 %v8024_v53  ;;  %v8004_v62 = vor.u32 %v11450_v60, %v8003_v59  ;;  %v8008_v3 = vor.u32 %v11448_v0, %v8005_v1 }
  0xbe   :  { %796 = vmatpush.bf16.msra.mxu2 %v8012_v57 }
  0xbf   :  { %v432_v16 = vadd.f32 %v431_v13, %v430_v10  ;;  %v440_v17 = vsel %vm437_vm3, %v399_v14, %v435_v15  ;;  %v360_v14 = vld [vmem:[#allocation11] sm:$0x1] }
  0xc0   :  { %v444_v20 = vpack.c.bf16 %v440_v17, %v440_v17  ;;  %809 = vmatpush.bf16.msra.mxu3 %v8016_v61  ;;  %770 = vmatpush.bf16.msra.mxu0 %v8004_v62 }
  0xc1   :  { %v436_v22 = vmul.f32 %v432_v16, %v12808_v19  ;;  %783 = vmatpush.bf16.msra.mxu1 %v8008_v3 }
  0xc2   :  { %672 = vmatmul.bf16.vlgmr.msrb.gmra.mxu2 %v444_v20 }
  0xc3   :  { %v441_v23 = vsel %vm437_vm3, %v400_v21, %v436_v22 }
  0xc4   :  { %v445_v25 = vpack.c.bf16 %v441_v23, %v441_v23 }
  0xc6   :  { %685 = vmatmul.bf16.vlgmr.msrb.gmra.mxu3 %v445_v25 }
 0x137   :  { %v647_v26 = vpop.f32.mrf.mxu0 }
 0x138   :  { %v660_v27 = vpop.f32.mrf.mxu1 }
 0x139   :  { %v661_v30 = vadd.f32 %v660_v27, %v647_v26 }
 0x13f   :  { %v649_v28 = vpop.f32.mrf.mxu0 }
 0x140   :  { %v662_v29 = vpop.f32.mrf.mxu1 }
 0x145   :  { %v673_v31 = vpop.f32.mrf.mxu2 }
 0x146   :  { %v674_v32 = vadd.f32 %v673_v31, %v661_v30 }
 0x149   :  { %v686_v33 = vpop.f32.mrf.mxu3 }
 0x14a   :  { %v687_v34 = vadd.f32 %v686_v33, %v674_v32 }
 0x14c   :  { %v690_v35 = vmul.f32 %v687_v34, %v687_v34 }
 0x14d   :  { %v675_v36 = vpop.f32.mrf.mxu2 }
 0x14e   :  { %v692_v37 = vrot.slane %v690_v35, 7 }
 0x150   :  { %v694_v38 = vsub.f32 %v687_v34, %v692_v37 }
 0x151   :  { %v688_v39 = vpop.f32.mrf.mxu3 }
 0x152   :  { %v695_v40 = vmax.f32 %v694_v38, 0.0 }
 0x154   :  { %v696_v44 = vadd.f32 1e-05, %v695_v40 }
 0x156   :  { %12313 = vrsqrt.f32 %v696_v44  ;;  %vm703_vm5 = vweird.f32 %v696_v44 }
 0x15c   :  { %v12314_v4 = vpop.eup %12313 }
 0x15d   :  { %v698_v5 = vmul.f32 %v12314_v4, %v696_v44  ;;  %vm704_vm4 = vweird.f32 %v12314_v4 }
 0x15e   :  { %vm705_vm6 = vmor %vm703_vm5, %vm704_vm4 }
 0x15f   :  { %v699_v6 = vmul.f32 %v12314_v4, %v698_v5 }
 0x161   :  { %v700_v7 = vmul.f32 0.5, %v699_v6 }
 0x163   :  { %v701_v8 = vsub.f32 1.5, %v700_v7 }
 0x165   :  { %v702_v9 = vmul.f32 %v12314_v4, %v701_v8 }
 0x167   :  { %v706_v10 = vsel %vm705_vm6, %v12314_v4, %v702_v9 }
 0x168   :  { %708 = vst [vmem:[#allocation1] sm:$0xff] %v706_v10 }
 0x16f   :  { %v710_v12 = vld [vmem:[#allocation1 + $0x1] ss:$9 sm:$0xff] }
 0x170   :  { %v712_v13 = vmul.f32 %v710_v12, %v359_v11 }
 0x172   :  { %v713_v15 = vmul.f32 %v712_v13, %v687_v34 }
 0x174   :  { %v714_v16 = vsub.f32 %v360_v14, %v713_v15 }
 0x176   :  { %v716_v17 = vperm.slane %v714_v16, 0 }
 0x178   :  { %v718_v20 = vsel %vm437_vm3, %v712_v13, %v716_v17 }
 0x179   :  { %v719_v21 = vpack.c.bf16 %v718_v20, %v718_v20 }
 0x17b   :  { %8033 = vmatmul.msk.bf16.vlgmr.msra.gmra.mxu0 %vm231_vm0, %v719_v21  ;;  %8034 = vmatmul.msk.bf16.vlgmr.msra.gmra.mxu1 %vm231_vm0, %v719_v21 }
 0x17c   :  { %8035 = vmatmul.msk.bf16.vlgmr.msra.gmra.mxu2 %vm231_vm0, %v719_v21  ;;  %8036 = vmatmul.msk.bf16.vlgmr.msra.gmra.mxu3 %vm231_vm0, %v719_v21 }
 0x1f8   :  { %v772_v22 = vpop.f32.mrf.mxu0  ;;  %v785_v23 = vpop.f32.mrf.mxu1 }
 0x1f9   :  { %v815_v25 = vperm.slane %v772_v22, 0  ;;  %v816_v26 = vperm.slane %v785_v23, 0  ;;  %v823_v28 = vperm.slane %v772_v22, 1  ;;  %v824_v30 = vperm.slane %v785_v23, 1 }
 0x1fb   :  { %v819_v27 = vmul.f32 %v815_v25, %v12792_v63  ;;  %v820_v29 = vmul.f32 %v816_v26, %v12798_v2 }
 0x1fd   :  { %v12850_v31 = vadd.f32 %v823_v28, %v819_v27  ;;  %v12852_v32 = vadd.f32 %v824_v30, %v820_v29 }
 0x1ff   :  { %v831_v33 = vmax.f32 %v12850_v31, 0.0  ;;  %v832_v34 = vmax.f32 %v12852_v32, 0.0  ;;  %v798_v35 = vpop.f32.mrf.mxu2  ;;  %v811_v36 = vpop.f32.mrf.mxu3 }
 0x200   :  { %v817_v37 = vperm.slane %v798_v35, 0  ;;  %v818_v38 = vperm.slane %v811_v36, 0  ;;  %v774_v39 = vpop.f32.mrf.mxu0  ;;  %v787_v40 = vpop.f32.mrf.mxu1  ;;  %v825_v41 = vperm.slane %v798_v35, 1  ;;  %v826_v42 = vperm.slane %v811_v36, 1 }
 0x202   :  { %v821_v63 = vmul.f32 %v817_v37, %v12806_v18  ;;  %v822_v2 = vmul.f32 %v818_v38, %v12814_v24 }
 0x204   :  { %v12858_v43 = vadd.f32 %v825_v41, %v821_v63  ;;  %v12860_v44 = vadd.f32 %v826_v42, %v822_v2 }
 0x206   :  { %v833_v45 = vmax.f32 %v12858_v43, 0.0  ;;  %v834_v46 = vmax.f32 %v12860_v44, 0.0 }
 0x207   :  { %v800_v47 = vpop.f32.mrf.mxu2  ;;  %v813_v48 = vpop.f32.mrf.mxu3 }
 0x208   :  { %12577 = dma.done.wait [#allocation5], 32768 }
 0x209   :  { %12578 = vsyncadd [#allocation5], 4294934528  ;;  %v8263_v49 = vld [vmem:[#allocation2 + $0x1c0] sm:$0xf]  ;;  %vm3643_vm10 = vcmask 130048  }
 0x20a   :  { %v11516_v50 = vld [vmem:[#allocation2 + $0x1dc] sm:$0xf0] }
 0x20b   :  { %v8519_v51 = vld [vmem:[#allocation2 + $0x3c0] sm:$0xf]  ;;  %v8264_v18 = vor.u32 %v11516_v50, %v8263_v49 }
 0x20c   :  { %v11580_v52 = vld [vmem:[#allocation2 + $0x3dc] sm:$0xf0] }
 0x20d   :  { %v8775_v53 = vld [vmem:[#allocation2 + $0x5c0] sm:$0xf]  ;;  %v8520_v54 = vor.u32 %v11580_v52, %v8519_v51  ;;  %2379 = vmatpush.bf16.msrb.mxu0 %v8264_v18 }
 0x20e   :  { %v11644_v24 = vld [vmem:[#allocation2 + $0x5dc] sm:$0xf0] }
 0x20f   :  { %v8776_v55 = vor.u32 %v11644_v24, %v8775_v53  ;;  %v9031_v56 = vld [vmem:[#allocation2 + $0x7c0] sm:$0xf]  ;;  %2392 = vmatpush.bf16.msrb.mxu1 %v8520_v54 }
 0x210   :  { %v11708_v57 = vld [vmem:[#allocation2 + $0x7dc] sm:$0xf0] }
 0x211   :  { %v8231_v58 = vld [vmem:[#allocation2 + $0x180] sm:$0xf]  ;;  %v9032_v59 = vor.u32 %v11708_v57, %v9031_v56  ;;  %2405 = vmatpush.bf16.msrb.mxu2 %v8776_v55 }
 0x212   :  { %v11508_v60 = vld [vmem:[#allocation2 + $0x19c] sm:$0xf0] }
 0x213   :  { %v8487_v61 = vld [vmem:[#allocation2 + $0x380] sm:$0xf]  ;;  %v8232_v0 = vor.u32 %v11508_v60, %v8231_v58  ;;  %2418 = vmatpush.bf16.msrb.mxu3 %v9032_v59 }
 0x214   :  { %v11572_v62 = vld [vmem:[#allocation2 + $0x39c] sm:$0xf0] }
 0x215   :  { %v8488_v1 = vor.u32 %v11572_v62, %v8487_v61  ;;  %v8743_v3 = vld [vmem:[#allocation2 + $0x580] sm:$0xf]  ;;  %2380 = vmatpush.bf16.msrb.mxu0 %v8232_v0 }
 0x216   :  { %v11636_v4 = vld [vmem:[#allocation2 + $0x59c] sm:$0xf0] }
 0x217   :  { %v8999_v5 = vld [vmem:[#allocation2 + $0x780] sm:$0xf]  ;;  %v8744_v6 = vor.u32 %v11636_v4, %v8743_v3  ;;  %2393 = vmatpush.bf16.msrb.mxu1 %v8488_v1 }
 0x218   :  { %v11700_v7 = vld [vmem:[#allocation2 + $0x79c] sm:$0xf0] }
 0x219   :  { %v8199_v8 = vld [vmem:[#allocation2 + $0x140] sm:$0xf]  ;;  %v9000_v10 = vor.u32 %v11700_v7, %v8999_v5  ;;  %2406 = vmatpush.bf16.msrb.mxu2 %v8744_v6 }
 0x21a   :  { %v11500_v9 = vld [vmem:[#allocation2 + $0x15c] sm:$0xf0] }
 0x21b   :  { %v8455_v11 = vld [vmem:[#allocation2 + $0x340] sm:$0xf]  ;;  %v8200_v14 = vor.u32 %v11500_v9, %v8199_v8  ;;  %2419 = vmatpush.bf16.msrb.mxu3 %v9000_v10 }
 0x21c   :  { %v11564_v12 = vld [vmem:[#allocation2 + $0x35c] sm:$0xf0] }
 0x21d   :  { %v8711_v13 = vld [vmem:[#allocation2 + $0x540] sm:$0xf]  ;;  %v8456_v20 = vor.u32 %v11564_v12, %v8455_v11  ;;  %2381 = vmatpush.bf16.msrb.mxu0 %v8200_v14 }
 0x21e   :  { %v11628_v15 = vld [vmem:[#allocation2 + $0x55c] sm:$0xf0] }
 0x21f   :  { %v8967_v16 = vld [vmem:[#allocation2 + $0x740] sm:$0xf]  ;;  %v8712_v21 = vor.u32 %v11628_v15, %v8711_v13  ;;  %2394 = vmatpush.bf16.msrb.mxu1 %v8456_v20 }
 0x220   :  { %v11692_v17 = vld [vmem:[#allocation2 + $0x75c] sm:$0xf0] }
 0x221   :  { %v8167_v22 = vld [vmem:[#allocation2 + $0x100] sm:$0xf]  ;;  %v8968_v26 = vor.u32 %v11692_v17, %v8967_v16  ;;  %2407 = vmatpush.bf16.msrb.mxu2 %v8712_v21 }
 0x222   :  { %v11492_v23 = vld [vmem:[#allocation2 + $0x11c] sm:$0xf0] }
 0x223   :  { %v8423_v25 = vld [vmem:[#allocation2 + $0x300] sm:$0xf]  ;;  %v8168_v36 = vor.u32 %v11492_v23, %v8167_v22  ;;  %2420 = vmatpush.bf16.msrb.mxu3 %v8968_v26  ;;  %v8265_v26 = vld [vmem:[#allocation2 + $0x1e0] sm:$0xf0] }
 0x224   :  { %v11556_v27 = vld [vmem:[#allocation2 + $0x31c] sm:$0xf0] }
 0x225   :  { %v8679_v28 = vld [vmem:[#allocation2 + $0x500] sm:$0xf]  ;;  %v8424_v37 = vor.u32 %v11556_v27, %v8423_v25  ;;  %2382 = vmatpush.bf16.msrb.mxu0 %v8168_v36  ;;  %v11512_v25 = vld [vmem:[#allocation2 + $0x1c4] sm:$0xf] }
 0x226   :  { %v11620_v29 = vld [vmem:[#allocation2 + $0x51c] sm:$0xf0]  ;;  %v11576_v27 = vld [vmem:[#allocation2 + $0x3c4] sm:$0xf] }
 0x227   :  { %v8935_v30 = vld [vmem:[#allocation2 + $0x700] sm:$0xf]  ;;  %v8680_v38 = vor.u32 %v11620_v29, %v8679_v28  ;;  %2395 = vmatpush.bf16.msrb.mxu1 %v8424_v37  ;;  %v8521_v29 = vld [vmem:[#allocation2 + $0x3e0] sm:$0xf0] }
 0x228   :  { %v11684_v35 = vld [vmem:[#allocation2 + $0x71c] sm:$0xf0] }
 0x229   :  { %v8135_v39 = vld [vmem:[#allocation2 + $0xc0] sm:$0xf]  ;;  %v8936_v41 = vor.u32 %v11684_v35, %v8935_v30  ;;  %2408 = vmatpush.bf16.msrb.mxu2 %v8680_v38  ;;  %v11640_v30 = vld [vmem:[#allocation2 + $0x5c4] sm:$0xf] }
 0x22a   :  { %v11484_v40 = vld [vmem:[#allocation2 + $0xdc] sm:$0xf0]  ;;  %v8777_v35 = vld [vmem:[#allocation2 + $0x5e0] sm:$0xf0] }
 0x22b   :  { %v8391_v63 = vld [vmem:[#allocation2 + $0x2c0] sm:$0xf]  ;;  %v8136_v50 = vor.u32 %v11484_v40, %v8135_v39  ;;  %2421 = vmatpush.bf16.msrb.mxu3 %v8936_v41  ;;  %v11704_v38 = vld [vmem:[#allocation2 + $0x7c4] sm:$0xf]  ;;  %v8524_v41 = vor.u32 %v11576_v27, %v8521_v29 }
 0x22c   :  { %v11548_v2 = vld [vmem:[#allocation2 + $0x2dc] sm:$0xf0]  ;;  %v9033_v39 = vld [vmem:[#allocation2 + $0x7e0] sm:$0xf0] }
 0x22d   :  { %v8647_v42 = vld [vmem:[#allocation2 + $0x4c0] sm:$0xf]  ;;  %v8392_v51 = vor.u32 %v11548_v2, %v8391_v63  ;;  %2383 = vmatpush.bf16.msrb.mxu0 %v8136_v50  ;;  %v8268_v63 = vor.u32 %v11512_v25, %v8265_v26  ;;  %v8780_v2 = vor.u32 %v11640_v30, %v8777_v35  ;;  %v8489_v50 = vld [vmem:[#allocation2 + $0x3a0] sm:$0xf0] }
 0x22e   :  { %v11612_v47 = vld [vmem:[#allocation2 + $0x4dc] sm:$0xf0]  ;;  %v8905_v25 = vld [vmem:[#allocation2 + $0x6e0] sm:$0xf0] }
 0x22f   :  { %v8903_v48 = vld [vmem:[#allocation2 + $0x6c0] sm:$0xf]  ;;  %v8648_v18 = vor.u32 %v11612_v47, %v8647_v42  ;;  %2396 = vmatpush.bf16.msrb.mxu1 %v8392_v51  ;;  %v11504_v42 = vld [vmem:[#allocation2 + $0x184] sm:$0xf] }
 0x230   :  { %v11676_v49 = vld [vmem:[#allocation2 + $0x6dc] sm:$0xf0]  ;;  %v8233_v47 = vld [vmem:[#allocation2 + $0x1a0] sm:$0xf0] }
 0x231   :  { %v8103_v52 = vld [vmem:[#allocation2 + $0x80] sm:$0xf]  ;;  %v8904_v54 = vor.u32 %v11676_v49, %v8903_v48  ;;  %2409 = vmatpush.bf16.msrb.mxu2 %v8648_v18  ;;  %v11568_v48 = vld [vmem:[#allocation2 + $0x384] sm:$0xf]  ;;  %v9036_v49 = vor.u32 %v11704_v38, %v9033_v39  ;;  %v8236_v43 = vor.u32 %v11504_v42, %v8233_v47 }
 0x232   :  { %v11476_v53 = vld [vmem:[#allocation2 + $0x9c] sm:$0xf0]  ;;  %v11632_v51 = vld [vmem:[#allocation2 + $0x584] sm:$0xf] }
 0x233   :  { %v8359_v24 = vld [vmem:[#allocation2 + $0x280] sm:$0xf]  ;;  %v8104_v60 = vor.u32 %v11476_v53, %v8103_v52  ;;  %2422 = vmatpush.bf16.msrb.mxu3 %v8904_v54  ;;  %v8745_v18 = vld [vmem:[#allocation2 + $0x5a0] sm:$0xf0]  ;;  %v12867_v52 = vpack.c.bf16 %v833_v45, %v833_v45  ;;  %v12872_v54 = vpack.c.bf16 %v834_v46, %v834_v46  ;;  %v12882_v45 = vpack.c.bf16 %v832_v34, %v832_v34 }
 0x234   :  { %v11540_v55 = vld [vmem:[#allocation2 + $0x29c] sm:$0xf0]  ;;  %v11696_v53 = vld [vmem:[#allocation2 + $0x784] sm:$0xf]  ;;  %v8748_v44 = vor.u32 %v11632_v51, %v8745_v18 }
 0x235   :  { %v8615_v56 = vld [vmem:[#allocation2 + $0x480] sm:$0xf]  ;;  %v8360_v61 = vor.u32 %v11540_v55, %v8359_v24  ;;  %2384 = vmatpush.bf16.msrb.mxu0 %v8104_v60  ;;  %v9001_v24 = vld [vmem:[#allocation2 + $0x7a0] sm:$0xf0]  ;;  %v12877_v55 = vpack.c.bf16 %v831_v33, %v831_v33 }
 0x236   :  { %v11604_v57 = vld [vmem:[#allocation2 + $0x49c] sm:$0xf0]  ;;  %v8201_v46 = vld [vmem:[#allocation2 + $0x160] sm:$0xf0]  ;;  %v9004_v31 = vor.u32 %v11696_v53, %v9001_v24 }
 0x237   :  { %v8871_v58 = vld [vmem:[#allocation2 + $0x680] sm:$0xf]  ;;  %v8616_v62 = vor.u32 %v11604_v57, %v8615_v56  ;;  %2397 = vmatpush.bf16.msrb.mxu1 %v8360_v61  ;;  %v8492_v56 = vor.u32 %v11568_v48, %v8489_v50  ;;  %v11496_v57 = vld [vmem:[#allocation2 + $0x144] sm:$0xf] }
 0x238   :  { %v11668_v59 = vld [vmem:[#allocation2 + $0x69c] sm:$0xf0]  ;;  %v11624_v33 = vld [vmem:[#allocation2 + $0x544] sm:$0xf]  ;;  %v8204_v32 = vor.u32 %v11496_v57, %v8201_v46 }
 0x239   :  { %v8071_v0 = vld [vmem:[#allocation2 + $0x40] sm:$0xf]  ;;  %v8872_v4 = vor.u32 %v11668_v59, %v8871_v58  ;;  %2410 = vmatpush.bf16.msrb.mxu2 %v8616_v62  ;;  %v11560_v58 = vld [vmem:[#allocation2 + $0x344] sm:$0xf] }
 0x23a   :  { %v11468_v1 = vld [vmem:[#allocation2 + $0x5c] sm:$0xf0]  ;;  %v8457_v59 = vld [vmem:[#allocation2 + $0x360] sm:$0xf0] }
 0x23b   :  { %v8327_v3 = vld [vmem:[#allocation2 + $0x240] sm:$0xf]  ;;  %v8072_v10 = vor.u32 %v11468_v1, %v8071_v0  ;;  %2423 = vmatpush.bf16.msrb.mxu3 %v8872_v4  ;;  %v8713_v60 = vld [vmem:[#allocation2 + $0x560] sm:$0xf0]  ;;  %v8460_v34 = vor.u32 %v11560_v58, %v8457_v59 }
 0x23c   :  { %v11532_v5 = vld [vmem:[#allocation2 + $0x25c] sm:$0xf0]  ;;  %v11688_v61 = vld [vmem:[#allocation2 + $0x744] sm:$0xf]  ;;  %v8716_v0 = vor.u32 %v11624_v33, %v8713_v60 }
 0x23d   :  { %v8583_v6 = vld [vmem:[#allocation2 + $0x440] sm:$0xf]  ;;  %v8328_v13 = vor.u32 %v11532_v5, %v8327_v3  ;;  %2385 = vmatpush.bf16.msrb.mxu0 %v8072_v10  ;;  %v8969_v62 = vld [vmem:[#allocation2 + $0x760] sm:$0xf0] }
 0x23e   :  { %v11596_v7 = vld [vmem:[#allocation2 + $0x45c] sm:$0xf0]  ;;  %v11488_v1 = vld [vmem:[#allocation2 + $0x104] sm:$0xf]  ;;  %v8972_v5 = vor.u32 %v11688_v61, %v8969_v62 }
 0x23f   :  { %v8839_v8 = vld [vmem:[#allocation2 + $0x640] sm:$0xf]  ;;  %v8584_v14 = vor.u32 %v11596_v7, %v8583_v6  ;;  %2398 = vmatpush.bf16.msrb.mxu1 %v8328_v13  ;;  %v8169_v3 = vld [vmem:[#allocation2 + $0x120] sm:$0xf0] }
 0x240   :  { %v11660_v9 = vld [vmem:[#allocation2 + $0x65c] sm:$0xf0]  ;;  %v11552_v4 = vld [vmem:[#allocation2 + $0x304] sm:$0xf] }
 0x241   :  { %v8039_v11 = vld [vmem:[#allocation2] sm:$0xf]  ;;  %v8840_v20 = vor.u32 %v11660_v9, %v8839_v8  ;;  %2411 = vmatpush.bf16.msrb.mxu2 %v8584_v14  ;;  %v8425_v6 = vld [vmem:[#allocation2 + $0x320] sm:$0xf0] }
 0x242   :  { %v11460_v12 = vld [vmem:[#allocation2 + $0x1c] sm:$0xf0]  ;;  %v11616_v7 = vld [vmem:[#allocation2 + $0x504] sm:$0xf] }
 0x243   :  { %v8295_v15 = vld [vmem:[#allocation2 + $0x200] sm:$0xf]  ;;  %v8040_v28 = vor.u32 %v11460_v12, %v8039_v11  ;;  %2424 = vmatpush.bf16.msrb.mxu3 %v8840_v20  ;;  %v8681_v8 = vld [vmem:[#allocation2 + $0x520] sm:$0xf0]  ;;  %v8172_v11 = vor.u32 %v11488_v1, %v8169_v3  ;;  %v8428_v12 = vor.u32 %v11552_v4, %v8425_v6  ;;  %v8527_v1 = vld [vmem:[#allocation2 + $0x3c8] sm:$0xf] }
 0x244   :  { %v11524_v16 = vld [vmem:[#allocation2 + $0x21c] sm:$0xf0]  ;;  %v11680_v9 = vld [vmem:[#allocation2 + $0x704] sm:$0xf]  ;;  %v8684_v13 = vor.u32 %v11616_v7, %v8681_v8  ;;  %v11581_v4 = vld [vmem:[#allocation2 + $0x3e4] sm:$0xf0] }
 0x245   :  { %v8551_v17 = vld [vmem:[#allocation2 + $0x400] sm:$0xf]  ;;  %v8296_v36 = vor.u32 %v11524_v16, %v8295_v15  ;;  %2386 = vmatpush.bf16.msrb.mxu0 %v8040_v28  ;;  %v8937_v10 = vld [vmem:[#allocation2 + $0x720] sm:$0xf0]  ;;  %v11645_v6 = vld [vmem:[#allocation2 + $0x5e4] sm:$0xf0] }
 0x246   :  { %v11588_v21 = vld [vmem:[#allocation2 + $0x41c] sm:$0xf0]  ;;  %v11480_v14 = vld [vmem:[#allocation2 + $0xc4] sm:$0xf] }
 0x247   :  { %v8807_v22 = vld [vmem:[#allocation2 + $0x600] sm:$0xf]  ;;  %v8552_v37 = vor.u32 %v11588_v21, %v8551_v17  ;;  %2399 = vmatpush.bf16.msrb.mxu1 %v8296_v36  ;;  %v8137_v15 = vld [vmem:[#allocation2 + $0xe0] sm:$0xf0]  ;;  %v8940_v17 = vor.u32 %v11680_v9, %v8937_v10  ;;  %v9039_v9 = vld [vmem:[#allocation2 + $0x7c8] sm:$0xf] }
 0x248   :  { %v11652_v23 = vld [vmem:[#allocation2 + $0x61c] sm:$0xf0]  ;;  %2387 = vmatmul.bf16.vlgmr.msrb.gmra.mxu0 %v12877_v55  ;;  %v11544_v16 = vld [vmem:[#allocation2 + $0x2c4] sm:$0xf]  ;;  %v8140_v26 = vor.u32 %v11480_v14, %v8137_v15  ;;  %v11709_v10 = vld [vmem:[#allocation2 + $0x7e4] sm:$0xf0] }
 0x249   :  { %v8808_v40 = vor.u32 %v11652_v23, %v8807_v22  ;;  %2412 = vmatpush.bf16.msrb.mxu2 %v8552_v37  ;;  %2431 = vmatpush.bf16.msra.mxu0 %v8268_v63  ;;  %v8393_v20 = vld [vmem:[#allocation2 + $0x2e0] sm:$0xf0]  ;;  %v8239_v15 = vld [vmem:[#allocation2 + $0x188] sm:$0xf] }
 0x24a   :  { %2400 = vmatmul.bf16.vlgmr.msrb.gmra.mxu1 %v12882_v45  ;;  %v11608_v21 = vld [vmem:[#allocation2 + $0x4c4] sm:$0xf]  ;;  %v8396_v27 = vor.u32 %v11544_v16, %v8393_v20  ;;  %v11509_v16 = vld [vmem:[#allocation2 + $0x1a4] sm:$0xf0]  ;;  %v9040_v20 = vor.u32 %v11709_v10, %v9039_v9 }
 0x24b   :  { %2425 = vmatpush.bf16.msrb.mxu3 %v8808_v40  ;;  %2444 = vmatpush.bf16.msra.mxu1 %v8524_v41  ;;  %v8649_v22 = vld [vmem:[#allocation2 + $0x4e0] sm:$0xf0]  ;;  %v8623_v9 = vld [vmem:[#allocation2 + $0x488] sm:$0xf] }
 0x24c   :  { %2413 = vmatmul.bf16.vlgmr.msrb.gmra.mxu2 %v12867_v52  ;;  %v11672_v23 = vld [vmem:[#allocation2 + $0x6c4] sm:$0xf]  ;;  %v8652_v28 = vor.u32 %v11608_v21, %v8649_v22  ;;  %v11573_v21 = vld [vmem:[#allocation2 + $0x3a4] sm:$0xf0] }
 0x24d   :  { %2457 = vmatpush.bf16.msra.mxu2 %v8780_v2  ;;  %2432 = vmatpush.bf16.msra.mxu0 %v8236_v43  ;;  %v11472_v29 = vld [vmem:[#allocation2 + $0x84] sm:$0xf]  ;;  %v8908_v36 = vor.u32 %v11672_v23, %v8905_v25  ;;  %v8751_v22 = vld [vmem:[#allocation2 + $0x588] sm:$0xf] }
 0x24e   :  { %2426 = vmatmul.bf16.vlgmr.msrb.gmra.mxu3 %v12872_v54  ;;  %v8105_v30 = vld [vmem:[#allocation2 + $0xa0] sm:$0xf0]  ;;  %v11637_v23 = vld [vmem:[#allocation2 + $0x5a4] sm:$0xf0] }
 0x24f   :  { %2470 = vmatpush.bf16.msra.mxu3 %v9036_v49  ;;  %2445 = vmatpush.bf16.msra.mxu1 %v8492_v56  ;;  %v11536_v35 = vld [vmem:[#allocation2 + $0x284] sm:$0xf]  ;;  %v8108_v41 = vor.u32 %v11472_v29, %v8105_v30  ;;  %v9007_v25 = vld [vmem:[#allocation2 + $0x788] sm:$0xf]  ;;  %v8752_v29 = vor.u32 %v11637_v23, %v8751_v22 }
 0x250   :  { %v8361_v37 = vld [vmem:[#allocation2 + $0x2a0] sm:$0xf0]  ;;  %v8207_v30 = vld [vmem:[#allocation2 + $0x148] sm:$0xf] }
 0x251   :  { %2458 = vmatpush.bf16.msra.mxu2 %v8748_v44  ;;  %2433 = vmatpush.bf16.msra.mxu0 %v8204_v32  ;;  %v11600_v38 = vld [vmem:[#allocation2 + $0x484] sm:$0xf]  ;;  %v8364_v2 = vor.u32 %v11536_v35, %v8361_v37  ;;  %v11501_v35 = vld [vmem:[#allocation2 + $0x164] sm:$0xf0] }
 0x252   :  { %v8617_v39 = vld [vmem:[#allocation2 + $0x4a0] sm:$0xf0]  ;;  %v11605_v10 = vld [vmem:[#allocation2 + $0x4a4] sm:$0xf0] }
 0x253   :  { %2471 = vmatpush.bf16.msra.mxu3 %v9004_v31  ;;  %2446 = vmatpush.bf16.msra.mxu1 %v8460_v34  ;;  %v11664_v40 = vld [vmem:[#allocation2 + $0x684] sm:$0xf]  ;;  %v8620_v42 = vor.u32 %v11600_v38, %v8617_v39  ;;  %v8271_v34 = vld [vmem:[#allocation2 + $0x1c8] sm:$0xf] }
 0x254   :  { %v8873_v63 = vld [vmem:[#allocation2 + $0x6a0] sm:$0xf0]  ;;  %v11565_v38 = vld [vmem:[#allocation2 + $0x364] sm:$0xf0] }
 0x255   :  { %2459 = vmatpush.bf16.msra.mxu2 %v8716_v0  ;;  %2434 = vmatpush.bf16.msra.mxu0 %v8172_v11  ;;  %v11464_v47 = vld [vmem:[#allocation2 + $0x44] sm:$0xf]  ;;  %v8876_v50 = vor.u32 %v11664_v40, %v8873_v63  ;;  %v11517_v0 = vld [vmem:[#allocation2 + $0x1e4] sm:$0xf0] }
 0x256   :  { %v8073_v48 = vld [vmem:[#allocation2 + $0x60] sm:$0xf0]  ;;  %v8719_v39 = vld [vmem:[#allocation2 + $0x548] sm:$0xf] }
 0x257   :  { %2472 = vmatpush.bf16.msra.mxu3 %v8972_v5  ;;  %2447 = vmatpush.bf16.msra.mxu1 %v8428_v12  ;;  %v11528_v49 = vld [vmem:[#allocation2 + $0x244] sm:$0xf]  ;;  %v8076_v56 = vor.u32 %v11464_v47, %v8073_v48  ;;  %v8783_v5 = vld [vmem:[#allocation2 + $0x5c8] sm:$0xf]  ;;  %v8272_v12 = vor.u32 %v11517_v0, %v8271_v34 }
 0x258   :  { %v8329_v51 = vld [vmem:[#allocation2 + $0x260] sm:$0xf0]  ;;  %v8784_v14 = vor.u32 %v11645_v6, %v8783_v5  ;;  %v11629_v40 = vld [vmem:[#allocation2 + $0x564] sm:$0xf0] }
 0x259   :  { %2460 = vmatpush.bf16.msra.mxu2 %v8684_v13  ;;  %2435 = vmatpush.bf16.msra.mxu0 %v8140_v26  ;;  %v11592_v18 = vld [vmem:[#allocation2 + $0x444] sm:$0xf]  ;;  %v8332_v46 = vor.u32 %v11528_v49, %v8329_v51  ;;  %v8528_v13 = vor.u32 %v11581_v4, %v8527_v1  ;;  %v11701_v26 = vld [vmem:[#allocation2 + $0x7a4] sm:$0xf0]  ;;  %v8720_v47 = vor.u32 %v11629_v40, %v8719_v39 }
 0x25a   :  { %v8585_v53 = vld [vmem:[#allocation2 + $0x460] sm:$0xf0]  ;;  %v9008_v37 = vor.u32 %v11701_v26, %v9007_v25  ;;  %v8975_v63 = vld [vmem:[#allocation2 + $0x748] sm:$0xf] }
 0x25b   :  { %2473 = vmatpush.bf16.msra.mxu3 %v8940_v17  ;;  %2448 = vmatpush.bf16.msra.mxu1 %v8396_v27  ;;  %v11656_v24 = vld [vmem:[#allocation2 + $0x644] sm:$0xf]  ;;  %v8588_v58 = vor.u32 %v11592_v18, %v8585_v53  ;;  %v8495_v17 = vld [vmem:[#allocation2 + $0x388] sm:$0xf]  ;;  %v8240_v27 = vor.u32 %v11509_v16, %v8239_v15  ;;  %v8624_v15 = vor.u32 %v11605_v10, %v8623_v9  ;;  %v8465_v9 = vld [vmem:[#allocation2 + $0x368] sm:$0xf0] }
 0x25c   :  { %v8841_v43 = vld [vmem:[#allocation2 + $0x660] sm:$0xf0]  ;;  %v8175_v48 = vld [vmem:[#allocation2 + $0x108] sm:$0xf]  ;;  %v11625_v10 = vld [vmem:[#allocation2 + $0x54c] sm:$0xf] }
 0x25d   :  { %2461 = vmatpush.bf16.msra.mxu2 %v8652_v28  ;;  %2436 = vmatpush.bf16.msra.mxu0 %v8108_v41  ;;  %v11456_v44 = vld [vmem:[#allocation2 + $0x4] sm:$0xf]  ;;  %v8844_v60 = vor.u32 %v11656_v24, %v8841_v43  ;;  %v8496_v28 = vor.u32 %v11573_v21, %v8495_v17  ;;  %v11693_v41 = vld [vmem:[#allocation2 + $0x764] sm:$0xf0] }
 0x25e   :  { %v8041_v57 = vld [vmem:[#allocation2 + $0x20] sm:$0xf0]  ;;  %v11493_v49 = vld [vmem:[#allocation2 + $0x124] sm:$0xf0]  ;;  %v8976_v51 = vor.u32 %v11693_v41, %v8975_v63 }
 0x25f   :  { %2474 = vmatpush.bf16.msra.mxu3 %v8908_v36  ;;  %2449 = vmatpush.bf16.msra.mxu1 %v8364_v2  ;;  %v11520_v31 = vld [vmem:[#allocation2 + $0x204] sm:$0xf]  ;;  %v8044_v3 = vor.u32 %v11456_v44, %v8041_v57  ;;  %v8463_v36 = vld [vmem:[#allocation2 + $0x348] sm:$0xf]  ;;  %v8208_v2 = vor.u32 %v11501_v35, %v8207_v30  ;;  %v8176_v44 = vor.u32 %v11493_v49, %v8175_v48  ;;  %v11577_v48 = vld [vmem:[#allocation2 + $0x3cc] sm:$0xf] }
 0x260   :  { %v8297_v59 = vld [vmem:[#allocation2 + $0x220] sm:$0xf0]  ;;  %v11557_v18 = vld [vmem:[#allocation2 + $0x324] sm:$0xf0] }
 0x261   :  { %2462 = vmatpush.bf16.msra.mxu2 %v8620_v42  ;;  %v11584_v33 = vld [vmem:[#allocation2 + $0x404] sm:$0xf]  ;;  %2437 = vmatpush.bf16.msra.mxu0 %v8076_v56  ;;  %v8300_v7 = vor.u32 %v11520_v31, %v8297_v59  ;;  %v8464_v42 = vor.u32 %v11565_v38, %v8463_v36  ;;  %v8687_v53 = vld [vmem:[#allocation2 + $0x508] sm:$0xf] }
 0x262   :  { %v8553_v61 = vld [vmem:[#allocation2 + $0x420] sm:$0xf0]  ;;  %v11621_v24 = vld [vmem:[#allocation2 + $0x524] sm:$0xf0] }
 0x263   :  { %2475 = vmatpush.bf16.msra.mxu3 %v8876_v50  ;;  %v11648_v62 = vld [vmem:[#allocation2 + $0x604] sm:$0xf]  ;;  %2450 = vmatpush.bf16.msra.mxu1 %v8332_v46  ;;  %v8556_v8 = vor.u32 %v11584_v33, %v8553_v61  ;;  %v8431_v50 = vld [vmem:[#allocation2 + $0x308] sm:$0xf]  ;;  %v8688_v46 = vor.u32 %v11621_v24, %v8687_v53 }
 0x264   :  { %v8809_v32 = vld [vmem:[#allocation2 + $0x620] sm:$0xf0]  ;;  %v8943_v43 = vld [vmem:[#allocation2 + $0x708] sm:$0xf]  ;;  %v8432_v57 = vor.u32 %v11557_v18, %v8431_v50  ;;  %v8529_v50 = vld [vmem:[#allocation2 + $0x3e8] sm:$0xf0] }
 0x265   :  { %2463 = vmatpush.bf16.msra.mxu2 %v8588_v58  ;;  %v8812_v11 = vor.u32 %v11648_v62, %v8809_v32  ;;  %2438 = vmatpush.bf16.msra.mxu0 %v8044_v3  ;;  %v11685_v56 = vld [vmem:[#allocation2 + $0x724] sm:$0xf0]  ;;  %v8785_v18 = vld [vmem:[#allocation2 + $0x5e8] sm:$0xf0] }
 0x266   :  { %v8143_v58 = vld [vmem:[#allocation2 + $0xc8] sm:$0xf]  ;;  %v8944_v33 = vor.u32 %v11685_v56, %v8943_v43  ;;  %v11705_v43 = vld [vmem:[#allocation2 + $0x7cc] sm:$0xf] }
 0x267   :  { %2476 = vmatpush.bf16.msra.mxu3 %v8844_v60  ;;  %2451 = vmatpush.bf16.msra.mxu1 %v8300_v7  ;;  %v11485_v31 = vld [vmem:[#allocation2 + $0xe4] sm:$0xf0]  ;;  %v9041_v56 = vld [vmem:[#allocation2 + $0x7e8] sm:$0xf0] }
 0x268   :  { %2439 = vmatmul.bf16.vlgmr.msra.gmra.mxu0 %v12877_v55  ;;  %v8399_v59 = vld [vmem:[#allocation2 + $0x2c8] sm:$0xf]  ;;  %v8144_v0 = vor.u32 %v11485_v31, %v8143_v58  ;;  %v11505_v31 = vld [vmem:[#allocation2 + $0x18c] sm:$0xf] }
 0x269   :  { %2464 = vmatpush.bf16.msra.mxu2 %v8556_v8  ;;  %2483 = vmatpush.bf16.msrb.mxu0 %v8272_v12  ;;  %v11549_v60 = vld [vmem:[#allocation2 + $0x2e4] sm:$0xf0] }
 0x26a   :  { %2452 = vmatmul.bf16.vlgmr.msra.gmra.mxu1 %v12882_v45  ;;  %v8655_v61 = vld [vmem:[#allocation2 + $0x4c8] sm:$0xf]  ;;  %v8400_v1 = vor.u32 %v11549_v60, %v8399_v59  ;;  %v8241_v59 = vld [vmem:[#allocation2 + $0x1a8] sm:$0xf0]  ;;  %v9044_v60 = vor.u32 %v11705_v43, %v9041_v56 }
 0x26b   :  { %2477 = vmatpush.bf16.msra.mxu3 %v8812_v11  ;;  %2496 = vmatpush.bf16.msrb.mxu1 %v8528_v13  ;;  %v11613_v62 = vld [vmem:[#allocation2 + $0x4e4] sm:$0xf0]  ;;  %v11601_v43 = vld [vmem:[#allocation2 + $0x48c] sm:$0xf] }
 0x26c   :  { %2465 = vmatmul.bf16.vlgmr.msra.gmra.mxu2 %v12867_v52  ;;  %v8911_v32 = vld [vmem:[#allocation2 + $0x6c8] sm:$0xf]  ;;  %v8656_v3 = vor.u32 %v11613_v62, %v8655_v61  ;;  %v8497_v61 = vld [vmem:[#allocation2 + $0x3a8] sm:$0xf0] }
 0x26d   :  { %2509 = vmatpush.bf16.msrb.mxu2 %v8784_v14  ;;  %2484 = vmatpush.bf16.msrb.mxu0 %v8240_v27  ;;  %v11677_v34 = vld [vmem:[#allocation2 + $0x6e4] sm:$0xf0]  ;;  %v11633_v62 = vld [vmem:[#allocation2 + $0x58c] sm:$0xf] }
 0x26e   :  { %2478 = vmatmul.bf16.vlgmr.msra.gmra.mxu3 %v12872_v54  ;;  %v8111_v4 = vld [vmem:[#allocation2 + $0x88] sm:$0xf]  ;;  %v8912_v7 = vor.u32 %v11677_v34, %v8911_v32  ;;  %v8753_v32 = vld [vmem:[#allocation2 + $0x5a8] sm:$0xf0] }
 0x26f   :  { %2522 = vmatpush.bf16.msrb.mxu3 %v9040_v20  ;;  %2497 = vmatpush.bf16.msrb.mxu1 %v8496_v28  ;;  %v11477_v5 = vld [vmem:[#allocation2 + $0xa4] sm:$0xf0]  ;;  %v11697_v34 = vld [vmem:[#allocation2 + $0x78c] sm:$0xf] }
 0x270   :  { %v8367_v6 = vld [vmem:[#allocation2 + $0x288] sm:$0xf]  ;;  %v8112_v13 = vor.u32 %v11477_v5, %v8111_v4  ;;  %v8756_v4 = vor.u32 %v11633_v62, %v8753_v32  ;;  %v11497_v5 = vld [vmem:[#allocation2 + $0x14c] sm:$0xf] }
 0x271   :  { %2510 = vmatpush.bf16.msrb.mxu2 %v8752_v29  ;;  %2485 = vmatpush.bf16.msrb.mxu0 %v8208_v2  ;;  %v11541_v8 = vld [vmem:[#allocation2 + $0x2a4] sm:$0xf0]  ;;  %v8625_v56 = vld [vmem:[#allocation2 + $0x4a8] sm:$0xf0] }
 0x272   :  { %v8879_v11 = vld [vmem:[#allocation2 + $0x688] sm:$0xf]  ;;  %v8368_v14 = vor.u32 %v11541_v8, %v8367_v6  ;;  %v8209_v6 = vld [vmem:[#allocation2 + $0x168] sm:$0xf0] }
 0x273   :  { %2523 = vmatpush.bf16.msrb.mxu3 %v9008_v37  ;;  %2498 = vmatpush.bf16.msrb.mxu1 %v8464_v42  ;;  %v11669_v12 = vld [vmem:[#allocation2 + $0x6a4] sm:$0xf0]  ;;  %v11513_v42 = vld [vmem:[#allocation2 + $0x1cc] sm:$0xf] }
 0x274   :  { %v8079_v16 = vld [vmem:[#allocation2 + $0x48] sm:$0xf]  ;;  %v8880_v21 = vor.u32 %v11669_v12, %v8879_v11  ;;  %v8721_v11 = vld [vmem:[#allocation2 + $0x568] sm:$0xf0] }
 0x275   :  { %2511 = vmatpush.bf16.msrb.mxu2 %v8720_v47  ;;  %2486 = vmatpush.bf16.msrb.mxu0 %v8176_v44  ;;  %v11469_v17 = vld [vmem:[#allocation2 + $0x64] sm:$0xf0]  ;;  %v8273_v47 = vld [vmem:[#allocation2 + $0x1e8] sm:$0xf0] }
 0x276   :  { %v8335_v20 = vld [vmem:[#allocation2 + $0x248] sm:$0xf]  ;;  %v8080_v28 = vor.u32 %v11469_v17, %v8079_v16  ;;  %v11689_v12 = vld [vmem:[#allocation2 + $0x74c] sm:$0xf]  ;;  %v8724_v16 = vor.u32 %v11625_v10, %v8721_v11 }
 0x277   :  { %2524 = vmatpush.bf16.msrb.mxu3 %v8976_v51  ;;  %2499 = vmatpush.bf16.msrb.mxu1 %v8432_v57  ;;  %v11533_v22 = vld [vmem:[#allocation2 + $0x264] sm:$0xf0]  ;;  %v11641_v51 = vld [vmem:[#allocation2 + $0x5cc] sm:$0xf]  ;;  %v8276_v57 = vor.u32 %v11513_v42, %v8273_v47 }
 0x278   :  { %v8591_v23 = vld [vmem:[#allocation2 + $0x448] sm:$0xf]  ;;  %v8336_v35 = vor.u32 %v11533_v22, %v8335_v20  ;;  %v8788_v58 = vor.u32 %v11641_v51, %v8785_v18  ;;  %v11489_v17 = vld [vmem:[#allocation2 + $0x10c] sm:$0xf] }
 0x279   :  { %2512 = vmatpush.bf16.msrb.mxu2 %v8688_v46  ;;  %2487 = vmatpush.bf16.msrb.mxu0 %v8144_v0  ;;  %v11597_v25 = vld [vmem:[#allocation2 + $0x464] sm:$0xf0]  ;;  %v8532_v46 = vor.u32 %v11577_v48, %v8529_v50  ;;  %v9009_v0 = vld [vmem:[#allocation2 + $0x7a8] sm:$0xf0] }
 0x27a   :  { %v8847_v26 = vld [vmem:[#allocation2 + $0x648] sm:$0xf]  ;;  %v8592_v36 = vor.u32 %v11597_v25, %v8591_v23  ;;  %v9012_v8 = vor.u32 %v11697_v34, %v9009_v0  ;;  %v8177_v20 = vld [vmem:[#allocation2 + $0x128] sm:$0xf0] }
 0x27b   :  { %2525 = vmatpush.bf16.msrb.mxu3 %v8944_v33  ;;  %2500 = vmatpush.bf16.msrb.mxu1 %v8400_v1  ;;  %v11661_v27 = vld [vmem:[#allocation2 + $0x664] sm:$0xf0]  ;;  %v11569_v33 = vld [vmem:[#allocation2 + $0x38c] sm:$0xf]  ;;  %v8244_v1 = vor.u32 %v11505_v31, %v8241_v59  ;;  %v8628_v31 = vor.u32 %v11601_v43, %v8625_v56  ;;  %v11566_v43 = vld [vmem:[#allocation2 + $0x36c] sm:$0xf0] }
 0x27c   :  { %v8047_v29 = vld [vmem:[#allocation2 + $0x8] sm:$0xf]  ;;  %v8848_v40 = vor.u32 %v11661_v27, %v8847_v26  ;;  %v8433_v23 = vld [vmem:[#allocation2 + $0x328] sm:$0xf0]  ;;  %v8727_v56 = vld [vmem:[#allocation2 + $0x550] sm:$0xf] }
 0x27d   :  { %2513 = vmatpush.bf16.msrb.mxu2 %v8656_v3  ;;  %2488 = vmatpush.bf16.msrb.mxu0 %v8112_v13  ;;  %v11461_v30 = vld [vmem:[#allocation2 + $0x24] sm:$0xf0]  ;;  %v8500_v3 = vor.u32 %v11569_v33, %v8497_v61  ;;  %v8977_v13 = vld [vmem:[#allocation2 + $0x768] sm:$0xf0] }
 0x27e   :  { %v8303_v37 = vld [vmem:[#allocation2 + $0x208] sm:$0xf]  ;;  %v8048_v49 = vor.u32 %v11461_v30, %v8047_v29  ;;  %v8980_v22 = vor.u32 %v11689_v12, %v8977_v13  ;;  %v11617_v25 = vld [vmem:[#allocation2 + $0x50c] sm:$0xf]  ;;  %v8180_v29 = vor.u32 %v11489_v17, %v8177_v20  ;;  %v8535_v17 = vld [vmem:[#allocation2 + $0x3d0] sm:$0xf] }
 0x27f   :  { %2526 = vmatpush.bf16.msrb.mxu3 %v8912_v7  ;;  %2501 = vmatpush.bf16.msrb.mxu1 %v8368_v14  ;;  %v11525_v38 = vld [vmem:[#allocation2 + $0x224] sm:$0xf0]  ;;  %v11561_v7 = vld [vmem:[#allocation2 + $0x34c] sm:$0xf]  ;;  %v8212_v14 = vor.u32 %v11497_v5, %v8209_v6 }
 0x280   :  { %v8559_v39 = vld [vmem:[#allocation2 + $0x408] sm:$0xf]  ;;  %v8304_v53 = vor.u32 %v11525_v38, %v8303_v37  ;;  %v8689_v26 = vld [vmem:[#allocation2 + $0x528] sm:$0xf0] }
 0x281   :  { %2514 = vmatpush.bf16.msrb.mxu2 %v8624_v15  ;;  %v11589_v63 = vld [vmem:[#allocation2 + $0x424] sm:$0xf0]  ;;  %2489 = vmatpush.bf16.msrb.mxu0 %v8080_v28  ;;  %v8468_v15 = vor.u32 %v11561_v7, %v8465_v9  ;;  %v11681_v27 = vld [vmem:[#allocation2 + $0x70c] sm:$0xf] }
 0x282   :  { %v8815_v41 = vld [vmem:[#allocation2 + $0x608] sm:$0xf]  ;;  %v8560_v24 = vor.u32 %v11589_v63, %v8559_v39  ;;  %v8945_v28 = vld [vmem:[#allocation2 + $0x728] sm:$0xf0] }
 0x283   :  { %2527 = vmatpush.bf16.msrb.mxu3 %v8880_v21  ;;  %v11653_v2 = vld [vmem:[#allocation2 + $0x624] sm:$0xf0]  ;;  %2502 = vmatpush.bf16.msrb.mxu1 %v8336_v35  ;;  %v11553_v21 = vld [vmem:[#allocation2 + $0x30c] sm:$0xf]  ;;  %v8692_v35 = vor.u32 %v11617_v25, %v8689_v26  ;;  %v8948_v39 = vor.u32 %v11681_v27, %v8945_v28  ;;  %v9047_v27 = vld [vmem:[#allocation2 + $0x7d0] sm:$0xf] }
 0x284   :  { %v8816_v44 = vor.u32 %v11653_v2, %v8815_v41  ;;  %v8436_v30 = vor.u32 %v11553_v21, %v8433_v23  ;;  %v8145_v37 = vld [vmem:[#allocation2 + $0xe8] sm:$0xf0]  ;;  %v11582_v21 = vld [vmem:[#allocation2 + $0x3ec] sm:$0xf0] }
 0x285   :  { %2515 = vmatpush.bf16.msrb.mxu2 %v8592_v36  ;;  %2490 = vmatpush.bf16.msrb.mxu0 %v8048_v49  ;;  %v11481_v36 = vld [vmem:[#allocation2 + $0xcc] sm:$0xf]  ;;  %v11646_v23 = vld [vmem:[#allocation2 + $0x5ec] sm:$0xf0] }
 0x286   :  { %v11545_v38 = vld [vmem:[#allocation2 + $0x2cc] sm:$0xf]  ;;  %v8148_v47 = vor.u32 %v11481_v36, %v8145_v37  ;;  %v11710_v28 = vld [vmem:[#allocation2 + $0x7ec] sm:$0xf0] }
 0x287   :  { %2528 = vmatpush.bf16.msrb.mxu3 %v8848_v40  ;;  %2503 = vmatpush.bf16.msrb.mxu1 %v8304_v53  ;;  %v8401_v40 = vld [vmem:[#allocation2 + $0x2e8] sm:$0xf0]  ;;  %v8247_v37 = vld [vmem:[#allocation2 + $0x190] sm:$0xf] }
 0x288   :  { %2491 = vmatmul.bf16.vlgmr.msrb.gmra.mxu0 %v12877_v55  ;;  %v11609_v63 = vld [vmem:[#allocation2 + $0x4cc] sm:$0xf]  ;;  %v8404_v48 = vor.u32 %v11545_v38, %v8401_v40  ;;  %v11510_v38 = vld [vmem:[#allocation2 + $0x1ac] sm:$0xf0]  ;;  %v9048_v40 = vor.u32 %v11710_v28, %v9047_v27 }
 0x289   :  { %2516 = vmatpush.bf16.msrb.mxu2 %v8560_v24  ;;  %2535 = vmatpush.bf16.msra.mxu0 %v8276_v57  ;;  %v8657_v41 = vld [vmem:[#allocation2 + $0x4e8] sm:$0xf0]  ;;  %v8631_v27 = vld [vmem:[#allocation2 + $0x490] sm:$0xf] }
 0x28a   :  { %2504 = vmatmul.bf16.vlgmr.msrb.gmra.mxu1 %v12882_v45  ;;  %v11673_v2 = vld [vmem:[#allocation2 + $0x6cc] sm:$0xf]  ;;  %v8660_v49 = vor.u32 %v11609_v63, %v8657_v41  ;;  %v11574_v63 = vld [vmem:[#allocation2 + $0x3ac] sm:$0xf0] }
 0x28b   :  { %2529 = vmatpush.bf16.msrb.mxu3 %v8816_v44  ;;  %2548 = vmatpush.bf16.msra.mxu1 %v8532_v46  ;;  %v8913_v42 = vld [vmem:[#allocation2 + $0x6e8] sm:$0xf0]  ;;  %v8759_v41 = vld [vmem:[#allocation2 + $0x590] sm:$0xf] }
 0x28c   :  { %2517 = vmatmul.bf16.vlgmr.msrb.gmra.mxu2 %v12867_v52  ;;  %v11473_v50 = vld [vmem:[#allocation2 + $0x8c] sm:$0xf]  ;;  %v8916_v53 = vor.u32 %v11673_v2, %v8913_v42  ;;  %v11638_v2 = vld [vmem:[#allocation2 + $0x5ac] sm:$0xf0] }
 0x28d   :  { %2561 = vmatpush.bf16.msra.mxu2 %v8788_v58  ;;  %2536 = vmatpush.bf16.msra.mxu0 %v8244_v1  ;;  %v8113_v51 = vld [vmem:[#allocation2 + $0xa8] sm:$0xf0]  ;;  %v9015_v42 = vld [vmem:[#allocation2 + $0x790] sm:$0xf] }
 0x28e   :  { %2530 = vmatmul.bf16.vlgmr.msrb.gmra.mxu3 %v12872_v54  ;;  %v11537_v18 = vld [vmem:[#allocation2 + $0x28c] sm:$0xf]  ;;  %v8116_v46 = vor.u32 %v11473_v50, %v8113_v51  ;;  %v8760_v50 = vor.u32 %v11638_v2, %v8759_v41  ;;  %v8215_v51 = vld [vmem:[#allocation2 + $0x150] sm:$0xf] }
 0x28f   :  { %2574 = vmatpush.bf16.msra.mxu3 %v9044_v60  ;;  %2549 = vmatpush.bf16.msra.mxu1 %v8500_v3  ;;  %v8369_v24 = vld [vmem:[#allocation2 + $0x2a8] sm:$0xf0]  ;;  %v11606_v28 = vld [vmem:[#allocation2 + $0x4ac] sm:$0xf0] }
 0x290   :  { %v11665_v44 = vld [vmem:[#allocation2 + $0x68c] sm:$0xf]  ;;  %v8372_v58 = vor.u32 %v11537_v18, %v8369_v24  ;;  %v11502_v18 = vld [vmem:[#allocation2 + $0x16c] sm:$0xf0] }
 0x291   :  { %2562 = vmatpush.bf16.msra.mxu2 %v8756_v4  ;;  %2537 = vmatpush.bf16.msra.mxu0 %v8212_v14  ;;  %v8881_v57 = vld [vmem:[#allocation2 + $0x6a8] sm:$0xf0]  ;;  %v11534_v41 = vld [vmem:[#allocation2 + $0x26c] sm:$0xf0] }
 0x292   :  { %v11465_v59 = vld [vmem:[#allocation2 + $0x4c] sm:$0xf]  ;;  %v8884_v61 = vor.u32 %v11665_v44, %v8881_v57  ;;  %v11630_v44 = vld [vmem:[#allocation2 + $0x56c] sm:$0xf0] }
 0x293   :  { %2575 = vmatpush.bf16.msra.mxu3 %v9012_v8  ;;  %2550 = vmatpush.bf16.msra.mxu1 %v8468_v15  ;;  %v8081_v33 = vld [vmem:[#allocation2 + $0x68] sm:$0xf0]  ;;  %v8279_v15 = vld [vmem:[#allocation2 + $0x1d0] sm:$0xf] }
 0x294   :  { %v11529_v60 = vld [vmem:[#allocation2 + $0x24c] sm:$0xf]  ;;  %v8084_v3 = vor.u32 %v11465_v59, %v8081_v33  ;;  %v8983_v57 = vld [vmem:[#allocation2 + $0x750] sm:$0xf]  ;;  %v8728_v59 = vor.u32 %v11630_v44, %v8727_v56 }
 0x295   :  { %2563 = vmatpush.bf16.msra.mxu2 %v8724_v16  ;;  %2538 = vmatpush.bf16.msra.mxu0 %v8180_v29  ;;  %v8337_v62 = vld [vmem:[#allocation2 + $0x268] sm:$0xf0]  ;;  %v11518_v16 = vld [vmem:[#allocation2 + $0x1ec] sm:$0xf0] }
 0x296   :  { %v11593_v32 = vld [vmem:[#allocation2 + $0x44c] sm:$0xf]  ;;  %v8340_v6 = vor.u32 %v11529_v60, %v8337_v62  ;;  %v8183_v33 = vld [vmem:[#allocation2 + $0x110] sm:$0xf] }
 0x297   :  { %2576 = vmatpush.bf16.msra.mxu3 %v8980_v22  ;;  %2551 = vmatpush.bf16.msra.mxu1 %v8436_v30  ;;  %v8593_v34 = vld [vmem:[#allocation2 + $0x468] sm:$0xf0]  ;;  %v8791_v22 = vld [vmem:[#allocation2 + $0x5d0] sm:$0xf]  ;;  %v8280_v30 = vor.u32 %v11518_v16, %v8279_v15 }
 0x298   :  { %v11657_v0 = vld [vmem:[#allocation2 + $0x64c] sm:$0xf]  ;;  %v8596_v7 = vor.u32 %v11593_v32, %v8593_v34  ;;  %v8792_v36 = vor.u32 %v11646_v23, %v8791_v22  ;;  %v11494_v60 = vld [vmem:[#allocation2 + $0x12c] sm:$0xf0] }
 0x299   :  { %2564 = vmatpush.bf16.msra.mxu2 %v8692_v35  ;;  %2539 = vmatpush.bf16.msra.mxu0 %v8148_v47  ;;  %v8849_v1 = vld [vmem:[#allocation2 + $0x668] sm:$0xf0]  ;;  %v8536_v35 = vor.u32 %v11582_v21, %v8535_v17  ;;  %v11702_v47 = vld [vmem:[#allocation2 + $0x7ac] sm:$0xf0] }
 0x29a   :  { %v11457_v4 = vld [vmem:[#allocation2 + $0xc] sm:$0xf]  ;;  %v8852_v11 = vor.u32 %v11657_v0, %v8849_v1  ;;  %v9016_v24 = vor.u32 %v11702_v47, %v9015_v42  ;;  %v11558_v32 = vld [vmem:[#allocation2 + $0x32c] sm:$0xf0] }
 0x29b   :  { %2577 = vmatpush.bf16.msra.mxu3 %v8948_v39  ;;  %2552 = vmatpush.bf16.msra.mxu1 %v8404_v48  ;;  %v8049_v5 = vld [vmem:[#allocation2 + $0x28] sm:$0xf0]  ;;  %v8503_v39 = vld [vmem:[#allocation2 + $0x390] sm:$0xf]  ;;  %v8248_v48 = vor.u32 %v11510_v38, %v8247_v37  ;;  %v8632_v37 = vor.u32 %v11606_v28, %v8631_v27  ;;  %v8473_v27 = vld [vmem:[#allocation2 + $0x370] sm:$0xf0] }
 0x29c   :  { %v11521_v8 = vld [vmem:[#allocation2 + $0x20c] sm:$0xf]  ;;  %v8052_v20 = vor.u32 %v11457_v4, %v8049_v5  ;;  %v8695_v34 = vld [vmem:[#allocation2 + $0x510] sm:$0xf]  ;;  %v8184_v4 = vor.u32 %v11494_v60, %v8183_v33  ;;  %v11578_v33 = vld [vmem:[#allocation2 + $0x3d4] sm:$0xf] }
 0x29d   :  { %2565 = vmatpush.bf16.msra.mxu2 %v8660_v49  ;;  %2540 = vmatpush.bf16.msra.mxu0 %v8116_v46  ;;  %v8305_v9 = vld [vmem:[#allocation2 + $0x228] sm:$0xf0]  ;;  %v8504_v49 = vor.u32 %v11574_v63, %v8503_v39  ;;  %v11694_v46 = vld [vmem:[#allocation2 + $0x76c] sm:$0xf0]  ;;  %v11626_v28 = vld [vmem:[#allocation2 + $0x554] sm:$0xf] }
 0x29e   :  { %v11585_v10 = vld [vmem:[#allocation2 + $0x40c] sm:$0xf]  ;;  %v8308_v25 = vor.u32 %v11521_v8, %v8305_v9  ;;  %v8984_v62 = vor.u32 %v11694_v46, %v8983_v57  ;;  %v11622_v0 = vld [vmem:[#allocation2 + $0x52c] sm:$0xf0] }
 0x29f   :  { %2578 = vmatpush.bf16.msra.mxu3 %v8916_v53  ;;  %2553 = vmatpush.bf16.msra.mxu1 %v8372_v58  ;;  %v8561_v12 = vld [vmem:[#allocation2 + $0x428] sm:$0xf0]  ;;  %v8471_v53 = vld [vmem:[#allocation2 + $0x350] sm:$0xf]  ;;  %v8216_v58 = vor.u32 %v11502_v18, %v8215_v51 }
 0x2a0   :  { %v11649_v13 = vld [vmem:[#allocation2 + $0x60c] sm:$0xf]  ;;  %v8564_v26 = vor.u32 %v11585_v10, %v8561_v12  ;;  %v8951_v1 = vld [vmem:[#allocation2 + $0x710] sm:$0xf] }
 0x2a1   :  { %2566 = vmatpush.bf16.msra.mxu2 %v8628_v31  ;;  %v8817_v14 = vld [vmem:[#allocation2 + $0x628] sm:$0xf0]  ;;  %2541 = vmatpush.bf16.msra.mxu0 %v8084_v3  ;;  %v8472_v31 = vor.u32 %v11566_v43, %v8471_v53  ;;  %v11686_v3 = vld [vmem:[#allocation2 + $0x72c] sm:$0xf0] }
 0x2a2   :  { %v8820_v29 = vor.u32 %v11649_v13, %v8817_v14  ;;  %v11486_v8 = vld [vmem:[#allocation2 + $0xec] sm:$0xf0]  ;;  %v8952_v10 = vor.u32 %v11686_v3, %v8951_v1  ;;  %v11706_v1 = vld [vmem:[#allocation2 + $0x7d4] sm:$0xf] }
 0x2a3   :  { %2579 = vmatpush.bf16.msra.mxu3 %v8884_v61  ;;  %2554 = vmatpush.bf16.msra.mxu1 %v8340_v6  ;;  %v8439_v61 = vld [vmem:[#allocation2 + $0x310] sm:$0xf]  ;;  %v8696_v6 = vor.u32 %v11622_v0, %v8695_v34  ;;  %v9049_v3 = vld [vmem:[#allocation2 + $0x7f0] sm:$0xf0] }
 0x2a4   :  { %v8440_v5 = vor.u32 %v11558_v32, %v8439_v61  ;;  %v8407_v9 = vld [vmem:[#allocation2 + $0x2d0] sm:$0xf]  ;;  %v8537_v61 = vld [vmem:[#allocation2 + $0x3f0] sm:$0xf0] }
 0x2a5   :  { %2567 = vmatpush.bf16.msra.mxu2 %v8596_v7  ;;  %2542 = vmatpush.bf16.msra.mxu0 %v8052_v20  ;;  %v8151_v7 = vld [vmem:[#allocation2 + $0xd0] sm:$0xf]  ;;  %v8793_v32 = vld [vmem:[#allocation2 + $0x5f0] sm:$0xf0] }
 0x2a6   :  { %v8663_v12 = vld [vmem:[#allocation2 + $0x4d0] sm:$0xf]  ;;  %v8152_v16 = vor.u32 %v11486_v8, %v8151_v7  ;;  %v11506_v8 = vld [vmem:[#allocation2 + $0x194] sm:$0xf] }
 0x2a7   :  { %2580 = vmatpush.bf16.msra.mxu3 %v8852_v11  ;;  %2555 = vmatpush.bf16.msra.mxu1 %v8308_v25  ;;  %v11550_v11 = vld [vmem:[#allocation2 + $0x2ec] sm:$0xf0] }
 0x2a8   :  { %2543 = vmatmul.bf16.vlgmr.msra.gmra.mxu0 %v12877_v55  ;;  %v11614_v13 = vld [vmem:[#allocation2 + $0x4ec] sm:$0xf0]  ;;  %v8408_v17 = vor.u32 %v11550_v11, %v8407_v9  ;;  %v8249_v9 = vld [vmem:[#allocation2 + $0x1b0] sm:$0xf0]  ;;  %v9052_v11 = vor.u32 %v11706_v1, %v9049_v3 }
 0x2a9   :  { %2568 = vmatpush.bf16.msra.mxu2 %v8564_v26  ;;  %2587 = vmatpush.bf16.msrb.mxu0 %v8280_v30  ;;  %v8919_v14 = vld [vmem:[#allocation2 + $0x6d0] sm:$0xf]  ;;  %v8664_v20 = vor.u32 %v11614_v13, %v8663_v12  ;;  %v8505_v12 = vld [vmem:[#allocation2 + $0x3b0] sm:$0xf0] }
 0x2aa   :  { %2556 = vmatmul.bf16.vlgmr.msra.gmra.mxu1 %v12882_v45  ;;  %v11678_v15 = vld [vmem:[#allocation2 + $0x6ec] sm:$0xf0]  ;;  %v11634_v13 = vld [vmem:[#allocation2 + $0x594] sm:$0xf] }
 0x2ab   :  { %2581 = vmatpush.bf16.msra.mxu3 %v8820_v29  ;;  %2600 = vmatpush.bf16.msrb.mxu1 %v8536_v35  ;;  %v8119_v21 = vld [vmem:[#allocation2 + $0x90] sm:$0xf]  ;;  %v8920_v25 = vor.u32 %v11678_v15, %v8919_v14  ;;  %v8761_v14 = vld [vmem:[#allocation2 + $0x5b0] sm:$0xf0] }
 0x2ac   :  { %2569 = vmatmul.bf16.vlgmr.msra.gmra.mxu2 %v12867_v52  ;;  %v11478_v22 = vld [vmem:[#allocation2 + $0xac] sm:$0xf0]  ;;  %v11698_v15 = vld [vmem:[#allocation2 + $0x794] sm:$0xf] }
 0x2ad   :  { %2613 = vmatpush.bf16.msrb.mxu2 %v8792_v36  ;;  %2588 = vmatpush.bf16.msrb.mxu0 %v8248_v48  ;;  %v8375_v23 = vld [vmem:[#allocation2 + $0x290] sm:$0xf]  ;;  %v8120_v35 = vor.u32 %v11478_v22, %v8119_v21  ;;  %v8764_v21 = vor.u32 %v11634_v13, %v8761_v14  ;;  %v11498_v22 = vld [vmem:[#allocation2 + $0x154] sm:$0xf] }
 0x2ae   :  { %2582 = vmatmul.bf16.vlgmr.msra.gmra.mxu3 %v12872_v54  ;;  %v11542_v26 = vld [vmem:[#allocation2 + $0x2ac] sm:$0xf0]  ;;  %v11538_v1 = vld [vmem:[#allocation2 + $0x294] sm:$0xf] }
 0x2af   :  { %2626 = vmatpush.bf16.msrb.mxu3 %v9048_v40  ;;  %2601 = vmatpush.bf16.msrb.mxu1 %v8504_v49  ;;  %v8887_v29 = vld [vmem:[#allocation2 + $0x690] sm:$0xf]  ;;  %v8376_v36 = vor.u32 %v11542_v26, %v8375_v23  ;;  %v8217_v23 = vld [vmem:[#allocation2 + $0x170] sm:$0xf0] }
 0x2b0   :  { %v11670_v30 = vld [vmem:[#allocation2 + $0x6ac] sm:$0xf0] }
 0x2b1   :  { %2614 = vmatpush.bf16.msrb.mxu2 %v8760_v50  ;;  %2589 = vmatpush.bf16.msrb.mxu0 %v8216_v58  ;;  %v8087_v38 = vld [vmem:[#allocation2 + $0x50] sm:$0xf]  ;;  %v8888_v63 = vor.u32 %v11670_v30, %v8887_v29  ;;  %v8729_v29 = vld [vmem:[#allocation2 + $0x570] sm:$0xf0] }
 0x2b2   :  { %v11470_v39 = vld [vmem:[#allocation2 + $0x6c] sm:$0xf0]  ;;  %v11690_v30 = vld [vmem:[#allocation2 + $0x754] sm:$0xf] }
 0x2b3   :  { %2627 = vmatpush.bf16.msrb.mxu3 %v9016_v24  ;;  %2602 = vmatpush.bf16.msrb.mxu1 %v8472_v31  ;;  %v8343_v40 = vld [vmem:[#allocation2 + $0x250] sm:$0xf]  ;;  %v8088_v49 = vor.u32 %v11470_v39, %v8087_v38  ;;  %v11514_v31 = vld [vmem:[#allocation2 + $0x1d4] sm:$0xf]  ;;  %v8732_v38 = vor.u32 %v11626_v28, %v8729_v29 }
 0x2b4   :  { %v8599_v2 = vld [vmem:[#allocation2 + $0x450] sm:$0xf]  ;;  %v8344_v18 = vor.u32 %v11534_v41, %v8343_v40  ;;  %v11490_v39 = vld [vmem:[#allocation2 + $0x114] sm:$0xf] }
 0x2b5   :  { %2615 = vmatpush.bf16.msrb.mxu2 %v8728_v59  ;;  %2590 = vmatpush.bf16.msrb.mxu0 %v8184_v4  ;;  %v11598_v42 = vld [vmem:[#allocation2 + $0x46c] sm:$0xf0]  ;;  %v8281_v59 = vld [vmem:[#allocation2 + $0x1f0] sm:$0xf0] }
 0x2b6   :  { %v8855_v47 = vld [vmem:[#allocation2 + $0x650] sm:$0xf]  ;;  %v8600_v53 = vor.u32 %v11598_v42, %v8599_v2  ;;  %v8185_v40 = vld [vmem:[#allocation2 + $0x130] sm:$0xf0] }
 0x2b7   :  { %2628 = vmatpush.bf16.msrb.mxu3 %v8984_v62  ;;  %2603 = vmatpush.bf16.msrb.mxu1 %v8440_v5  ;;  %v11662_v48 = vld [vmem:[#allocation2 + $0x66c] sm:$0xf0]  ;;  %v11642_v62 = vld [vmem:[#allocation2 + $0x5d4] sm:$0xf]  ;;  %v8284_v5 = vor.u32 %v11514_v31, %v8281_v59 }
 0x2b8   :  { %v8055_v50 = vld [vmem:[#allocation2 + $0x10] sm:$0xf]  ;;  %v8856_v44 = vor.u32 %v11662_v48, %v8855_v47  ;;  %v8796_v7 = vor.u32 %v11642_v62, %v8793_v32  ;;  %v8441_v2 = vld [vmem:[#allocation2 + $0x330] sm:$0xf0] }
 0x2b9   :  { %2616 = vmatpush.bf16.msrb.mxu2 %v8696_v6  ;;  %2591 = vmatpush.bf16.msrb.mxu0 %v8152_v16  ;;  %v11462_v51 = vld [vmem:[#allocation2 + $0x2c] sm:$0xf0]  ;;  %v8540_v6 = vor.u32 %v11578_v33, %v8537_v61  ;;  %v9017_v16 = vld [vmem:[#allocation2 + $0x7b0] sm:$0xf0] }
 0x2ba   :  { %v8311_v24 = vld [vmem:[#allocation2 + $0x210] sm:$0xf]  ;;  %v8056_v60 = vor.u32 %v11462_v51, %v8055_v50  ;;  %v9020_v26 = vor.u32 %v11698_v15, %v9017_v16  ;;  %v11618_v42 = vld [vmem:[#allocation2 + $0x514] sm:$0xf]  ;;  %v8188_v50 = vor.u32 %v11490_v39, %v8185_v40 }
 0x2bb   :  { %2629 = vmatpush.bf16.msrb.mxu3 %v8952_v10  ;;  %2604 = vmatpush.bf16.msrb.mxu1 %v8408_v17  ;;  %v11526_v43 = vld [vmem:[#allocation2 + $0x22c] sm:$0xf0]  ;;  %v11570_v10 = vld [vmem:[#allocation2 + $0x394] sm:$0xf]  ;;  %v8252_v17 = vor.u32 %v11506_v8, %v8249_v9 }
 0x2bc   :  { %v8567_v56 = vld [vmem:[#allocation2 + $0x410] sm:$0xf]  ;;  %v8312_v34 = vor.u32 %v11526_v43, %v8311_v24  ;;  %v8697_v47 = vld [vmem:[#allocation2 + $0x530] sm:$0xf0] }
 0x2bd   :  { %2617 = vmatpush.bf16.msrb.mxu2 %v8664_v20  ;;  %2592 = vmatpush.bf16.msrb.mxu0 %v8120_v35  ;;  %v11590_v57 = vld [vmem:[#allocation2 + $0x42c] sm:$0xf0]  ;;  %v8508_v20 = vor.u32 %v11570_v10, %v8505_v12  ;;  %v8985_v35 = vld [vmem:[#allocation2 + $0x770] sm:$0xf0] }
 0x2be   :  { %v8823_v46 = vld [vmem:[#allocation2 + $0x610] sm:$0xf]  ;;  %v8568_v0 = vor.u32 %v11590_v57, %v8567_v56  ;;  %v8988_v41 = vor.u32 %v11690_v30, %v8985_v35  ;;  %v11682_v48 = vld [vmem:[#allocation2 + $0x714] sm:$0xf] }
 0x2bf   :  { %2630 = vmatpush.bf16.msrb.mxu3 %v8920_v25  ;;  %2605 = vmatpush.bf16.msrb.mxu1 %v8376_v36  ;;  %v11654_v58 = vld [vmem:[#allocation2 + $0x62c] sm:$0xf0]  ;;  %v11562_v25 = vld [vmem:[#allocation2 + $0x354] sm:$0xf]  ;;  %v8220_v36 = vor.u32 %v11498_v22, %v8217_v23 }
 0x2c0   :  { %v8824_v4 = vor.u32 %v11654_v58, %v8823_v46  ;;  %v11482_v24 = vld [vmem:[#allocation2 + $0xd4] sm:$0xf] }
 0x2c1   :  { %2618 = vmatpush.bf16.msrb.mxu2 %v8632_v37  ;;  %2593 = vmatpush.bf16.msrb.mxu0 %v8088_v49  ;;  %v8476_v37 = vor.u32 %v11562_v25, %v8473_v27  ;;  %v8953_v49 = vld [vmem:[#allocation2 + $0x730] sm:$0xf0] }
 0x2c2   :  { %v8153_v43 = vld [vmem:[#allocation2 + $0xf0] sm:$0xf0]  ;;  %v8956_v57 = vor.u32 %v11682_v48, %v8953_v49 }
 0x2c3   :  { %2631 = vmatpush.bf16.msrb.mxu3 %v8888_v63  ;;  %2606 = vmatpush.bf16.msrb.mxu1 %v8344_v18  ;;  %v11554_v63 = vld [vmem:[#allocation2 + $0x314] sm:$0xf]  ;;  %v8156_v61 = vor.u32 %v11482_v24, %v8153_v43  ;;  %v11583_v24 = vld [vmem:[#allocation2 + $0x3f4] sm:$0xf0] }
 0x2c4   :  { %v8444_v18 = vor.u32 %v11554_v63, %v8441_v2  ;;  %v11546_v56 = vld [vmem:[#allocation2 + $0x2d4] sm:$0xf]  ;;  %v8799_v43 = vld [vmem:[#allocation2 + $0x5d8] sm:$0xf] }
 0x2c5   :  { %2619 = vmatpush.bf16.msrb.mxu2 %v8600_v53  ;;  %2594 = vmatpush.bf16.msrb.mxu0 %v8056_v60  ;;  %v2388_v51 = vpop.f32.mrf.mxu0  ;;  %v8700_v53 = vor.u32 %v11618_v42, %v8697_v47  ;;  %v8409_v46 = vld [vmem:[#allocation2 + $0x2f0] sm:$0xf0] }
 0x2c6   :  { %v11610_v58 = vld [vmem:[#allocation2 + $0x4d4] sm:$0xf]  ;;  %v8412_v62 = vor.u32 %v11546_v56, %v8409_v46  ;;  %v11647_v56 = vld [vmem:[#allocation2 + $0x5f4] sm:$0xf0] }
 0x2c7   :  { %2632 = vmatpush.bf16.msrb.mxu3 %v8856_v44  ;;  %2607 = vmatpush.bf16.msrb.mxu1 %v8312_v34  ;;  %v2401_v44 = vpop.f32.mrf.mxu1  ;;  %v8665_v31 = vld [vmem:[#allocation2 + $0x4f0] sm:$0xf0]  ;;  %v9055_v46 = vld [vmem:[#allocation2 + $0x7d8] sm:$0xf] }
 0x2c8   :  { %2595 = vmatmul.bf16.vlgmr.msrb.gmra.mxu0 %v12877_v55  ;;  %v2402_v59 = vadd.f32 %v2401_v44, %v2388_v51  ;;  %v11674_v33 = vld [vmem:[#allocation2 + $0x6d4] sm:$0xf]  ;;  %v8668_v32 = vor.u32 %v11610_v58, %v8665_v31  ;;  %v11519_v51 = vld [vmem:[#allocation2 + $0x1f4] sm:$0xf0] }
 0x2c9   :  { %2620 = vmatpush.bf16.msrb.mxu2 %v8568_v0  ;;  %2639 = vmatpush.bf16.msra.mxu0 %v8284_v5  ;;  %v8921_v60 = vld [vmem:[#allocation2 + $0x6f0] sm:$0xf0]  ;;  %v11711_v58 = vld [vmem:[#allocation2 + $0x7f4] sm:$0xf0] }
 0x2ca   :  { %2608 = vmatmul.bf16.vlgmr.msrb.gmra.mxu1 %v12882_v45  ;;  %v11474_v34 = vld [vmem:[#allocation2 + $0x94] sm:$0xf] }
 0x2cb   :  { %2633 = vmatpush.bf16.msrb.mxu3 %v8824_v4  ;;  %2652 = vmatpush.bf16.msra.mxu1 %v8540_v6  ;;  %v8121_v0 = vld [vmem:[#allocation2 + $0xb0] sm:$0xf0]  ;;  %v8924_v4 = vor.u32 %v11674_v33, %v8921_v60  ;;  %v8800_v60 = vor.u32 %v11647_v56, %v8799_v43 }
 0x2cc   :  { %2621 = vmatmul.bf16.vlgmr.msrb.gmra.mxu2 %v12867_v52  ;;  %v8377_v5 = vld [vmem:[#allocation2 + $0x2b0] sm:$0xf0]  ;;  %v8124_v12 = vor.u32 %v11474_v34, %v8121_v0  ;;  %v9056_v34 = vor.u32 %v11711_v58, %v9055_v46  ;;  %v11575_v0 = vld [vmem:[#allocation2 + $0x3b4] sm:$0xf0] }
 0x2cd   :  { %2665 = vmatpush.bf16.msra.mxu2 %v8796_v7  ;;  %2640 = vmatpush.bf16.msra.mxu0 %v8252_v17  ;;  %v11602_v6 = vld [vmem:[#allocation2 + $0x494] sm:$0xf]  ;;  %v2390_v14 = vpop.f32.mrf.mxu0  ;;  %v8380_v15 = vor.u32 %v11538_v1, %v8377_v5  ;;  %v8767_v1 = vld [vmem:[#allocation2 + $0x598] sm:$0xf] }
 0x2ce   :  { %2634 = vmatmul.bf16.vlgmr.msrb.gmra.mxu3 %v12872_v54  ;;  %v8633_v7 = vld [vmem:[#allocation2 + $0x4b0] sm:$0xf0]  ;;  %v11703_v5 = vld [vmem:[#allocation2 + $0x7b4] sm:$0xf0] }
 0x2cf   :  { %2678 = vmatpush.bf16.msra.mxu3 %v9052_v11  ;;  %2653 = vmatpush.bf16.msra.mxu1 %v8508_v20  ;;  %v2414_v3 = vpop.f32.mrf.mxu2  ;;  %v11666_v10 = vld [vmem:[#allocation2 + $0x694] sm:$0xf]  ;;  %v8636_v16 = vor.u32 %v11602_v6, %v8633_v7  ;;  %v2403_v22 = vpop.f32.mrf.mxu1  ;;  %v11567_v14 = vld [vmem:[#allocation2 + $0x374] sm:$0xf0] }
 0x2d0   :  { %v2415_v8 = vadd.f32 %v2414_v3, %v2402_v59  ;;  %v8889_v11 = vld [vmem:[#allocation2 + $0x6b0] sm:$0xf0]  ;;  %v11639_v3 = vld [vmem:[#allocation2 + $0x5b4] sm:$0xf0] }
 0x2d1   :  { %2666 = vmatpush.bf16.msra.mxu2 %v8764_v21  ;;  %2641 = vmatpush.bf16.msra.mxu0 %v8220_v36  ;;  %v2427_v9 = vpop.f32.mrf.mxu3  ;;  %v11466_v17 = vld [vmem:[#allocation2 + $0x54] sm:$0xf]  ;;  %v8892_v23 = vor.u32 %v11666_v10, %v8889_v11  ;;  %v11503_v10 = vld [vmem:[#allocation2 + $0x174] sm:$0xf0] }
 0x2d2   :  { %v12904_v13 = vadd.f32 %v2427_v9, %v2415_v8  ;;  %v8089_v20 = vld [vmem:[#allocation2 + $0x70] sm:$0xf0]  ;;  %v8768_v8 = vor.u32 %v11639_v3, %v8767_v1  ;;  %v8223_v9 = vld [vmem:[#allocation2 + $0x158] sm:$0xf] }
 0x2d3   :  { %2679 = vmatpush.bf16.msra.mxu3 %v9020_v26  ;;  %2654 = vmatpush.bf16.msra.mxu1 %v8476_v37  ;;  %v11530_v21 = vld [vmem:[#allocation2 + $0x254] sm:$0xf]  ;;  %v8092_v30 = vor.u32 %v11466_v17, %v8089_v20  ;;  %v8479_v11 = vld [vmem:[#allocation2 + $0x358] sm:$0xf] }
 0x2d4   :  { %v8345_v25 = vld [vmem:[#allocation2 + $0x270] sm:$0xf0]  ;;  %v8991_v17 = vld [vmem:[#allocation2 + $0x758] sm:$0xf]  ;;  %v8480_v22 = vor.u32 %v11567_v14, %v8479_v11 }
 0x2d5   :  { %2667 = vmatpush.bf16.msra.mxu2 %v8732_v38  ;;  %2642 = vmatpush.bf16.msra.mxu0 %v8188_v50  ;;  %v11594_v26 = vld [vmem:[#allocation2 + $0x454] sm:$0xf]  ;;  %v8348_v37 = vor.u32 %v11530_v21, %v8345_v25  ;;  %v8287_v50 = vld [vmem:[#allocation2 + $0x1d8] sm:$0xf]  ;;  %v8224_v21 = vor.u32 %v11503_v10, %v8223_v9 }
 0x2d6   :  { %v8601_v27 = vld [vmem:[#allocation2 + $0x470] sm:$0xf0]  ;;  %v8288_v59 = vor.u32 %v11519_v51, %v8287_v50  ;;  %v11695_v20 = vld [vmem:[#allocation2 + $0x774] sm:$0xf0] }
 0x2d7   :  { %2680 = vmatpush.bf16.msra.mxu3 %v8988_v41  ;;  %2655 = vmatpush.bf16.msra.mxu1 %v8444_v18  ;;  %v11658_v28 = vld [vmem:[#allocation2 + $0x654] sm:$0xf]  ;;  %v8604_v38 = vor.u32 %v11594_v26, %v8601_v27  ;;  %v2416_v41 = vpop.f32.mrf.mxu2  ;;  %v8543_v18 = vld [vmem:[#allocation2 + $0x3d8] sm:$0xf] }
 0x2d8   :  { %v8857_v29 = vld [vmem:[#allocation2 + $0x670] sm:$0xf0]  ;;  %v8544_v33 = vor.u32 %v11583_v24, %v8543_v18  ;;  %v8191_v25 = vld [vmem:[#allocation2 + $0x118] sm:$0xf] }
 0x2d9   :  { %2668 = vmatpush.bf16.msra.mxu2 %v8700_v53  ;;  %2643 = vmatpush.bf16.msra.mxu0 %v8156_v61  ;;  %v11458_v35 = vld [vmem:[#allocation2 + $0x14] sm:$0xf]  ;;  %v8860_v2 = vor.u32 %v11658_v28, %v8857_v29  ;;  %v2429_v49 = vpop.f32.mrf.mxu3  ;;  %v8255_v61 = vld [vmem:[#allocation2 + $0x198] sm:$0xf]  ;;  %v8992_v28 = vor.u32 %v11695_v20, %v8991_v17 }
 0x2da   :  { %v8057_v36 = vld [vmem:[#allocation2 + $0x30] sm:$0xf0]  ;;  %v11495_v26 = vld [vmem:[#allocation2 + $0x134] sm:$0xf0] }
 0x2db   :  { %2681 = vmatpush.bf16.msra.mxu3 %v8956_v57  ;;  %2656 = vmatpush.bf16.msra.mxu1 %v8412_v62  ;;  %v11522_v39 = vld [vmem:[#allocation2 + $0x214] sm:$0xf]  ;;  %v8060_v53 = vor.u32 %v11458_v35, %v8057_v36  ;;  %v11511_v62 = vld [vmem:[#allocation2 + $0x1b4] sm:$0xf0] }
 0x2dc   :  { %v8313_v40 = vld [vmem:[#allocation2 + $0x230] sm:$0xf0]  ;;  %v8256_v6 = vor.u32 %v11511_v62, %v8255_v61  ;;  %v8447_v27 = vld [vmem:[#allocation2 + $0x318] sm:$0xf] }
 0x2dd   :  { %2669 = vmatpush.bf16.msra.mxu2 %v8668_v32  ;;  %2644 = vmatpush.bf16.msra.mxu0 %v8124_v12  ;;  %v11586_v63 = vld [vmem:[#allocation2 + $0x414] sm:$0xf]  ;;  %v8316_v44 = vor.u32 %v11522_v39, %v8313_v40  ;;  %v8511_v32 = vld [vmem:[#allocation2 + $0x398] sm:$0xf] }
 0x2de   :  { %v8569_v42 = vld [vmem:[#allocation2 + $0x430] sm:$0xf0]  ;;  %v8512_v7 = vor.u32 %v11575_v0, %v8511_v32  ;;  %v11559_v29 = vld [vmem:[#allocation2 + $0x334] sm:$0xf0] }
 0x2df   :  { %2682 = vmatpush.bf16.msra.mxu3 %v8924_v4  ;;  %2657 = vmatpush.bf16.msra.mxu1 %v8380_v15  ;;  %v11650_v47 = vld [vmem:[#allocation2 + $0x614] sm:$0xf]  ;;  %v8572_v57 = vor.u32 %v11586_v63, %v8569_v42  ;;  %v9023_v4 = vld [vmem:[#allocation2 + $0x798] sm:$0xf]  ;;  %v8448_v40 = vor.u32 %v11559_v29, %v8447_v27 }
 0x2e0   :  { %v8825_v48 = vld [vmem:[#allocation2 + $0x630] sm:$0xf0]  ;;  %v9024_v12 = vor.u32 %v11703_v5, %v9023_v4  ;;  %v8735_v15 = vld [vmem:[#allocation2 + $0x558] sm:$0xf] }
 0x2e1   :  { %2670 = vmatpush.bf16.msra.mxu2 %v8636_v16  ;;  %2645 = vmatpush.bf16.msra.mxu0 %v8092_v30  ;;  %v8828_v31 = vor.u32 %v11650_v47, %v8825_v48  ;;  %v11631_v16 = vld [vmem:[#allocation2 + $0x574] sm:$0xf0] }
 0x2e2   :  { %v8703_v30 = vld [vmem:[#allocation2 + $0x518] sm:$0xf] }
 0x2e3   :  { %2683 = vmatpush.bf16.msra.mxu3 %v8892_v23  ;;  %2658 = vmatpush.bf16.msra.mxu1 %v8348_v37  ;;  %v8736_v23 = vor.u32 %v11631_v16, %v8735_v15  ;;  %v11623_v35 = vld [vmem:[#allocation2 + $0x534] sm:$0xf0] }
 0x2e4   :  { %v8959_v36 = vld [vmem:[#allocation2 + $0x718] sm:$0xf]  ;;  %v8704_v63 = vor.u32 %v11623_v35, %v8703_v30 }
 0x2e5   :  { %2671 = vmatpush.bf16.msra.mxu2 %v8604_v38  ;;  %2646 = vmatpush.bf16.msra.mxu0 %v8060_v53  ;;  %v11687_v37 = vld [vmem:[#allocation2 + $0x734] sm:$0xf0]  ;;  %v8192_v38 = vor.u32 %v11495_v26, %v8191_v25  ;;  %v12910_v39 = vpop.f32.mrf.mxu0 }
 0x2e6   :  { %v8159_v41 = vld [vmem:[#allocation2 + $0xd8] sm:$0xf]  ;;  %v8960_v48 = vor.u32 %v11687_v37, %v8959_v36  ;;  %v11515_v36 = vld [vmem:[#allocation2 + $0x1dc] sm:$0xf] }
 0x2e7   :  { %2684 = vmatpush.bf16.msra.mxu3 %v8860_v2  ;;  %2659 = vmatpush.bf16.msra.mxu1 %v8316_v44  ;;  %v11487_v2 = vld [vmem:[#allocation2 + $0xf4] sm:$0xf0]  ;;  %v12912_v47 = vpop.f32.mrf.mxu1  ;;  %v8289_v37 = vld [vmem:[#allocation2 + $0x1f8] sm:$0xf0] }
 0x2e8   :  { %2647 = vmatmul.bf16.vlgmr.msra.gmra.mxu0 %v12877_v55  ;;  %v8415_v42 = vld [vmem:[#allocation2 + $0x2d8] sm:$0xf]  ;;  %v8160_v24 = vor.u32 %v11487_v2, %v8159_v41  ;;  %v11643_v41 = vld [vmem:[#allocation2 + $0x5dc] sm:$0xf] }
 0x2e9   :  { %2672 = vmatpush.bf16.msra.mxu2 %v8572_v57  ;;  %2691 = vmatpush.bf16.msrb.mxu0 %v8288_v59  ;;  %v11551_v49 = vld [vmem:[#allocation2 + $0x2f4] sm:$0xf0]  ;;  %v8801_v2 = vld [vmem:[#allocation2 + $0x5f8] sm:$0xf0] }
 0x2ea   :  { %2660 = vmatmul.bf16.vlgmr.msra.gmra.mxu1 %v12882_v45  ;;  %v8671_v50 = vld [vmem:[#allocation2 + $0x4d8] sm:$0xf]  ;;  %v8416_v43 = vor.u32 %v11551_v49, %v8415_v42  ;;  %v11707_v49 = vld [vmem:[#allocation2 + $0x7dc] sm:$0xf] }
 0x2eb   :  { %2685 = vmatpush.bf16.msra.mxu3 %v8828_v31  ;;  %2704 = vmatpush.bf16.msrb.mxu1 %v8544_v33  ;;  %v11615_v51 = vld [vmem:[#allocation2 + $0x4f4] sm:$0xf0] }
 0x2ec   :  { %2673 = vmatmul.bf16.vlgmr.msra.gmra.mxu2 %v12867_v52  ;;  %v8927_v18 = vld [vmem:[#allocation2 + $0x6d8] sm:$0xf]  ;;  %v8672_v56 = vor.u32 %v11615_v51, %v8671_v50  ;;  %v9057_v50 = vld [vmem:[#allocation2 + $0x7f8] sm:$0xf0] }
 0x2ed   :  { %2717 = vmatpush.bf16.msrb.mxu2 %v8800_v60  ;;  %2692 = vmatpush.bf16.msrb.mxu0 %v8256_v6  ;;  %v11679_v53 = vld [vmem:[#allocation2 + $0x6f4] sm:$0xf0]  ;;  %v2442_v0 = vpop.f32.mrf.mxu0 }
 0x2ee   :  { %2686 = vmatmul.bf16.vlgmr.msra.gmra.mxu3 %v12872_v54  ;;  %v8127_v44 = vld [vmem:[#allocation2 + $0x98] sm:$0xf]  ;;  %v8928_v31 = vor.u32 %v11679_v53, %v8927_v18  ;;  %v8292_v18 = vor.u32 %v11515_v36, %v8289_v37  ;;  %v11499_v0 = vld [vmem:[#allocation2 + $0x15c] sm:$0xf] }
 0x2ef   :  { %2730 = vmatpush.bf16.msrb.mxu3 %v9056_v34  ;;  %2705 = vmatpush.bf16.msrb.mxu1 %v8512_v7  ;;  %v11479_v57 = vld [vmem:[#allocation2 + $0xb4] sm:$0xf0]  ;;  %v12914_v58 = vpop.f32.mrf.mxu2  ;;  %v2455_v7 = vpop.f32.mrf.mxu1  ;;  %v11547_v36 = vld [vmem:[#allocation2 + $0x2dc] sm:$0xf] }
 0x2f0   :  { %v8383_v46 = vld [vmem:[#allocation2 + $0x298] sm:$0xf]  ;;  %v8128_v34 = vor.u32 %v11479_v57, %v8127_v44  ;;  %v11571_v44 = vld [vmem:[#allocation2 + $0x39c] sm:$0xf]  ;;  %v9060_v57 = vor.u32 %v11707_v49, %v9057_v50 }
 0x2f1   :  { %2718 = vmatpush.bf16.msrb.mxu2 %v8768_v8  ;;  %2693 = vmatpush.bf16.msrb.mxu0 %v8224_v21  ;;  %v11543_v59 = vld [vmem:[#allocation2 + $0x2b4] sm:$0xf0]  ;;  %v12916_v61 = vpop.f32.mrf.mxu3  ;;  %v8737_v7 = vld [vmem:[#allocation2 + $0x578] sm:$0xf0] }
 0x2f2   :  { %v8639_v33 = vld [vmem:[#allocation2 + $0x498] sm:$0xf]  ;;  %v8384_v1 = vor.u32 %v11543_v59, %v8383_v46  ;;  %v8513_v46 = vld [vmem:[#allocation2 + $0x3b8] sm:$0xf0] }
 0x2f3   :  { %2731 = vmatpush.bf16.msrb.mxu3 %v9024_v12  ;;  %2706 = vmatpush.bf16.msrb.mxu1 %v8480_v22  ;;  %v11607_v60 = vld [vmem:[#allocation2 + $0x4b4] sm:$0xf0]  ;;  %v8769_v59 = vld [vmem:[#allocation2 + $0x5b8] sm:$0xf0] }
 0x2f4   :  { %v8895_v62 = vld [vmem:[#allocation2 + $0x698] sm:$0xf]  ;;  %v8640_v3 = vor.u32 %v11607_v60, %v8639_v33  ;;  %v11699_v33 = vld [vmem:[#allocation2 + $0x79c] sm:$0xf] }
 0x2f5   :  { %2719 = vmatpush.bf16.msrb.mxu2 %v8736_v23  ;;  %2694 = vmatpush.bf16.msrb.mxu0 %v8192_v38  ;;  %v11671_v32 = vld [vmem:[#allocation2 + $0x6b4] sm:$0xf0]  ;;  %v11579_v38 = vld [vmem:[#allocation2 + $0x3dc] sm:$0xf] }
 0x2f6   :  { %v8095_v4 = vld [vmem:[#allocation2 + $0x58] sm:$0xf]  ;;  %v8896_v8 = vor.u32 %v11671_v32, %v8895_v62  ;;  %v9025_v60 = vld [vmem:[#allocation2 + $0x7b8] sm:$0xf0]  ;;  %v8516_v32 = vor.u32 %v11571_v44, %v8513_v46 }
 0x2f7   :  { %2732 = vmatpush.bf16.msrb.mxu3 %v8992_v28  ;;  %2707 = vmatpush.bf16.msrb.mxu1 %v8448_v40  ;;  %v11471_v5 = vld [vmem:[#allocation2 + $0x74] sm:$0xf0]  ;;  %v2468_v26 = vpop.f32.mrf.mxu2  ;;  %v8929_v49 = vld [vmem:[#allocation2 + $0x6f8] sm:$0xf0] }
 0x2f8   :  { %v8351_v6 = vld [vmem:[#allocation2 + $0x258] sm:$0xf]  ;;  %v8096_v15 = vor.u32 %v11471_v5, %v8095_v4  ;;  %v9028_v4 = vor.u32 %v11699_v33, %v9025_v60  ;;  %v8481_v5 = vld [vmem:[#allocation2 + $0x378] sm:$0xf0] }
 0x2f9   :  { %2720 = vmatpush.bf16.msrb.mxu2 %v8704_v63  ;;  %2695 = vmatpush.bf16.msrb.mxu0 %v8160_v24  ;;  %v11535_v9 = vld [vmem:[#allocation2 + $0x274] sm:$0xf0]  ;;  %v2481_v35 = vpop.f32.mrf.mxu3  ;;  %v8545_v63 = vld [vmem:[#allocation2 + $0x3f8] sm:$0xf0]  ;;  %v8804_v24 = vor.u32 %v11643_v41, %v8801_v2 }
 0x2fa   :  { %v8607_v10 = vld [vmem:[#allocation2 + $0x458] sm:$0xf]  ;;  %v8352_v20 = vor.u32 %v11535_v9, %v8351_v6  ;;  %v8548_v53 = vor.u32 %v11579_v38, %v8545_v63  ;;  %v11627_v6 = vld [vmem:[#allocation2 + $0x55c] sm:$0xf]  ;;  %v2454_v38 = vadd.f32 %v12912_v47, %v12910_v39 }
 0x2fb   :  { %2733 = vmatpush.bf16.msrb.mxu3 %v8960_v48  ;;  %2708 = vmatpush.bf16.msrb.mxu1 %v8416_v43  ;;  %v11599_v11 = vld [vmem:[#allocation2 + $0x474] sm:$0xf0]  ;;  %v11507_v43 = vld [vmem:[#allocation2 + $0x19c] sm:$0xf] }
 0x2fc   :  { %v8863_v12 = vld [vmem:[#allocation2 + $0x658] sm:$0xf]  ;;  %v8608_v21 = vor.u32 %v11599_v11, %v8607_v10  ;;  %v8993_v9 = vld [vmem:[#allocation2 + $0x778] sm:$0xf0]  ;;  %v2467_v39 = vadd.f32 %v12914_v58, %v2454_v38 }
 0x2fd   :  { %2721 = vmatpush.bf16.msrb.mxu2 %v8672_v56  ;;  %v11663_v14 = vld [vmem:[#allocation2 + $0x674] sm:$0xf0]  ;;  %2696 = vmatpush.bf16.msrb.mxu0 %v8128_v34  ;;  %v8257_v56 = vld [vmem:[#allocation2 + $0x1b8] sm:$0xf0] }
 0x2fe   :  { %v8063_v16 = vld [vmem:[#allocation2 + $0x18] sm:$0xf]  ;;  %v8864_v27 = vor.u32 %v11663_v14, %v8863_v12  ;;  %v8260_v62 = vor.u32 %v11507_v43, %v8257_v56  ;;  %v8740_v12 = vor.u32 %v11627_v6, %v8737_v7  ;;  %v11491_v14 = vld [vmem:[#allocation2 + $0x11c] sm:$0xf]  ;;  %v12928_v6 = vadd.f32 %v12916_v61, %v2467_v39 }
 0x2ff   :  { %2734 = vmatpush.bf16.msrb.mxu3 %v8928_v31  ;;  %v11463_v17 = vld [vmem:[#allocation2 + $0x34] sm:$0xf0]  ;;  %2709 = vmatpush.bf16.msrb.mxu1 %v8384_v1  ;;  %v11635_v31 = vld [vmem:[#allocation2 + $0x59c] sm:$0xf] }
 0x300   :  { %v8319_v22 = vld [vmem:[#allocation2 + $0x218] sm:$0xf]  ;;  %v8064_v40 = vor.u32 %v11463_v17, %v8063_v16  ;;  %v8772_v34 = vor.u32 %v11635_v31, %v8769_v59  ;;  %v8225_v1 = vld [vmem:[#allocation2 + $0x178] sm:$0xf0] }
 0x301   :  { %2722 = vmatpush.bf16.msrb.mxu2 %v8640_v3  ;;  %v11527_v23 = vld [vmem:[#allocation2 + $0x234] sm:$0xf0]  ;;  %2697 = vmatpush.bf16.msrb.mxu0 %v8096_v15  ;;  %v11563_v3 = vld [vmem:[#allocation2 + $0x35c] sm:$0xf]  ;;  %v8228_v10 = vor.u32 %v11499_v0, %v8225_v1 }
 0x302   :  { %v8575_v25 = vld [vmem:[#allocation2 + $0x418] sm:$0xf]  ;;  %v8320_v42 = vor.u32 %v11527_v23, %v8319_v22  ;;  %v8484_v11 = vor.u32 %v11563_v3, %v8481_v5  ;;  %v8193_v15 = vld [vmem:[#allocation2 + $0x138] sm:$0xf0] }
 0x303   :  { %2735 = vmatpush.bf16.msrb.mxu3 %v8896_v8  ;;  %v11591_v28 = vld [vmem:[#allocation2 + $0x434] sm:$0xf0]  ;;  %2710 = vmatpush.bf16.msrb.mxu1 %v8352_v20  ;;  %v11691_v8 = vld [vmem:[#allocation2 + $0x75c] sm:$0xf]  ;;  %v8196_v26 = vor.u32 %v11491_v14, %v8193_v15 }
 0x304   :  { %v8831_v29 = vld [vmem:[#allocation2 + $0x618] sm:$0xf]  ;;  %v8576_v48 = vor.u32 %v11591_v28, %v8575_v25  ;;  %v11555_v16 = vld [vmem:[#allocation2 + $0x31c] sm:$0xf]  ;;  %v8996_v17 = vor.u32 %v11691_v8, %v8993_v9 }
 0x305   :  { %v11655_v30 = vld [vmem:[#allocation2 + $0x634] sm:$0xf0]  ;;  %2723 = vmatpush.bf16.msrb.mxu2 %v8608_v21  ;;  %2698 = vmatpush.bf16.msrb.mxu0 %v8064_v40  ;;  %v8449_v20 = vld [vmem:[#allocation2 + $0x338] sm:$0xf0] }
 0x306   :  { %v8832_v51 = vor.u32 %v11655_v30, %v8831_v29  ;;  %v11619_v21 = vld [vmem:[#allocation2 + $0x51c] sm:$0xf]  ;;  %v8452_v28 = vor.u32 %v11555_v16, %v8449_v20  ;;  %v2997_v16 = vmul.f32 %v12904_v13, %v12904_v13 }
 0x307   :  { %2736 = vmatpush.bf16.msrb.mxu3 %v8864_v27  ;;  %2711 = vmatpush.bf16.msrb.mxu1 %v8320_v42  ;;  %v8705_v22 = vld [vmem:[#allocation2 + $0x538] sm:$0xf0]  ;;  %v2492_v27 = vpop.f32.mrf.mxu0  ;;  %v2505_v37 = vpop.f32.mrf.mxu1 }
 0x308   :  { %2699 = vmatmul.bf16.vlgmr.msrb.gmra.mxu0 %v12877_v55  ;;  %v11683_v23 = vld [vmem:[#allocation2 + $0x71c] sm:$0xf]  ;;  %v8708_v29 = vor.u32 %v11619_v21, %v8705_v22  ;;  %v2506_v42 = vadd.f32 %v2505_v37, %v2492_v27 }
 0x309   :  { %2724 = vmatpush.bf16.msrb.mxu2 %v8576_v48  ;;  %2743 = vmatpush.bf16.msra.mxu0 %v8292_v18  ;;  %v8961_v25 = vld [vmem:[#allocation2 + $0x738] sm:$0xf0] }
 0x30a   :  { %2712 = vmatmul.bf16.vlgmr.msrb.gmra.mxu1 %v12882_v45  ;;  %v11483_v30 = vld [vmem:[#allocation2 + $0xdc] sm:$0xf]  ;;  %v8964_v40 = vor.u32 %v11683_v23, %v8961_v25  ;;  %v2998_v25 = vmul.f32 %v12928_v6, %v12928_v6 }
 0x30b   :  { %2737 = vmatpush.bf16.msrb.mxu3 %v8832_v51  ;;  %2756 = vmatpush.bf16.msra.mxu1 %v8548_v53  ;;  %v8161_v35 = vld [vmem:[#allocation2 + $0xf8] sm:$0xf0] }
 0x30c   :  { %2725 = vmatmul.bf16.vlgmr.msrb.gmra.mxu2 %v12867_v52  ;;  %v8417_v63 = vld [vmem:[#allocation2 + $0x2f8] sm:$0xf0]  ;;  %v8164_v50 = vor.u32 %v11483_v30, %v8161_v35 }
 0x30d   :  { %2769 = vmatpush.bf16.msra.mxu2 %v8804_v24  ;;  %2744 = vmatpush.bf16.msra.mxu0 %v8260_v62  ;;  %v11611_v41 = vld [vmem:[#allocation2 + $0x4dc] sm:$0xf]  ;;  %v8420_v51 = vor.u32 %v11547_v36, %v8417_v63  ;;  %v2933_v63 = vsel %vm361_vm1, %v12904_v13, 0.0 }
 0x30e   :  { %2738 = vmatmul.bf16.vlgmr.msrb.gmra.mxu3 %v12872_v54  ;;  %v8673_v2 = vld [vmem:[#allocation2 + $0x4f8] sm:$0xf0] }
 0x30f   :  { %2782 = vmatpush.bf16.msra.mxu3 %v9060_v57  ;;  %2757 = vmatpush.bf16.msra.mxu1 %v8516_v32  ;;  %v11675_v48 = vld [vmem:[#allocation2 + $0x6dc] sm:$0xf]  ;;  %v8676_v18 = vor.u32 %v11611_v41, %v8673_v2  ;;  %v2518_v56 = vpop.f32.mrf.mxu2  ;;  %v2507_v5 = vpop.f32.mrf.mxu1  ;;  %v3005_v41 = vsel %vm361_vm1, %v2997_v16, 0.0 }
 0x310   :  { %v11475_v53 = vld [vmem:[#allocation2 + $0x9c] sm:$0xf]  ;;  %v8932_v47 = vor.u32 %v11675_v48, %v8929_v49  ;;  %v2519_v31 = vadd.f32 %v2518_v56, %v2506_v42  ;;  %v2940_v48 = vsel %vm361_vm1, %v12928_v6, 0.0  ;;  %v3012_v49 = vsel %vm361_vm1, %v2998_v25, 0.0  ;;  %v11715_v25 = vld [vmem:[%s13402_s6 + $0x18] sm:$0xff] }
 0x311   :  { %2770 = vmatpush.bf16.msra.mxu2 %v8772_v34  ;;  %2745 = vmatpush.bf16.msra.mxu0 %v8228_v10  ;;  %v8129_v24 = vld [vmem:[#allocation2 + $0xb8] sm:$0xf0]  ;;  %v2531_v59 = vpop.f32.mrf.mxu3  ;;  %v2494_v34 = vpop.f32.mrf.mxu0  ;;  %v2934_v56 = vrot.slane %v2933_v63, 4  ;;  %v3006_v39 = vrot.slane %v3005_v41, 4 }
 0x312   :  { %v11539_v43 = vld [vmem:[#allocation2 + $0x29c] sm:$0xf]  ;;  %v8132_v62 = vor.u32 %v11475_v53, %v8129_v24  ;;  %v12925_v32 = vadd.f32 %v2531_v59, %v2519_v31  ;;  %v11735_v53 = vld [vmem:[%s13402_s6 + $0xb8] sm:$0xff] }
 0x313   :  { %2783 = vmatpush.bf16.msra.mxu3 %v9028_v4  ;;  %2758 = vmatpush.bf16.msra.mxu1 %v8484_v11  ;;  %v8385_v44 = vld [vmem:[#allocation2 + $0x2b8] sm:$0xf0]  ;;  %v3007_v34 = vadd.f32 %v3006_v39, %v3005_v41 }
 0x314   :  { %v11603_v57 = vld [vmem:[#allocation2 + $0x49c] sm:$0xf]  ;;  %v8388_v0 = vor.u32 %v11539_v43, %v8385_v44  ;;  %v2999_v15 = vmul.f32 %v12925_v32, %v12925_v32  ;;  %v2947_v38 = vsel %vm361_vm1, %v12925_v32, 0.0  ;;  %v3013_v44 = vrot.slane %v3012_v49, 4 }
 0x315   :  { %2771 = vmatpush.bf16.msra.mxu2 %v8740_v12  ;;  %2746 = vmatpush.bf16.msra.mxu0 %v8196_v26  ;;  %v8641_v46 = vld [vmem:[#allocation2 + $0x4b8] sm:$0xf0]  ;;  %v2948_v24 = vrot.slane %v2947_v38, 4  ;;  %v3008_v5 = vrot.slane %v3007_v34, 2 }
 0x316   :  { %v11667_v33 = vld [vmem:[#allocation2 + $0x69c] sm:$0xf]  ;;  %v8644_v1 = vor.u32 %v11603_v57, %v8641_v46  ;;  %v11718_v57 = vld [vmem:[%s13402_s6 + $0x30] sm:$0xff]  ;;  %v11743_v46 = vld [vmem:[%s13402_s6 + $0xf8] sm:$0xff] }
 0x317   :  { %2784 = vmatpush.bf16.msra.mxu3 %v8996_v17  ;;  %2759 = vmatpush.bf16.msra.mxu1 %v8452_v28  ;;  %v8897_v60 = vld [vmem:[#allocation2 + $0x6b8] sm:$0xf0]  ;;  %v2520_v23 = vpop.f32.mrf.mxu2  ;;  %v2949_v31 = vadd.f32 %v2948_v24, %v2947_v38 }
 0x318   :  { %v11467_v3 = vld [vmem:[#allocation2 + $0x5c] sm:$0xf]  ;;  %v8900_v7 = vor.u32 %v11667_v33, %v8897_v60  ;;  %v11726_v33 = vld [vmem:[%s13402_s6 + $0x70] sm:$0xff] }
 0x319   :  { %2772 = vmatpush.bf16.msra.mxu2 %v8708_v29  ;;  %2747 = vmatpush.bf16.msra.mxu0 %v8164_v50  ;;  %v8097_v58 = vld [vmem:[#allocation2 + $0x78] sm:$0xf0]  ;;  %v2533_v30 = vpop.f32.mrf.mxu3  ;;  %v11734_v60 = vld [vmem:[%s13402_s6 + $0xb0] sm:$0xff] }
 0x31a   :  { %v11531_v4 = vld [vmem:[#allocation2 + $0x25c] sm:$0xf]  ;;  %v8100_v14 = vor.u32 %v11467_v3, %v8097_v58  ;;  %v11717_v3 = vld [vmem:[%s13402_s6 + $0x28] sm:$0xff]  ;;  %v11742_v58 = vld [vmem:[%s13402_s6 + $0xf0] sm:$0xff] }
 0x31b   :  { %2785 = vmatpush.bf16.msra.mxu3 %v8964_v40  ;;  %2760 = vmatpush.bf16.msra.mxu1 %v8420_v51  ;;  %v8353_v8 = vld [vmem:[#allocation2 + $0x278] sm:$0xf0]  ;;  %v3019_v40 = vsel %vm361_vm1, %v2999_v15, 0.0  ;;  %v11719_v51 = vld [vmem:[%s13402_s6 + $0x38] sm:$0xff] }
 0x31c   :  { %v11595_v9 = vld [vmem:[#allocation2 + $0x45c] sm:$0xf]  ;;  %v8356_v17 = vor.u32 %v11531_v4, %v8353_v8  ;;  %v3020_v43 = vrot.slane %v3019_v40, 4  ;;  %v2950_v4 = vrot.slane %v2949_v31, 2  ;;  %v11731_v30 = vld [vmem:[%s13402_s6 + $0x98] sm:$0xff] }
 0x31d   :  { %2773 = vmatpush.bf16.msra.mxu2 %v8676_v18  ;;  %v8609_v10 = vld [vmem:[#allocation2 + $0x478] sm:$0xf0]  ;;  %2748 = vmatpush.bf16.msra.mxu0 %v8132_v62  ;;  %v11727_v18 = vld [vmem:[%s13402_s6 + $0x78] sm:$0xff]  ;;  %v2935_v62 = vadd.f32 %v2934_v56, %v2933_v63 }
 0x31e   :  { %v11659_v11 = vld [vmem:[#allocation2 + $0x65c] sm:$0xf]  ;;  %v8612_v61 = vor.u32 %v11595_v9, %v8609_v10  ;;  %v3021_v59 = vadd.f32 %v3020_v43, %v3019_v40 }
 0x31f   :  { %2786 = vmatpush.bf16.msra.mxu3 %v8932_v47  ;;  %v8865_v12 = vld [vmem:[#allocation2 + $0x678] sm:$0xf0]  ;;  %2761 = vmatpush.bf16.msra.mxu1 %v8388_v0  ;;  %v2941_v47 = vrot.slane %v2940_v48, 4 }
 0x320   :  { %v11459_v20 = vld [vmem:[#allocation2 + $0x1c] sm:$0xf]  ;;  %v8868_v26 = vor.u32 %v11659_v11, %v8865_v12  ;;  %v11741_v11 = vld [vmem:[%s13402_s6 + $0xe8] sm:$0xff]  ;;  %v2951_v12 = vadd.f32 %v2950_v4, %v2949_v31 }
 0x321   :  { %2774 = vmatpush.bf16.msra.mxu2 %v8644_v1  ;;  %v8065_v21 = vld [vmem:[#allocation2 + $0x38] sm:$0xf0]  ;;  %2749 = vmatpush.bf16.msra.mxu0 %v8100_v14  ;;  %v2942_v0 = vadd.f32 %v2941_v47, %v2940_v48  ;;  %v3014_v1 = vadd.f32 %v3013_v44, %v3012_v49  ;;  %v11739_v48 = vld [vmem:[%s13402_s6 + $0xd8] sm:$0xff] }
 0x322   :  { %v11523_v22 = vld [vmem:[#allocation2 + $0x21c] sm:$0xf]  ;;  %v8068_v37 = vor.u32 %v11459_v20, %v8065_v21  ;;  %v3009_v20 = vadd.f32 %v3008_v5, %v3007_v34  ;;  %v11721_v34 = vld [vmem:[%s13402_s6 + $0x48] sm:$0xff] }
 0x323   :  { %2787 = vmatpush.bf16.msra.mxu3 %v8900_v7  ;;  %v8321_v27 = vld [vmem:[#allocation2 + $0x238] sm:$0xf0]  ;;  %2762 = vmatpush.bf16.msra.mxu1 %v8356_v17  ;;  %v2943_v7 = vrot.slane %v2942_v0, 2  ;;  %v3015_v8 = vrot.slane %v3014_v1, 2 }
 0x324   :  { %v11587_v28 = vld [vmem:[#allocation2 + $0x41c] sm:$0xf]  ;;  %v8324_v2 = vor.u32 %v11523_v22, %v8321_v27  ;;  %v2952_v27 = vrot.slane %v2951_v12, 1 }
 0x325   :  { %v8577_v29 = vld [vmem:[#allocation2 + $0x438] sm:$0xf0]  ;;  %2775 = vmatpush.bf16.msra.mxu2 %v8612_v61  ;;  %2750 = vmatpush.bf16.msra.mxu0 %v8068_v37  ;;  %v2544_v10 = vpop.f32.mrf.mxu0  ;;  %v2944_v22 = vadd.f32 %v2943_v7, %v2942_v0  ;;  %v3016_v23 = vadd.f32 %v3015_v8, %v3014_v1  ;;  %v3010_v37 = vrot.slane %v3009_v20, 1  ;;  %v11729_v0 = vld [vmem:[%s13402_s6 + $0x88] sm:$0xff] }
 0x326   :  { %v11651_v35 = vld [vmem:[#allocation2 + $0x61c] sm:$0xf]  ;;  %v8580_v42 = vor.u32 %v11587_v28, %v8577_v29  ;;  %v11723_v29 = vld [vmem:[%s13402_s6 + $0x58] sm:$0xff] }
 0x327   :  { %v8833_v36 = vld [vmem:[#allocation2 + $0x638] sm:$0xf0]  ;;  %2788 = vmatpush.bf16.msra.mxu3 %v8868_v26  ;;  %2763 = vmatpush.bf16.msra.mxu1 %v8324_v2  ;;  %v2557_v17 = vpop.f32.mrf.mxu1  ;;  %v2945_v63 = vrot.slane %v2944_v22, 1  ;;  %v3017_v41 = vrot.slane %v3016_v23, 1  ;;  %v3011_v47 = vadd.f32 %v3010_v37, %v3009_v20 }
 0x328   :  { %v8836_v50 = vor.u32 %v11651_v35, %v8833_v36  ;;  %2751 = vmatmul.bf16.vlgmr.msra.gmra.mxu0 %v12877_v55  ;;  %v3022_v55 = vrot.slane %v3021_v59, 2  ;;  %v11716_v9 = vld [vmem:[%s13402_s6 + $0x20] sm:$0xff]  ;;  %v2558_v21 = vadd.f32 %v2557_v17, %v2544_v10  ;;  %v11751_v17 = vld [vmem:[%s13402_s6 + $0x138] sm:$0xff] }
 0x329   :  { %2776 = vmatpush.bf16.msra.mxu2 %v8580_v42  ;;  %3469 = vmatpush.bf16.msrb.mxu0 %v11719_v51  ;;  %v11724_v15 = vld [vmem:[%s13402_s6 + $0x60] sm:$0xff]  ;;  %v11714_v42 = vld [vmem:[%s13402_s6 + $0x10] sm:$0xff]  ;;  %v2946_v44 = vadd.f32 %v2945_v63, %v2944_v22 }
 0x32a   :  { %2764 = vmatmul.bf16.vlgmr.msra.gmra.mxu1 %v12882_v45  ;;  %v2936_v45 = vrot.slane %v2935_v62, 2  ;;  %v3023_v14 = vadd.f32 %v3022_v55, %v3021_v59  ;;  %v11732_v16 = vld [vmem:[%s13402_s6 + $0xa0] sm:$0xff]  ;;  %v11722_v51 = vld [vmem:[%s13402_s6 + $0x50] sm:$0xff]  ;;  %v11713_v59 = vld [vmem:[%s13402_s6 + $0x8] sm:$0xff]  ;;  %v3061_v55 = vmul.f32 %v3011_v47, %v12808_v19 }
 0x32b   :  { %2789 = vmatpush.bf16.msra.mxu3 %v8836_v50  ;;  %3482 = vmatpush.bf16.msrb.mxu1 %v11727_v18  ;;  %v11740_v26 = vld [vmem:[%s13402_s6 + $0xe0] sm:$0xff]  ;;  %v2953_v50 = vadd.f32 %v2952_v27, %v2951_v12  ;;  %v11730_v18 = vld [vmem:[%s13402_s6 + $0x90] sm:$0xff]  ;;  %v2990_v5 = vmul.f32 %v2946_v44, %v12808_v19 }
 0x32c   :  { %2777 = vmatmul.bf16.vlgmr.msra.gmra.mxu2 %v12867_v52  ;;  %v11725_v52 = vld [vmem:[%s13402_s6 + $0x68] sm:$0xff]  ;;  %v2937_v61 = vadd.f32 %v2936_v45, %v2935_v62  ;;  %v3024_v28 = vrot.slane %v3023_v14, 1  ;;  %v11712_v8 = vld [vmem:[%s13402_s6] sm:$0xff] }
 0x32d   :  { %3495 = vmatpush.bf16.msrb.mxu2 %v11735_v53  ;;  %3470 = vmatpush.bf16.msrb.mxu0 %v11718_v57  ;;  %v2546_v49 = vpop.f32.mrf.mxu0  ;;  %v2991_v1 = vmul.f32 %v2953_v50, %v12808_v19  ;;  %v11720_v12 = vld [vmem:[%s13402_s6 + $0x40] sm:$0xff] }
 0x32e   :  { %2790 = vmatmul.bf16.vlgmr.msra.gmra.mxu3 %v12872_v54  ;;  %v11733_v54 = vld [vmem:[%s13402_s6 + $0xa8] sm:$0xff]  ;;  %v2938_v36 = vrot.slane %v2937_v61, 1  ;;  %v3025_v53 = vadd.f32 %v3024_v28, %v3023_v14  ;;  %v11728_v14 = vld [vmem:[%s13402_s6 + $0x80] sm:$0xff] }
 0x32f   :  { %3508 = vmatpush.bf16.msrb.mxu3 %v11743_v46  ;;  %3483 = vmatpush.bf16.msrb.mxu1 %v11726_v33  ;;  %v2570_v35 = vpop.f32.mrf.mxu2  ;;  %v2559_v24 = vpop.f32.mrf.mxu1  ;;  %v3018_v46 = vadd.f32 %v3017_v41, %v3016_v23  ;;  %v11738_v33 = vld [vmem:[%s13402_s6 + $0xd0] sm:$0xff]  ;;  %v11759_v23 = vld [vmem:[%s13402_s6 + $0x178] sm:$0xff]  ;;  %v11736_v28 = vld [vmem:[%s13402_s6 + $0xc0] sm:$0xff] }
 0x330   :  { %v2571_v38 = vadd.f32 %v2570_v35, %v2558_v21  ;;  %v2939_v43 = vadd.f32 %v2938_v36, %v2937_v61 }
 0x331   :  { %3496 = vmatpush.bf16.msrb.mxu2 %v11734_v60  ;;  %3471 = vmatpush.bf16.msrb.mxu0 %v11717_v3  ;;  %v2583_v40 = vpop.f32.mrf.mxu3  ;;  %v3063_v3 = vmul.f32 %v3025_v53, %v12808_v19  ;;  %v3062_v7 = vmul.f32 %v3018_v46, %v12808_v19 }
 0x332   :  { %v13006_v2 = vadd.f32 %v2583_v40, %v2571_v38  ;;  %v2989_v4 = vmul.f32 %v2939_v43, %v12808_v19  ;;  %v11749_v38 = vld [vmem:[%s13402_s6 + $0x128] sm:$0xff] }
 0x333   :  { %3509 = vmatpush.bf16.msrb.mxu3 %v11742_v58  ;;  %3484 = vmatpush.bf16.msrb.mxu1 %v11725_v52  ;;  %v3070_v21 = vsel %vm437_vm3, %v2990_v5, %v3062_v7  ;;  %v11757_v43 = vld [vmem:[%s13402_s6 + $0x168] sm:$0xff] }
 0x334   :  { %v2954_v56 = vsel %vm361_vm1, %v13006_v2, 0.0  ;;  %v3000_v39 = vmul.f32 %v13006_v2, %v13006_v2 }
 0x335   :  { %3497 = vmatpush.bf16.msrb.mxu2 %v11733_v54  ;;  %3472 = vmatpush.bf16.msrb.mxu0 %v11716_v9  ;;  %v2955_v57 = vrot.slane %v2954_v56, 4  ;;  %v11737_v9 = vld [vmem:[%s13402_s6 + $0xc8] sm:$0xff] }
 0x336   :  { %v3026_v31 = vsel %vm361_vm1, %v3000_v39, 0.0  ;;  %v11746_v39 = vld [vmem:[%s13402_s6 + $0x110] sm:$0xff] }
 0x337   :  { %3510 = vmatpush.bf16.msrb.mxu3 %v11741_v11  ;;  %3485 = vmatpush.bf16.msrb.mxu1 %v11724_v15  ;;  %v2956_v60 = vadd.f32 %v2955_v57, %v2954_v56  ;;  %v3027_v62 = vrot.slane %v3026_v31, 4  ;;  %v2572_v58 = vpop.f32.mrf.mxu2  ;;  %v3071_v15 = vsel %vm437_vm3, %v2991_v1, %v3063_v3  ;;  %v11755_v3 = vld [vmem:[%s13402_s6 + $0x158] sm:$0xff] }
 0x338   :  { %v3079_v22 = vpack.c.bf16 %v3071_v15, %v3071_v15  ;;  %v11752_v15 = vld [vmem:[%s13402_s6 + $0x140] sm:$0xff] }
 0x339   :  { %3498 = vmatpush.bf16.msrb.mxu2 %v11732_v16  ;;  %3473 = vmatpush.bf16.msrb.mxu0 %v11715_v25  ;;  %v2585_v52 = vpop.f32.mrf.mxu3  ;;  %v2957_v54 = vrot.slane %v2956_v60, 2  ;;  %v3028_v45 = vadd.f32 %v3027_v62, %v3026_v31  ;;  %v3069_v16 = vsel %vm437_vm3, %v2989_v4, %v3061_v55  ;;  %v11756_v31 = vld [vmem:[%s13402_s6 + $0x160] sm:$0xff] }
 0x33a   :  { %v3077_v27 = vpack.c.bf16 %v3069_v16, %v3069_v16  ;;  %v11744_v55 = vld [vmem:[%s13402_s6 + $0x100] sm:$0xff] }
 0x33b   :  { %3511 = vmatpush.bf16.msrb.mxu3 %v11740_v26  ;;  %3486 = vmatpush.bf16.msrb.mxu1 %v11723_v29  ;;  %v2958_v10 = vadd.f32 %v2957_v54, %v2956_v60  ;;  %v3029_v11 = vrot.slane %v3028_v45, 2  ;;  %v3078_v29 = vpack.c.bf16 %v3070_v21, %v3070_v21  ;;  %v11745_v60 = vld [vmem:[%s13402_s6 + $0x108] sm:$0xff]  ;;  %v11766_v21 = vld [vmem:[%s13402_s6 + $0x1b0] sm:$0xff] }
 0x33d   :  { %3499 = vmatpush.bf16.msrb.mxu2 %v11731_v30  ;;  %3474 = vmatpush.bf16.msrb.mxu0 %v11714_v42  ;;  %v2959_v61 = vrot.slane %v2958_v10, 1  ;;  %v3030_v20 = vadd.f32 %v3029_v11, %v3028_v45  ;;  %v11750_v30 = vld [vmem:[%s13402_s6 + $0x130] sm:$0xff]  ;;  %v11748_v42 = vld [vmem:[%s13402_s6 + $0x120] sm:$0xff] }
 0x33e   :  { %v11754_v45 = vld [vmem:[%s13402_s6 + $0x150] sm:$0xff] }
 0x33f   :  { %3512 = vmatpush.bf16.msrb.mxu3 %v11739_v48  ;;  %3487 = vmatpush.bf16.msrb.mxu1 %v11722_v51  ;;  %v2960_v25 = vadd.f32 %v2959_v61, %v2958_v10  ;;  %v3031_v26 = vrot.slane %v3030_v20, 1  ;;  %v11758_v48 = vld [vmem:[%s13402_s6 + $0x170] sm:$0xff]  ;;  %v11747_v51 = vld [vmem:[%s13402_s6 + $0x118] sm:$0xff] }
 0x341   :  { %3500 = vmatpush.bf16.msrb.mxu2 %v11730_v18  ;;  %3475 = vmatpush.bf16.msrb.mxu0 %v11713_v59  ;;  %v2992_v35 = vmul.f32 %v2960_v25, %v12808_v19  ;;  %v3032_v36 = vadd.f32 %v3031_v26, %v3030_v20  ;;  %v11765_v26 = vld [vmem:[%s13402_s6 + $0x1a8] sm:$0xff] }
 0x343   :  { %3513 = vmatpush.bf16.msrb.mxu3 %v11738_v33  ;;  %3488 = vmatpush.bf16.msrb.mxu1 %v11721_v34  ;;  %v3064_v37 = vmul.f32 %v3032_v36, %v12808_v19  ;;  %v11764_v36 = vld [vmem:[%s13402_s6 + $0x1a0] sm:$0xff] }
 0x345   :  { %3501 = vmatpush.bf16.msrb.mxu2 %v11729_v0  ;;  %3476 = vmatpush.bf16.msrb.mxu0 %v11712_v8  ;;  %v3072_v40 = vsel %vm437_vm3, %v2992_v35, %v3064_v37  ;;  %v2596_v41 = vpop.f32.mrf.mxu0  ;;  %v11767_v8 = vld [vmem:[%s13402_s6 + $0x1b8] sm:$0xff] }
 0x346   :  { %v3080_v63 = vpack.c.bf16 %v3072_v40, %v3072_v40 }
 0x347   :  { %3514 = vmatpush.bf16.msrb.mxu3 %v11737_v9  ;;  %3489 = vmatpush.bf16.msrb.mxu1 %v11720_v12  ;;  %v2609_v49 = vpop.f32.mrf.mxu1  ;;  %v11753_v9 = vld [vmem:[%s13402_s6 + $0x148] sm:$0xff] }
 0x348   :  { %3477 = vmatmul.bf16.vlgmr.msrb.gmra.mxu0 %v3077_v27  ;;  %v2610_v50 = vadd.f32 %v2609_v49, %v2596_v41  ;;  %v11763_v49 = vld [vmem:[%s13402_s6 + $0x198] sm:$0xff] }
 0x349   :  { %3502 = vmatpush.bf16.msrb.mxu2 %v11728_v14  ;;  %3521 = vmatpush.bf16.msra.mxu0 %v11751_v17 }
 0x34a   :  { %3490 = vmatmul.bf16.vlgmr.msrb.gmra.mxu1 %v3078_v29 }
 0x34b   :  { %3534 = vmatpush.bf16.msra.mxu1 %v11759_v23  ;;  %3515 = vmatpush.bf16.msrb.mxu3 %v11736_v28 }
 0x34c   :  { %3503 = vmatmul.bf16.vlgmr.msrb.gmra.mxu2 %v3079_v22 }
 0x34d   :  { %3522 = vmatpush.bf16.msra.mxu0 %v11750_v30  ;;  %v2598_v47 = vpop.f32.mrf.mxu0  ;;  %3547 = vmatpush.bf16.msra.mxu2 %v11767_v8  ;;  %v11772_v8 = vld [vmem:[%s13402_s6 + $0x1e0] sm:$0xff] }
 0x34e   :  { %3516 = vmatmul.bf16.vlgmr.msrb.gmra.mxu3 %v3080_v63 }
 0x34f   :  { %3535 = vmatpush.bf16.msra.mxu1 %v11758_v48  ;;  %v2622_v18 = vpop.f32.mrf.mxu2  ;;  %v2611_v44 = vpop.f32.mrf.mxu1 }
 0x350   :  { %v2623_v53 = vadd.f32 %v2622_v18, %v2610_v50  ;;  %v11761_v44 = vld [vmem:[%s13402_s6 + $0x188] sm:$0xff] }
 0x351   :  { %3523 = vmatpush.bf16.msra.mxu0 %v11749_v38  ;;  %v2635_v24 = vpop.f32.mrf.mxu3  ;;  %3548 = vmatpush.bf16.msra.mxu2 %v11766_v21 }
 0x352   :  { %v13088_v56 = vadd.f32 %v2635_v24, %v2623_v53 }
 0x353   :  { %3536 = vmatpush.bf16.msra.mxu1 %v11757_v43  ;;  %v11762_v43 = vld [vmem:[%s13402_s6 + $0x190] sm:$0xff] }
 0x354   :  { %v2961_v57 = vsel %vm361_vm1, %v13088_v56, 0.0  ;;  %v3001_v46 = vmul.f32 %v13088_v56, %v13088_v56 }
 0x355   :  { %3524 = vmatpush.bf16.msra.mxu0 %v11748_v42  ;;  %v2962_v59 = vrot.slane %v2961_v57, 4  ;;  %3549 = vmatpush.bf16.msra.mxu2 %v11765_v26 }
 0x356   :  { %v3033_v33 = vsel %vm361_vm1, %v3001_v46, 0.0 }
 0x357   :  { %3537 = vmatpush.bf16.msra.mxu1 %v11756_v31  ;;  %v2963_v62 = vadd.f32 %v2962_v59, %v2961_v57  ;;  %v3034_v34 = vrot.slane %v3033_v33, 4  ;;  %v2624_v0 = vpop.f32.mrf.mxu2 }
 0x359   :  { %3525 = vmatpush.bf16.msra.mxu0 %v11747_v51  ;;  %v2637_v1 = vpop.f32.mrf.mxu3  ;;  %v2964_v58 = vrot.slane %v2963_v62, 2  ;;  %v3035_v4 = vadd.f32 %v3034_v34, %v3033_v33  ;;  %3550 = vmatpush.bf16.msra.mxu2 %v11764_v36  ;;  %v11760_v33 = vld [vmem:[%s13402_s6 + $0x180] sm:$0xff] }
 0x35a   :  { %v11774_v1 = vld [vmem:[%s13402_s6 + $0x1f0] sm:$0xff] }
 0x35b   :  { %3538 = vmatpush.bf16.msra.mxu1 %v11755_v3  ;;  %v2965_v52 = vadd.f32 %v2964_v58, %v2963_v62  ;;  %v3036_v54 = vrot.slane %v3035_v4, 2  ;;  %v11775_v62 = vld [vmem:[%s13402_s6 + $0x1f8] sm:$0xff] }
 0x35c   :  { %3560 = vmatpush.bf16.msra.mxu3 %v11775_v62 }
 0x35d   :  { %3526 = vmatpush.bf16.msra.mxu0 %v11746_v39  ;;  %v2966_v5 = vrot.slane %v2965_v52, 1  ;;  %v3037_v7 = vadd.f32 %v3036_v54, %v3035_v4  ;;  %3551 = vmatpush.bf16.msra.mxu2 %v11763_v49 }
 0x35f   :  { %3539 = vmatpush.bf16.msra.mxu1 %v11754_v45  ;;  %v2967_v10 = vadd.f32 %v2966_v5, %v2965_v52  ;;  %v3038_v11 = vrot.slane %v3037_v7, 1 }
 0x360   :  { %3561 = vmatpush.bf16.msra.mxu3 %v11774_v1 }
 0x361   :  { %3527 = vmatpush.bf16.msra.mxu0 %v11745_v60  ;;  %v2993_v12 = vmul.f32 %v2967_v10, %v12808_v19  ;;  %v3039_v14 = vadd.f32 %v3038_v11, %v3037_v7  ;;  %3552 = vmatpush.bf16.msra.mxu2 %v11762_v43 }
 0x363   :  { %3540 = vmatpush.bf16.msra.mxu1 %v11753_v9  ;;  %v3065_v16 = vmul.f32 %v3039_v14, %v12808_v19 }
 0x365   :  { %3528 = vmatpush.bf16.msra.mxu0 %v11744_v55  ;;  %v3073_v17 = vsel %vm437_vm3, %v2993_v12, %v3065_v16  ;;  %v2648_v20 = vpop.f32.mrf.mxu0  ;;  %3553 = vmatpush.bf16.msra.mxu2 %v11761_v44  ;;  %v11773_v55 = vld [vmem:[%s13402_s6 + $0x1e8] sm:$0xff] }
 0x366   :  { %v3081_v61 = vpack.c.bf16 %v3073_v17, %v3073_v17  ;;  %3562 = vmatpush.bf16.msra.mxu3 %v11773_v55 }
 0x367   :  { %3541 = vmatpush.bf16.msra.mxu1 %v11752_v15  ;;  %v2661_v22 = vpop.f32.mrf.mxu1  ;;  %v11771_v15 = vld [vmem:[%s13402_s6 + $0x1d8] sm:$0xff] }
 0x368   :  { %3529 = vmatmul.bf16.vlgmr.msra.gmra.mxu0 %v3081_v61  ;;  %v2662_v23 = vadd.f32 %v2661_v22, %v2648_v20 }
 0x369   :  { %3554 = vmatpush.bf16.msra.mxu2 %v11760_v33 }
 0x36a   :  { %3563 = vmatpush.bf16.msra.mxu3 %v11772_v8 }
 0x36d   :  { %v2650_v30 = vpop.f32.mrf.mxu0 }
 0x36e   :  { %3564 = vmatpush.bf16.msra.mxu3 %v11771_v15  ;;  %v11769_v30 = vld [vmem:[%s13402_s6 + $0x1c8] sm:$0xff] }
 0x36f   :  { %v2674_v25 = vpop.f32.mrf.mxu2  ;;  %v2663_v35 = vpop.f32.mrf.mxu1 }
 0x370   :  { %v2675_v27 = vadd.f32 %v2674_v25, %v2662_v23  ;;  %v11770_v23 = vld [vmem:[%s13402_s6 + $0x1d0] sm:$0xff] }
 0x371   :  { %v2687_v28 = vpop.f32.mrf.mxu3 }
 0x372   :  { %v13131_v29 = vadd.f32 %v2687_v28, %v2675_v27  ;;  %3565 = vmatpush.bf16.msra.mxu3 %v11770_v23 }
 0x374   :  { %v2968_v37 = vsel %vm361_vm1, %v13131_v29, 0.0  ;;  %v3002_v38 = vmul.f32 %v13131_v29, %v13131_v29 }
 0x375   :  { %v2969_v40 = vrot.slane %v2968_v37, 4 }
 0x376   :  { %v3040_v63 = vsel %vm361_vm1, %v3002_v38, 0.0  ;;  %3566 = vmatpush.bf16.msra.mxu3 %v11769_v30 }
 0x377   :  { %v2970_v41 = vadd.f32 %v2969_v40, %v2968_v37  ;;  %v3041_v42 = vrot.slane %v3040_v63, 4  ;;  %v2676_v48 = vpop.f32.mrf.mxu2  ;;  %v11768_v37 = vld [vmem:[%s13402_s6 + $0x1c0] sm:$0xff] }
 0x379   :  { %v2689_v50 = vpop.f32.mrf.mxu3  ;;  %v2971_v51 = vrot.slane %v2970_v41, 2  ;;  %v3042_v18 = vadd.f32 %v3041_v42, %v3040_v63 }
 0x37a   :  { %3567 = vmatpush.bf16.msra.mxu3 %v11768_v37 }
 0x37b   :  { %v2972_v53 = vadd.f32 %v2971_v51, %v2970_v41  ;;  %v3043_v24 = vrot.slane %v3042_v18, 2 }
 0x37d   :  { %v2973_v39 = vrot.slane %v2972_v53, 1  ;;  %v3044_v47 = vadd.f32 %v3043_v24, %v3042_v18 }
 0x37f   :  { %v2974_v57 = vadd.f32 %v2973_v39, %v2972_v53  ;;  %v3045_v46 = vrot.slane %v3044_v47, 1 }
 0x381   :  { %v2994_v31 = vmul.f32 %v2974_v57, %v12808_v19  ;;  %v3046_v59 = vadd.f32 %v3045_v46, %v3044_v47 }
 0x383   :  { %v3066_v60 = vmul.f32 %v3046_v59, %v12808_v19 }
 0x385   :  { %v3074_v34 = vsel %vm437_vm3, %v2994_v31, %v3066_v60  ;;  %v2700_v3 = vpop.f32.mrf.mxu0 }
 0x386   :  { %v3082_v0 = vpack.c.bf16 %v3074_v34, %v3074_v34 }
 0x387   :  { %v2713_v58 = vpop.f32.mrf.mxu1 }
 0x388   :  { %3542 = vmatmul.bf16.vlgmr.msra.gmra.mxu1 %v3082_v0  ;;  %v2714_v4 = vadd.f32 %v2713_v58, %v2700_v3 }
 0x38d   :  { %v2702_v7 = vpop.f32.mrf.mxu0 }
 0x38f   :  { %v2726_v52 = vpop.f32.mrf.mxu2  ;;  %v2715_v9 = vpop.f32.mrf.mxu1 }
 0x390   :  { %v2727_v54 = vadd.f32 %v2726_v52, %v2714_v4 }
 0x391   :  { %v2739_v45 = vpop.f32.mrf.mxu3 }
 0x392   :  { %v13165_v5 = vadd.f32 %v2739_v45, %v2727_v54 }
 0x394   :  { %v2975_v10 = vsel %vm361_vm1, %v13165_v5, 0.0  ;;  %v3003_v11 = vmul.f32 %v13165_v5, %v13165_v5 }
 0x395   :  { %v2976_v12 = vrot.slane %v2975_v10, 4 }
 0x396   :  { %v3047_v14 = vsel %vm361_vm1, %v3003_v11, 0.0 }
 0x397   :  { %v2977_v16 = vadd.f32 %v2976_v12, %v2975_v10  ;;  %v3048_v17 = vrot.slane %v3047_v14, 4  ;;  %v2728_v61 = vpop.f32.mrf.mxu2 }
 0x399   :  { %v2741_v20 = vpop.f32.mrf.mxu3  ;;  %v2978_v21 = vrot.slane %v2977_v16, 2  ;;  %v3049_v22 = vadd.f32 %v3048_v17, %v3047_v14 }
 0x39b   :  { %v2979_v25 = vadd.f32 %v2978_v21, %v2977_v16  ;;  %v3050_v26 = vrot.slane %v3049_v22, 2 }
 0x39d   :  { %v2980_v27 = vrot.slane %v2979_v25, 1  ;;  %v3051_v28 = vadd.f32 %v3050_v26, %v3049_v22 }
 0x39f   :  { %v2981_v35 = vadd.f32 %v2980_v27, %v2979_v25  ;;  %v3052_v36 = vrot.slane %v3051_v28, 1 }
 0x3a1   :  { %v2995_v38 = vmul.f32 %v2981_v35, %v12808_v19  ;;  %v3053_v40 = vadd.f32 %v3052_v36, %v3051_v28 }
 0x3a3   :  { %v3067_v63 = vmul.f32 %v3053_v40, %v12808_v19 }
 0x3a5   :  { %v3075_v41 = vsel %vm437_vm3, %v2995_v38, %v3067_v63  ;;  %v2752_v48 = vpop.f32.mrf.mxu0 }
 0x3a6   :  { %v3083_v42 = vpack.c.bf16 %v3075_v41, %v3075_v41 }
 0x3a7   :  { %v2765_v49 = vpop.f32.mrf.mxu1 }
 0x3a8   :  { %3555 = vmatmul.bf16.vlgmr.msra.gmra.mxu2 %v3083_v42  ;;  %v2766_v50 = vadd.f32 %v2765_v49, %v2752_v48  ;;  %v9327_v49 = vld [vmem:[#allocation13 + $0x8] sm:$0xf] }
 0x3ad   :  { %v2754_v24 = vpop.f32.mrf.mxu0 }
 0x3ae   :  { %v9319_v24 = vld [vmem:[#allocation13] sm:$0xf] }
 0x3af   :  { %v2778_v51 = vpop.f32.mrf.mxu2  ;;  %v2767_v43 = vpop.f32.mrf.mxu1 }
 0x3b0   :  { %v2779_v53 = vadd.f32 %v2778_v51, %v2766_v50  ;;  %v11781_v50 = vld [vmem:[#allocation13 + $0x24] sm:$0xf0]  ;;  %v11777_v51 = vld [vmem:[#allocation13 + $0xc] sm:$0xf]  ;;  %v11780_v43 = vld [vmem:[#allocation13 + $0x1c] sm:$0xf0] }
 0x3b1   :  { %v2791_v18 = vpop.f32.mrf.mxu3 }
 0x3b2   :  { %v13190_v39 = vadd.f32 %v2791_v18, %v2779_v53  ;;  %v9328_v18 = vor.u32 %v11781_v50, %v9327_v49  ;;  %v9329_v53 = vld [vmem:[#allocation13 + $0x28] sm:$0xf0] }
 0x3b4   :  { %v2982_v47 = vsel %vm361_vm1, %v13190_v39, 0.0  ;;  %v3004_v44 = vmul.f32 %v13190_v39, %v13190_v39  ;;  %3680 = vmatpush.bf16.msrb.mxu2 %v9328_v18 }
 0x3b5   :  { %v2983_v57 = vrot.slane %v2982_v47, 4 }
 0x3b6   :  { %v3054_v46 = vsel %vm361_vm1, %v3004_v44, 0.0  ;;  %v9320_v44 = vor.u32 %v11780_v43, %v9319_v24 }
 0x3b7   :  { %v2984_v31 = vadd.f32 %v2983_v57, %v2982_v47  ;;  %v3055_v59 = vrot.slane %v3054_v46, 4  ;;  %v2780_v33 = vpop.f32.mrf.mxu2  ;;  %v9332_v47 = vor.u32 %v11777_v51, %v9329_v53  ;;  %v11776_v57 = vld [vmem:[#allocation13 + $0x4] sm:$0xf] }
 0x3b8   :  { %3654 = vmatpush.bf16.msrb.mxu0 %v9320_v44  ;;  %v9343_v33 = vld [vmem:[#allocation13 + $0x18] sm:$0xf] }
 0x3b9   :  { %v2793_v60 = vpop.f32.mrf.mxu3  ;;  %v2985_v62 = vrot.slane %v2984_v31, 2  ;;  %v3056_v34 = vadd.f32 %v3055_v59, %v3054_v46  ;;  %v9321_v46 = vld [vmem:[#allocation13 + $0x20] sm:$0xf0]  ;;  %3693 = vmatpush.bf16.msrb.mxu3 %v9332_v47 }
 0x3ba   :  { %v11783_v60 = vld [vmem:[#allocation13 + $0x34] sm:$0xf0] }
 0x3bb   :  { %v2986_v0 = vadd.f32 %v2985_v62, %v2984_v31  ;;  %v3057_v1 = vrot.slane %v3056_v34, 2  ;;  %v9324_v31 = vor.u32 %v11776_v57, %v9321_v46  ;;  %v11779_v62 = vld [vmem:[#allocation13 + $0x1c] sm:$0xf] }
 0x3bd   :  { %v2987_v3 = vrot.slane %v2986_v0, 1  ;;  %v3058_v58 = vadd.f32 %v3057_v1, %v3056_v34  ;;  %3667 = vmatpush.bf16.msrb.mxu1 %v9324_v31  ;;  %v9345_v1 = vld [vmem:[#allocation13 + $0x38] sm:$0xf0] }
 0x3bf   :  { %v2988_v4 = vadd.f32 %v2987_v3, %v2986_v0  ;;  %v3059_v55 = vrot.slane %v3058_v58, 1  ;;  %v9344_v0 = vor.u32 %v11783_v60, %v9343_v33  ;;  %v9335_v3 = vld [vmem:[#allocation13 + $0x10] sm:$0xf] }
 0x3c1   :  { %v3060_v52 = vadd.f32 %v3059_v55, %v3058_v58  ;;  %v2996_v54 = vmul.f32 %v2988_v4, %v12808_v19  ;;  %v11782_v58 = vld [vmem:[#allocation13 + $0x2c] sm:$0xf0]  ;;  %v9348_v4 = vor.u32 %v11779_v62, %v9345_v1  ;;  %3732 = vmatpush.bf16.msra.mxu2 %v9344_v0 }
 0x3c2   :  { %v9336_v55 = vor.u32 %v11782_v58, %v9335_v3 }
 0x3c3   :  { %v3068_v45 = vmul.f32 %v3060_v52, %v12808_v19  ;;  %v11778_v52 = vld [vmem:[#allocation13 + $0x14] sm:$0xf] }
 0x3c4   :  { %3706 = vmatpush.bf16.msra.mxu0 %v9336_v55 }
 0x3c5   :  { %v3478_v7 = vpop.f32.mrf.mxu0  ;;  %v3076_v8 = vsel %vm437_vm3, %v2996_v54, %v3068_v45  ;;  %v9337_v54 = vld [vmem:[#allocation13 + $0x30] sm:$0xf0] }
 0x3c6   :  { %v3084_v10 = vpack.c.bf16 %v3076_v8, %v3076_v8 }
 0x3c7   :  { %v3491_v9 = vpop.f32.mrf.mxu1 }
 0x3c8   :  { %v3492_v11 = vadd.f32 %v3491_v9, %v3478_v7  ;;  %3568 = vmatmul.bf16.vlgmr.msra.gmra.mxu3 %v3084_v10  ;;  %v9340_v7 = vor.u32 %v11778_v52, %v9337_v54 }
 0x3c9   :  { %3745 = vmatpush.bf16.msra.mxu3 %v9348_v4 }
 0x3ca   :  { %3719 = vmatpush.bf16.msra.mxu1 %v9340_v7 }
 0x3cd   :  { %v3480_v15 = vpop.f32.mrf.mxu0 }
 0x3cf   :  { %v3504_v12 = vpop.f32.mrf.mxu2  ;;  %v3493_v16 = vpop.f32.mrf.mxu1 }
 0x3d0   :  { %v3505_v14 = vadd.f32 %v3504_v12, %v3492_v11  ;;  %v2931_v12 = vld [vmem:[#allocation14] sm:$0x1]  ;;  %v2932_v16 = vld [vmem:[#allocation16] sm:$0x1] }
 0x3d1   :  { %v3517_v17 = vpop.f32.mrf.mxu3 }
 0x3d2   :  { %v3518_v61 = vadd.f32 %v3517_v17, %v3505_v14 }
 0x3d7   :  { %v3506_v20 = vpop.f32.mrf.mxu2 }
 0x3d9   :  { %v3519_v21 = vpop.f32.mrf.mxu3 }
 0x3e5   :  { %v3530_v22 = vpop.f32.mrf.mxu0 }
 0x3e6   :  { %v3531_v23 = vadd.f32 %v3530_v22, %v3518_v61 }
 0x3ed   :  { %v3532_v25 = vpop.f32.mrf.mxu0 }
 0x405   :  { %v3543_v26 = vpop.f32.mrf.mxu1 }
 0x406   :  { %v3544_v30 = vadd.f32 %v3543_v26, %v3531_v23 }
 0x40d   :  { %v3545_v19 = vpop.f32.mrf.mxu1 }
 0x42b   :  { %v3556_v27 = vpop.f32.mrf.mxu2 }
 0x42c   :  { %v3557_v35 = vadd.f32 %v3556_v27, %v3544_v30 }
 0x433   :  { %v3558_v28 = vpop.f32.mrf.mxu2 }
 0x44b   :  { %v3569_v36 = vpop.f32.mrf.mxu3 }
 0x44c   :  { %v3570_v37 = vadd.f32 %v3569_v36, %v3557_v35 }
 0x44e   :  { %v3573_v38 = vmul.f32 %v3570_v37, %v3570_v37 }
 0x450   :  { %v3575_v40 = vrot.slane %v3573_v38, 7 }
 0x452   :  { %v3577_v63 = vsub.f32 %v3570_v37, %v3575_v40 }
 0x453   :  { %v3571_v41 = vpop.f32.mrf.mxu3 }
 0x454   :  { %v3578_v42 = vmax.f32 %v3577_v63, 0.0 }
 0x456   :  { %v3579_v48 = vadd.f32 1e-05, %v3578_v42 }
 0x458   :  { %12315 = vrsqrt.f32 %v3579_v48  ;;  %vm3586_vm8 = vweird.f32 %v3579_v48 }
 0x45e   :  { %v12316_v59 = vpop.eup %12315 }
 0x45f   :  { %v3581_v34 = vmul.f32 %v12316_v59, %v3579_v48  ;;  %vm3587_vm7 = vweird.f32 %v12316_v59 }
 0x460   :  { %vm3588_vm9 = vmor %vm3586_vm8, %vm3587_vm7 }
 0x461   :  { %v3582_v45 = vmul.f32 %v12316_v59, %v3581_v34 }
 0x463   :  { %v3583_v8 = vmul.f32 0.5, %v3582_v45 }
 0x465   :  { %v3584_v9 = vsub.f32 1.5, %v3583_v8 }
 0x467   :  { %v3585_v10 = vmul.f32 %v12316_v59, %v3584_v9 }
 0x469   :  { %v3589_v11 = vsel %vm3588_vm9, %v12316_v59, %v3585_v10 }
 0x46a   :  { %3591 = vst [vmem:[#allocation1] sm:$0xff] %v3589_v11 }
 0x471   :  { %v3593_v14 = vld [vmem:[#allocation1 + $0x1] ss:$9 sm:$0xff] }
 0x472   :  { %v3595_v15 = vmul.f32 %v3593_v14, %v2931_v12 }
 0x474   :  { %v3596_v17 = vmul.f32 %v3595_v15, %v3570_v37 }
 0x476   :  { %v3597_v61 = vsub.f32 %v2932_v16, %v3596_v17 }
 0x478   :  { %v3599_v20 = vperm.slane %v3597_v61, 0 }
 0x47a   :  { %v3601_v21 = vsel %vm437_vm3, %v3595_v15, %v3599_v20 }
 0x47b   :  { %v3602_v22 = vpack.c.bf16 %v3601_v21, %v3601_v21 }
 0x47d   :  { %9349 = vmatmul.msk.bf16.vlgmr.msrb.gmra.mxu0 %vm3643_vm10, %v3602_v22  ;;  %9350 = vmatmul.msk.bf16.vlgmr.msrb.gmra.mxu1 %vm3643_vm10, %v3602_v22 }
 0x47e   :  { %9351 = vmatmul.msk.bf16.vlgmr.msrb.gmra.mxu2 %vm3643_vm10, %v3602_v22  ;;  %9352 = vmatmul.msk.bf16.vlgmr.msrb.gmra.mxu3 %vm3643_vm10, %v3602_v22 }
 0x48d   :  { %9353 = vmatmul.msk.bf16.vlgmr.msra.gmra.mxu0 %vm3643_vm10, %v3602_v22  ;;  %9354 = vmatmul.msk.bf16.vlgmr.msra.gmra.mxu1 %vm3643_vm10, %v3602_v22 }
 0x48e   :  { %9355 = vmatmul.msk.bf16.vlgmr.msra.gmra.mxu2 %vm3643_vm10, %v3602_v22  ;;  %9356 = vmatmul.msk.bf16.vlgmr.msra.gmra.mxu3 %vm3643_vm10, %v3602_v22 }
 0x4fa   :  { %v3656_v23 = vpop.f32.mrf.mxu0  ;;  %v3669_v25 = vpop.f32.mrf.mxu1 }
 0x4fb   :  { %v3751_v26 = vperm.slane %v3656_v23, 0  ;;  %v3752_v19 = vperm.slane %v3669_v25, 0  ;;  %v3767_v28 = vperm.slane %v3656_v23, 1  ;;  %v3768_v35 = vperm.slane %v3669_v25, 1 }
 0x4fd   :  { %v3759_v27 = vmul.f32 %v3751_v26, %v12904_v13  ;;  %v3760_v30 = vmul.f32 %v3752_v19, %v12928_v6 }
 0x4ff   :  { %v13203_v36 = vadd.f32 %v3767_v28, %v3759_v27  ;;  %v13205_v37 = vadd.f32 %v3768_v35, %v3760_v30 }
 0x501   :  { %v3783_v38 = vmax.f32 %v13203_v36, 0.0  ;;  %v3784_v40 = vmax.f32 %v13205_v37, 0.0  ;;  %v3682_v63 = vpop.f32.mrf.mxu2  ;;  %v3695_v41 = vpop.f32.mrf.mxu3 }
 0x502   :  { %v3753_v42 = vperm.slane %v3682_v63, 0  ;;  %v3754_v48 = vperm.slane %v3695_v41, 0  ;;  %v3658_v49 = vpop.f32.mrf.mxu0  ;;  %v3671_v50 = vpop.f32.mrf.mxu1  ;;  %v3769_v51 = vperm.slane %v3682_v63, 1  ;;  %v3770_v18 = vperm.slane %v3695_v41, 1 }
 0x504   :  { %v3761_v13 = vmul.f32 %v3753_v42, %v12925_v32  ;;  %v3762_v6 = vmul.f32 %v3754_v48, %v13006_v2 }
 0x506   :  { %v13211_v53 = vadd.f32 %v3769_v51, %v3761_v13  ;;  %v13213_v24 = vadd.f32 %v3770_v18, %v3762_v6 }
 0x508   :  { %v3785_v43 = vmax.f32 %v13211_v53, 0.0  ;;  %v3786_v47 = vmax.f32 %v13213_v24, 0.0 }
 0x509   :  { %v3684_v44 = vpop.f32.mrf.mxu2  ;;  %v3697_v57 = vpop.f32.mrf.mxu3 }
 0x50a   :  { %v3708_v46 = vpop.f32.mrf.mxu0  ;;  %v3721_v31 = vpop.f32.mrf.mxu1 }
 0x50b   :  { %v3755_v59 = vperm.slane %v3708_v46, 0  ;;  %v3756_v33 = vperm.slane %v3721_v31, 0  ;;  %v3771_v60 = vperm.slane %v3708_v46, 1  ;;  %v3772_v62 = vperm.slane %v3721_v31, 1 }
 0x50d   :  { %v3763_v32 = vmul.f32 %v3755_v59, %v13088_v56  ;;  %v3764_v2 = vmul.f32 %v3756_v33, %v13131_v29 }
 0x50f   :  { %v13219_v34 = vadd.f32 %v3771_v60, %v3763_v32  ;;  %v13221_v0 = vadd.f32 %v3772_v62, %v3764_v2 }
 0x511   :  { %v3787_v1 = vmax.f32 %v13219_v34, 0.0  ;;  %v3788_v3 = vmax.f32 %v13221_v0, 0.0  ;;  %v3734_v58 = vpop.f32.mrf.mxu2  ;;  %v3747_v4 = vpop.f32.mrf.mxu3 }
 0x512   :  { %v3757_v55 = vperm.slane %v3734_v58, 0  ;;  %v3758_v52 = vperm.slane %v3747_v4, 0  ;;  %v3710_v54 = vpop.f32.mrf.mxu0  ;;  %v3723_v45 = vpop.f32.mrf.mxu1  ;;  %v3773_v7 = vperm.slane %v3734_v58, 1  ;;  %v3774_v8 = vperm.slane %v3747_v4, 1 }
 0x514   :  { %v3765_v56 = vmul.f32 %v3757_v55, %v13165_v5  ;;  %v3766_v29 = vmul.f32 %v3758_v52, %v13190_v39 }
 0x516   :  { %v13227_v9 = vadd.f32 %v3773_v7, %v3765_v56  ;;  %v13229_v10 = vadd.f32 %v3774_v8, %v3766_v29 }
 0x518   :  { %v3789_v11 = vmax.f32 %v13227_v9, 0.0  ;;  %v3790_v12 = vmax.f32 %v13229_v10, 0.0 }
 0x519   :  { %v3736_v14 = vpop.f32.mrf.mxu2  ;;  %v3749_v15 = vpop.f32.mrf.mxu3 }
 0x51a   :  { %12579 = dma.done.wait [#allocation5 + $0x1], 49152 }
 0x51b   :  { %12580 = vsyncadd [#allocation5 + $0x1], 4294918144  ;;  %v9527_v16 = vld [vmem:[#allocation3 + $0x150] sm:$0xf]  ;;  %v11829_v17 = vld [vmem:[#allocation3 + $0x164] sm:$0xf0] }
 0x51c   :  { %v9719_v61 = vld [vmem:[#allocation3 + $0x2d0] sm:$0xf]  ;;  %v9528_v5 = vor.u32 %v11829_v17, %v9527_v16  ;;  %v11877_v20 = vld [vmem:[#allocation3 + $0x2e4] sm:$0xf0]  ;;  %v9503_v19 = vld [vmem:[#allocation3 + $0x120] sm:$0xf] }
 0x51d   :  { %v9911_v21 = vld [vmem:[#allocation3 + $0x450] sm:$0xf]  ;;  %v11925_v39 = vld [vmem:[#allocation3 + $0x464] sm:$0xf0]  ;;  %v9720_v22 = vor.u32 %v11877_v20, %v9719_v61  ;;  %v11823_v28 = vld [vmem:[#allocation3 + $0x134] sm:$0xf0] }
 0x51e   :  { %v9912_v23 = vor.u32 %v11925_v39, %v9911_v21  ;;  %v10103_v25 = vld [vmem:[#allocation3 + $0x5d0] sm:$0xf]  ;;  %v11973_v26 = vld [vmem:[#allocation3 + $0x5e4] sm:$0xf0]  ;;  %6107 = vmatpush.bf16.msrb.mxu0 %v9528_v5  ;;  %v9695_v30 = vld [vmem:[#allocation3 + $0x2a0] sm:$0xf]  ;;  %v9504_v63 = vor.u32 %v11823_v28, %v9503_v19 }
 0x51f   :  { %v10104_v27 = vor.u32 %v11973_v26, %v10103_v25  ;;  %v11871_v35 = vld [vmem:[#allocation3 + $0x2b4] sm:$0xf0]  ;;  %6120 = vmatpush.bf16.msrb.mxu1 %v9720_v22  ;;  %v9887_v42 = vld [vmem:[#allocation3 + $0x420] sm:$0xf]  ;;  %v9479_v51 = vld [vmem:[#allocation3 + $0xf0] sm:$0xf] }
 0x520   :  { %6133 = vmatpush.bf16.msrb.mxu2 %v9912_v23  ;;  %v9696_v41 = vor.u32 %v11871_v35, %v9695_v30  ;;  %v11919_v48 = vld [vmem:[#allocation3 + $0x434] sm:$0xf0]  ;;  %v10079_v49 = vld [vmem:[#allocation3 + $0x5a0] sm:$0xf]  ;;  %v11817_v6 = vld [vmem:[#allocation3 + $0x104] sm:$0xf0] }
 0x521   :  { %6146 = vmatpush.bf16.msrb.mxu3 %v10104_v27  ;;  %v9888_v50 = vor.u32 %v11919_v48, %v9887_v42  ;;  %v11967_v13 = vld [vmem:[#allocation3 + $0x5b4] sm:$0xf0]  ;;  %v9671_v44 = vld [vmem:[#allocation3 + $0x270] sm:$0xf]  ;;  %v11865_v57 = vld [vmem:[#allocation3 + $0x284] sm:$0xf0]  ;;  %v9480_v31 = vor.u32 %v11817_v6, %v9479_v51 }
 0x522   :  { %v10080_v18 = vor.u32 %v11967_v13, %v10079_v49  ;;  %v9863_v46 = vld [vmem:[#allocation3 + $0x3f0] sm:$0xf]  ;;  %6108 = vmatpush.bf16.msrb.mxu0 %v9504_v63  ;;  %v11913_v59 = vld [vmem:[#allocation3 + $0x404] sm:$0xf0]  ;;  %v9672_v60 = vor.u32 %v11865_v57, %v9671_v44  ;;  %v9455_v62 = vld [vmem:[#allocation3 + $0xc0] sm:$0xf] }
 0x523   :  { %v10055_v33 = vld [vmem:[#allocation3 + $0x570] sm:$0xf]  ;;  %v11961_v32 = vld [vmem:[#allocation3 + $0x584] sm:$0xf0]  ;;  %6121 = vmatpush.bf16.msrb.mxu1 %v9696_v41  ;;  %v9864_v2 = vor.u32 %v11913_v59, %v9863_v46  ;;  %v11811_v58 = vld [vmem:[#allocation3 + $0xd4] sm:$0xf0] }
 0x524   :  { %6134 = vmatpush.bf16.msrb.mxu2 %v9888_v50  ;;  %v9647_v4 = vld [vmem:[#allocation3 + $0x240] sm:$0xf]  ;;  %v10056_v55 = vor.u32 %v11961_v32, %v10055_v33  ;;  %v11859_v52 = vld [vmem:[#allocation3 + $0x254] sm:$0xf0]  ;;  %v9456_v29 = vor.u32 %v11811_v58, %v9455_v62  ;;  %v9431_v15 = vld [vmem:[#allocation3 + $0x90] sm:$0xf] }
 0x525   :  { %6147 = vmatpush.bf16.msrb.mxu3 %v10080_v18  ;;  %v9839_v54 = vld [vmem:[#allocation3 + $0x3c0] sm:$0xf]  ;;  %v11907_v45 = vld [vmem:[#allocation3 + $0x3d4] sm:$0xf0]  ;;  %v9648_v8 = vor.u32 %v11859_v52, %v9647_v4  ;;  %v11805_v16 = vld [vmem:[#allocation3 + $0xa4] sm:$0xf0] }
 0x526   :  { %v10031_v56 = vld [vmem:[#allocation3 + $0x540] sm:$0xf]  ;;  %v11955_v7 = vld [vmem:[#allocation3 + $0x554] sm:$0xf0]  ;;  %6109 = vmatpush.bf16.msrb.mxu0 %v9480_v31  ;;  %v9840_v14 = vor.u32 %v11907_v45, %v9839_v54  ;;  %v9623_v17 = vld [vmem:[#allocation3 + $0x210] sm:$0xf]  ;;  %v9432_v23 = vor.u32 %v11805_v16, %v9431_v15 }
 0x527   :  { %6122 = vmatpush.bf16.msrb.mxu1 %v9672_v60  ;;  %v10032_v61 = vor.u32 %v11955_v7, %v10031_v56  ;;  %v11853_v5 = vld [vmem:[#allocation3 + $0x224] sm:$0xf0]  ;;  %v9815_v20 = vld [vmem:[#allocation3 + $0x390] sm:$0xf]  ;;  %v9407_v19 = vld [vmem:[#allocation3 + $0x60] sm:$0xf] }
 0x528   :  { %6135 = vmatpush.bf16.msrb.mxu2 %v9864_v2  ;;  %v11901_v21 = vld [vmem:[#allocation3 + $0x3a4] sm:$0xf0]  ;;  %v10007_v39 = vld [vmem:[#allocation3 + $0x510] sm:$0xf]  ;;  %v9624_v25 = vor.u32 %v11853_v5, %v9623_v17  ;;  %v11799_v27 = vld [vmem:[#allocation3 + $0x74] sm:$0xf0] }
 0x529   :  { %6148 = vmatpush.bf16.msrb.mxu3 %v10056_v55  ;;  %v11949_v22 = vld [vmem:[#allocation3 + $0x524] sm:$0xf0]  ;;  %v9816_v26 = vor.u32 %v11901_v21, %v9815_v20  ;;  %v9599_v28 = vld [vmem:[#allocation3 + $0x1e0] sm:$0xf]  ;;  %v11847_v35 = vld [vmem:[#allocation3 + $0x1f4] sm:$0xf0]  ;;  %v9408_v49 = vor.u32 %v11799_v27, %v9407_v19 }
 0x52a   :  { %6110 = vmatpush.bf16.msrb.mxu0 %v9456_v29  ;;  %v10008_v30 = vor.u32 %v11949_v22, %v10007_v39  ;;  %v9791_v63 = vld [vmem:[#allocation3 + $0x360] sm:$0xf]  ;;  %v11895_v41 = vld [vmem:[#allocation3 + $0x374] sm:$0xf0]  ;;  %v9600_v50 = vor.u32 %v11847_v35, %v9599_v28  ;;  %v9383_v51 = vld [vmem:[#allocation3 + $0x30] sm:$0xf] }
 0x52b   :  { %6123 = vmatpush.bf16.msrb.mxu1 %v9648_v8  ;;  %v9983_v42 = vld [vmem:[#allocation3 + $0x4e0] sm:$0xf]  ;;  %v11943_v48 = vld [vmem:[#allocation3 + $0x4f4] sm:$0xf0]  ;;  %v9792_v13 = vor.u32 %v11895_v41, %v9791_v63  ;;  %v11793_v6 = vld [vmem:[#allocation3 + $0x44] sm:$0xf0] }
 0x52c   :  { %6136 = vmatpush.bf16.msrb.mxu2 %v9840_v14  ;;  %v9575_v18 = vld [vmem:[#allocation3 + $0x1b0] sm:$0xf]  ;;  %v9984_v44 = vor.u32 %v11943_v48, %v9983_v42  ;;  %v11841_v57 = vld [vmem:[#allocation3 + $0x1c4] sm:$0xf0]  ;;  %v9384_v32 = vor.u32 %v11793_v6, %v9383_v51  ;;  %v9359_v60 = vld [vmem:[#allocation3] sm:$0xf]  ;;  %v13236_v42 = vpack.c.bf16 %v3785_v43, %v3785_v43  ;;  %v13251_v43 = vpack.c.bf16 %v3784_v40, %v3784_v40 }
 0x52d   :  { %6149 = vmatpush.bf16.msrb.mxu3 %v10032_v61  ;;  %v9767_v46 = vld [vmem:[#allocation3 + $0x330] sm:$0xf]  ;;  %v11889_v31 = vld [vmem:[#allocation3 + $0x344] sm:$0xf0]  ;;  %v11787_v2 = vld [vmem:[#allocation3 + $0x14] sm:$0xf0]  ;;  %v9576_v62 = vor.u32 %v11841_v57, %v9575_v18 }
 0x52e   :  { %6111 = vmatpush.bf16.msrb.mxu0 %v9432_v23  ;;  %v9959_v59 = vld [vmem:[#allocation3 + $0x4b0] sm:$0xf]  ;;  %v11937_v33 = vld [vmem:[#allocation3 + $0x4c4] sm:$0xf0]  ;;  %v9768_v58 = vor.u32 %v11889_v31, %v9767_v46  ;;  %v9551_v4 = vld [vmem:[#allocation3 + $0x180] sm:$0xf]  ;;  %v9360_v15 = vor.u32 %v11787_v2, %v9359_v60 }
 0x52f   :  { %6124 = vmatpush.bf16.msrb.mxu1 %v9624_v25  ;;  %v11835_v55 = vld [vmem:[#allocation3 + $0x194] sm:$0xf0]  ;;  %v9743_v52 = vld [vmem:[#allocation3 + $0x300] sm:$0xf]  ;;  %v9960_v54 = vor.u32 %v11937_v33, %v9959_v59  ;;  %v10295_v29 = vld [vmem:[#allocation3 + $0x750] sm:$0xf] }
 0x530   :  { %6137 = vmatpush.bf16.msrb.mxu2 %v9816_v26  ;;  %v11883_v45 = vld [vmem:[#allocation3 + $0x314] sm:$0xf0]  ;;  %v9935_v56 = vld [vmem:[#allocation3 + $0x480] sm:$0xf]  ;;  %v12021_v8 = vld [vmem:[#allocation3 + $0x764] sm:$0xf0]  ;;  %v9552_v5 = vor.u32 %v11835_v55, %v9551_v4 }
 0x531   :  { %6150 = vmatpush.bf16.msrb.mxu3 %v10008_v30  ;;  %v11931_v7 = vld [vmem:[#allocation3 + $0x494] sm:$0xf0]  ;;  %v10487_v14 = vld [vmem:[#allocation3 + $0x8d0] sm:$0xf]  ;;  %v12069_v16 = vld [vmem:[#allocation3 + $0x8e4] sm:$0xf0]  ;;  %v9744_v20 = vor.u32 %v11883_v45, %v9743_v52  ;;  %v10296_v23 = vor.u32 %v12021_v8, %v10295_v29 }
 0x532   :  { %6112 = vmatpush.bf16.msrb.mxu0 %v9408_v49  ;;  %v10679_v17 = vld [vmem:[#allocation3 + $0xa50] sm:$0xf]  ;;  %v12117_v61 = vld [vmem:[#allocation3 + $0xa64] sm:$0xf0]  ;;  %v9936_v22 = vor.u32 %v11931_v7, %v9935_v56  ;;  %v10488_v25 = vor.u32 %v12069_v16, %v10487_v14  ;;  %v10271_v19 = vld [vmem:[#allocation3 + $0x720] sm:$0xf] }
 0x533   :  { %6125 = vmatpush.bf16.msrb.mxu1 %v9600_v50  ;;  %v10871_v21 = vld [vmem:[#allocation3 + $0xbd0] sm:$0xf]  ;;  %v12165_v39 = vld [vmem:[#allocation3 + $0xbe4] sm:$0xf0]  ;;  %v10680_v26 = vor.u32 %v12117_v61, %v10679_v17  ;;  %v12015_v27 = vld [vmem:[#allocation3 + $0x734] sm:$0xf0]  ;;  %v13241_v50 = vpack.c.bf16 %v3783_v38, %v3783_v38 }
 0x534   :  { %6138 = vmatpush.bf16.msrb.mxu2 %v9792_v13  ;;  %v10463_v28 = vld [vmem:[#allocation3 + $0x8a0] sm:$0xf]  ;;  %v10872_v30 = vor.u32 %v12165_v39, %v10871_v21  ;;  %v12063_v35 = vld [vmem:[#allocation3 + $0x8b4] sm:$0xf0]  ;;  %v13246_v13 = vpack.c.bf16 %v3786_v47, %v3786_v47  ;;  %v10272_v53 = vor.u32 %v12015_v27, %v10271_v19  ;;  %v10247_v6 = vld [vmem:[#allocation3 + $0x6f0] sm:$0xf] }
 0x535   :  { %6151 = vmatpush.bf16.msrb.mxu3 %v9984_v44  ;;  %v10655_v63 = vld [vmem:[#allocation3 + $0xa20] sm:$0xf]  ;;  %v12111_v41 = vld [vmem:[#allocation3 + $0xa34] sm:$0xf0]  ;;  %v10464_v51 = vor.u32 %v12063_v35, %v10463_v28  ;;  %v12009_v38 = vld [vmem:[#allocation3 + $0x704] sm:$0xf0] }
 0x536   :  { %6113 = vmatpush.bf16.msrb.mxu0 %v9384_v32  ;;  %v10847_v48 = vld [vmem:[#allocation3 + $0xba0] sm:$0xf]  ;;  %v12159_v49 = vld [vmem:[#allocation3 + $0xbb4] sm:$0xf0]  ;;  %v10656_v36 = vor.u32 %v12111_v41, %v10655_v63  ;;  %v10439_v18 = vld [vmem:[#allocation3 + $0x870] sm:$0xf]  ;;  %v10248_v37 = vor.u32 %v12009_v38, %v10247_v6 }
 0x537   :  { %6126 = vmatpush.bf16.msrb.mxu1 %v9576_v62  ;;  %v10848_v24 = vor.u32 %v12159_v49, %v10847_v48  ;;  %v12057_v44 = vld [vmem:[#allocation3 + $0x884] sm:$0xf0]  ;;  %v10631_v47 = vld [vmem:[#allocation3 + $0x9f0] sm:$0xf]  ;;  %v10223_v33 = vld [vmem:[#allocation3 + $0x6c0] sm:$0xf] }
 0x538   :  { %6139 = vmatpush.bf16.msrb.mxu2 %v9768_v58  ;;  %v12105_v57 = vld [vmem:[#allocation3 + $0xa04] sm:$0xf0]  ;;  %v10823_v46 = vld [vmem:[#allocation3 + $0xb70] sm:$0xf]  ;;  %v10440_v40 = vor.u32 %v12057_v44, %v10439_v18  ;;  %v12003_v32 = vld [vmem:[#allocation3 + $0x6d4] sm:$0xf0] }
 0x539   :  { %6152 = vmatpush.bf16.msrb.mxu3 %v9960_v54  ;;  %v12153_v31 = vld [vmem:[#allocation3 + $0xb84] sm:$0xf0]  ;;  %v10632_v59 = vor.u32 %v12105_v57, %v10631_v47  ;;  %v10415_v60 = vld [vmem:[#allocation3 + $0x840] sm:$0xf]  ;;  %v12051_v62 = vld [vmem:[#allocation3 + $0x854] sm:$0xf0]  ;;  %v10224_v54 = vor.u32 %v12003_v32, %v10223_v33 }
 0x53a   :  { %6114 = vmatpush.bf16.msrb.mxu0 %v9360_v15  ;;  %v10824_v2 = vor.u32 %v12153_v31, %v10823_v46  ;;  %v10607_v58 = vld [vmem:[#allocation3 + $0x9c0] sm:$0xf]  ;;  %v12099_v4 = vld [vmem:[#allocation3 + $0x9d4] sm:$0xf0]  ;;  %v10416_v45 = vor.u32 %v12051_v62, %v10415_v60  ;;  %v10199_v7 = vld [vmem:[#allocation3 + $0x690] sm:$0xf] }
 0x53b   :  { %6127 = vmatpush.bf16.msrb.mxu1 %v9552_v5  ;;  %v10799_v55 = vld [vmem:[#allocation3 + $0xb40] sm:$0xf]  ;;  %v12147_v52 = vld [vmem:[#allocation3 + $0xb54] sm:$0xf0]  ;;  %v10608_v56 = vor.u32 %v12099_v4, %v10607_v58  ;;  %v11997_v29 = vld [vmem:[#allocation3 + $0x6a4] sm:$0xf0] }
 0x53c   :  { %6140 = vmatpush.bf16.msrb.mxu2 %v9744_v20  ;;  %v10391_v8 = vld [vmem:[#allocation3 + $0x810] sm:$0xf]  ;;  %v10800_v14 = vor.u32 %v12147_v52, %v10799_v55  ;;  %v12045_v15 = vld [vmem:[#allocation3 + $0x824] sm:$0xf0]  ;;  %v10200_v20 = vor.u32 %v11997_v29, %v10199_v7  ;;  %v12039_v19 = vld [vmem:[#allocation3 + $0x7f4] sm:$0xf0] }
 0x53d   :  { %6153 = vmatpush.bf16.msrb.mxu3 %v9936_v22  ;;  %6115 = vmatmul.bf16.vlgmr.msrb.gmra.mxu0 %v13241_v50  ;;  %v10583_v16 = vld [vmem:[#allocation3 + $0x990] sm:$0xf]  ;;  %v12093_v17 = vld [vmem:[#allocation3 + $0x9a4] sm:$0xf0]  ;;  %v10392_v21 = vor.u32 %v12045_v15, %v10391_v8  ;;  %v10175_v22 = vld [vmem:[#allocation3 + $0x660] sm:$0xf] }
 0x53e   :  { %6159 = vmatpush.bf16.msra.mxu0 %v10296_v23  ;;  %6128 = vmatmul.bf16.vlgmr.msrb.gmra.mxu1 %v13251_v43  ;;  %v10775_v61 = vld [vmem:[#allocation3 + $0xb10] sm:$0xf]  ;;  %v12141_v5 = vld [vmem:[#allocation3 + $0xb24] sm:$0xf0]  ;;  %v10584_v39 = vor.u32 %v12093_v17, %v10583_v16  ;;  %v11991_v23 = vld [vmem:[#allocation3 + $0x674] sm:$0xf0] }
 0x53f   :  { %6172 = vmatpush.bf16.msra.mxu1 %v10488_v25  ;;  %6141 = vmatmul.bf16.vlgmr.msrb.gmra.mxu2 %v13236_v42  ;;  %v10367_v25 = vld [vmem:[#allocation3 + $0x7e0] sm:$0xf]  ;;  %v12087_v28 = vld [vmem:[#allocation3 + $0x974] sm:$0xf0]  ;;  %v10176_v63 = vor.u32 %v11991_v23, %v10175_v22  ;;  %v10151_v49 = vld [vmem:[#allocation3 + $0x630] sm:$0xf] }
 0x540   :  { %6185 = vmatpush.bf16.msra.mxu2 %v10680_v26  ;;  %6154 = vmatmul.bf16.vlgmr.msrb.gmra.mxu3 %v13246_v13  ;;  %v10776_v26 = vor.u32 %v12141_v5, %v10775_v61  ;;  %v10559_v27 = vld [vmem:[#allocation3 + $0x960] sm:$0xf]  ;;  %v12135_v35 = vld [vmem:[#allocation3 + $0xaf4] sm:$0xf0]  ;;  %v10368_v41 = vor.u32 %v12039_v19, %v10367_v25  ;;  %v12033_v6 = vld [vmem:[#allocation3 + $0x7c4] sm:$0xf0] }
 0x541   :  { %6198 = vmatpush.bf16.msra.mxu3 %v10872_v30  ;;  %v10751_v30 = vld [vmem:[#allocation3 + $0xae0] sm:$0xf]  ;;  %v10560_v48 = vor.u32 %v12087_v28, %v10559_v27  ;;  %v10535_v38 = vld [vmem:[#allocation3 + $0x930] sm:$0xf]  ;;  %v12081_v18 = vld [vmem:[#allocation3 + $0x944] sm:$0xf0]  ;;  %v13265_v28 = vpack.c.bf16 %v3787_v1, %v3787_v1 }
 0x542   :  { %6160 = vmatpush.bf16.msra.mxu0 %v10272_v53  ;;  %v11985_v53 = vld [vmem:[#allocation3 + $0x644] sm:$0xf0]  ;;  %v10127_v57 = vld [vmem:[#allocation3 + $0x600] sm:$0xf]  ;;  %v11979_v46 = vld [vmem:[#allocation3 + $0x614] sm:$0xf0] }
 0x543   :  { %6173 = vmatpush.bf16.msra.mxu1 %v10464_v51  ;;  %v10343_v51 = vld [vmem:[#allocation3 + $0x7b0] sm:$0xf]  ;;  %v12129_v44 = vld [vmem:[#allocation3 + $0xac4] sm:$0xf0]  ;;  %v10152_v47 = vor.u32 %v11985_v53, %v10151_v49  ;;  %v10511_v33 = vld [vmem:[#allocation3 + $0x900] sm:$0xf]  ;;  %v10128_v52 = vor.u32 %v11979_v46, %v10127_v57 }
 0x544   :  { %6186 = vmatpush.bf16.msra.mxu2 %v10656_v36  ;;  %v10752_v36 = vor.u32 %v12135_v35, %v10751_v30  ;;  %v10344_v31 = vor.u32 %v12033_v6, %v10343_v51  ;;  %v12075_v60 = vld [vmem:[#allocation3 + $0x914] sm:$0xf0]  ;;  %v11826_v58 = vld [vmem:[#allocation3 + $0x154] sm:$0xf]  ;;  %v9529_v4 = vld [vmem:[#allocation3 + $0x168] sm:$0xf0]  ;;  %v13270_v30 = vpack.c.bf16 %v3790_v12, %v3790_v12 }
 0x545   :  { %6199 = vmatpush.bf16.msra.mxu3 %v10848_v24  ;;  %v10727_v24 = vld [vmem:[#allocation3 + $0xab0] sm:$0xf]  ;;  %v12123_v62 = vld [vmem:[#allocation3 + $0xa94] sm:$0xf0]  ;;  %v11874_v55 = vld [vmem:[#allocation3 + $0x2d4] sm:$0xf]  ;;  %v10512_v29 = vor.u32 %v12075_v60, %v10511_v33  ;;  %v9532_v16 = vor.u32 %v11826_v58, %v9529_v4 }
 0x546   :  { %6161 = vmatpush.bf16.msra.mxu0 %v10248_v37  ;;  %v10536_v37 = vor.u32 %v12081_v18, %v10535_v38  ;;  %v10728_v32 = vor.u32 %v12129_v44, %v10727_v24  ;;  %v11970_v8 = vld [vmem:[#allocation3 + $0x5d4] sm:$0xf]  ;;  %v11820_v5 = vld [vmem:[#allocation3 + $0x124] sm:$0xf]  ;;  %v9697_v22 = vld [vmem:[#allocation3 + $0x2b8] sm:$0xf0] }
 0x547   :  { %6174 = vmatpush.bf16.msra.mxu1 %v10440_v40  ;;  %v10319_v40 = vld [vmem:[#allocation3 + $0x780] sm:$0xf]  ;;  %v11916_v23 = vld [vmem:[#allocation3 + $0x424] sm:$0xf]  ;;  %v9889_v25 = vld [vmem:[#allocation3 + $0x438] sm:$0xf0] }
 0x548   :  { %6187 = vmatpush.bf16.msra.mxu2 %v10632_v59  ;;  %v12027_v59 = vld [vmem:[#allocation3 + $0x794] sm:$0xf0]  ;;  %v11964_v19 = vld [vmem:[#allocation3 + $0x5a4] sm:$0xf]  ;;  %v10081_v27 = vld [vmem:[#allocation3 + $0x5b8] sm:$0xf0]  ;;  %v9892_v34 = vor.u32 %v11916_v23, %v9889_v25 }
 0x549   :  { %6200 = vmatpush.bf16.msra.mxu3 %v10824_v2  ;;  %v10703_v2 = vld [vmem:[#allocation3 + $0xa80] sm:$0xf]  ;;  %v10320_v7 = vor.u32 %v12027_v59, %v10319_v40  ;;  %v9481_v1 = vld [vmem:[#allocation3 + $0x108] sm:$0xf0]  ;;  %v10084_v10 = vor.u32 %v11964_v19, %v10081_v27  ;;  %v11958_v0 = vld [vmem:[#allocation3 + $0x574] sm:$0xf] }
 0x54a   :  { %6162 = vmatpush.bf16.msra.mxu0 %v10224_v54  ;;  %v9721_v54 = vld [vmem:[#allocation3 + $0x2e8] sm:$0xf0]  ;;  %v10704_v15 = vor.u32 %v12123_v62, %v10703_v2  ;;  %v11808_v6 = vld [vmem:[#allocation3 + $0xc4] sm:$0xf]  ;;  %v9457_v38 = vld [vmem:[#allocation3 + $0xd8] sm:$0xf0] }
 0x54b   :  { %6175 = vmatpush.bf16.msra.mxu1 %v10416_v45  ;;  %v11922_v45 = vld [vmem:[#allocation3 + $0x454] sm:$0xf]  ;;  %v9724_v17 = vor.u32 %v11874_v55, %v9721_v54  ;;  %v9673_v12 = vld [vmem:[#allocation3 + $0x288] sm:$0xf0]  ;;  %v11856_v18 = vld [vmem:[#allocation3 + $0x244] sm:$0xf] }
 0x54c   :  { %6188 = vmatpush.bf16.msra.mxu2 %v10608_v56  ;;  %v9913_v56 = vld [vmem:[#allocation3 + $0x468] sm:$0xf0]  ;;  %v9649_v44 = vld [vmem:[#allocation3 + $0x258] sm:$0xf0]  ;;  %v11952_v46 = vld [vmem:[#allocation3 + $0x544] sm:$0xf] }
 0x54d   :  { %6201 = vmatpush.bf16.msra.mxu3 %v10800_v14  ;;  %v10105_v14 = vld [vmem:[#allocation3 + $0x5e8] sm:$0xf0]  ;;  %v9916_v61 = vor.u32 %v11922_v45, %v9913_v56  ;;  %v9841_v57 = vld [vmem:[#allocation3 + $0x3d8] sm:$0xf0]  ;;  %v9652_v40 = vor.u32 %v11856_v18, %v9649_v44  ;;  %v11802_v33 = vld [vmem:[#allocation3 + $0x94] sm:$0xf] }
 0x54e   :  { %6163 = vmatpush.bf16.msra.mxu0 %v10200_v20  ;;  %v9505_v20 = vld [vmem:[#allocation3 + $0x138] sm:$0xf0]  ;;  %v9865_v49 = vld [vmem:[#allocation3 + $0x408] sm:$0xf0]  ;;  %v11850_v60 = vld [vmem:[#allocation3 + $0x214] sm:$0xf] }
 0x54f   :  { %6176 = vmatpush.bf16.msra.mxu1 %v10392_v21  ;;  %v11868_v21 = vld [vmem:[#allocation3 + $0x2a4] sm:$0xf]  ;;  %v9508_v9 = vor.u32 %v11820_v5, %v9505_v20  ;;  %v9625_v62 = vld [vmem:[#allocation3 + $0x228] sm:$0xf0]  ;;  %v11898_v58 = vld [vmem:[#allocation3 + $0x394] sm:$0xf] }
 0x550   :  { %6189 = vmatpush.bf16.msra.mxu2 %v10584_v39  ;;  %v10108_v39 = vor.u32 %v11970_v8, %v10105_v14  ;;  %v9700_v35 = vor.u32 %v11868_v21, %v9697_v22  ;;  %v9817_v4 = vld [vmem:[#allocation3 + $0x3a8] sm:$0xf0]  ;;  %v11946_v55 = vld [vmem:[#allocation3 + $0x514] sm:$0xf]  ;;  %v9628_v45 = vor.u32 %v11850_v60, %v9625_v62  ;;  %v11844_v8 = vld [vmem:[#allocation3 + $0x1e4] sm:$0xf] }
 0x551   :  { %6202 = vmatpush.bf16.msra.mxu3 %v10776_v26  ;;  %v13260_v26 = vpack.c.bf16 %v3789_v11, %v3789_v11  ;;  %v13275_v11 = vpack.c.bf16 %v3788_v3, %v3788_v3  ;;  %v10057_v3 = vld [vmem:[#allocation3 + $0x588] sm:$0xf0]  ;;  %v9820_v56 = vor.u32 %v11898_v58, %v9817_v4  ;;  %v9985_v5 = vld [vmem:[#allocation3 + $0x4f8] sm:$0xf0]  ;;  %v11790_v22 = vld [vmem:[#allocation3 + $0x34] sm:$0xf] }
 0x552   :  { %6164 = vmatpush.bf16.msra.mxu0 %v10176_v63  ;;  %v11814_v63 = vld [vmem:[#allocation3 + $0xf4] sm:$0xf]  ;;  %v10060_v24 = vor.u32 %v11958_v0, %v10057_v3  ;;  %v9385_v23 = vld [vmem:[#allocation3 + $0x48] sm:$0xf0]  ;;  %v9553_v0 = vld [vmem:[#allocation3 + $0x198] sm:$0xf0] }
 0x553   :  { %6177 = vmatpush.bf16.msra.mxu1 %v10368_v41  ;;  %v11862_v41 = vld [vmem:[#allocation3 + $0x274] sm:$0xf]  ;;  %v9484_v53 = vor.u32 %v11814_v63, %v9481_v1  ;;  %v9577_v27 = vld [vmem:[#allocation3 + $0x1c8] sm:$0xf0]  ;;  %v9388_v1 = vor.u32 %v11790_v22, %v9385_v23  ;;  %v11880_v3 = vld [vmem:[#allocation3 + $0x304] sm:$0xf] }
 0x554   :  { %6190 = vmatpush.bf16.msra.mxu2 %v10560_v48  ;;  %v11910_v48 = vld [vmem:[#allocation3 + $0x3f4] sm:$0xf]  ;;  %v9676_v51 = vor.u32 %v11862_v41, %v9673_v12  ;;  %v9961_v63 = vld [vmem:[#allocation3 + $0x4c8] sm:$0xf0]  ;;  %v11784_v41 = vld [vmem:[#allocation3 + $0x4] sm:$0xf] }
 0x555   :  { %6203 = vmatpush.bf16.msra.mxu3 %v10752_v36  ;;  %v9868_v36 = vor.u32 %v11910_v48, %v9865_v49  ;;  %v11838_v25 = vld [vmem:[#allocation3 + $0x1b4] sm:$0xf]  ;;  %v11832_v49 = vld [vmem:[#allocation3 + $0x184] sm:$0xf]  ;;  %v10297_v18 = vld [vmem:[#allocation3 + $0x768] sm:$0xf0] }
 0x556   :  { %6165 = vmatpush.bf16.msra.mxu0 %v10152_v47  ;;  %v11904_v47 = vld [vmem:[#allocation3 + $0x3c4] sm:$0xf]  ;;  %v9580_v12 = vor.u32 %v11838_v25, %v9577_v27  ;;  %v10273_v58 = vld [vmem:[#allocation3 + $0x738] sm:$0xf0]  ;;  %v10825_v22 = vld [vmem:[#allocation3 + $0xb88] sm:$0xf0] }
 0x557   :  { %6178 = vmatpush.bf16.msra.mxu1 %v10344_v31  ;;  %v10033_v31 = vld [vmem:[#allocation3 + $0x558] sm:$0xf0]  ;;  %v9844_v59 = vor.u32 %v11904_v47, %v9841_v57  ;;  %v10489_v47 = vld [vmem:[#allocation3 + $0x8e8] sm:$0xf0]  ;;  %v12114_v57 = vld [vmem:[#allocation3 + $0xa54] sm:$0xf] }
 0x558   :  { %6191 = vmatpush.bf16.msra.mxu2 %v10536_v37  ;;  %v9460_v37 = vor.u32 %v11808_v6, %v9457_v38  ;;  %v10036_v2 = vor.u32 %v11952_v46, %v10033_v31  ;;  %v9937_v6 = vld [vmem:[#allocation3 + $0x498] sm:$0xf0]  ;;  %v12018_v38 = vld [vmem:[#allocation3 + $0x754] sm:$0xf]  ;;  %v10681_v46 = vld [vmem:[#allocation3 + $0xa68] sm:$0xf0]  ;;  %v9556_v31 = vor.u32 %v11832_v49, %v9553_v0 }
 0x559   :  { %6204 = vmatpush.bf16.msra.mxu3 %v10728_v32  ;;  %v9433_v32 = vld [vmem:[#allocation3 + $0xa8] sm:$0xf0]  ;;  %v12012_v62 = vld [vmem:[#allocation3 + $0x724] sm:$0xf] }
 0x55a   :  { %6166 = vmatpush.bf16.msra.mxu0 %v10128_v52  ;;  %v10009_v52 = vld [vmem:[#allocation3 + $0x528] sm:$0xf0]  ;;  %v9436_v54 = vor.u32 %v11802_v33, %v9433_v32  ;;  %v10300_v32 = vor.u32 %v12018_v38, %v10297_v18  ;;  %v12060_v4 = vld [vmem:[#allocation3 + $0x8a4] sm:$0xf]  ;;  %v12090_v38 = vld [vmem:[#allocation3 + $0x994] sm:$0xf] }
 0x55b   :  { %6179 = vmatpush.bf16.msra.mxu1 %v10320_v7  ;;  %v11796_v7 = vld [vmem:[#allocation3 + $0x64] sm:$0xf]  ;;  %v10012_v14 = vor.u32 %v11946_v55, %v10009_v52  ;;  %v10465_v52 = vld [vmem:[#allocation3 + $0x8b8] sm:$0xf0]  ;;  %v10585_v18 = vld [vmem:[#allocation3 + $0x9a8] sm:$0xf0] }
 0x55c   :  { %6192 = vmatpush.bf16.msra.mxu2 %v10512_v29  ;;  %v9409_v29 = vld [vmem:[#allocation3 + $0x78] sm:$0xf0]  ;;  %v12000_v27 = vld [vmem:[#allocation3 + $0x6c4] sm:$0xf] }
 0x55d   :  { %6205 = vmatpush.bf16.msra.mxu3 %v10704_v15  ;;  %6167 = vmatmul.bf16.vlgmr.msra.gmra.mxu0 %v13265_v28  ;;  %v9601_v15 = vld [vmem:[#allocation3 + $0x1f8] sm:$0xf0]  ;;  %v9412_v20 = vor.u32 %v11796_v7, %v9409_v29  ;;  %v10276_v29 = vor.u32 %v12012_v62, %v10273_v58 }
 0x55e   :  { %6211 = vmatpush.bf16.msrb.mxu0 %v9532_v16  ;;  %6180 = vmatmul.bf16.vlgmr.msra.gmra.mxu1 %v13275_v11  ;;  %v11892_v16 = vld [vmem:[#allocation3 + $0x364] sm:$0xf]  ;;  %v9604_v21 = vor.u32 %v11844_v8, %v9601_v15  ;;  %v10849_v7 = vld [vmem:[#allocation3 + $0xbb8] sm:$0xf0]  ;;  %v10468_v8 = vor.u32 %v12060_v4, %v10465_v52  ;;  %v12006_v15 = vld [vmem:[#allocation3 + $0x6f4] sm:$0xf] }
 0x55f   :  { %6224 = vmatpush.bf16.msrb.mxu1 %v9724_v17  ;;  %6193 = vmatmul.bf16.vlgmr.msra.gmra.mxu2 %v13260_v26  ;;  %v9793_v17 = vld [vmem:[#allocation3 + $0x378] sm:$0xf0]  ;;  %v11982_v52 = vld [vmem:[#allocation3 + $0x634] sm:$0xf] }
 0x560   :  { %6237 = vmatpush.bf16.msrb.mxu2 %v9916_v61  ;;  %6206 = vmatmul.bf16.vlgmr.msra.gmra.mxu3 %v13270_v30  ;;  %v11940_v61 = vld [vmem:[#allocation3 + $0x4e4] sm:$0xf]  ;;  %v10753_v62 = vld [vmem:[#allocation3 + $0xaf8] sm:$0xf0] }
 0x561   :  { %6250 = vmatpush.bf16.msrb.mxu3 %v10108_v39  ;;  %v9796_v39 = vor.u32 %v11892_v16, %v9793_v17  ;;  %v9988_v19 = vor.u32 %v11940_v61, %v9985_v5  ;;  %v10249_v16 = vld [vmem:[#allocation3 + $0x708] sm:$0xf0]  ;;  %v12054_v17 = vld [vmem:[#allocation3 + $0x874] sm:$0xf] }
 0x562   :  { %6212 = vmatpush.bf16.msrb.mxu0 %v9508_v9  ;;  %v11886_v9 = vld [vmem:[#allocation3 + $0x334] sm:$0xf]  ;;  %v10441_v5 = vld [vmem:[#allocation3 + $0x888] sm:$0xf0]  ;;  %v10252_v23 = vor.u32 %v12006_v15, %v10249_v16 }
 0x563   :  { %6225 = vmatpush.bf16.msrb.mxu1 %v9700_v35  ;;  %v9769_v35 = vld [vmem:[#allocation3 + $0x348] sm:$0xf0]  ;;  %v10444_v25 = vor.u32 %v12054_v17, %v10441_v5  ;;  %v11976_v17 = vld [vmem:[#allocation3 + $0x604] sm:$0xf] }
 0x564   :  { %6238 = vmatpush.bf16.msrb.mxu2 %v9892_v34  ;;  %v11934_v34 = vld [vmem:[#allocation3 + $0x4b4] sm:$0xf]  ;;  %v9772_v48 = vor.u32 %v11886_v9, %v9769_v35  ;;  %v10225_v9 = vld [vmem:[#allocation3 + $0x6d8] sm:$0xf0]  ;;  %v12048_v35 = vld [vmem:[#allocation3 + $0x844] sm:$0xf] }
 0x565   :  { %6251 = vmatpush.bf16.msrb.mxu3 %v10084_v10  ;;  %v9361_v10 = vld [vmem:[#allocation3 + $0x18] sm:$0xf0]  ;;  %v10729_v15 = vld [vmem:[#allocation3 + $0xac8] sm:$0xf0] }
 0x566   :  { %6213 = vmatpush.bf16.msrb.mxu0 %v9484_v53  ;;  %v9964_v53 = vor.u32 %v11934_v34, %v9961_v63  ;;  %v9364_v44 = vor.u32 %v11784_v41, %v9361_v10  ;;  %v10417_v63 = vld [vmem:[#allocation3 + $0x858] sm:$0xf0]  ;;  %v12144_v10 = vld [vmem:[#allocation3 + $0xb44] sm:$0xf] }
 0x567   :  { %6226 = vmatpush.bf16.msrb.mxu1 %v9676_v51  ;;  %v9745_v51 = vld [vmem:[#allocation3 + $0x318] sm:$0xf0]  ;;  %v10420_v49 = vor.u32 %v12048_v35, %v10417_v63  ;;  %v11830_v35 = vld [vmem:[#allocation3 + $0x16c] sm:$0xf0] }
 0x568   :  { %6239 = vmatpush.bf16.msrb.mxu2 %v9868_v36  ;;  %v11928_v36 = vld [vmem:[#allocation3 + $0x484] sm:$0xf]  ;;  %v10609_v41 = vld [vmem:[#allocation3 + $0x9d8] sm:$0xf0] }
 0x569   :  { %6252 = vmatpush.bf16.msrb.mxu3 %v10060_v24  ;;  %v12066_v24 = vld [vmem:[#allocation3 + $0x8d4] sm:$0xf]  ;;  %v9940_v33 = vor.u32 %v11928_v36, %v9937_v6  ;;  %v10393_v6 = vld [vmem:[#allocation3 + $0x828] sm:$0xf0] }
 0x56a   :  { %6214 = vmatpush.bf16.msrb.mxu0 %v9460_v37  ;;  %v9748_v37 = vor.u32 %v11880_v3, %v9745_v51  ;;  %v10492_v60 = vor.u32 %v12066_v24, %v10489_v47  ;;  %v11994_v3 = vld [vmem:[#allocation3 + $0x694] sm:$0xf] }
 0x56b   :  { %6227 = vmatpush.bf16.msrb.mxu1 %v9652_v40  ;;  %v12162_v40 = vld [vmem:[#allocation3 + $0xbd4] sm:$0xf] }
 0x56c   :  { %6240 = vmatpush.bf16.msrb.mxu2 %v9844_v59  ;;  %v10873_v59 = vld [vmem:[#allocation3 + $0xbe8] sm:$0xf0]  ;;  %v12042_v51 = vld [vmem:[#allocation3 + $0x814] sm:$0xf] }
 0x56d   :  { %6253 = vmatpush.bf16.msrb.mxu3 %v10036_v2  ;;  %v10684_v2 = vor.u32 %v12114_v57, %v10681_v46  ;;  %v10876_v55 = vor.u32 %v12162_v40, %v10873_v59  ;;  %v12138_v24 = vld [vmem:[#allocation3 + $0xb14] sm:$0xf]  ;;  %v10396_v57 = vor.u32 %v12042_v51, %v10393_v6  ;;  %v10588_v46 = vor.u32 %v12090_v38, %v10585_v18  ;;  %v12036_v40 = vld [vmem:[#allocation3 + $0x7e4] sm:$0xf]  ;;  %v9511_v6 = vld [vmem:[#allocation3 + $0x128] sm:$0xf] }
 0x56e   :  { %6215 = vmatpush.bf16.msrb.mxu0 %v9436_v54  ;;  %v12108_v54 = vld [vmem:[#allocation3 + $0xa24] sm:$0xf]  ;;  %v11824_v38 = vld [vmem:[#allocation3 + $0x13c] sm:$0xf0]  ;;  %v9703_v18 = vld [vmem:[#allocation3 + $0x2a8] sm:$0xf] }
 0x56f   :  { %6228 = vmatpush.bf16.msrb.mxu1 %v9628_v45  ;;  %v10657_v45 = vld [vmem:[#allocation3 + $0xa38] sm:$0xf0] }
 0x570   :  { %6241 = vmatpush.bf16.msrb.mxu2 %v9820_v56  ;;  %v12156_v56 = vld [vmem:[#allocation3 + $0xba4] sm:$0xf] }
 0x571   :  { %6254 = vmatpush.bf16.msrb.mxu3 %v10012_v14  ;;  %v10660_v14 = vor.u32 %v12108_v54, %v10657_v45  ;;  %v10852_v61 = vor.u32 %v12156_v56, %v10849_v7  ;;  %v10153_v54 = vld [vmem:[#allocation3 + $0x648] sm:$0xf0]  ;;  %v12030_v45 = vld [vmem:[#allocation3 + $0x7b4] sm:$0xf] }
 0x572   :  { %6216 = vmatpush.bf16.msrb.mxu0 %v9412_v20  ;;  %v12102_v20 = vld [vmem:[#allocation3 + $0x9f4] sm:$0xf]  ;;  %v10345_v7 = vld [vmem:[#allocation3 + $0x7c8] sm:$0xf0]  ;;  %v10156_v16 = vor.u32 %v11982_v52, %v10153_v54  ;;  %v11962_v52 = vld [vmem:[#allocation3 + $0x58c] sm:$0xf0] }
 0x573   :  { %6229 = vmatpush.bf16.msrb.mxu1 %v9604_v21  ;;  %v10633_v21 = vld [vmem:[#allocation3 + $0xa08] sm:$0xf0]  ;;  %v10348_v5 = vor.u32 %v12030_v45, %v10345_v7  ;;  %v9463_v7 = vld [vmem:[#allocation3 + $0xc8] sm:$0xf] }
 0x574   :  { %6242 = vmatpush.bf16.msrb.mxu2 %v9796_v39  ;;  %v12150_v39 = vld [vmem:[#allocation3 + $0xb74] sm:$0xf] }
 0x575   :  { %6255 = vmatpush.bf16.msrb.mxu3 %v9988_v19  ;;  %v10636_v19 = vor.u32 %v12102_v20, %v10633_v21  ;;  %v10828_v34 = vor.u32 %v12150_v39, %v10825_v22  ;;  %v12024_v21 = vld [vmem:[#allocation3 + $0x784] sm:$0xf]  ;;  %v10321_v39 = vld [vmem:[#allocation3 + $0x798] sm:$0xf0] }
 0x576   :  { %6217 = vmatpush.bf16.msrb.mxu0 %v9388_v1  ;;  %v12096_v1 = vld [vmem:[#allocation3 + $0x9c4] sm:$0xf] }
 0x577   :  { %6230 = vmatpush.bf16.msrb.mxu1 %v9580_v12  ;;  %v10801_v12 = vld [vmem:[#allocation3 + $0xb58] sm:$0xf0]  ;;  %v10612_v0 = vor.u32 %v12096_v1, %v10609_v41  ;;  %v12072_v22 = vld [vmem:[#allocation3 + $0x904] sm:$0xf]  ;;  %v11878_v1 = vld [vmem:[#allocation3 + $0x2ec] sm:$0xf0] }
 0x578   :  { %6243 = vmatpush.bf16.msrb.mxu2 %v9772_v48  ;;  %v10228_v48 = vor.u32 %v12000_v27, %v10225_v9  ;;  %v10804_v36 = vor.u32 %v12144_v10, %v10801_v12  ;;  %v10705_v27 = vld [vmem:[#allocation3 + $0xa98] sm:$0xf0]  ;;  %v9535_v9 = vld [vmem:[#allocation3 + $0x158] sm:$0xf]  ;;  %v11926_v10 = vld [vmem:[#allocation3 + $0x46c] sm:$0xf0]  ;;  %v10324_v12 = vor.u32 %v12024_v21, %v10321_v39 }
 0x579   :  { %6256 = vmatpush.bf16.msrb.mxu3 %v9964_v53  ;;  %v10201_v53 = vld [vmem:[#allocation3 + $0x6a8] sm:$0xf0]  ;;  %v9919_v41 = vld [vmem:[#allocation3 + $0x458] sm:$0xf] }
 0x57a   :  { %6218 = vmatpush.bf16.msrb.mxu0 %v9364_v44  ;;  %v10777_v44 = vld [vmem:[#allocation3 + $0xb28] sm:$0xf0]  ;;  %v10204_v47 = vor.u32 %v11994_v3, %v10201_v53  ;;  %v9536_v53 = vor.u32 %v11830_v35, %v9535_v9  ;;  %v9823_v9 = vld [vmem:[#allocation3 + $0x398] sm:$0xf]  ;;  %v11902_v35 = vld [vmem:[#allocation3 + $0x3ac] sm:$0xf0] }
 0x57b   :  { %6231 = vmatpush.bf16.msrb.mxu1 %v9556_v31  ;;  %v11988_v31 = vld [vmem:[#allocation3 + $0x664] sm:$0xf]  ;;  %v10780_v59 = vor.u32 %v12138_v24, %v10777_v44  ;;  %v11872_v44 = vld [vmem:[#allocation3 + $0x2bc] sm:$0xf0] }
 0x57c   :  { %6244 = vmatpush.bf16.msrb.mxu2 %v9748_v37  ;;  %v10177_v37 = vld [vmem:[#allocation3 + $0x678] sm:$0xf0] }
 0x57d   :  { %6257 = vmatpush.bf16.msrb.mxu3 %v9940_v33  ;;  %6219 = vmatmul.bf16.vlgmr.msrb.gmra.mxu0 %v13241_v50  ;;  %v10369_v33 = vld [vmem:[#allocation3 + $0x7f8] sm:$0xf0]  ;;  %v10180_v58 = vor.u32 %v11988_v31, %v10177_v37  ;;  %v11968_v31 = vld [vmem:[#allocation3 + $0x5bc] sm:$0xf0]  ;;  %v9512_v37 = vor.u32 %v11824_v38, %v9511_v6 }
 0x57e   :  { %6263 = vmatpush.bf16.msra.mxu0 %v10300_v32  ;;  %6232 = vmatmul.bf16.vlgmr.msrb.gmra.mxu1 %v13251_v43  ;;  %v12084_v32 = vld [vmem:[#allocation3 + $0x964] sm:$0xf]  ;;  %v10372_v4 = vor.u32 %v12036_v40, %v10369_v33  ;;  %v9704_v40 = vor.u32 %v11872_v44, %v9703_v18  ;;  %v9487_v33 = vld [vmem:[#allocation3 + $0xf8] sm:$0xf]  ;;  %v11944_v6 = vld [vmem:[#allocation3 + $0x4fc] sm:$0xf0] }
 0x57f   :  { %6276 = vmatpush.bf16.msra.mxu1 %v10492_v60  ;;  %6245 = vmatmul.bf16.vlgmr.msrb.gmra.mxu2 %v13236_v42  ;;  %v10561_v60 = vld [vmem:[#allocation3 + $0x978] sm:$0xf0]  ;;  %v9391_v44 = vld [vmem:[#allocation3 + $0x38] sm:$0xf] }
 0x580   :  { %6289 = vmatpush.bf16.msra.mxu2 %v10684_v2  ;;  %6258 = vmatmul.bf16.vlgmr.msrb.gmra.mxu3 %v13246_v13  ;;  %v12132_v2 = vld [vmem:[#allocation3 + $0xae4] sm:$0xf] }
 0x581   :  { %6302 = vmatpush.bf16.msra.mxu3 %v10876_v55  ;;  %v10564_v55 = vor.u32 %v12084_v32, %v10561_v60  ;;  %v10756_v56 = vor.u32 %v12132_v2, %v10753_v62  ;;  %v11818_v32 = vld [vmem:[#allocation3 + $0x10c] sm:$0xf0]  ;;  %v9679_v60 = vld [vmem:[#allocation3 + $0x278] sm:$0xf] }
 0x582   :  { %6264 = vmatpush.bf16.msra.mxu0 %v10276_v29  ;;  %v12078_v29 = vld [vmem:[#allocation3 + $0x934] sm:$0xf]  ;;  %v11866_v62 = vld [vmem:[#allocation3 + $0x28c] sm:$0xf0]  ;;  %v9488_v54 = vor.u32 %v11818_v32, %v9487_v33 }
 0x583   :  { %6277 = vmatpush.bf16.msra.mxu1 %v10468_v8  ;;  %v10537_v8 = vld [vmem:[#allocation3 + $0x948] sm:$0xf0]  ;;  %v9680_v45 = vor.u32 %v11866_v62, %v9679_v60  ;;  %v11938_v33 = vld [vmem:[#allocation3 + $0x4cc] sm:$0xf0]  ;;  %v9367_v60 = vld [vmem:[#allocation3 + $0x8] sm:$0xf] }
 0x584   :  { %6290 = vmatpush.bf16.msra.mxu2 %v10660_v14  ;;  %v12126_v14 = vld [vmem:[#allocation3 + $0xab4] sm:$0xf]  ;;  %v10540_v20 = vor.u32 %v12078_v29, %v10537_v8  ;;  %v11812_v29 = vld [vmem:[#allocation3 + $0xdc] sm:$0xf0]  ;;  %v9655_v8 = vld [vmem:[#allocation3 + $0x248] sm:$0xf] }
 0x585   :  { %6303 = vmatpush.bf16.msra.mxu3 %v10852_v61  ;;  %v10129_v61 = vld [vmem:[#allocation3 + $0x618] sm:$0xf0] }
 0x586   :  { %6265 = vmatpush.bf16.msra.mxu0 %v10252_v23  ;;  %v10732_v23 = vor.u32 %v12126_v14, %v10729_v15  ;;  %v10132_v63 = vor.u32 %v11976_v17, %v10129_v61  ;;  %v11860_v15 = vld [vmem:[#allocation3 + $0x25c] sm:$0xf0]  ;;  %v10039_v61 = vld [vmem:[#allocation3 + $0x548] sm:$0xf] }
 0x587   :  { %6278 = vmatpush.bf16.msra.mxu1 %v10444_v25  ;;  %v10513_v25 = vld [vmem:[#allocation3 + $0x918] sm:$0xf0]  ;;  %v11908_v17 = vld [vmem:[#allocation3 + $0x3dc] sm:$0xf0]  ;;  %v9656_v21 = vor.u32 %v11860_v15, %v9655_v8  ;;  %v12022_v8 = vld [vmem:[#allocation3 + $0x76c] sm:$0xf0] }
 0x588   :  { %6291 = vmatpush.bf16.msra.mxu2 %v10636_v19  ;;  %v12120_v19 = vld [vmem:[#allocation3 + $0xa84] sm:$0xf] }
 0x589   :  { %6304 = vmatpush.bf16.msra.mxu3 %v10828_v34  ;;  %v9727_v34 = vld [vmem:[#allocation3 + $0x2d8] sm:$0xf]  ;;  %v10708_v3 = vor.u32 %v12120_v19, %v10705_v27  ;;  %v11854_v27 = vld [vmem:[#allocation3 + $0x22c] sm:$0xf0] }
 0x58a   :  { %6266 = vmatpush.bf16.msra.mxu0 %v10228_v48  ;;  %v10516_v48 = vor.u32 %v12072_v22, %v10513_v25  ;;  %v9728_v51 = vor.u32 %v11878_v1, %v9727_v34  ;;  %v9439_v22 = vld [vmem:[#allocation3 + $0x98] sm:$0xf] }
 0x58b   :  { %6279 = vmatpush.bf16.msra.mxu1 %v10420_v49  ;;  %v10111_v49 = vld [vmem:[#allocation3 + $0x5d8] sm:$0xf] }
 0x58c   :  { %6292 = vmatpush.bf16.msra.mxu2 %v10612_v0  ;;  %v11974_v0 = vld [vmem:[#allocation3 + $0x5ec] sm:$0xf0]  ;;  %v9631_v25 = vld [vmem:[#allocation3 + $0x218] sm:$0xf] }
 0x58d   :  { %6305 = vmatpush.bf16.msra.mxu3 %v10804_v36  ;;  %v9920_v36 = vor.u32 %v11926_v10, %v9919_v41  ;;  %v10112_v24 = vor.u32 %v11974_v0, %v10111_v49  ;;  %v10015_v34 = vld [vmem:[#allocation3 + $0x518] sm:$0xf]  ;;  %v9632_v41 = vor.u32 %v11854_v27, %v9631_v25  ;;  %v9824_v10 = vor.u32 %v11902_v35, %v9823_v9  ;;  %v9607_v49 = vld [vmem:[#allocation3 + $0x1e8] sm:$0xf]  ;;  %v12016_v9 = vld [vmem:[#allocation3 + $0x73c] sm:$0xf0] }
 0x58e   :  { %6267 = vmatpush.bf16.msra.mxu0 %v10204_v47  ;;  %v9895_v47 = vld [vmem:[#allocation3 + $0x428] sm:$0xf] }
 0x58f   :  { %6280 = vmatpush.bf16.msra.mxu1 %v10396_v57  ;;  %v11920_v57 = vld [vmem:[#allocation3 + $0x43c] sm:$0xf0]  ;;  %v10279_v27 = vld [vmem:[#allocation3 + $0x728] sm:$0xf] }
 0x590   :  { %6293 = vmatpush.bf16.msra.mxu2 %v10588_v46  ;;  %v10087_v46 = vld [vmem:[#allocation3 + $0x5a8] sm:$0xf] }
 0x591   :  { %6306 = vmatpush.bf16.msra.mxu3 %v10780_v59  ;;  %v9896_v59 = vor.u32 %v11920_v57, %v9895_v47  ;;  %v10088_v2 = vor.u32 %v11968_v31, %v10087_v46  ;;  %v11794_v47 = vld [vmem:[#allocation3 + $0x4c] sm:$0xf0]  ;;  %v9583_v57 = vld [vmem:[#allocation3 + $0x1b8] sm:$0xf]  ;;  %v10471_v35 = vld [vmem:[#allocation3 + $0x8a8] sm:$0xf] }
 0x592   :  { %6268 = vmatpush.bf16.msra.mxu0 %v10180_v58  ;;  %v9871_v58 = vld [vmem:[#allocation3 + $0x3f8] sm:$0xf]  ;;  %v11842_v31 = vld [vmem:[#allocation3 + $0x1cc] sm:$0xf0]  ;;  %v9392_v32 = vor.u32 %v11794_v47, %v9391_v44 }
 0x593   :  { %6281 = vmatpush.bf16.msra.mxu1 %v10372_v4  ;;  %v11914_v4 = vld [vmem:[#allocation3 + $0x40c] sm:$0xf0]  ;;  %v9584_v62 = vor.u32 %v11842_v31, %v9583_v57  ;;  %v10231_v31 = vld [vmem:[#allocation3 + $0x6c8] sm:$0xf] }
 0x594   :  { %6294 = vmatpush.bf16.msra.mxu2 %v10564_v55  ;;  %v10063_v55 = vld [vmem:[#allocation3 + $0x578] sm:$0xf]  ;;  %v12154_v44 = vld [vmem:[#allocation3 + $0xb8c] sm:$0xf0] }
 0x595   :  { %6307 = vmatpush.bf16.msra.mxu3 %v10756_v56  ;;  %v9872_v56 = vor.u32 %v11914_v4, %v9871_v58  ;;  %v10064_v14 = vor.u32 %v11962_v52, %v10063_v55  ;;  %v9559_v4 = vld [vmem:[#allocation3 + $0x188] sm:$0xf]  ;;  %v11836_v55 = vld [vmem:[#allocation3 + $0x19c] sm:$0xf0] }
 0x596   :  { %6269 = vmatpush.bf16.msra.mxu0 %v10156_v16  ;;  %v9847_v16 = vld [vmem:[#allocation3 + $0x3c8] sm:$0xf] }
 0x597   :  { %6282 = vmatpush.bf16.msra.mxu1 %v10348_v5  ;;  %v11956_v5 = vld [vmem:[#allocation3 + $0x55c] sm:$0xf0]  ;;  %v9848_v39 = vor.u32 %v11908_v17, %v9847_v16  ;;  %v9751_v52 = vld [vmem:[#allocation3 + $0x308] sm:$0xf]  ;;  %v12070_v16 = vld [vmem:[#allocation3 + $0x8ec] sm:$0xf0] }
 0x598   :  { %6295 = vmatpush.bf16.msra.mxu2 %v10540_v20  ;;  %v9464_v20 = vor.u32 %v11812_v29, %v9463_v7  ;;  %v10040_v19 = vor.u32 %v11956_v5, %v10039_v61  ;;  %v11932_v7 = vld [vmem:[#allocation3 + $0x49c] sm:$0xf0]  ;;  %v10303_v29 = vld [vmem:[#allocation3 + $0x758] sm:$0xf]  ;;  %v12118_v61 = vld [vmem:[#allocation3 + $0xa6c] sm:$0xf0]  ;;  %v9560_v5 = vor.u32 %v11836_v55, %v9559_v4 }
 0x599   :  { %6308 = vmatpush.bf16.msra.mxu3 %v10732_v23  ;;  %v11806_v23 = vld [vmem:[#allocation3 + $0xac] sm:$0xf0]  ;;  %v10687_v17 = vld [vmem:[#allocation3 + $0xa58] sm:$0xf] }
 0x59a   :  { %6270 = vmatpush.bf16.msra.mxu0 %v10132_v63  ;;  %v11950_v63 = vld [vmem:[#allocation3 + $0x52c] sm:$0xf0]  ;;  %v9440_v1 = vor.u32 %v11806_v23, %v9439_v22  ;;  %v10304_v23 = vor.u32 %v12022_v8, %v10303_v29 }
 0x59b   :  { %6283 = vmatpush.bf16.msra.mxu1 %v10324_v12  ;;  %v9415_v12 = vld [vmem:[#allocation3 + $0x68] sm:$0xf]  ;;  %v10016_v0 = vor.u32 %v11950_v63, %v10015_v34  ;;  %v12064_v63 = vld [vmem:[#allocation3 + $0x8bc] sm:$0xf0]  ;;  %v12046_v8 = vld [vmem:[#allocation3 + $0x82c] sm:$0xf0] }
 0x59c   :  { %6296 = vmatpush.bf16.msra.mxu2 %v10516_v48  ;;  %v11800_v48 = vld [vmem:[#allocation3 + $0x7c] sm:$0xf0] }
 0x59d   :  { %6309 = vmatpush.bf16.msra.mxu3 %v10708_v3  ;;  %6271 = vmatmul.bf16.vlgmr.msra.gmra.mxu0 %v13265_v28  ;;  %v11848_v3 = vld [vmem:[#allocation3 + $0x1fc] sm:$0xf0]  ;;  %v9416_v38 = vor.u32 %v11800_v48, %v9415_v12  ;;  %v10280_v48 = vor.u32 %v12016_v9, %v10279_v27  ;;  %v10567_v9 = vld [vmem:[#allocation3 + $0x968] sm:$0xf] }
 0x59e   :  { %6315 = vmatpush.bf16.msrb.mxu0 %v9536_v53  ;;  %6284 = vmatmul.bf16.vlgmr.msra.gmra.mxu1 %v13275_v11  ;;  %v9799_v53 = vld [vmem:[#allocation3 + $0x368] sm:$0xf]  ;;  %v9608_v18 = vor.u32 %v11848_v3, %v9607_v49  ;;  %v12160_v12 = vld [vmem:[#allocation3 + $0xbbc] sm:$0xf0]  ;;  %v10472_v49 = vor.u32 %v12064_v63, %v10471_v35  ;;  %v10255_v3 = vld [vmem:[#allocation3 + $0x6f8] sm:$0xf] }
 0x59f   :  { %6328 = vmatpush.bf16.msrb.mxu1 %v9728_v51  ;;  %6297 = vmatmul.bf16.vlgmr.msra.gmra.mxu2 %v13260_v26  ;;  %v11896_v51 = vld [vmem:[#allocation3 + $0x37c] sm:$0xf0] }
 0x5a0   :  { %6341 = vmatpush.bf16.msrb.mxu2 %v9920_v36  ;;  %6310 = vmatmul.bf16.vlgmr.msra.gmra.mxu3 %v13270_v30  ;;  %v9991_v36 = vld [vmem:[#allocation3 + $0x4e8] sm:$0xf]  ;;  %v12040_v27 = vld [vmem:[#allocation3 + $0x7fc] sm:$0xf0] }
 0x5a1   :  { %6354 = vmatpush.bf16.msrb.mxu3 %v10112_v24  ;;  %v9800_v24 = vor.u32 %v11896_v51, %v9799_v53  ;;  %v9992_v46 = vor.u32 %v11944_v6, %v9991_v36  ;;  %v12010_v53 = vld [vmem:[#allocation3 + $0x70c] sm:$0xf0]  ;;  %v10447_v51 = vld [vmem:[#allocation3 + $0x878] sm:$0xf]  ;;  %v12088_v35 = vld [vmem:[#allocation3 + $0x97c] sm:$0xf0] }
 0x5a2   :  { %6316 = vmatpush.bf16.msrb.mxu0 %v9512_v37  ;;  %v9775_v37 = vld [vmem:[#allocation3 + $0x338] sm:$0xf]  ;;  %v12058_v6 = vld [vmem:[#allocation3 + $0x88c] sm:$0xf0]  ;;  %v10256_v47 = vor.u32 %v12010_v53, %v10255_v3 }
 0x5a3   :  { %6329 = vmatpush.bf16.msrb.mxu1 %v9704_v40  ;;  %v11890_v40 = vld [vmem:[#allocation3 + $0x34c] sm:$0xf0]  ;;  %v10448_v57 = vor.u32 %v12058_v6, %v10447_v51  ;;  %v10159_v3 = vld [vmem:[#allocation3 + $0x638] sm:$0xf] }
 0x5a4   :  { %6342 = vmatpush.bf16.msrb.mxu2 %v9896_v59  ;;  %v9967_v59 = vld [vmem:[#allocation3 + $0x4b8] sm:$0xf]  ;;  %v9776_v58 = vor.u32 %v11890_v40, %v9775_v37  ;;  %v12004_v37 = vld [vmem:[#allocation3 + $0x6dc] sm:$0xf0]  ;;  %v10423_v40 = vld [vmem:[#allocation3 + $0x848] sm:$0xf] }
 0x5a5   :  { %6355 = vmatpush.bf16.msrb.mxu3 %v10088_v2  ;;  %v11788_v2 = vld [vmem:[#allocation3 + $0x1c] sm:$0xf0]  ;;  %v11986_v53 = vld [vmem:[#allocation3 + $0x64c] sm:$0xf0]  ;;  %v10351_v51 = vld [vmem:[#allocation3 + $0x7b8] sm:$0xf] }
 0x5a6   :  { %6317 = vmatpush.bf16.msrb.mxu0 %v9488_v54  ;;  %v9968_v54 = vor.u32 %v11938_v33, %v9967_v59  ;;  %v9368_v15 = vor.u32 %v11788_v2, %v9367_v60  ;;  %v12052_v33 = vld [vmem:[#allocation3 + $0x85c] sm:$0xf0]  ;;  %v10807_v2 = vld [vmem:[#allocation3 + $0xb48] sm:$0xf] }
 0x5a7   :  { %6330 = vmatpush.bf16.msrb.mxu1 %v9680_v45  ;;  %v11884_v45 = vld [vmem:[#allocation3 + $0x31c] sm:$0xf0]  ;;  %v10424_v55 = vor.u32 %v12052_v33, %v10423_v40 }
 0x5a8   :  { %6343 = vmatpush.bf16.msrb.mxu2 %v9872_v56  ;;  %v9943_v56 = vld [vmem:[#allocation3 + $0x488] sm:$0xf]  ;;  %v12100_v60 = vld [vmem:[#allocation3 + $0x9dc] sm:$0xf0] }
 0x5a9   :  { %6356 = vmatpush.bf16.msrb.mxu3 %v10064_v14  ;;  %v10495_v14 = vld [vmem:[#allocation3 + $0x8d8] sm:$0xf]  ;;  %v9944_v22 = vor.u32 %v11932_v7, %v9943_v56  ;;  %v12028_v33 = vld [vmem:[#allocation3 + $0x79c] sm:$0xf0] }
 0x5aa   :  { %6318 = vmatpush.bf16.msrb.mxu0 %v9464_v20  ;;  %v9752_v20 = vor.u32 %v11884_v45, %v9751_v52  ;;  %v10496_v25 = vor.u32 %v12070_v16, %v10495_v14  ;;  %v11998_v45 = vld [vmem:[#allocation3 + $0x6ac] sm:$0xf0]  ;;  %v10399_v56 = vld [vmem:[#allocation3 + $0x818] sm:$0xf] }
 0x5ab   :  { %6331 = vmatpush.bf16.msrb.mxu1 %v9656_v21  ;;  %v10879_v21 = vld [vmem:[#allocation3 + $0xbd8] sm:$0xf] }
 0x5ac   :  { %6344 = vmatpush.bf16.msrb.mxu2 %v9848_v39  ;;  %v12166_v39 = vld [vmem:[#allocation3 + $0xbec] sm:$0xf0]  ;;  %v10591_v14 = vld [vmem:[#allocation3 + $0x998] sm:$0xf] }
 0x5ad   :  { %6357 = vmatpush.bf16.msrb.mxu3 %v10040_v19  ;;  %v10688_v19 = vor.u32 %v12118_v61, %v10687_v17  ;;  %v10880_v34 = vor.u32 %v12166_v39, %v10879_v21  ;;  %v10783_v17 = vld [vmem:[#allocation3 + $0xb18] sm:$0xf]  ;;  %v12142_v61 = vld [vmem:[#allocation3 + $0xb2c] sm:$0xf0]  ;;  %v10183_v39 = vld [vmem:[#allocation3 + $0x668] sm:$0xf] }
 0x5ae   :  { %6319 = vmatpush.bf16.msrb.mxu0 %v9440_v1  ;;  %v10663_v1 = vld [vmem:[#allocation3 + $0xa28] sm:$0xf] }
 0x5af   :  { %6332 = vmatpush.bf16.msrb.mxu1 %v9632_v41  ;;  %v12112_v41 = vld [vmem:[#allocation3 + $0xa3c] sm:$0xf0] }
 0x5b0   :  { %6345 = vmatpush.bf16.msrb.mxu2 %v9824_v10  ;;  %v10855_v10 = vld [vmem:[#allocation3 + $0xba8] sm:$0xf] }
 0x5b1   :  { %6358 = vmatpush.bf16.msrb.mxu3 %v10016_v0  ;;  %v10664_v0 = vor.u32 %v12112_v41, %v10663_v1  ;;  %v10856_v36 = vor.u32 %v12160_v12, %v10855_v10  ;;  %v10759_v1 = vld [vmem:[#allocation3 + $0xae8] sm:$0xf]  ;;  %v12136_v41 = vld [vmem:[#allocation3 + $0xafc] sm:$0xf0] }
 0x5b2   :  { %6320 = vmatpush.bf16.msrb.mxu0 %v9416_v38  ;;  %v10639_v38 = vld [vmem:[#allocation3 + $0x9f8] sm:$0xf]  ;;  %v10760_v6 = vor.u32 %v12136_v41, %v10759_v1 }
 0x5b3   :  { %6333 = vmatpush.bf16.msrb.mxu1 %v9608_v18  ;;  %v12106_v18 = vld [vmem:[#allocation3 + $0xa0c] sm:$0xf0] }
 0x5b4   :  { %6346 = vmatpush.bf16.msrb.mxu2 %v9800_v24  ;;  %v10831_v24 = vld [vmem:[#allocation3 + $0xb78] sm:$0xf] }
 0x5b5   :  { %6359 = vmatpush.bf16.msrb.mxu3 %v9992_v46  ;;  %v10640_v46 = vor.u32 %v12106_v18, %v10639_v38  ;;  %v10832_v59 = vor.u32 %v12154_v44, %v10831_v24  ;;  %v12034_v38 = vld [vmem:[#allocation3 + $0x7cc] sm:$0xf0]  ;;  %v10543_v18 = vld [vmem:[#allocation3 + $0x938] sm:$0xf] }
 0x5b6   :  { %6321 = vmatpush.bf16.msrb.mxu0 %v9392_v32  ;;  %v10615_v32 = vld [vmem:[#allocation3 + $0x9c8] sm:$0xf]  ;;  %v12082_v24 = vld [vmem:[#allocation3 + $0x94c] sm:$0xf0]  ;;  %v10735_v44 = vld [vmem:[#allocation3 + $0xab8] sm:$0xf] }
 0x5b7   :  { %6334 = vmatpush.bf16.msrb.mxu1 %v9584_v62  ;;  %v12148_v62 = vld [vmem:[#allocation3 + $0xb5c] sm:$0xf0]  ;;  %v10616_v52 = vor.u32 %v12100_v60, %v10615_v32  ;;  %v10544_v40 = vor.u32 %v12082_v24, %v10543_v18  ;;  %v10519_v32 = vld [vmem:[#allocation3 + $0x908] sm:$0xf] }
 0x5b8   :  { %6347 = vmatpush.bf16.msrb.mxu2 %v9776_v58  ;;  %v10232_v58 = vor.u32 %v12004_v37, %v10231_v31  ;;  %v10808_v29 = vor.u32 %v12148_v62, %v10807_v2  ;;  %v11980_v31 = vld [vmem:[#allocation3 + $0x61c] sm:$0xf0]  ;;  %v10352_v37 = vor.u32 %v12034_v38, %v10351_v51  ;;  %v9873_v51 = vld [vmem:[#allocation3 + $0x410] sm:$0xf0] }
 0x5b9   :  { %6360 = vmatpush.bf16.msrb.mxu3 %v9968_v54  ;;  %v10207_v54 = vld [vmem:[#allocation3 + $0x698] sm:$0xf]  ;;  %v12076_v62 = vld [vmem:[#allocation3 + $0x91c] sm:$0xf0] }
 0x5ba   :  { %6322 = vmatpush.bf16.msrb.mxu0 %v9368_v15  ;;  %v6116_v4 = vpop.f32.mrf.mxu0  ;;  %v12094_v15 = vld [vmem:[#allocation3 + $0x9ac] sm:$0xf0] }
 0x5bb   :  { %6335 = vmatpush.bf16.msrb.mxu1 %v9560_v5  ;;  %v6129_v7 = vpop.f32.mrf.mxu1  ;;  %v10208_v5 = vor.u32 %v11998_v45, %v10207_v54  ;;  %v10592_v21 = vor.u32 %v12094_v15, %v10591_v14  ;;  %v9537_v54 = vld [vmem:[#allocation3 + $0x170] sm:$0xf0]  ;;  %v11875_v45 = vld [vmem:[#allocation3 + $0x2dc] sm:$0xf]  ;;  %v10520_v15 = vor.u32 %v12076_v62, %v10519_v32 }
 0x5bc   :  { %6348 = vmatpush.bf16.msrb.mxu2 %v9752_v20  ;;  %v6130_v16 = vadd.f32 %v6129_v7, %v6116_v4  ;;  %v10400_v20 = vor.u32 %v12046_v8, %v10399_v56  ;;  %v12124_v4 = vld [vmem:[#allocation3 + $0xa9c] sm:$0xf0]  ;;  %v9729_v7 = vld [vmem:[#allocation3 + $0x2f0] sm:$0xf0] }
 0x5bd   :  { %6361 = vmatpush.bf16.msrb.mxu3 %v9944_v22  ;;  %6323 = vmatmul.bf16.vlgmr.msrb.gmra.mxu0 %v13241_v50  ;;  %v11992_v22 = vld [vmem:[#allocation3 + $0x67c] sm:$0xf0]  ;;  %v9921_v8 = vld [vmem:[#allocation3 + $0x470] sm:$0xf0] }
 0x5be   :  { %6367 = vmatpush.bf16.msra.mxu0 %v10304_v23  ;;  %6336 = vmatmul.bf16.vlgmr.msrb.gmra.mxu1 %v13251_v43  ;;  %v10375_v23 = vld [vmem:[#allocation3 + $0x7e8] sm:$0xf]  ;;  %v10184_v10 = vor.u32 %v11992_v22, %v10183_v39  ;;  %v11821_v39 = vld [vmem:[#allocation3 + $0x12c] sm:$0xf]  ;;  %v9513_v22 = vld [vmem:[#allocation3 + $0x140] sm:$0xf0] }
 0x5bf   :  { %6380 = vmatpush.bf16.msra.mxu1 %v10496_v25  ;;  %6349 = vmatmul.bf16.vlgmr.msrb.gmra.mxu2 %v13236_v42 }
 0x5c0   :  { %6393 = vmatpush.bf16.msra.mxu2 %v10688_v19  ;;  %6362 = vmatmul.bf16.vlgmr.msrb.gmra.mxu3 %v13246_v13  ;;  %v10784_v19 = vor.u32 %v12142_v61, %v10783_v17  ;;  %v10113_v17 = vld [vmem:[#allocation3 + $0x5f0] sm:$0xf0] }
 0x5c1   :  { %6406 = vmatpush.bf16.msra.mxu3 %v10880_v34 }
 0x5c2   :  { %6368 = vmatpush.bf16.msra.mxu0 %v10280_v48  ;;  %v6142_v25 = vpop.f32.mrf.mxu2  ;;  %v6118_v48 = vpop.f32.mrf.mxu0 }
 0x5c3   :  { %6381 = vmatpush.bf16.msra.mxu1 %v10472_v49  ;;  %v6143_v34 = vadd.f32 %v6142_v25, %v6130_v16  ;;  %v6155_v63 = vpop.f32.mrf.mxu3  ;;  %v10376_v49 = vor.u32 %v12040_v27, %v10375_v23  ;;  %v11971_v16 = vld [vmem:[#allocation3 + $0x5dc] sm:$0xf]  ;;  %v11869_v23 = vld [vmem:[#allocation3 + $0x2ac] sm:$0xf]  ;;  %v9489_v48 = vld [vmem:[#allocation3 + $0x110] sm:$0xf0] }
 0x5c4   :  { %6394 = vmatpush.bf16.msra.mxu2 %v10664_v0  ;;  %v10568_v0 = vor.u32 %v12088_v35, %v10567_v9  ;;  %v10116_v25 = vor.u32 %v11971_v16, %v10113_v17  ;;  %v11917_v27 = vld [vmem:[#allocation3 + $0x42c] sm:$0xf]  ;;  %v9897_v9 = vld [vmem:[#allocation3 + $0x440] sm:$0xf0] }
 0x5c5   :  { %6407 = vmatpush.bf16.msra.mxu3 %v10856_v36  ;;  %v13293_v12 = vadd.f32 %v6155_v63, %v6143_v34  ;;  %v6131_v36 = vpop.f32.mrf.mxu1  ;;  %v11965_v35 = vld [vmem:[#allocation3 + $0x5ac] sm:$0xf]  ;;  %v10089_v34 = vld [vmem:[#allocation3 + $0x5c0] sm:$0xf0]  ;;  %v9516_v63 = vor.u32 %v11821_v39, %v9513_v22  ;;  %v9900_v41 = vor.u32 %v11917_v27, %v9897_v9 }
 0x5c6   :  { %6369 = vmatpush.bf16.msra.mxu0 %v10256_v47  ;;  %v12130_v47 = vld [vmem:[#allocation3 + $0xacc] sm:$0xf0]  ;;  %v11959_v36 = vld [vmem:[#allocation3 + $0x57c] sm:$0xf]  ;;  %v9609_v22 = vld [vmem:[#allocation3 + $0x200] sm:$0xf0] }
 0x5c7   :  { %6382 = vmatpush.bf16.msra.mxu1 %v10448_v57  ;;  %v10160_v57 = vor.u32 %v11986_v53, %v10159_v3  ;;  %v10736_v2 = vor.u32 %v12130_v47, %v10735_v44  ;;  %v9681_v3 = vld [vmem:[#allocation3 + $0x290] sm:$0xf0]  ;;  %v11911_v53 = vld [vmem:[#allocation3 + $0x3fc] sm:$0xf]  ;;  %v11809_v44 = vld [vmem:[#allocation3 + $0xcc] sm:$0xf] }
 0x5c8   :  { %6395 = vmatpush.bf16.msra.mxu2 %v10640_v46  ;;  %v10135_v46 = vld [vmem:[#allocation3 + $0x608] sm:$0xf]  ;;  %v9876_v24 = vor.u32 %v11911_v53, %v9873_v51  ;;  %v9465_v47 = vld [vmem:[#allocation3 + $0xe0] sm:$0xf0]  ;;  %v11941_v9 = vld [vmem:[#allocation3 + $0x4ec] sm:$0xf] }
 0x5c9   :  { %6408 = vmatpush.bf16.msra.mxu3 %v10832_v59  ;;  %v10327_v59 = vld [vmem:[#allocation3 + $0x788] sm:$0xf]  ;;  %v10136_v56 = vor.u32 %v11980_v31, %v10135_v46  ;;  %v9657_v31 = vld [vmem:[#allocation3 + $0x260] sm:$0xf0]  ;;  %v9468_v32 = vor.u32 %v11809_v44, %v9465_v47  ;;  %v9585_v51 = vld [vmem:[#allocation3 + $0x1d0] sm:$0xf0] }
 0x5ca   :  { %6370 = vmatpush.bf16.msra.mxu0 %v10232_v58  ;;  %v6144_v60 = vpop.f32.mrf.mxu2  ;;  %v10711_v58 = vld [vmem:[#allocation3 + $0xa88] sm:$0xf]  ;;  %v10328_v14 = vor.u32 %v12028_v33, %v10327_v59  ;;  %v11953_v59 = vld [vmem:[#allocation3 + $0x54c] sm:$0xf]  ;;  %v10041_v33 = vld [vmem:[#allocation3 + $0x560] sm:$0xf0] }
 0x5cb   :  { %6383 = vmatpush.bf16.msra.mxu1 %v10424_v55  ;;  %v6157_v55 = vpop.f32.mrf.mxu3  ;;  %v10712_v61 = vor.u32 %v12124_v4, %v10711_v58  ;;  %v11803_v58 = vld [vmem:[#allocation3 + $0x9c] sm:$0xf]  ;;  %v9441_v4 = vld [vmem:[#allocation3 + $0xb0] sm:$0xf0]  ;;  %v11785_v44 = vld [vmem:[#allocation3 + $0xc] sm:$0xf] }
 0x5cc   :  { %6396 = vmatpush.bf16.msra.mxu2 %v10616_v52  ;;  %v11827_v52 = vld [vmem:[#allocation3 + $0x15c] sm:$0xf]  ;;  %v9444_v16 = vor.u32 %v11803_v58, %v9441_v4  ;;  %v9369_v47 = vld [vmem:[#allocation3 + $0x20] sm:$0xf0]  ;;  %v10305_v4 = vld [vmem:[#allocation3 + $0x770] sm:$0xf0] }
 0x5cd   :  { %6409 = vmatpush.bf16.msra.mxu3 %v10808_v29  ;;  %v11923_v29 = vld [vmem:[#allocation3 + $0x45c] sm:$0xf] }
 0x5ce   :  { %6371 = vmatpush.bf16.msra.mxu0 %v10208_v5  ;;  %v9540_v5 = vor.u32 %v11827_v52, %v9537_v54  ;;  %v11851_v55 = vld [vmem:[#allocation3 + $0x21c] sm:$0xf] }
 0x5cf   :  { %6384 = vmatpush.bf16.msra.mxu1 %v10400_v20  ;;  %v9732_v20 = vor.u32 %v11875_v45, %v9729_v7  ;;  %v10044_v45 = vor.u32 %v11953_v59, %v10041_v33  ;;  %v11899_v7 = vld [vmem:[#allocation3 + $0x39c] sm:$0xf] }
 0x5d0   :  { %6397 = vmatpush.bf16.msra.mxu2 %v10592_v21  ;;  %v9924_v21 = vor.u32 %v11923_v29, %v9921_v8  ;;  %v9825_v29 = vld [vmem:[#allocation3 + $0x3b0] sm:$0xf0]  ;;  %v11947_v8 = vld [vmem:[#allocation3 + $0x51c] sm:$0xf] }
 0x5d1   :  { %6410 = vmatpush.bf16.msra.mxu3 %v10784_v19  ;;  %v9705_v19 = vld [vmem:[#allocation3 + $0x2c0] sm:$0xf0]  ;;  %v12019_v58 = vld [vmem:[#allocation3 + $0x75c] sm:$0xf] }
 0x5d2   :  { %6372 = vmatpush.bf16.msra.mxu0 %v10184_v10  ;;  %v9708_v1 = vor.u32 %v11869_v23, %v9705_v19  ;;  %v11815_v10 = vld [vmem:[#allocation3 + $0xfc] sm:$0xf]  ;;  %v11893_v23 = vld [vmem:[#allocation3 + $0x36c] sm:$0xf] }
 0x5d3   :  { %6385 = vmatpush.bf16.msra.mxu1 %v10376_v49  ;;  %v11863_v49 = vld [vmem:[#allocation3 + $0x27c] sm:$0xf]  ;;  %v9492_v38 = vor.u32 %v11815_v10, %v9489_v48 }
 0x5d4   :  { %6398 = vmatpush.bf16.msra.mxu2 %v10568_v0  ;;  %v10092_v0 = vor.u32 %v11965_v35, %v10089_v34  ;;  %v9684_v18 = vor.u32 %v11863_v49, %v9681_v3  ;;  %v9993_v35 = vld [vmem:[#allocation3 + $0x500] sm:$0xf0]  ;;  %v11791_v48 = vld [vmem:[#allocation3 + $0x3c] sm:$0xf]  ;;  %v9393_v49 = vld [vmem:[#allocation3 + $0x50] sm:$0xf0] }
 0x5d5   :  { %6411 = vmatpush.bf16.msra.mxu3 %v10760_v6  ;;  %v10065_v6 = vld [vmem:[#allocation3 + $0x590] sm:$0xf0]  ;;  %v9996_v53 = vor.u32 %v11941_v9, %v9993_v35 }
 0x5d6   :  { %6373 = vmatpush.bf16.msra.mxu0 %v10160_v57  ;;  %v11857_v57 = vld [vmem:[#allocation3 + $0x24c] sm:$0xf]  ;;  %v10068_v46 = vor.u32 %v11959_v36, %v10065_v6  ;;  %v11887_v36 = vld [vmem:[#allocation3 + $0x33c] sm:$0xf]  ;;  %v9777_v6 = vld [vmem:[#allocation3 + $0x350] sm:$0xf0] }
 0x5d7   :  { %6386 = vmatpush.bf16.msra.mxu1 %v10352_v37  ;;  %v11905_v37 = vld [vmem:[#allocation3 + $0x3cc] sm:$0xf] }
 0x5d8   :  { %6399 = vmatpush.bf16.msra.mxu2 %v10544_v40  ;;  %v9849_v40 = vld [vmem:[#allocation3 + $0x3e0] sm:$0xf0] }
 0x5d9   :  { %6412 = vmatpush.bf16.msra.mxu3 %v10736_v2  ;;  %v9660_v2 = vor.u32 %v11857_v57, %v9657_v31  ;;  %v9852_v62 = vor.u32 %v11905_v37, %v9849_v40  ;;  %v11833_v31 = vld [vmem:[#allocation3 + $0x18c] sm:$0xf]  ;;  %v9561_v37 = vld [vmem:[#allocation3 + $0x1a0] sm:$0xf0] }
 0x5da   :  { %6374 = vmatpush.bf16.msra.mxu0 %v10136_v56  ;;  %v6168_v60 = vpop.f32.mrf.mxu0  ;;  %v9633_v56 = vld [vmem:[#allocation3 + $0x230] sm:$0xf0]  ;;  %v11881_v40 = vld [vmem:[#allocation3 + $0x30c] sm:$0xf] }
 0x5db   :  { %6387 = vmatpush.bf16.msra.mxu1 %v10328_v14  ;;  %v6169_v52 = vadd.f32 %v6168_v60, %v13293_v12  ;;  %v6181_v54 = vpop.f32.mrf.mxu1  ;;  %v10017_v14 = vld [vmem:[#allocation3 + $0x530] sm:$0xf0]  ;;  %v9636_v17 = vor.u32 %v11851_v55, %v9633_v56  ;;  %v11929_v60 = vld [vmem:[#allocation3 + $0x48c] sm:$0xf]  ;;  %v12067_v55 = vld [vmem:[#allocation3 + $0x8dc] sm:$0xf] }
 0x5dc   :  { %6400 = vmatpush.bf16.msra.mxu2 %v10520_v15  ;;  %v10020_v12 = vor.u32 %v11947_v8, %v10017_v14  ;;  %v10689_v56 = vld [vmem:[#allocation3 + $0xa70] sm:$0xf0]  ;;  %v12163_v8 = vld [vmem:[#allocation3 + $0xbdc] sm:$0xf] }
 0x5dd   :  { %6413 = vmatpush.bf16.msra.mxu3 %v10712_v61  ;;  %6375 = vmatmul.bf16.vlgmr.msra.gmra.mxu0 %v13265_v28  ;;  %v6182_v15 = vadd.f32 %v6181_v54, %v6169_v52  ;;  %v9828_v61 = vor.u32 %v11899_v7, %v9825_v29  ;;  %v9372_v52 = vor.u32 %v11785_v44, %v9369_v47  ;;  %v10497_v54 = vld [vmem:[#allocation3 + $0x8f0] sm:$0xf0]  ;;  %v10425_v47 = vld [vmem:[#allocation3 + $0x860] sm:$0xf0] }
 0x5de   :  { %6419 = vmatpush.bf16.msrb.mxu0 %v9540_v5  ;;  %6388 = vmatmul.bf16.vlgmr.msra.gmra.mxu1 %v13275_v11  ;;  %v11797_v5 = vld [vmem:[#allocation3 + $0x6c] sm:$0xf]  ;;  %v9564_v7 = vor.u32 %v11833_v31, %v9561_v37  ;;  %v10881_v14 = vld [vmem:[#allocation3 + $0xbf0] sm:$0xf0]  ;;  %v10809_v37 = vld [vmem:[#allocation3 + $0xb60] sm:$0xf0] }
 0x5df   :  { %6432 = vmatpush.bf16.msrb.mxu1 %v9732_v20  ;;  %6401 = vmatmul.bf16.vlgmr.msra.gmra.mxu2 %v13260_v26  ;;  %v9417_v20 = vld [vmem:[#allocation3 + $0x80] sm:$0xf0]  ;;  %v12145_v31 = vld [vmem:[#allocation3 + $0xb4c] sm:$0xf] }
 0x5e0   :  { %6445 = vmatpush.bf16.msrb.mxu2 %v9924_v21  ;;  %6414 = vmatmul.bf16.vlgmr.msra.gmra.mxu3 %v13270_v30  ;;  %v11845_v21 = vld [vmem:[#allocation3 + $0x1ec] sm:$0xf]  ;;  %v9420_v34 = vor.u32 %v11797_v5, %v9417_v20  ;;  %v10281_v20 = vld [vmem:[#allocation3 + $0x740] sm:$0xf0] }
 0x5e1   :  { %6458 = vmatpush.bf16.msrb.mxu3 %v10116_v25  ;;  %v9801_v25 = vld [vmem:[#allocation3 + $0x380] sm:$0xf0]  ;;  %v12013_v5 = vld [vmem:[#allocation3 + $0x72c] sm:$0xf] }
 0x5e2   :  { %6420 = vmatpush.bf16.msrb.mxu0 %v9516_v63  ;;  %v6194_v39 = vpop.f32.mrf.mxu2  ;;  %v9804_v10 = vor.u32 %v11893_v23, %v9801_v25  ;;  %v10665_v23 = vld [vmem:[#allocation3 + $0xa40] sm:$0xf0]  ;;  %v12157_v25 = vld [vmem:[#allocation3 + $0xbac] sm:$0xf] }
 0x5e3   :  { %6433 = vmatpush.bf16.msrb.mxu1 %v9708_v1  ;;  %v6195_v19 = vadd.f32 %v6194_v39, %v6182_v15  ;;  %v6207_v27 = vpop.f32.mrf.mxu3  ;;  %v6170_v1 = vpop.f32.mrf.mxu0  ;;  %v10884_v39 = vor.u32 %v12163_v8, %v10881_v14 }
 0x5e4   :  { %6446 = vmatpush.bf16.msrb.mxu2 %v9900_v41  ;;  %v9612_v41 = vor.u32 %v11845_v21, %v9609_v22  ;;  %v6183_v3 = vpop.f32.mrf.mxu1  ;;  %v12061_v21 = vld [vmem:[#allocation3 + $0x8ac] sm:$0xf]  ;;  %v10257_v1 = vld [vmem:[#allocation3 + $0x710] sm:$0xf0] }
 0x5e5   :  { %6459 = vmatpush.bf16.msrb.mxu3 %v10092_v0  ;;  %v13300_v63 = vadd.f32 %v6207_v27, %v6195_v19  ;;  %v11839_v0 = vld [vmem:[#allocation3 + $0x1bc] sm:$0xf]  ;;  %v12109_v22 = vld [vmem:[#allocation3 + $0xa2c] sm:$0xf]  ;;  %v10857_v19 = vld [vmem:[#allocation3 + $0xbc0] sm:$0xf0]  ;;  %v10284_v27 = vor.u32 %v12013_v5, %v10281_v20 }
 0x5e6   :  { %6421 = vmatpush.bf16.msrb.mxu0 %v9492_v38  ;;  %v11935_v38 = vld [vmem:[#allocation3 + $0x4bc] sm:$0xf]  ;;  %v9588_v57 = vor.u32 %v11839_v0, %v9585_v51  ;;  %v10668_v35 = vor.u32 %v12109_v22, %v10665_v23  ;;  %v10641_v0 = vld [vmem:[#allocation3 + $0xa10] sm:$0xf0]  ;;  %v10377_v20 = vld [vmem:[#allocation3 + $0x800] sm:$0xf0] }
 0x5e7   :  { %6434 = vmatpush.bf16.msrb.mxu1 %v9684_v18  ;;  %v9969_v18 = vld [vmem:[#allocation3 + $0x4d0] sm:$0xf0]  ;;  %v12151_v3 = vld [vmem:[#allocation3 + $0xb7c] sm:$0xf]  ;;  %v12133_v23 = vld [vmem:[#allocation3 + $0xaec] sm:$0xf]  ;;  %12317 = vtanh.f32 %v13300_v63 }
 0x5e8   :  { %6447 = vmatpush.bf16.msrb.mxu2 %v9876_v24  ;;  %v9396_v24 = vor.u32 %v11791_v48, %v9393_v49  ;;  %v9972_v33 = vor.u32 %v11935_v38, %v9969_v18  ;;  %v10449_v48 = vld [vmem:[#allocation3 + $0x890] sm:$0xf0]  ;;  %v12103_v49 = vld [vmem:[#allocation3 + $0x9fc] sm:$0xf]  ;;  %v12001_v38 = vld [vmem:[#allocation3 + $0x6cc] sm:$0xf] }
 0x5e9   :  { %6460 = vmatpush.bf16.msrb.mxu3 %v10068_v46  ;;  %v9780_v46 = vor.u32 %v11887_v36, %v9777_v6  ;;  %v10644_v6 = vor.u32 %v12103_v49, %v10641_v0  ;;  %v10233_v18 = vld [vmem:[#allocation3 + $0x6e0] sm:$0xf0]  ;;  %v10353_v0 = vld [vmem:[#allocation3 + $0x7d0] sm:$0xf0]  ;;  %v11789_v63 = vld [vmem:[#allocation3 + $0x24] sm:$0xf0] }
 0x5ea   :  { %6422 = vmatpush.bf16.msrb.mxu0 %v9468_v32  ;;  %v6196_v59 = vpop.f32.mrf.mxu2  ;;  %v9753_v32 = vld [vmem:[#allocation3 + $0x320] sm:$0xf0] }
 0x5eb   :  { %6435 = vmatpush.bf16.msrb.mxu1 %v9660_v2  ;;  %v9945_v2 = vld [vmem:[#allocation3 + $0x4a0] sm:$0xf0]  ;;  %v9756_v29 = vor.u32 %v11881_v40, %v9753_v32  ;;  %v10236_v40 = vor.u32 %v12001_v38, %v10233_v18  ;;  %v11977_v38 = vld [vmem:[#allocation3 + $0x60c] sm:$0xf] }
 0x5ec   :  { %6448 = vmatpush.bf16.msrb.mxu2 %v9852_v62  ;;  %v6209_v62 = vpop.f32.mrf.mxu3  ;;  %v9948_v15 = vor.u32 %v11929_v60, %v9945_v2  ;;  %v11995_v60 = vld [vmem:[#allocation3 + $0x69c] sm:$0xf]  ;;  %v10209_v2 = vld [vmem:[#allocation3 + $0x6b0] sm:$0xf0]  ;;  %v10137_v18 = vld [vmem:[#allocation3 + $0x620] sm:$0xf0] }
 0x5ed   :  { %6461 = vmatpush.bf16.msrb.mxu3 %v10044_v45  ;;  %v12115_v45 = vld [vmem:[#allocation3 + $0xa5c] sm:$0xf] }
 0x5ee   :  { %6423 = vmatpush.bf16.msrb.mxu0 %v9444_v16  ;;  %v10308_v16 = vor.u32 %v12019_v58, %v10305_v4  ;;  %v12043_v62 = vld [vmem:[#allocation3 + $0x81c] sm:$0xf]  ;;  %v10812_v4 = vor.u32 %v12145_v31, %v10809_v37 }
 0x5ef   :  { %6436 = vmatpush.bf16.msrb.mxu1 %v9636_v17  ;;  %v10500_v17 = vor.u32 %v12067_v55, %v10497_v54  ;;  %v10401_v55 = vld [vmem:[#allocation3 + $0x830] sm:$0xf0] }
 0x5f0   :  { %6449 = vmatpush.bf16.msrb.mxu2 %v9828_v61  ;;  %v10692_v61 = vor.u32 %v12115_v45, %v10689_v56  ;;  %v10593_v54 = vld [vmem:[#allocation3 + $0x9b0] sm:$0xf0]  ;;  %v12139_v56 = vld [vmem:[#allocation3 + $0xb1c] sm:$0xf]  ;;  %v10404_v8 = vor.u32 %v12043_v62, %v10401_v55  ;;  %v9735_v62 = vld [vmem:[#allocation3 + $0x2e0] sm:$0xf] }
 0x5f1   :  { %6462 = vmatpush.bf16.msrb.mxu3 %v10020_v12  ;;  %v10473_v12 = vld [vmem:[#allocation3 + $0x8c0] sm:$0xf0]  ;;  %v9927_v55 = vld [vmem:[#allocation3 + $0x460] sm:$0xf] }
 0x5f2   :  { %6424 = vmatpush.bf16.msrb.mxu0 %v9420_v34  ;;  %v10476_v9 = vor.u32 %v12061_v21, %v10473_v12  ;;  %v12007_v34 = vld [vmem:[#allocation3 + $0x6fc] sm:$0xf]  ;;  %v12085_v21 = vld [vmem:[#allocation3 + $0x96c] sm:$0xf] }
 0x5f3   :  { %6437 = vmatpush.bf16.msrb.mxu1 %v9612_v41  ;;  %v12055_v41 = vld [vmem:[#allocation3 + $0x87c] sm:$0xf]  ;;  %v10260_v51 = vor.u32 %v12007_v34, %v10257_v1 }
 0x5f4   :  { %6450 = vmatpush.bf16.msrb.mxu2 %v9804_v10  ;;  %v10860_v10 = vor.u32 %v12157_v25, %v10857_v19  ;;  %v10452_v36 = vor.u32 %v12055_v41, %v10449_v48  ;;  %v10761_v25 = vld [vmem:[#allocation3 + $0xb00] sm:$0xf0]  ;;  %v11983_v1 = vld [vmem:[#allocation3 + $0x63c] sm:$0xf]  ;;  %v10161_v41 = vld [vmem:[#allocation3 + $0x650] sm:$0xf0] }
 0x5f5   :  { %6463 = vmatpush.bf16.msrb.mxu3 %v9996_v53  ;;  %v10833_v53 = vld [vmem:[#allocation3 + $0xb90] sm:$0xf0]  ;;  %v10764_v49 = vor.u32 %v12133_v23, %v10761_v25 }
 0x5f6   :  { %6425 = vmatpush.bf16.msrb.mxu0 %v9396_v24  ;;  %v12049_v24 = vld [vmem:[#allocation3 + $0x84c] sm:$0xf]  ;;  %v10836_v44 = vor.u32 %v12151_v3, %v10833_v53  ;;  %v12079_v3 = vld [vmem:[#allocation3 + $0x93c] sm:$0xf]  ;;  %v10545_v53 = vld [vmem:[#allocation3 + $0x950] sm:$0xf0] }
 0x5f7   :  { %6438 = vmatpush.bf16.msrb.mxu1 %v9588_v57  ;;  %v12097_v57 = vld [vmem:[#allocation3 + $0x9cc] sm:$0xf] }
 0x5f8   :  { %6451 = vmatpush.bf16.msrb.mxu2 %v9780_v46  ;;  %v10617_v46 = vld [vmem:[#allocation3 + $0x9e0] sm:$0xf0] }
 0x5f9   :  { %6464 = vmatpush.bf16.msrb.mxu3 %v9972_v33  ;;  %v10428_v33 = vor.u32 %v12049_v24, %v10425_v47  ;;  %v10620_v32 = vor.u32 %v12097_v57, %v10617_v46  ;;  %v12025_v47 = vld [vmem:[#allocation3 + $0x78c] sm:$0xf]  ;;  %v10329_v57 = vld [vmem:[#allocation3 + $0x7a0] sm:$0xf0] }
 0x5fa   :  { %6426 = vmatpush.bf16.msrb.mxu0 %v9372_v52  ;;  %v6220_v59 = vpop.f32.mrf.mxu0  ;;  %v12091_v52 = vld [vmem:[#allocation3 + $0x99c] sm:$0xf]  ;;  %v12073_v46 = vld [vmem:[#allocation3 + $0x90c] sm:$0xf] }
 0x5fb   :  { %6439 = vmatpush.bf16.msrb.mxu1 %v9564_v7  ;;  %v6233_v58 = vpop.f32.mrf.mxu1  ;;  %v10785_v7 = vld [vmem:[#allocation3 + $0xb30] sm:$0xf0]  ;;  %v10596_v14 = vor.u32 %v12091_v52, %v10593_v54  ;;  %v11927_v52 = vld [vmem:[#allocation3 + $0x474] sm:$0xf0]  ;;  %v10332_v54 = vor.u32 %v12025_v47, %v10329_v57  ;;  %v11909_v47 = vld [vmem:[#allocation3 + $0x3e4] sm:$0xf0] }
 0x5fc   :  { %6452 = vmatpush.bf16.msrb.mxu2 %v9756_v29  ;;  %v6234_v45 = vadd.f32 %v6233_v58, %v6220_v59  ;;  %v10212_v29 = vor.u32 %v11995_v60, %v10209_v2  ;;  %v10788_v5 = vor.u32 %v12139_v56, %v10785_v7  ;;  %v12121_v59 = vld [vmem:[#allocation3 + $0xa8c] sm:$0xf]  ;;  %v9543_v60 = vld [vmem:[#allocation3 + $0x160] sm:$0xf]  ;;  %v11831_v2 = vld [vmem:[#allocation3 + $0x174] sm:$0xf0]  ;;  %v10140_v58 = vor.u32 %v11977_v38, %v10137_v18 }
 0x5fd   :  { %6465 = vmatpush.bf16.msrb.mxu3 %v9948_v15  ;;  %6427 = vmatmul.bf16.vlgmr.msrb.gmra.mxu0 %v13241_v50  ;;  %v11989_v15 = vld [vmem:[#allocation3 + $0x66c] sm:$0xf]  ;;  %v10119_v56 = vld [vmem:[#allocation3 + $0x5e0] sm:$0xf]  ;;  %v11975_v7 = vld [vmem:[#allocation3 + $0x5f4] sm:$0xf0] }
 0x5fe   :  { %6471 = vmatpush.bf16.msra.mxu0 %v10308_v16  ;;  %6440 = vmatmul.bf16.vlgmr.msrb.gmra.mxu1 %v13251_v43  ;;  %v10185_v16 = vld [vmem:[#allocation3 + $0x680] sm:$0xf0]  ;;  %v9663_v38 = vld [vmem:[#allocation3 + $0x250] sm:$0xf] }
 0x5ff   :  { %6484 = vmatpush.bf16.msra.mxu1 %v10500_v17  ;;  %6453 = vmatmul.bf16.vlgmr.msrb.gmra.mxu2 %v13236_v42  ;;  %v12037_v17 = vld [vmem:[#allocation3 + $0x7ec] sm:$0xf]  ;;  %v10188_v19 = vor.u32 %v11989_v15, %v10185_v16  ;;  %v9928_v15 = vor.u32 %v11927_v52, %v9927_v55  ;;  %v9519_v16 = vld [vmem:[#allocation3 + $0x130] sm:$0xf]  ;;  %v9831_v55 = vld [vmem:[#allocation3 + $0x3a0] sm:$0xf] }
 0x600   :  { %6497 = vmatpush.bf16.msra.mxu2 %v10692_v61  ;;  %6466 = vmatmul.bf16.vlgmr.msrb.gmra.mxu3 %v13246_v13  ;;  %v10047_v57 = vld [vmem:[#allocation3 + $0x550] sm:$0xf]  ;;  %v11903_v52 = vld [vmem:[#allocation3 + $0x3b4] sm:$0xf0] }
 0x601   :  { %6510 = vmatpush.bf16.msra.mxu3 %v10884_v39  ;;  %v10569_v39 = vld [vmem:[#allocation3 + $0x980] sm:$0xf0] }
 0x602   :  { %6472 = vmatpush.bf16.msra.mxu0 %v10284_v27  ;;  %v6246_v61 = vpop.f32.mrf.mxu2  ;;  %v10572_v34 = vor.u32 %v12085_v21, %v10569_v39  ;;  %v9903_v21 = vld [vmem:[#allocation3 + $0x430] sm:$0xf]  ;;  %v11921_v39 = vld [vmem:[#allocation3 + $0x444] sm:$0xf0] }
 0x603   :  { %6485 = vmatpush.bf16.msra.mxu1 %v10476_v9  ;;  %v6247_v12 = vadd.f32 %v6246_v61, %v6234_v45  ;;  %v6259_v22 = vpop.f32.mrf.mxu3  ;;  %v6222_v9 = vpop.f32.mrf.mxu0  ;;  %v9711_v61 = vld [vmem:[#allocation3 + $0x2b0] sm:$0xf] }
 0x604   :  { %6498 = vmatpush.bf16.msra.mxu2 %v10668_v35  ;;  %v10380_v35 = vor.u32 %v12037_v17, %v10377_v20  ;;  %v6235_v48 = vpop.f32.mrf.mxu1  ;;  %v11825_v17 = vld [vmem:[#allocation3 + $0x144] sm:$0xf0]  ;;  %v9495_v9 = vld [vmem:[#allocation3 + $0x100] sm:$0xf] }
 0x605   :  { %6511 = vmatpush.bf16.msra.mxu3 %v10860_v10  ;;  %v13306_v27 = vadd.f32 %v6259_v22, %v6247_v12  ;;  %v12031_v10 = vld [vmem:[#allocation3 + $0x7bc] sm:$0xf]  ;;  %v11873_v20 = vld [vmem:[#allocation3 + $0x2c4] sm:$0xf0]  ;;  %v10095_v12 = vld [vmem:[#allocation3 + $0x5b0] sm:$0xf]  ;;  %v9520_v23 = vor.u32 %v11825_v17, %v9519_v16 }
 0x606   :  { %6473 = vmatpush.bf16.msra.mxu0 %v10260_v51  ;;  %v12127_v51 = vld [vmem:[#allocation3 + $0xabc] sm:$0xf]  ;;  %v10356_v24 = vor.u32 %v12031_v10, %v10353_v0  ;;  %v11969_v22 = vld [vmem:[#allocation3 + $0x5c4] sm:$0xf0]  ;;  %v9712_v25 = vor.u32 %v11873_v20, %v9711_v61  ;;  %v9879_v10 = vld [vmem:[#allocation3 + $0x400] sm:$0xf] }
 0x607   :  { %6486 = vmatpush.bf16.msra.mxu1 %v10452_v36  ;;  %v10737_v36 = vld [vmem:[#allocation3 + $0xad0] sm:$0xf0]  ;;  %v11915_v48 = vld [vmem:[#allocation3 + $0x414] sm:$0xf0]  ;;  %v9615_v16 = vld [vmem:[#allocation3 + $0x1f0] sm:$0xf] }
 0x608   :  { %6499 = vmatpush.bf16.msra.mxu2 %v10644_v6  ;;  %v10164_v6 = vor.u32 %v11983_v1, %v10161_v41  ;;  %v10740_v37 = vor.u32 %v12127_v51, %v10737_v36  ;;  %v10096_v1 = vor.u32 %v11969_v22, %v10095_v12  ;;  %v11867_v41 = vld [vmem:[#allocation3 + $0x294] sm:$0xf0]  ;;  %v9880_v51 = vor.u32 %v11915_v48, %v9879_v10  ;;  %v9471_v36 = vld [vmem:[#allocation3 + $0xd0] sm:$0xf]  ;;  %v11849_v20 = vld [vmem:[#allocation3 + $0x204] sm:$0xf0] }
 0x609   :  { %6512 = vmatpush.bf16.msra.mxu3 %v10836_v44  ;;  %v10548_v44 = vor.u32 %v12079_v3, %v10545_v53  ;;  %v11963_v0 = vld [vmem:[#allocation3 + $0x594] sm:$0xf0]  ;;  %v9999_v12 = vld [vmem:[#allocation3 + $0x4f0] sm:$0xf]  ;;  %v11945_v22 = vld [vmem:[#allocation3 + $0x504] sm:$0xf0] }
 0x60a   :  { %6474 = vmatpush.bf16.msra.mxu0 %v10236_v40  ;;  %v6248_v31 = vpop.f32.mrf.mxu2  ;;  %v10521_v40 = vld [vmem:[#allocation3 + $0x920] sm:$0xf0]  ;;  %v10000_v48 = vor.u32 %v11945_v22, %v9999_v12  ;;  %v10863_v12 = vld [vmem:[#allocation3 + $0xbb0] sm:$0xf]  ;;  %v12161_v22 = vld [vmem:[#allocation3 + $0xbc4] sm:$0xf0] }
 0x60b   :  { %6487 = vmatpush.bf16.msra.mxu1 %v10428_v33  ;;  %v10713_v33 = vld [vmem:[#allocation3 + $0xaa0] sm:$0xf0]  ;;  %v10524_v45 = vor.u32 %v12073_v46, %v10521_v40  ;;  %v11957_v46 = vld [vmem:[#allocation3 + $0x564] sm:$0xf0] }
 0x60c   :  { %6500 = vmatpush.bf16.msra.mxu2 %v10620_v32  ;;  %v6261_v32 = vpop.f32.mrf.mxu3 }
 0x60d   :  { %6513 = vmatpush.bf16.msra.mxu3 %v10812_v4  ;;  %v11879_v4 = vld [vmem:[#allocation3 + $0x2f4] sm:$0xf0] }
 0x60e   :  { %6475 = vmatpush.bf16.msra.mxu0 %v10212_v29  ;;  %v10716_v29 = vor.u32 %v12121_v59, %v10713_v33 }
 0x60f   :  { %6488 = vmatpush.bf16.msra.mxu1 %v10404_v8  ;;  %v9544_v8 = vor.u32 %v11831_v2, %v9543_v60  ;;  %v9447_v60 = vld [vmem:[#allocation3 + $0xa0] sm:$0xf]  ;;  %v11807_v2 = vld [vmem:[#allocation3 + $0xb4] sm:$0xf0] }
 0x610   :  { %6501 = vmatpush.bf16.msra.mxu2 %v10596_v14  ;;  %v9736_v14 = vor.u32 %v11879_v4, %v9735_v62  ;;  %v9639_v62 = vld [vmem:[#allocation3 + $0x220] sm:$0xf]  ;;  %v11855_v4 = vld [vmem:[#allocation3 + $0x234] sm:$0xf0] }
 0x611   :  { %6514 = vmatpush.bf16.msra.mxu3 %v10788_v5  ;;  %v10120_v5 = vor.u32 %v11975_v7, %v10119_v56  ;;  %v11951_v56 = vld [vmem:[#allocation3 + $0x534] sm:$0xf0]  ;;  %v9448_v7 = vor.u32 %v11807_v2, %v9447_v60  ;;  %v10503_v2 = vld [vmem:[#allocation3 + $0x8e0] sm:$0xf] }
 0x612   :  { %6476 = vmatpush.bf16.msra.mxu0 %v10188_v19  ;;  %v9904_v19 = vor.u32 %v11921_v39, %v9903_v21  ;;  %v9807_v21 = vld [vmem:[#allocation3 + $0x370] sm:$0xf]  ;;  %v11897_v39 = vld [vmem:[#allocation3 + $0x384] sm:$0xf0]  ;;  %v12023_v60 = vld [vmem:[#allocation3 + $0x774] sm:$0xf0] }
 0x613   :  { %6489 = vmatpush.bf16.msra.mxu1 %v10380_v35  ;;  %v11819_v35 = vld [vmem:[#allocation3 + $0x114] sm:$0xf0] }
 0x614   :  { %6502 = vmatpush.bf16.msra.mxu2 %v10572_v34  ;;  %v9687_v34 = vld [vmem:[#allocation3 + $0x280] sm:$0xf]  ;;  %v9496_v3 = vor.u32 %v11819_v35, %v9495_v9  ;;  %v9616_v9 = vor.u32 %v11849_v20, %v9615_v16  ;;  %v9808_v35 = vor.u32 %v11897_v39, %v9807_v21  ;;  %v10287_v16 = vld [vmem:[#allocation3 + $0x730] sm:$0xf]  ;;  %v12065_v20 = vld [vmem:[#allocation3 + $0x8c4] sm:$0xf0] }
 0x615   :  { %6515 = vmatpush.bf16.msra.mxu3 %v10764_v49  ;;  %v10071_v49 = vld [vmem:[#allocation3 + $0x580] sm:$0xf]  ;;  %v9688_v53 = vor.u32 %v11867_v41, %v9687_v34  ;;  %v10671_v21 = vld [vmem:[#allocation3 + $0xa30] sm:$0xf]  ;;  %v12113_v39 = vld [vmem:[#allocation3 + $0xa44] sm:$0xf0] }
 0x616   :  { %6477 = vmatpush.bf16.msra.mxu0 %v10164_v6  ;;  %v11813_v6 = vld [vmem:[#allocation3 + $0xe4] sm:$0xf0]  ;;  %v10072_v18 = vor.u32 %v11963_v0, %v10071_v49  ;;  %v9399_v34 = vld [vmem:[#allocation3 + $0x40] sm:$0xf]  ;;  %v11843_v49 = vld [vmem:[#allocation3 + $0x1d4] sm:$0xf0] }
 0x617   :  { %6490 = vmatpush.bf16.msra.mxu1 %v10356_v24  ;;  %v11861_v24 = vld [vmem:[#allocation3 + $0x264] sm:$0xf0]  ;;  %v9472_v31 = vor.u32 %v11813_v6, %v9471_v36  ;;  %v9591_v41 = vld [vmem:[#allocation3 + $0x1c0] sm:$0xf]  ;;  %v9375_v6 = vld [vmem:[#allocation3 + $0x10] sm:$0xf] }
 0x618   :  { %6503 = vmatpush.bf16.msra.mxu2 %v10548_v44  ;;  %v9855_v44 = vld [vmem:[#allocation3 + $0x3d0] sm:$0xf]  ;;  %v9664_v40 = vor.u32 %v11861_v24, %v9663_v38  ;;  %v9783_v0 = vld [vmem:[#allocation3 + $0x340] sm:$0xf]  ;;  %v9592_v38 = vor.u32 %v11843_v49, %v9591_v41  ;;  %v12059_v41 = vld [vmem:[#allocation3 + $0x894] sm:$0xf0] }
 0x619   :  { %6516 = vmatpush.bf16.msra.mxu3 %v10740_v37  ;;  %v9856_v59 = vor.u32 %v11909_v47, %v9855_v44  ;;  %v9567_v24 = vld [vmem:[#allocation3 + $0x190] sm:$0xf]  ;;  %v11837_v44 = vld [vmem:[#allocation3 + $0x1a4] sm:$0xf0]  ;;  %v10839_v49 = vld [vmem:[#allocation3 + $0xb80] sm:$0xf] }
 0x61a   :  { %6478 = vmatpush.bf16.msra.mxu0 %v10140_v58  ;;  %v6272_v37 = vpop.f32.mrf.mxu0  ;;  %v10048_v58 = vor.u32 %v11957_v46, %v10047_v57  ;;  %v9759_v47 = vld [vmem:[#allocation3 + $0x310] sm:$0xf] }
 0x61b   :  { %6491 = vmatpush.bf16.msra.mxu1 %v10332_v54  ;;  %v6273_v33 = vadd.f32 %v6272_v37, %v13306_v27  ;;  %v6285_v32 = vpop.f32.mrf.mxu1  ;;  %v9423_v27 = vld [vmem:[#allocation3 + $0x70] sm:$0xf] }
 0x61c   :  { %6504 = vmatpush.bf16.msra.mxu2 %v10524_v45  ;;  %v10023_v45 = vld [vmem:[#allocation3 + $0x520] sm:$0xf]  ;;  %v9951_v37 = vld [vmem:[#allocation3 + $0x490] sm:$0xf] }
 0x61d   :  { %6517 = vmatpush.bf16.msra.mxu3 %v10716_v29  ;;  %6479 = vmatmul.bf16.vlgmr.msra.gmra.mxu0 %v13265_v28  ;;  %v6286_v54 = vadd.f32 %v6285_v32, %v6273_v33  ;;  %v9640_v29 = vor.u32 %v11855_v4, %v9639_v62  ;;  %v10024_v17 = vor.u32 %v11951_v56, %v10023_v45  ;;  %v12318_v33 = vpop.eup %12317  ;;  %v10311_v32 = vld [vmem:[#allocation3 + $0x760] sm:$0xf]  ;;  %v12071_v4 = vld [vmem:[#allocation3 + $0x8f4] sm:$0xf0] }
 0x61e   :  { %6523 = vmatpush.bf16.msrb.mxu0 %v9544_v8  ;;  %6492 = vmatmul.bf16.vlgmr.msra.gmra.mxu1 %v13275_v11  ;;  %v9832_v8 = vor.u32 %v11903_v52, %v9831_v55  ;;  %v10695_v55 = vld [vmem:[#allocation3 + $0xa60] sm:$0xf]  ;;  %v12119_v52 = vld [vmem:[#allocation3 + $0xa74] sm:$0xf0]  ;;  %v9568_v45 = vor.u32 %v11837_v44, %v9567_v24  ;;  %v10623_v24 = vld [vmem:[#allocation3 + $0x9d0] sm:$0xf] }
 0x61f   :  { %6536 = vmatpush.bf16.msrb.mxu1 %v9736_v14  ;;  %6505 = vmatmul.bf16.vlgmr.msra.gmra.mxu2 %v13260_v26  ;;  %v12101_v44 = vld [vmem:[#allocation3 + $0x9e4] sm:$0xf0] }
 0x620   :  { %6549 = vmatpush.bf16.msrb.mxu2 %v9928_v15  ;;  %6518 = vmatmul.bf16.vlgmr.msra.gmra.mxu3 %v13270_v30  ;;  %v11801_v15 = vld [vmem:[#allocation3 + $0x84] sm:$0xf0] }
 0x621   :  { %6562 = vmatpush.bf16.msrb.mxu3 %v10120_v5 }
 0x622   :  { %6524 = vmatpush.bf16.msrb.mxu0 %v9520_v23  ;;  %v6298_v14 = vpop.f32.mrf.mxu2 }
 0x623   :  { %6537 = vmatpush.bf16.msrb.mxu1 %v9712_v25  ;;  %v6299_v61 = vadd.f32 %v6298_v14, %v6286_v54  ;;  %v6311_v5 = vpop.f32.mrf.mxu3  ;;  %v9424_v25 = vor.u32 %v11801_v15, %v9423_v27  ;;  %v6287_v10 = vpop.f32.mrf.mxu1  ;;  %v10312_v14 = vor.u32 %v12023_v60, %v10311_v32  ;;  %v10504_v27 = vor.u32 %v12071_v4, %v10503_v2  ;;  %v10407_v32 = vld [vmem:[#allocation3 + $0x820] sm:$0xf]  ;;  %v12095_v4 = vld [vmem:[#allocation3 + $0x9b4] sm:$0xf0] }
 0x624   :  { %6550 = vmatpush.bf16.msrb.mxu2 %v9904_v19  ;;  %v6274_v19 = vpop.f32.mrf.mxu0  ;;  %v10696_v15 = vor.u32 %v12119_v52, %v10695_v55  ;;  %v10647_v10 = vld [vmem:[#allocation3 + $0xa00] sm:$0xf] }
 0x625   :  { %6563 = vmatpush.bf16.msrb.mxu3 %v10096_v1  ;;  %v6312_v23 = vadd.f32 %v6311_v5, %v6299_v61  ;;  %v11795_v1 = vld [vmem:[#allocation3 + $0x54] sm:$0xf0]  ;;  %v10479_v61 = vld [vmem:[#allocation3 + $0x8b0] sm:$0xf]  ;;  %v10672_v19 = vor.u32 %v12113_v39, %v10671_v21  ;;  %v10791_v52 = vld [vmem:[#allocation3 + $0xb20] sm:$0xf] }
 0x626   :  { %6525 = vmatpush.bf16.msrb.mxu0 %v9496_v3  ;;  %v11891_v3 = vld [vmem:[#allocation3 + $0x354] sm:$0xf0]  ;;  %v9400_v36 = vor.u32 %v11795_v1, %v9399_v34  ;;  %v10455_v34 = vld [vmem:[#allocation3 + $0x880] sm:$0xf]  ;;  %v10864_v1 = vor.u32 %v12161_v22, %v10863_v12  ;;  %v10767_v39 = vld [vmem:[#allocation3 + $0xaf0] sm:$0xf] }
 0x627   :  { %6538 = vmatpush.bf16.msrb.mxu1 %v9688_v53  ;;  %12319 = vtanh.f32 %v6312_v23  ;;  %v9975_v53 = vld [vmem:[#allocation3 + $0x4c0] sm:$0xf]  ;;  %v12137_v12 = vld [vmem:[#allocation3 + $0xb04] sm:$0xf0] }
 0x628   :  { %6551 = vmatpush.bf16.msrb.mxu2 %v9880_v51  ;;  %v11939_v51 = vld [vmem:[#allocation3 + $0x4d4] sm:$0xf0] }
 0x629   :  { %6564 = vmatpush.bf16.msrb.mxu3 %v10072_v18  ;;  %v9784_v18 = vor.u32 %v11891_v3, %v9783_v0  ;;  %v9976_v46 = vor.u32 %v11939_v51, %v9975_v53  ;;  %v12155_v0 = vld [vmem:[#allocation3 + $0xb94] sm:$0xf0]  ;;  %v10456_v53 = vor.u32 %v12059_v41, %v10455_v34 }
 0x62a   :  { %6526 = vmatpush.bf16.msrb.mxu0 %v9472_v31  ;;  %v6300_v57 = vpop.f32.mrf.mxu2  ;;  %v11885_v31 = vld [vmem:[#allocation3 + $0x324] sm:$0xf0]  ;;  %v11987_v34 = vld [vmem:[#allocation3 + $0x654] sm:$0xf0] }
 0x62b   :  { %6539 = vmatpush.bf16.msrb.mxu1 %v9664_v40  ;;  %v11933_v40 = vld [vmem:[#allocation3 + $0x4a4] sm:$0xf0]  ;;  %v9760_v56 = vor.u32 %v11885_v31, %v9759_v47  ;;  %v10815_v47 = vld [vmem:[#allocation3 + $0xb50] sm:$0xf] }
 0x62c   :  { %6552 = vmatpush.bf16.msrb.mxu2 %v9856_v59  ;;  %v6313_v59 = vpop.f32.mrf.mxu3  ;;  %v12149_v57 = vld [vmem:[#allocation3 + $0xb64] sm:$0xf0] }
 0x62d   :  { %6565 = vmatpush.bf16.msrb.mxu3 %v10048_v58  ;;  %v12320_v62 = vpop.eup %12319  ;;  %v9376_v58 = vor.u32 %v11789_v63, %v9375_v6  ;;  %v12005_v6 = vld [vmem:[#allocation3 + $0x6e4] sm:$0xf0]  ;;  %v10431_v63 = vld [vmem:[#allocation3 + $0x850] sm:$0xf]  ;;  %v10215_v59 = vld [vmem:[#allocation3 + $0x6a0] sm:$0xf]  ;;  %v10816_v2 = vor.u32 %v12149_v57, %v10815_v47 }
 0x62e   :  { %6527 = vmatpush.bf16.msrb.mxu0 %v9448_v7  ;;  %v13314_v54 = vpack.c.bf16 %v12320_v62, %v12318_v33  ;;  %v10887_v7 = vld [vmem:[#allocation3 + $0xbe0] sm:$0xf]  ;;  %v11999_v33 = vld [vmem:[#allocation3 + $0x6b4] sm:$0xf0] }
 0x62f   :  { %6540 = vmatpush.bf16.msrb.mxu1 %v9640_v29  ;;  %v12167_v29 = vld [vmem:[#allocation3 + $0xbf4] sm:$0xf0] }
 0x630   :  { %6553 = vmatpush.bf16.msrb.mxu2 %v9832_v8  ;;  %v9952_v8 = vor.u32 %v11933_v40, %v9951_v37  ;;  %v10888_v5 = vor.u32 %v12167_v29, %v10887_v7  ;;  %v10624_v40 = vor.u32 %v12101_v44, %v10623_v24  ;;  %v12047_v62 = vld [vmem:[#allocation3 + $0x834] sm:$0xf0]  ;;  %v12029_v24 = vld [vmem:[#allocation3 + $0x7a4] sm:$0xf0]  ;;  %v10527_v44 = vld [vmem:[#allocation3 + $0x910] sm:$0xf] }
 0x631   :  { %6566 = vmatpush.bf16.msrb.mxu3 %v10024_v17  ;;  %v12017_v17 = vld [vmem:[#allocation3 + $0x744] sm:$0xf0]  ;;  %v10408_v7 = vor.u32 %v12047_v62, %v10407_v32  ;;  %v11876_v32 = vld [vmem:[#allocation3 + $0x2e4] sm:$0xf] }
 0x632   :  { %6528 = vmatpush.bf16.msrb.mxu0 %v9424_v25  ;;  %v10288_v23 = vor.u32 %v12017_v17, %v10287_v16  ;;  %v10480_v25 = vor.u32 %v12065_v20, %v10479_v61  ;;  %v12041_v17 = vld [vmem:[#allocation3 + $0x804] sm:$0xf0]  ;;  %v10575_v61 = vld [vmem:[#allocation3 + $0x970] sm:$0xf]  ;;  %v11924_v62 = vld [vmem:[#allocation3 + $0x464] sm:$0xf] }
 0x633   :  { %6541 = vmatpush.bf16.msrb.mxu1 %v9616_v9  ;;  %v10263_v9 = vld [vmem:[#allocation3 + $0x700] sm:$0xf] }
 0x634   :  { %6554 = vmatpush.bf16.msrb.mxu2 %v9808_v35  ;;  %v12011_v35 = vld [vmem:[#allocation3 + $0x714] sm:$0xf0] }
 0x635   :  { %6567 = vmatpush.bf16.msrb.mxu3 %v10000_v48  ;;  %v12107_v48 = vld [vmem:[#allocation3 + $0xa14] sm:$0xf0]  ;;  %v10264_v3 = vor.u32 %v12011_v35, %v10263_v9  ;;  %v10167_v35 = vld [vmem:[#allocation3 + $0x640] sm:$0xf] }
 0x636   :  { %6529 = vmatpush.bf16.msrb.mxu0 %v9400_v36  ;;  %v10648_v51 = vor.u32 %v12107_v48, %v10647_v10  ;;  %v10239_v36 = vld [vmem:[#allocation3 + $0x6d0] sm:$0xf]  ;;  %v10768_v10 = vor.u32 %v12137_v12, %v10767_v39  ;;  %v12035_v48 = vld [vmem:[#allocation3 + $0x7d4] sm:$0xf0] }
 0x637   :  { %6542 = vmatpush.bf16.msrb.mxu1 %v9592_v38  ;;  %v10840_v38 = vor.u32 %v12155_v0, %v10839_v49  ;;  %v10551_v49 = vld [vmem:[#allocation3 + $0x940] sm:$0xf]  ;;  %v12083_v0 = vld [vmem:[#allocation3 + $0x954] sm:$0xf0] }
 0x638   :  { %6555 = vmatpush.bf16.msrb.mxu2 %v9784_v18  ;;  %v12053_v18 = vld [vmem:[#allocation3 + $0x864] sm:$0xf0] }
 0x639   :  { %6568 = vmatpush.bf16.msrb.mxu3 %v9976_v46  ;;  %v10240_v46 = vor.u32 %v12005_v6, %v10239_v36  ;;  %v10432_v37 = vor.u32 %v12053_v18, %v10431_v63  ;;  %v10143_v36 = vld [vmem:[#allocation3 + $0x610] sm:$0xf]  ;;  %v11981_v6 = vld [vmem:[#allocation3 + $0x624] sm:$0xf0] }
 0x63a   :  { %6530 = vmatpush.bf16.msrb.mxu0 %v9376_v58  ;;  %v6324_v31 = vpop.f32.mrf.mxu0  ;;  %v10599_v58 = vld [vmem:[#allocation3 + $0x9a0] sm:$0xf]  ;;  %v10335_v18 = vld [vmem:[#allocation3 + $0x790] sm:$0xf] }
 0x63b   :  { %6543 = vmatpush.bf16.msrb.mxu1 %v9568_v45  ;;  %v6337_v60 = vpop.f32.mrf.mxu1  ;;  %v12143_v45 = vld [vmem:[#allocation3 + $0xb34] sm:$0xf0]  ;;  %v10600_v29 = vor.u32 %v12095_v4, %v10599_v58  ;;  %v9929_v58 = vld [vmem:[#allocation3 + $0x478] sm:$0xf0]  ;;  %v10336_v4 = vor.u32 %v12029_v24, %v10335_v18  ;;  %v9857_v18 = vld [vmem:[#allocation3 + $0x3e8] sm:$0xf0] }
 0x63c   :  { %6556 = vmatpush.bf16.msrb.mxu2 %v9760_v56  ;;  %v6338_v55 = vadd.f32 %v6337_v60, %v6324_v31  ;;  %v10216_v56 = vor.u32 %v11999_v33, %v10215_v59  ;;  %v10792_v16 = vor.u32 %v12143_v45, %v10791_v52  ;;  %v10719_v31 = vld [vmem:[#allocation3 + $0xa90] sm:$0xf]  ;;  %v11828_v59 = vld [vmem:[#allocation3 + $0x164] sm:$0xf]  ;;  %v9545_v33 = vld [vmem:[#allocation3 + $0x178] sm:$0xf0]  ;;  %v10144_v60 = vor.u32 %v11981_v6, %v10143_v36 }
 0x63d   :  { %6569 = vmatpush.bf16.msrb.mxu3 %v9952_v8  ;;  %6531 = vmatmul.bf16.vlgmr.msrb.gmra.mxu0 %v13241_v50  ;;  %v10191_v8 = vld [vmem:[#allocation3 + $0x670] sm:$0xf]  ;;  %v11972_v52 = vld [vmem:[#allocation3 + $0x5e4] sm:$0xf]  ;;  %v10121_v45 = vld [vmem:[#allocation3 + $0x5f8] sm:$0xf0] }
 0x63e   :  { %6575 = vmatpush.bf16.msra.mxu0 %v10312_v14  ;;  %6544 = vmatmul.bf16.vlgmr.msrb.gmra.mxu1 %v13251_v43  ;;  %v11993_v14 = vld [vmem:[#allocation3 + $0x684] sm:$0xf0]  ;;  %v11858_v36 = vld [vmem:[#allocation3 + $0x254] sm:$0xf] }
 0x63f   :  { %6588 = vmatpush.bf16.msra.mxu1 %v10504_v27  ;;  %6557 = vmatmul.bf16.vlgmr.msrb.gmra.mxu2 %v13236_v42  ;;  %v10383_v27 = vld [vmem:[#allocation3 + $0x7f0] sm:$0xf]  ;;  %v10192_v22 = vor.u32 %v11993_v14, %v10191_v8  ;;  %v9932_v8 = vor.u32 %v11924_v62, %v9929_v58  ;;  %v11822_v14 = vld [vmem:[#allocation3 + $0x134] sm:$0xf]  ;;  %v11900_v62 = vld [vmem:[#allocation3 + $0x3a4] sm:$0xf] }
 0x640   :  { %6601 = vmatpush.bf16.msra.mxu2 %v10696_v15  ;;  %6570 = vmatmul.bf16.vlgmr.msrb.gmra.mxu3 %v13246_v13  ;;  %v11954_v24 = vld [vmem:[#allocation3 + $0x554] sm:$0xf]  ;;  %v9833_v58 = vld [vmem:[#allocation3 + $0x3b8] sm:$0xf0] }
 0x641   :  { %6614 = vmatpush.bf16.msra.mxu3 %v10888_v5  ;;  %v12089_v5 = vld [vmem:[#allocation3 + $0x984] sm:$0xf0] }
 0x642   :  { %6576 = vmatpush.bf16.msra.mxu0 %v10288_v23  ;;  %v6350_v15 = vpop.f32.mrf.mxu2  ;;  %v10576_v9 = vor.u32 %v12089_v5, %v10575_v61  ;;  %v11918_v61 = vld [vmem:[#allocation3 + $0x434] sm:$0xf]  ;;  %v9905_v5 = vld [vmem:[#allocation3 + $0x448] sm:$0xf0] }
 0x643   :  { %6589 = vmatpush.bf16.msra.mxu1 %v10480_v25  ;;  %v6351_v20 = vadd.f32 %v6350_v15, %v6338_v55  ;;  %v6363_v21 = vpop.f32.mrf.mxu3  ;;  %v6326_v25 = vpop.f32.mrf.mxu0  ;;  %v11870_v15 = vld [vmem:[#allocation3 + $0x2b4] sm:$0xf] }
 0x644   :  { %6602 = vmatpush.bf16.msra.mxu2 %v10672_v19  ;;  %v10384_v19 = vor.u32 %v12041_v17, %v10383_v27  ;;  %v6339_v41 = vpop.f32.mrf.mxu1  ;;  %v9521_v27 = vld [vmem:[#allocation3 + $0x148] sm:$0xf0]  ;;  %v11816_v25 = vld [vmem:[#allocation3 + $0x104] sm:$0xf] }
 0x645   :  { %6615 = vmatpush.bf16.msra.mxu3 %v10864_v1  ;;  %v13320_v23 = vadd.f32 %v6363_v21, %v6351_v20  ;;  %v10359_v1 = vld [vmem:[#allocation3 + $0x7c0] sm:$0xf]  ;;  %v9713_v17 = vld [vmem:[#allocation3 + $0x2c8] sm:$0xf0]  ;;  %v11966_v20 = vld [vmem:[#allocation3 + $0x5b4] sm:$0xf]  ;;  %v9524_v39 = vor.u32 %v11822_v14, %v9521_v27 }
 0x646   :  { %6577 = vmatpush.bf16.msra.mxu0 %v10264_v3  ;;  %v10743_v3 = vld [vmem:[#allocation3 + $0xac0] sm:$0xf]  ;;  %v10360_v63 = vor.u32 %v12035_v48, %v10359_v1  ;;  %v10097_v21 = vld [vmem:[#allocation3 + $0x5c8] sm:$0xf0]  ;;  %v9716_v12 = vor.u32 %v11870_v15, %v9713_v17  ;;  %v11912_v1 = vld [vmem:[#allocation3 + $0x404] sm:$0xf] }
 0x647   :  { %6590 = vmatpush.bf16.msra.mxu1 %v10456_v53  ;;  %v12131_v53 = vld [vmem:[#allocation3 + $0xad4] sm:$0xf0]  ;;  %v9881_v41 = vld [vmem:[#allocation3 + $0x418] sm:$0xf0]  ;;  %v11846_v14 = vld [vmem:[#allocation3 + $0x1f4] sm:$0xf] }
 0x648   :  { %6603 = vmatpush.bf16.msra.mxu2 %v10648_v51  ;;  %v10168_v51 = vor.u32 %v11987_v34, %v10167_v35  ;;  %v10744_v57 = vor.u32 %v12131_v53, %v10743_v3  ;;  %v10100_v35 = vor.u32 %v11966_v20, %v10097_v21  ;;  %v9689_v34 = vld [vmem:[#allocation3 + $0x298] sm:$0xf0]  ;;  %v9884_v3 = vor.u32 %v11912_v1, %v9881_v41  ;;  %v11810_v53 = vld [vmem:[#allocation3 + $0xd4] sm:$0xf]  ;;  %v9617_v15 = vld [vmem:[#allocation3 + $0x208] sm:$0xf0] }
 0x649   :  { %6616 = vmatpush.bf16.msra.mxu3 %v10840_v38  ;;  %v10552_v38 = vor.u32 %v12083_v0, %v10551_v49  ;;  %v10073_v48 = vld [vmem:[#allocation3 + $0x598] sm:$0xf0]  ;;  %v9809_v17 = vld [vmem:[#allocation3 + $0x388] sm:$0xf0]  ;;  %v11942_v20 = vld [vmem:[#allocation3 + $0x4f4] sm:$0xf] }
 0x64a   :  { %6578 = vmatpush.bf16.msra.mxu0 %v10240_v46  ;;  %v6352_v47 = vpop.f32.mrf.mxu2  ;;  %v12077_v46 = vld [vmem:[#allocation3 + $0x924] sm:$0xf0]  ;;  %v10001_v21 = vld [vmem:[#allocation3 + $0x508] sm:$0xf0] }
 0x64b   :  { %6591 = vmatpush.bf16.msra.mxu1 %v10432_v37  ;;  %v12125_v37 = vld [vmem:[#allocation3 + $0xaa4] sm:$0xf0]  ;;  %v10528_v55 = vor.u32 %v12077_v46, %v10527_v44  ;;  %v10049_v44 = vld [vmem:[#allocation3 + $0x568] sm:$0xf0]  ;;  %v10004_v41 = vor.u32 %v11942_v20, %v10001_v21 }
 0x64c   :  { %6604 = vmatpush.bf16.msra.mxu2 %v10624_v40  ;;  %v6365_v40 = vpop.f32.mrf.mxu3 }
 0x64d   :  { %6617 = vmatpush.bf16.msra.mxu3 %v10816_v2  ;;  %v9737_v2 = vld [vmem:[#allocation3 + $0x2f8] sm:$0xf0] }
 0x64e   :  { %6579 = vmatpush.bf16.msra.mxu0 %v10216_v56  ;;  %v10720_v56 = vor.u32 %v12125_v37, %v10719_v31  ;;  %v11804_v37 = vld [vmem:[#allocation3 + $0xa4] sm:$0xf]  ;;  %v9449_v40 = vld [vmem:[#allocation3 + $0xb8] sm:$0xf0] }
 0x64f   :  { %6592 = vmatpush.bf16.msra.mxu1 %v10408_v7  ;;  %v9548_v7 = vor.u32 %v11828_v59, %v9545_v33  ;;  %v11852_v59 = vld [vmem:[#allocation3 + $0x224] sm:$0xf] }
 0x650   :  { %6605 = vmatpush.bf16.msra.mxu2 %v10600_v29  ;;  %v9740_v29 = vor.u32 %v11876_v32, %v9737_v2  ;;  %v9641_v2 = vld [vmem:[#allocation3 + $0x238] sm:$0xf0] }
 0x651   :  { %6618 = vmatpush.bf16.msra.mxu3 %v10792_v16  ;;  %v10124_v16 = vor.u32 %v11972_v52, %v10121_v45  ;;  %v9452_v45 = vor.u32 %v11804_v37, %v9449_v40  ;;  %v12020_v40 = vld [vmem:[#allocation3 + $0x764] sm:$0xf] }
 0x652   :  { %6580 = vmatpush.bf16.msra.mxu0 %v10192_v22  ;;  %v9908_v22 = vor.u32 %v11918_v61, %v9905_v5 }
 0x653   :  { %6593 = vmatpush.bf16.msra.mxu1 %v10384_v19  ;;  %v9497_v19 = vld [vmem:[#allocation3 + $0x118] sm:$0xf0] }
 0x654   :  { %6606 = vmatpush.bf16.msra.mxu2 %v10576_v9  ;;  %v11864_v9 = vld [vmem:[#allocation3 + $0x284] sm:$0xf]  ;;  %v9500_v49 = vor.u32 %v11816_v25, %v9497_v19  ;;  %v9620_v25 = vor.u32 %v11846_v14, %v9617_v15  ;;  %v10289_v14 = vld [vmem:[#allocation3 + $0x748] sm:$0xf0] }
 0x655   :  { %6619 = vmatpush.bf16.msra.mxu3 %v10768_v10  ;;  %v11960_v10 = vld [vmem:[#allocation3 + $0x584] sm:$0xf]  ;;  %v9692_v0 = vor.u32 %v11864_v9, %v9689_v34  ;;  %v10481_v15 = vld [vmem:[#allocation3 + $0x8c8] sm:$0xf0] }
 0x656   :  { %6581 = vmatpush.bf16.msra.mxu0 %v10168_v51  ;;  %v9473_v51 = vld [vmem:[#allocation3 + $0xe8] sm:$0xf0]  ;;  %v10076_v6 = vor.u32 %v11960_v10, %v10073_v48  ;;  %v11792_v9 = vld [vmem:[#allocation3 + $0x44] sm:$0xf]  ;;  %v9593_v10 = vld [vmem:[#allocation3 + $0x1d8] sm:$0xf0] }
 0x657   :  { %6594 = vmatpush.bf16.msra.mxu1 %v10360_v63  ;;  %v9665_v63 = vld [vmem:[#allocation3 + $0x268] sm:$0xf0]  ;;  %v9476_v47 = vor.u32 %v11810_v53, %v9473_v51  ;;  %v11840_v34 = vld [vmem:[#allocation3 + $0x1c4] sm:$0xf]  ;;  %v11786_v51 = vld [vmem:[#allocation3 + $0x14] sm:$0xf] }
 0x658   :  { %6607 = vmatpush.bf16.msra.mxu2 %v10552_v38  ;;  %v11906_v38 = vld [vmem:[#allocation3 + $0x3d4] sm:$0xf]  ;;  %v9668_v46 = vor.u32 %v11858_v36, %v9665_v63  ;;  %v11888_v48 = vld [vmem:[#allocation3 + $0x344] sm:$0xf]  ;;  %v9377_v36 = vld [vmem:[#allocation3 + $0x28] sm:$0xf0] }
 0x659   :  { %6620 = vmatpush.bf16.msra.mxu3 %v10744_v57  ;;  %v9860_v31 = vor.u32 %v11906_v38, %v9857_v18  ;;  %v11834_v38 = vld [vmem:[#allocation3 + $0x194] sm:$0xf]  ;;  %v9569_v18 = vld [vmem:[#allocation3 + $0x1a8] sm:$0xf0] }
 0x65a   :  { %6582 = vmatpush.bf16.msra.mxu0 %v10144_v60  ;;  %v6376_v57 = vpop.f32.mrf.mxu0  ;;  %v10052_v60 = vor.u32 %v11954_v24, %v10049_v44  ;;  %v11882_v24 = vld [vmem:[#allocation3 + $0x314] sm:$0xf] }
 0x65b   :  { %6595 = vmatpush.bf16.msra.mxu1 %v10336_v4  ;;  %v6377_v33 = vadd.f32 %v6376_v57, %v13320_v23  ;;  %v6389_v32 = vpop.f32.mrf.mxu1  ;;  %v11948_v4 = vld [vmem:[#allocation3 + $0x524] sm:$0xf]  ;;  %v9761_v57 = vld [vmem:[#allocation3 + $0x328] sm:$0xf0] }
 0x65c   :  { %6608 = vmatpush.bf16.msra.mxu2 %v10528_v55  ;;  %v10025_v55 = vld [vmem:[#allocation3 + $0x538] sm:$0xf0] }
 0x65d   :  { %6621 = vmatpush.bf16.msra.mxu3 %v10720_v56  ;;  %6583 = vmatmul.bf16.vlgmr.msra.gmra.mxu0 %v13265_v28  ;;  %v6390_v52 = vadd.f32 %v6389_v32, %v6377_v33  ;;  %v9644_v56 = vor.u32 %v11852_v59, %v9641_v2  ;;  %v10028_v23 = vor.u32 %v11948_v4, %v10025_v55  ;;  %v10313_v59 = vld [vmem:[#allocation3 + $0x778] sm:$0xf0]  ;;  %v12068_v33 = vld [vmem:[#allocation3 + $0x8e4] sm:$0xf] }
 0x65e   :  { %6627 = vmatpush.bf16.msrb.mxu0 %v9548_v7  ;;  %6596 = vmatmul.bf16.vlgmr.msra.gmra.mxu1 %v13275_v11  ;;  %v9836_v7 = vor.u32 %v11900_v62, %v9833_v58  ;;  %v9380_v32 = vor.u32 %v11786_v51, %v9377_v36  ;;  %v12116_v2 = vld [vmem:[#allocation3 + $0xa64] sm:$0xf]  ;;  %v10697_v62 = vld [vmem:[#allocation3 + $0xa78] sm:$0xf0]  ;;  %v9572_v58 = vor.u32 %v11834_v38, %v9569_v18  ;;  %v10433_v36 = vld [vmem:[#allocation3 + $0x868] sm:$0xf0] }
 0x65f   :  { %6640 = vmatpush.bf16.msrb.mxu1 %v9740_v29  ;;  %6609 = vmatmul.bf16.vlgmr.msra.gmra.mxu2 %v13260_v26  ;;  %v11798_v29 = vld [vmem:[#allocation3 + $0x74] sm:$0xf]  ;;  %v9764_v4 = vor.u32 %v11882_v24, %v9761_v57  ;;  %v12164_v55 = vld [vmem:[#allocation3 + $0xbe4] sm:$0xf] }
 0x660   :  { %6653 = vmatpush.bf16.msrb.mxu2 %v9932_v8  ;;  %6622 = vmatmul.bf16.vlgmr.msra.gmra.mxu3 %v13270_v30  ;;  %v9425_v8 = vld [vmem:[#allocation3 + $0x88] sm:$0xf0]  ;;  %v12146_v38 = vld [vmem:[#allocation3 + $0xb54] sm:$0xf]  ;;  %v12044_v57 = vld [vmem:[#allocation3 + $0x824] sm:$0xf] }
 0x661   :  { %6666 = vmatpush.bf16.msrb.mxu3 %v10124_v16  ;;  %v11894_v16 = vld [vmem:[#allocation3 + $0x374] sm:$0xf] }
 0x662   :  { %6628 = vmatpush.bf16.msrb.mxu0 %v9524_v39  ;;  %v6402_v27 = vpop.f32.mrf.mxu2  ;;  %v9428_v39 = vor.u32 %v11798_v29, %v9425_v8  ;;  %v9812_v19 = vor.u32 %v11894_v16, %v9809_v17  ;;  %v10700_v29 = vor.u32 %v12116_v2, %v10697_v62  ;;  %v12014_v8 = vld [vmem:[#allocation3 + $0x734] sm:$0xf]  ;;  %v10673_v17 = vld [vmem:[#allocation3 + $0xa48] sm:$0xf0] }
 0x663   :  { %6641 = vmatpush.bf16.msrb.mxu1 %v9716_v12  ;;  %v6403_v61 = vadd.f32 %v6402_v27, %v6390_v52  ;;  %v6415_v5 = vpop.f32.mrf.mxu3  ;;  %v6391_v1 = vpop.f32.mrf.mxu1  ;;  %v10889_v52 = vld [vmem:[#allocation3 + $0xbf8] sm:$0xf0]  ;;  %v12062_v27 = vld [vmem:[#allocation3 + $0x8b4] sm:$0xf]  ;;  %v10292_v20 = vor.u32 %v12014_v8, %v10289_v14  ;;  %v10577_v8 = vld [vmem:[#allocation3 + $0x988] sm:$0xf0] }
 0x664   :  { %6654 = vmatpush.bf16.msrb.mxu2 %v9908_v22  ;;  %v6378_v22 = vpop.f32.mrf.mxu0  ;;  %v12110_v16 = vld [vmem:[#allocation3 + $0xa34] sm:$0xf]  ;;  %v10484_v21 = vor.u32 %v12062_v27, %v10481_v15  ;;  %v10649_v1 = vld [vmem:[#allocation3 + $0xa18] sm:$0xf0]  ;;  %v10769_v15 = vld [vmem:[#allocation3 + $0xb08] sm:$0xf0] }
 0x665   :  { %6667 = vmatpush.bf16.msrb.mxu3 %v10100_v35  ;;  %v13327_v12 = vadd.f32 %v6415_v5, %v6403_v61  ;;  %v9401_v35 = vld [vmem:[#allocation3 + $0x58] sm:$0xf0]  ;;  %v12158_v61 = vld [vmem:[#allocation3 + $0xbb4] sm:$0xf]  ;;  %v10865_v5 = vld [vmem:[#allocation3 + $0xbc8] sm:$0xf0] }
 0x666   :  { %6629 = vmatpush.bf16.msrb.mxu0 %v9500_v49  ;;  %v9785_v49 = vld [vmem:[#allocation3 + $0x358] sm:$0xf0]  ;;  %v9404_v53 = vor.u32 %v11792_v9, %v9401_v35  ;;  %v12008_v22 = vld [vmem:[#allocation3 + $0x704] sm:$0xf]  ;;  %v10868_v9 = vor.u32 %v12158_v61, %v10865_v5 }
 0x667   :  { %6642 = vmatpush.bf16.msrb.mxu1 %v9692_v0  ;;  %v11936_v0 = vld [vmem:[#allocation3 + $0x4c4] sm:$0xf]  ;;  %v9788_v63 = vor.u32 %v11888_v48, %v9785_v49  ;;  %v10457_v35 = vld [vmem:[#allocation3 + $0x898] sm:$0xf0]  ;;  %12321 = vtanh.f32 %v13327_v12 }
 0x668   :  { %6655 = vmatpush.bf16.msrb.mxu2 %v9884_v3  ;;  %v9977_v3 = vld [vmem:[#allocation3 + $0x4d8] sm:$0xf0] }
 0x669   :  { %6668 = vmatpush.bf16.msrb.mxu3 %v10076_v6  ;;  %v9596_v6 = vor.u32 %v11840_v34, %v9593_v10  ;;  %v12104_v34 = vld [vmem:[#allocation3 + $0xa04] sm:$0xf]  ;;  %v10841_v10 = vld [vmem:[#allocation3 + $0xb98] sm:$0xf0] }
 0x66a   :  { %6630 = vmatpush.bf16.msrb.mxu0 %v9476_v47  ;;  %v6404_v44 = vpop.f32.mrf.mxu2  ;;  %v9980_v47 = vor.u32 %v11936_v0, %v9977_v3  ;;  %v10652_v0 = vor.u32 %v12104_v34, %v10649_v1  ;;  %v12002_v3 = vld [vmem:[#allocation3 + $0x6d4] sm:$0xf]  ;;  %v10553_v34 = vld [vmem:[#allocation3 + $0x958] sm:$0xf0]  ;;  %v12128_v1 = vld [vmem:[#allocation3 + $0xac4] sm:$0xf] }
 0x66b   :  { %6643 = vmatpush.bf16.msrb.mxu1 %v9668_v46  ;;  %v11930_v46 = vld [vmem:[#allocation3 + $0x494] sm:$0xf]  ;;  %v6417_v37 = vpop.f32.mrf.mxu3  ;;  %v11996_v44 = vld [vmem:[#allocation3 + $0x6a4] sm:$0xf] }
 0x66c   :  { %6656 = vmatpush.bf16.msrb.mxu2 %v9860_v31  ;;  %v9953_v31 = vld [vmem:[#allocation3 + $0x4a8] sm:$0xf0]  ;;  %v10409_v37 = vld [vmem:[#allocation3 + $0x838] sm:$0xf0] }
 0x66d   :  { %6669 = vmatpush.bf16.msrb.mxu3 %v10052_v60  ;;  %v10505_v60 = vld [vmem:[#allocation3 + $0x8f8] sm:$0xf0]  ;;  %v10412_v62 = vor.u32 %v12044_v57, %v10409_v37 }
 0x66e   :  { %6631 = vmatpush.bf16.msrb.mxu0 %v9452_v45  ;;  %v9956_v45 = vor.u32 %v11930_v46, %v9953_v31 }
 0x66f   :  { %6644 = vmatpush.bf16.msrb.mxu1 %v9644_v56  ;;  %v10316_v56 = vor.u32 %v12020_v40, %v10313_v59  ;;  %v12092_v40 = vld [vmem:[#allocation3 + $0x9a4] sm:$0xf]  ;;  %v10601_v59 = vld [vmem:[#allocation3 + $0x9b8] sm:$0xf0] }
 0x670   :  { %6657 = vmatpush.bf16.msrb.mxu2 %v9836_v7  ;;  %v10508_v7 = vor.u32 %v12068_v33, %v10505_v60  ;;  %v10793_v60 = vld [vmem:[#allocation3 + $0xb38] sm:$0xf0] }
 0x671   :  { %6670 = vmatpush.bf16.msrb.mxu3 %v10028_v23  ;;  %v10892_v23 = vor.u32 %v12164_v55, %v10889_v52  ;;  %v10193_v55 = vld [vmem:[#allocation3 + $0x688] sm:$0xf0]  ;;  %v12038_v52 = vld [vmem:[#allocation3 + $0x7f4] sm:$0xf] }
 0x672   :  { %6632 = vmatpush.bf16.msrb.mxu0 %v9428_v39  ;;  %v10676_v39 = vor.u32 %v12110_v16, %v10673_v17 }
 0x673   :  { %6645 = vmatpush.bf16.msrb.mxu1 %v9620_v25  ;;  %v10265_v25 = vld [vmem:[#allocation3 + $0x718] sm:$0xf0] }
 0x674   :  { %6658 = vmatpush.bf16.msrb.mxu2 %v9812_v19  ;;  %v12056_v19 = vld [vmem:[#allocation3 + $0x884] sm:$0xf]  ;;  %v10268_v48 = vor.u32 %v12008_v22, %v10265_v25 }
 0x675   :  { %6671 = vmatpush.bf16.msrb.mxu3 %v10004_v41  ;;  %v12152_v41 = vld [vmem:[#allocation3 + $0xb84] sm:$0xf]  ;;  %v10460_v49 = vor.u32 %v12056_v19, %v10457_v35 }
 0x676   :  { %6633 = vmatpush.bf16.msrb.mxu0 %v9404_v53  ;;  %v10241_v53 = vld [vmem:[#allocation3 + $0x6e8] sm:$0xf0]  ;;  %v10844_v51 = vor.u32 %v12152_v41, %v10841_v10  ;;  %v12032_v22 = vld [vmem:[#allocation3 + $0x7c4] sm:$0xf]  ;;  %v10745_v41 = vld [vmem:[#allocation3 + $0xad8] sm:$0xf0] }
 0x677   :  { %6646 = vmatpush.bf16.msrb.mxu1 %v9596_v6  ;;  %v12098_v6 = vld [vmem:[#allocation3 + $0x9d4] sm:$0xf]  ;;  %v12080_v35 = vld [vmem:[#allocation3 + $0x944] sm:$0xf] }
 0x678   :  { %6659 = vmatpush.bf16.msrb.mxu2 %v9788_v63  ;;  %v10625_v63 = vld [vmem:[#allocation3 + $0x9e8] sm:$0xf0] }
 0x679   :  { %6672 = vmatpush.bf16.msrb.mxu3 %v9980_v47  ;;  %v10628_v24 = vor.u32 %v12098_v6, %v10625_v63  ;;  %v10217_v47 = vld [vmem:[#allocation3 + $0x6b8] sm:$0xf0]  ;;  %v12074_v6 = vld [vmem:[#allocation3 + $0x914] sm:$0xf]  ;;  %v10529_v63 = vld [vmem:[#allocation3 + $0x928] sm:$0xf0] }
 0x67a   :  { %6634 = vmatpush.bf16.msrb.mxu0 %v9380_v32  ;;  %v6428_v18 = vpop.f32.mrf.mxu0  ;;  %v12140_v32 = vld [vmem:[#allocation3 + $0xb24] sm:$0xf]  ;;  %v10220_v2 = vor.u32 %v11996_v44, %v10217_v47 }
 0x67b   :  { %6647 = vmatpush.bf16.msrb.mxu1 %v9572_v58  ;;  %v6441_v46 = vpop.f32.mrf.mxu1  ;;  %v10604_v58 = vor.u32 %v12092_v40, %v10601_v59 }
 0x67c   :  { %6660 = vmatpush.bf16.msrb.mxu2 %v9764_v4  ;;  %v6442_v33 = vadd.f32 %v6441_v46, %v6428_v18  ;;  %v11990_v4 = vld [vmem:[#allocation3 + $0x674] sm:$0xf] }
 0x67d   :  { %6673 = vmatpush.bf16.msrb.mxu3 %v9956_v45  ;;  %6635 = vmatmul.bf16.vlgmr.msrb.gmra.mxu0 %v13241_v50  ;;  %v10817_v50 = vld [vmem:[#allocation3 + $0xb68] sm:$0xf0]  ;;  %v10196_v16 = vor.u32 %v11990_v4, %v10193_v55 }
 0x67e   :  { %6679 = vmatpush.bf16.msra.mxu0 %v10316_v56  ;;  %6648 = vmatmul.bf16.vlgmr.msrb.gmra.mxu1 %v13251_v43  ;;  %v10820_v31 = vor.u32 %v12146_v38, %v10817_v50  ;;  %v10796_v56 = vor.u32 %v12140_v32, %v10793_v60  ;;  %v12122_v50 = vld [vmem:[#allocation3 + $0xa94] sm:$0xf] }
 0x67f   :  { %6692 = vmatpush.bf16.msra.mxu1 %v10508_v7  ;;  %6661 = vmatmul.bf16.vlgmr.msrb.gmra.mxu2 %v13236_v42  ;;  %v12050_v42 = vld [vmem:[#allocation3 + $0x854] sm:$0xf]  ;;  %v10385_v7 = vld [vmem:[#allocation3 + $0x808] sm:$0xf0] }
 0x680   :  { %6705 = vmatpush.bf16.msra.mxu2 %v10700_v29  ;;  %6674 = vmatmul.bf16.vlgmr.msrb.gmra.mxu3 %v13246_v13  ;;  %v10244_v13 = vor.u32 %v12002_v3, %v10241_v53  ;;  %v10436_v43 = vor.u32 %v12050_v42, %v10433_v36  ;;  %v12086_v29 = vld [vmem:[#allocation3 + $0x974] sm:$0xf]  ;;  %v10388_v5 = vor.u32 %v12038_v52, %v10385_v7  ;;  %v10145_v3 = vld [vmem:[#allocation3 + $0x628] sm:$0xf0] }
 0x681   :  { %6718 = vmatpush.bf16.msra.mxu3 %v10892_v23  ;;  %v12134_v23 = vld [vmem:[#allocation3 + $0xaf4] sm:$0xf]  ;;  %v10337_v36 = vld [vmem:[#allocation3 + $0x7a8] sm:$0xf0] }
 0x682   :  { %6680 = vmatpush.bf16.msra.mxu0 %v10292_v20  ;;  %v6454_v45 = vpop.f32.mrf.mxu2  ;;  %v6430_v61 = vpop.f32.mrf.mxu0  ;;  %v10580_v20 = vor.u32 %v12086_v29, %v10577_v8  ;;  %v10772_v19 = vor.u32 %v12134_v23, %v10769_v15  ;;  %v12026_v53 = vld [vmem:[#allocation3 + $0x794] sm:$0xf] }
 0x683   :  { %6693 = vmatpush.bf16.msra.mxu1 %v10484_v21  ;;  %v6455_v14 = vadd.f32 %v6454_v45, %v6442_v33  ;;  %v6467_v27 = vpop.f32.mrf.mxu3  ;;  %v11984_v21 = vld [vmem:[#allocation3 + $0x644] sm:$0xf]  ;;  %v6443_v25 = vpop.f32.mrf.mxu1 }
 0x684   :  { %6706 = vmatpush.bf16.msra.mxu2 %v10676_v39  ;;  %v10169_v39 = vld [vmem:[#allocation3 + $0x658] sm:$0xf0] }
 0x685   :  { %6719 = vmatpush.bf16.msra.mxu3 %v10868_v9  ;;  %v6468_v17 = vadd.f32 %v6467_v27, %v6455_v14  ;;  %v10361_v9 = vld [vmem:[#allocation3 + $0x7d8] sm:$0xf0]  ;;  %v10172_v10 = vor.u32 %v11984_v21, %v10169_v39 }
 0x686   :  { %6681 = vmatpush.bf16.msra.mxu0 %v10268_v48  ;;  %v10364_v48 = vor.u32 %v12032_v22, %v10361_v9 }
 0x687   :  { %6694 = vmatpush.bf16.msra.mxu1 %v10460_v49  ;;  %v10556_v49 = vor.u32 %v12080_v35, %v10553_v34 }
 0x688   :  { %6707 = vmatpush.bf16.msra.mxu2 %v10652_v0  ;;  %v11978_v0 = vld [vmem:[#allocation3 + $0x614] sm:$0xf] }
 0x689   :  { %6720 = vmatpush.bf16.msra.mxu3 %v10844_v51  ;;  %v10748_v51 = vor.u32 %v12128_v1, %v10745_v41  ;;  %v10148_v18 = vor.u32 %v11978_v0, %v10145_v3 }
 0x68a   :  { %6682 = vmatpush.bf16.msra.mxu0 %v10244_v13  ;;  %v6456_v42 = vpop.f32.mrf.mxu2  ;;  %v10721_v13 = vld [vmem:[#allocation3 + $0xaa8] sm:$0xf0] }
 0x68b   :  { %6695 = vmatpush.bf16.msra.mxu1 %v10436_v43  ;;  %v6469_v38 = vpop.f32.mrf.mxu3  ;;  %v10340_v43 = vor.u32 %v12026_v53, %v10337_v36  ;;  %v10724_v44 = vor.u32 %v12122_v50, %v10721_v13 }
 0x68c   :  { %6708 = vmatpush.bf16.msra.mxu2 %v10628_v24  ;;  %v10532_v24 = vor.u32 %v12074_v6, %v10529_v63 }
 0x68d   :  { %6721 = vmatpush.bf16.msra.mxu3 %v10820_v31 }
 0x68e   :  { %6683 = vmatpush.bf16.msra.mxu0 %v10220_v2 }
 0x68f   :  { %6696 = vmatpush.bf16.msra.mxu1 %v10412_v62 }
 0x690   :  { %6709 = vmatpush.bf16.msra.mxu2 %v10604_v58 }
 0x691   :  { %6722 = vmatpush.bf16.msra.mxu3 %v10796_v56 }
 0x692   :  { %6684 = vmatpush.bf16.msra.mxu0 %v10196_v16 }
 0x693   :  { %6697 = vmatpush.bf16.msra.mxu1 %v10388_v5 }
 0x694   :  { %6710 = vmatpush.bf16.msra.mxu2 %v10580_v20 }
 0x695   :  { %6723 = vmatpush.bf16.msra.mxu3 %v10772_v19 }
 0x696   :  { %6685 = vmatpush.bf16.msra.mxu0 %v10172_v10 }
 0x697   :  { %6698 = vmatpush.bf16.msra.mxu1 %v10364_v48 }
 0x698   :  { %6711 = vmatpush.bf16.msra.mxu2 %v10556_v49 }
 0x699   :  { %6724 = vmatpush.bf16.msra.mxu3 %v10748_v51 }
 0x69a   :  { %6686 = vmatpush.bf16.msra.mxu0 %v10148_v18  ;;  %v6480_v47 = vpop.f32.mrf.mxu0 }
 0x69b   :  { %6699 = vmatpush.bf16.msra.mxu1 %v10340_v43  ;;  %v6481_v57 = vadd.f32 %v6480_v47, %v6468_v17  ;;  %v6493_v46 = vpop.f32.mrf.mxu1 }
 0x69c   :  { %6712 = vmatpush.bf16.msra.mxu2 %v10532_v24 }
 0x69d   :  { %6725 = vmatpush.bf16.msra.mxu3 %v10724_v44  ;;  %6687 = vmatmul.bf16.vlgmr.msra.gmra.mxu0 %v13265_v28  ;;  %v6494_v31 = vadd.f32 %v6493_v46, %v6481_v57 }
 0x69e   :  { %6700 = vmatmul.bf16.vlgmr.msra.gmra.mxu1 %v13275_v11  ;;  %v12322_v11 = vpop.eup %12321 }
 0x69f   :  { %6713 = vmatmul.bf16.vlgmr.msra.gmra.mxu2 %v13260_v26 }
 0x6a0   :  { %6726 = vmatmul.bf16.vlgmr.msra.gmra.mxu3 %v13270_v30 }
 0x6a2   :  { %v6506_v37 = vpop.f32.mrf.mxu2  ;;  %v6482_v32 = vpop.f32.mrf.mxu0 }
 0x6a3   :  { %v6507_v40 = vadd.f32 %v6506_v37, %v6494_v31  ;;  %v6519_v59 = vpop.f32.mrf.mxu3  ;;  %v6495_v60 = vpop.f32.mrf.mxu1 }
 0x6a5   :  { %v6520_v33 = vadd.f32 %v6519_v59, %v6507_v40 }
 0x6a7   :  { %12323 = vtanh.f32 %v6520_v33 }
 0x6aa   :  { %v6508_v28 = vpop.f32.mrf.mxu2 }
 0x6ab   :  { %v6521_v2 = vpop.f32.mrf.mxu3 }
 0x6ad   :  { %v12324_v62 = vpop.eup %12323 }
 0x6ae   :  { %v13338_v26 = vpack.c.bf16 %v12324_v62, %v12322_v11 }
 0x6ba   :  { %v6532_v30 = vpop.f32.mrf.mxu0 }
 0x6bb   :  { %v6545_v58 = vpop.f32.mrf.mxu1 }
 0x6bc   :  { %v6546_v4 = vadd.f32 %v6545_v58, %v6532_v30 }
 0x6c2   :  { %v6558_v55 = vpop.f32.mrf.mxu2  ;;  %v6534_v7 = vpop.f32.mrf.mxu0 }
 0x6c3   :  { %v6559_v52 = vadd.f32 %v6558_v55, %v6546_v4  ;;  %v6571_v45 = vpop.f32.mrf.mxu3  ;;  %v6547_v29 = vpop.f32.mrf.mxu1 }
 0x6c5   :  { %v6572_v56 = vadd.f32 %v6571_v45, %v6559_v52 }
 0x6ca   :  { %v6560_v8 = vpop.f32.mrf.mxu2 }
 0x6cb   :  { %v6573_v14 = vpop.f32.mrf.mxu3 }
 0x6da   :  { %v6584_v12 = vpop.f32.mrf.mxu0 }
 0x6db   :  { %v6597_v27 = vpop.f32.mrf.mxu1  ;;  %v6585_v1 = vadd.f32 %v6584_v12, %v6572_v56 }
 0x6dd   :  { %v6598_v10 = vadd.f32 %v6597_v27, %v6585_v1 }
 0x6e2   :  { %v6610_v23 = vpop.f32.mrf.mxu2  ;;  %v6586_v16 = vpop.f32.mrf.mxu0 }
 0x6e3   :  { %v6623_v15 = vpop.f32.mrf.mxu3  ;;  %v6599_v17 = vpop.f32.mrf.mxu1  ;;  %v6611_v53 = vadd.f32 %v6610_v23, %v6598_v10 }
 0x6e5   :  { %v6624_v51 = vadd.f32 %v6623_v15, %v6611_v53 }
 0x6e7   :  { %12325 = vtanh.f32 %v6624_v51 }
 0x6ea   :  { %v6612_v61 = vpop.f32.mrf.mxu2 }
 0x6eb   :  { %v6625_v5 = vpop.f32.mrf.mxu3 }
 0x6ed   :  { %v12326_v24 = vpop.eup %12325 }
 0x6fa   :  { %v6636_v20 = vpop.f32.mrf.mxu0 }
 0x6fb   :  { %v6649_v21 = vpop.f32.mrf.mxu1 }
 0x6fc   :  { %v6650_v34 = vadd.f32 %v6649_v21, %v6636_v20 }
 0x702   :  { %v6662_v39 = vpop.f32.mrf.mxu2  ;;  %v6638_v25 = vpop.f32.mrf.mxu0 }
 0x703   :  { %v6675_v22 = vpop.f32.mrf.mxu3  ;;  %v6651_v19 = vpop.f32.mrf.mxu1  ;;  %v6663_v41 = vadd.f32 %v6662_v39, %v6650_v34 }
 0x705   :  { %v6676_v48 = vadd.f32 %v6675_v22, %v6663_v41 }
 0x70a   :  { %v6664_v9 = vpop.f32.mrf.mxu2 }
 0x70b   :  { %v6677_v35 = vpop.f32.mrf.mxu3 }
 0x71a   :  { %v6688_v49 = vpop.f32.mrf.mxu0 }
 0x71b   :  { %v6701_v0 = vpop.f32.mrf.mxu1  ;;  %v6689_v3 = vadd.f32 %v6688_v49, %v6676_v48 }
 0x71d   :  { %v6702_v42 = vadd.f32 %v6701_v0, %v6689_v3 }
 0x722   :  { %v6714_v36 = vpop.f32.mrf.mxu2  ;;  %v6690_v38 = vpop.f32.mrf.mxu0 }
 0x723   :  { %v6715_v6 = vadd.f32 %v6714_v36, %v6702_v42  ;;  %v6727_v63 = vpop.f32.mrf.mxu3  ;;  %v6703_v50 = vpop.f32.mrf.mxu1 }
 0x725   :  { %v6728_v13 = vadd.f32 %v6727_v63, %v6715_v6 }
 0x727   :  { %12327 = vtanh.f32 %v6728_v13 }
 0x72a   :  { %v6716_v18 = vpop.f32.mrf.mxu2 }
 0x72b   :  { %v6729_v43 = vpop.f32.mrf.mxu3 }
 0x72d   :  { %v12328_v44 = vpop.eup %12327 }
 0x72e   :  { %v13340_v47 = vpack.c.bf16 %v12328_v44, %v12326_v24 }
 0x72f   :  { %12581 = dma.done.wait [#allocation5 + $0x2], 16384 }
 0x730   :  { %12582 = vsyncadd [#allocation5 + $0x2], 4294950912  ;;  %v11119_v57 = vld [vmem:[#allocation4 + $0x1c0] sm:$0xf]  ;;  %v12224_v59 = vld [vmem:[#allocation4 + $0x1c4] sm:$0xf] }
 0x731   :  { %v12228_v46 = vld [vmem:[#allocation4 + $0x1dc] sm:$0xf0]  ;;  %v11121_v33 = vld [vmem:[#allocation4 + $0x1e0] sm:$0xf0]  ;;  %vm7766_vm11 = vcmask 1045508   ;;  %vm7768_vm12 = vcmask 1043456  }
 0x732   :  { %v11375_v31 = vld [vmem:[#allocation4 + $0x3c0] sm:$0xf]  ;;  %v11120_v37 = vor.u32 %v12228_v46, %v11119_v57  ;;  %v11124_v60 = vor.u32 %v12224_v59, %v11121_v33  ;;  %v12288_v28 = vld [vmem:[#allocation4 + $0x3c4] sm:$0xf] }
 0x733   :  { %v12292_v40 = vld [vmem:[#allocation4 + $0x3dc] sm:$0xf0]  ;;  %v11377_v2 = vld [vmem:[#allocation4 + $0x3e0] sm:$0xf0] }
 0x734   :  { %v11376_v32 = vor.u32 %v12292_v40, %v11375_v31  ;;  %v11087_v11 = vld [vmem:[#allocation4 + $0x180] sm:$0xf]  ;;  %7543 = vmatpush.bf16.msrb.mxu0 %v11120_v37  ;;  %v11380_v62 = vor.u32 %v12288_v28, %v11377_v2  ;;  %7569 = vmatpush.bf16.msrb.mxu2 %v11124_v60  ;;  %v12216_v45 = vld [vmem:[#allocation4 + $0x184] sm:$0xf] }
 0x735   :  { %v12220_v30 = vld [vmem:[#allocation4 + $0x19c] sm:$0xf0]  ;;  %v11089_v56 = vld [vmem:[#allocation4 + $0x1a0] sm:$0xf0] }
 0x736   :  { %v11343_v58 = vld [vmem:[#allocation4 + $0x380] sm:$0xf]  ;;  %7556 = vmatpush.bf16.msrb.mxu1 %v11376_v32  ;;  %v11088_v55 = vor.u32 %v12220_v30, %v11087_v11  ;;  %v12280_v7 = vld [vmem:[#allocation4 + $0x384] sm:$0xf]  ;;  %7582 = vmatpush.bf16.msrb.mxu3 %v11380_v62  ;;  %v11092_v29 = vor.u32 %v12216_v45, %v11089_v56 }
 0x737   :  { %v12284_v4 = vld [vmem:[#allocation4 + $0x39c] sm:$0xf0]  ;;  %v11345_v8 = vld [vmem:[#allocation4 + $0x3a0] sm:$0xf0] }
 0x738   :  { %v11344_v52 = vor.u32 %v12284_v4, %v11343_v58  ;;  %v11055_v14 = vld [vmem:[#allocation4 + $0x140] sm:$0xf]  ;;  %v11348_v27 = vor.u32 %v12280_v7, %v11345_v8  ;;  %v12208_v16 = vld [vmem:[#allocation4 + $0x144] sm:$0xf]  ;;  %7544 = vmatpush.bf16.msrb.mxu0 %v11088_v55  ;;  %7570 = vmatpush.bf16.msrb.mxu2 %v11092_v29  ;;  %v6750_v8 = vunpack.c.l.b16 %v13338_v26 }
 0x739   :  { %v12212_v12 = vld [vmem:[#allocation4 + $0x15c] sm:$0xf0]  ;;  %v11057_v61 = vld [vmem:[#allocation4 + $0x160] sm:$0xf0] }
 0x73a   :  { %v11311_v23 = vld [vmem:[#allocation4 + $0x340] sm:$0xf]  ;;  %v11056_v17 = vor.u32 %v12212_v12, %v11055_v14  ;;  %v12272_v5 = vld [vmem:[#allocation4 + $0x344] sm:$0xf]  ;;  %7557 = vmatpush.bf16.msrb.mxu1 %v11344_v52  ;;  %v11060_v39 = vor.u32 %v12208_v16, %v11057_v61  ;;  %7583 = vmatpush.bf16.msrb.mxu3 %v11348_v27  ;;  %v6757_v16 = vunpack.c.l.b16 %v13340_v47 }
 0x73b   :  { %v12276_v15 = vld [vmem:[#allocation4 + $0x35c] sm:$0xf0]  ;;  %v11313_v20 = vld [vmem:[#allocation4 + $0x360] sm:$0xf0] }
 0x73c   :  { %v11312_v21 = vor.u32 %v12276_v15, %v11311_v23  ;;  %v11023_v22 = vld [vmem:[#allocation4 + $0x100] sm:$0xf]  ;;  %v11316_v9 = vor.u32 %v12272_v5, %v11313_v20  ;;  %v12200_v34 = vld [vmem:[#allocation4 + $0x104] sm:$0xf]  ;;  %7545 = vmatpush.bf16.msrb.mxu0 %v11056_v17  ;;  %7571 = vmatpush.bf16.msrb.mxu2 %v11060_v39  ;;  %v6758_v39 = vunpack.c.h.b16 %v13340_v47  ;;  %v6759_v47 = vpack.c.b16 %v6757_v16, %v6757_v16  ;;  %v11287_v16 = vld [vmem:[#allocation4 + $0x308] sm:$0xf] }
 0x73d   :  { %v12204_v25 = vld [vmem:[#allocation4 + $0x11c] sm:$0xf0]  ;;  %v11025_v1 = vld [vmem:[#allocation4 + $0x120] sm:$0xf0] }
 0x73e   :  { %v11279_v19 = vld [vmem:[#allocation4 + $0x300] sm:$0xf]  ;;  %v12264_v41 = vld [vmem:[#allocation4 + $0x304] sm:$0xf]  ;;  %v11024_v48 = vor.u32 %v12204_v25, %v11023_v22  ;;  %7558 = vmatpush.bf16.msrb.mxu1 %v11312_v21  ;;  %v11028_v0 = vor.u32 %v12200_v34, %v11025_v1  ;;  %7584 = vmatpush.bf16.msrb.mxu3 %v11316_v9  ;;  %v6751_v21 = vunpack.c.h.b16 %v13338_v26  ;;  %v11127_v22 = vld [vmem:[#allocation4 + $0x1c8] sm:$0xf]  ;;  %v6745_v9 = vunpack.c.l.b16 %v13314_v54 }
 0x73f   :  { %v12268_v35 = vld [vmem:[#allocation4 + $0x31c] sm:$0xf0]  ;;  %v11281_v10 = vld [vmem:[#allocation4 + $0x320] sm:$0xf0]  ;;  %v12229_v25 = vld [vmem:[#allocation4 + $0x1e4] sm:$0xf0] }
 0x740   :  { %v11280_v49 = vor.u32 %v12268_v35, %v11279_v19  ;;  %v10991_v3 = vld [vmem:[#allocation4 + $0xc0] sm:$0xf]  ;;  %v11284_v51 = vor.u32 %v12264_v41, %v11281_v10  ;;  %v12192_v6 = vld [vmem:[#allocation4 + $0xc4] sm:$0xf]  ;;  %7546 = vmatpush.bf16.msrb.mxu0 %v11024_v48  ;;  %7572 = vmatpush.bf16.msrb.mxu2 %v11028_v0  ;;  %v11383_v19 = vld [vmem:[#allocation4 + $0x3c8] sm:$0xf]  ;;  %v6752_v10 = vpack.c.b16 %v6750_v8, %v6750_v8  ;;  %v6746_v48 = vunpack.c.h.b16 %v13314_v54 }
 0x741   :  { %v12196_v53 = vld [vmem:[#allocation4 + $0xdc] sm:$0xf0]  ;;  %v10993_v63 = vld [vmem:[#allocation4 + $0xe0] sm:$0xf0]  ;;  %v12293_v34 = vld [vmem:[#allocation4 + $0x3e4] sm:$0xf0] }
 0x742   :  { %v11247_v42 = vld [vmem:[#allocation4 + $0x2c0] sm:$0xf]  ;;  %v12256_v38 = vld [vmem:[#allocation4 + $0x2c4] sm:$0xf]  ;;  %v10992_v13 = vor.u32 %v12196_v53, %v10991_v3  ;;  %7559 = vmatpush.bf16.msrb.mxu1 %v11280_v49  ;;  %v10996_v43 = vor.u32 %v12192_v6, %v10993_v63  ;;  %7585 = vmatpush.bf16.msrb.mxu3 %v11284_v51  ;;  %v12225_v1 = vld [vmem:[#allocation4 + $0x1cc] sm:$0xf]  ;;  %v6753_v51 = vpack.c.b16 %v6751_v21, %v6751_v21 }
 0x743   :  { %v12260_v36 = vld [vmem:[#allocation4 + $0x2dc] sm:$0xf0]  ;;  %v11249_v50 = vld [vmem:[#allocation4 + $0x2e0] sm:$0xf0]  ;;  %v11129_v41 = vld [vmem:[#allocation4 + $0x1e8] sm:$0xf0]  ;;  %v11384_v6 = vor.u32 %v12293_v34, %v11383_v19 }
 0x744   :  { %v11248_v18 = vor.u32 %v12260_v36, %v11247_v42  ;;  %v10959_v24 = vld [vmem:[#allocation4 + $0x80] sm:$0xf]  ;;  %v11252_v46 = vor.u32 %v12256_v38, %v11249_v50  ;;  %v12184_v37 = vld [vmem:[#allocation4 + $0x84] sm:$0xf]  ;;  %7547 = vmatpush.bf16.msrb.mxu0 %v10992_v13  ;;  %7573 = vmatpush.bf16.msrb.mxu2 %v10996_v43  ;;  %v12289_v26 = vld [vmem:[#allocation4 + $0x3cc] sm:$0xf]  ;;  %v11128_v42 = vor.u32 %v12229_v25, %v11127_v22 }
 0x745   :  { %v12188_v44 = vld [vmem:[#allocation4 + $0x9c] sm:$0xf0]  ;;  %v10961_v40 = vld [vmem:[#allocation4 + $0xa0] sm:$0xf0]  ;;  %v11385_v3 = vld [vmem:[#allocation4 + $0x3e8] sm:$0xf0]  ;;  %v6760_v36 = vpack.c.b16 %v6758_v39, %v6758_v39  ;;  %v11132_v63 = vor.u32 %v12225_v1, %v11129_v41 }
 0x746   :  { %v11215_v57 = vld [vmem:[#allocation4 + $0x280] sm:$0xf]  ;;  %v12248_v59 = vld [vmem:[#allocation4 + $0x284] sm:$0xf]  ;;  %v10960_v32 = vor.u32 %v12188_v44, %v10959_v24  ;;  %7560 = vmatpush.bf16.msrb.mxu1 %v11248_v18  ;;  %v10964_v28 = vor.u32 %v12184_v37, %v10961_v40  ;;  %7586 = vmatpush.bf16.msrb.mxu3 %v11252_v46  ;;  %v11095_v38 = vld [vmem:[#allocation4 + $0x188] sm:$0xf]  ;;  %v6747_v18 = vpack.c.b16 %v6745_v9, %v6745_v9 }
 0x747   :  { %v12252_v31 = vld [vmem:[#allocation4 + $0x29c] sm:$0xf0]  ;;  %v11217_v33 = vld [vmem:[#allocation4 + $0x2a0] sm:$0xf0]  ;;  %v12221_v50 = vld [vmem:[#allocation4 + $0x1a4] sm:$0xf0]  ;;  %v11388_v54 = vor.u32 %v12289_v26, %v11385_v3 }
 0x748   :  { %v11216_v60 = vor.u32 %v12252_v31, %v11215_v57  ;;  %v10927_v2 = vld [vmem:[#allocation4 + $0x40] sm:$0xf]  ;;  %v11220_v30 = vor.u32 %v12248_v59, %v11217_v33  ;;  %v12176_v4 = vld [vmem:[#allocation4 + $0x44] sm:$0xf]  ;;  %7548 = vmatpush.bf16.msrb.mxu0 %v10960_v32  ;;  %7574 = vmatpush.bf16.msrb.mxu2 %v10964_v28  ;;  %v11351_v13 = vld [vmem:[#allocation4 + $0x388] sm:$0xf]  ;;  %v6748_v57 = vpack.c.b16 %v6746_v48, %v6746_v48 }
 0x749   :  { %v12180_v11 = vld [vmem:[#allocation4 + $0x5c] sm:$0xf0]  ;;  %v10929_v55 = vld [vmem:[#allocation4 + $0x60] sm:$0xf0]  ;;  %v12285_v43 = vld [vmem:[#allocation4 + $0x3a4] sm:$0xf0]  ;;  %v11096_v59 = vor.u32 %v12221_v50, %v11095_v38 }
 0x74a   :  { %v11183_v62 = vld [vmem:[#allocation4 + $0x240] sm:$0xf]  ;;  %v12240_v52 = vld [vmem:[#allocation4 + $0x244] sm:$0xf]  ;;  %v10928_v56 = vor.u32 %v12180_v11, %v10927_v2  ;;  %7561 = vmatpush.bf16.msrb.mxu1 %v11216_v60  ;;  %v10932_v12 = vor.u32 %v12176_v4, %v10929_v55  ;;  %7587 = vmatpush.bf16.msrb.mxu3 %v11220_v30  ;;  %v12217_v24 = vld [vmem:[#allocation4 + $0x18c] sm:$0xf]  ;;  %v11352_v60 = vor.u32 %v12285_v43, %v11351_v13 }
 0x74b   :  { %v12244_v58 = vld [vmem:[#allocation4 + $0x25c] sm:$0xf0]  ;;  %v11185_v45 = vld [vmem:[#allocation4 + $0x260] sm:$0xf0]  ;;  %v11097_v44 = vld [vmem:[#allocation4 + $0x1a8] sm:$0xf0] }
 0x74c   :  { %v10895_v7 = vld [vmem:[#allocation4] sm:$0xf]  ;;  %v11184_v14 = vor.u32 %v12244_v58, %v11183_v62  ;;  %v12168_v15 = vld [vmem:[#allocation4 + $0x4] sm:$0xf]  ;;  %v11188_v17 = vor.u32 %v12240_v52, %v11185_v45  ;;  %7549 = vmatpush.bf16.msrb.mxu0 %v10928_v56  ;;  %7575 = vmatpush.bf16.msrb.mxu2 %v10932_v12  ;;  %v12281_v46 = vld [vmem:[#allocation4 + $0x38c] sm:$0xf]  ;;  %v11100_v28 = vor.u32 %v12217_v24, %v11097_v44 }
 0x74d   :  { %v12172_v29 = vld [vmem:[#allocation4 + $0x1c] sm:$0xf0]  ;;  %v10897_v61 = vld [vmem:[#allocation4 + $0x20] sm:$0xf0]  ;;  %v11353_v31 = vld [vmem:[#allocation4 + $0x3a8] sm:$0xf0] }
 0x74e   :  { %v11151_v27 = vld [vmem:[#allocation4 + $0x200] sm:$0xf]  ;;  %v12232_v5 = vld [vmem:[#allocation4 + $0x204] sm:$0xf]  ;;  %v10896_v35 = vor.u32 %v12172_v29, %v10895_v7  ;;  %7562 = vmatpush.bf16.msrb.mxu1 %v11184_v14  ;;  %v10900_v0 = vor.u32 %v12168_v15, %v10897_v61  ;;  %7588 = vmatpush.bf16.msrb.mxu3 %v11188_v17  ;;  %v6754_v37 = vrot.slane %v6752_v10, 7  ;;  %v6761_v40 = vrot.slane %v6759_v47, 6 }
 0x74f   :  { %v12236_v23 = vld [vmem:[#allocation4 + $0x21c] sm:$0xf0]  ;;  %v11153_v20 = vld [vmem:[#allocation4 + $0x220] sm:$0xf0]  ;;  %v6755_v33 = vrot.slane %v6753_v51, 7  ;;  %v6762_v32 = vrot.slane %v6760_v36, 6  ;;  %v11356_v58 = vor.u32 %v12281_v46, %v11353_v31 }
 0x750   :  { %v11152_v49 = vor.u32 %v12236_v23, %v11151_v27  ;;  %v11156_v53 = vor.u32 %v12232_v5, %v11153_v20  ;;  %7550 = vmatpush.bf16.msrb.mxu0 %v10896_v35  ;;  %7576 = vmatpush.bf16.msrb.mxu2 %v10900_v0  ;;  %v11063_v2 = vld [vmem:[#allocation4 + $0x148] sm:$0xf]  ;;  %v6765_v30 = vsel %vm437_vm3, %v6747_v18, %v6754_v37  ;;  %v12209_v55 = vld [vmem:[#allocation4 + $0x14c] sm:$0xf] }
 0x751   :  { %v12213_v11 = vld [vmem:[#allocation4 + $0x164] sm:$0xf0]  ;;  %v11065_v52 = vld [vmem:[#allocation4 + $0x168] sm:$0xf0]  ;;  %v13350_v45 = vsel %vm361_vm1, %v6765_v30, %v6761_v40  ;;  %v6768_v56 = vsel %vm437_vm3, %v6748_v57, %v6755_v33 }
 0x752   :  { %7563 = vmatpush.bf16.msrb.mxu1 %v11152_v49  ;;  %7589 = vmatpush.bf16.msrb.mxu3 %v11156_v53  ;;  %v11319_v62 = vld [vmem:[#allocation4 + $0x348] sm:$0xf]  ;;  %v12273_v7 = vld [vmem:[#allocation4 + $0x34c] sm:$0xf]  ;;  %v13355_v8 = vsel %vm361_vm1, %v6768_v56, %v6762_v32  ;;  %v11064_v14 = vor.u32 %v12213_v11, %v11063_v2  ;;  %v11068_v27 = vor.u32 %v12209_v55, %v11065_v52 }
 0x753   :  { %v12277_v4 = vld [vmem:[#allocation4 + $0x364] sm:$0xf0]  ;;  %v11321_v29 = vld [vmem:[#allocation4 + $0x368] sm:$0xf0]  ;;  %7577 = vmatmul.bf16.vlgmr.msrb.gmra.mxu2 %v13350_v45  ;;  %7551 = vmatmul.bf16.vlgmr.msrb.gmra.mxu0 %v13350_v45 }
 0x754   :  { %7595 = vmatpush.bf16.msra.mxu0 %v11128_v42  ;;  %7621 = vmatpush.bf16.msra.mxu2 %v11132_v63  ;;  %v11320_v12 = vor.u32 %v12277_v4, %v11319_v62  ;;  %v11031_v23 = vld [vmem:[#allocation4 + $0x108] sm:$0xf]  ;;  %v11324_v17 = vor.u32 %v12273_v7, %v11321_v29  ;;  %v12201_v5 = vld [vmem:[#allocation4 + $0x10c] sm:$0xf]  ;;  %v11135_v7 = vld [vmem:[#allocation4 + $0x1d0] sm:$0xf] }
 0x755   :  { %7590 = vmatmul.bf16.vlgmr.msrb.gmra.mxu3 %v13355_v8  ;;  %v12205_v15 = vld [vmem:[#allocation4 + $0x124] sm:$0xf0]  ;;  %v11033_v20 = vld [vmem:[#allocation4 + $0x128] sm:$0xf0]  ;;  %7564 = vmatmul.bf16.vlgmr.msrb.gmra.mxu1 %v13355_v8  ;;  %v12230_v29 = vld [vmem:[#allocation4 + $0x1ec] sm:$0xf0] }
 0x756   :  { %7608 = vmatpush.bf16.msra.mxu1 %v11384_v6  ;;  %7634 = vmatpush.bf16.msra.mxu3 %v11388_v54  ;;  %v12269_v61 = vld [vmem:[#allocation4 + $0x324] sm:$0xf0]  ;;  %v12265_v21 = vld [vmem:[#allocation4 + $0x30c] sm:$0xf]  ;;  %v11032_v22 = vor.u32 %v12205_v15, %v11031_v23  ;;  %v11036_v19 = vor.u32 %v12201_v5, %v11033_v20  ;;  %v12226_v23 = vld [vmem:[#allocation4 + $0x1d4] sm:$0xf] }
 0x757   :  { %v11289_v39 = vld [vmem:[#allocation4 + $0x328] sm:$0xf0]  ;;  %v11288_v25 = vor.u32 %v12269_v61, %v11287_v16  ;;  %v10999_v9 = vld [vmem:[#allocation4 + $0xc8] sm:$0xf]  ;;  %v11137_v15 = vld [vmem:[#allocation4 + $0x1f0] sm:$0xf0] }
 0x758   :  { %7596 = vmatpush.bf16.msra.mxu0 %v11096_v59  ;;  %7622 = vmatpush.bf16.msra.mxu2 %v11100_v28  ;;  %v12197_v35 = vld [vmem:[#allocation4 + $0xe4] sm:$0xf0]  ;;  %v11292_v1 = vor.u32 %v12265_v21, %v11289_v39  ;;  %v12193_v10 = vld [vmem:[#allocation4 + $0xcc] sm:$0xf]  ;;  %v12290_v61 = vld [vmem:[#allocation4 + $0x3d4] sm:$0xf]  ;;  %v11136_v21 = vor.u32 %v12230_v29, %v11135_v7 }
 0x759   :  { %v11255_v34 = vld [vmem:[#allocation4 + $0x2c8] sm:$0xf]  ;;  %v11001_v48 = vld [vmem:[#allocation4 + $0xe8] sm:$0xf0]  ;;  %v11000_v26 = vor.u32 %v12197_v35, %v10999_v9  ;;  %v11393_v5 = vld [vmem:[#allocation4 + $0x3f0] sm:$0xf0] }
 0x75a   :  { %7609 = vmatpush.bf16.msra.mxu1 %v11352_v60  ;;  %7635 = vmatpush.bf16.msra.mxu3 %v11356_v58  ;;  %v12261_v41 = vld [vmem:[#allocation4 + $0x2e4] sm:$0xf0]  ;;  %v12257_v49 = vld [vmem:[#allocation4 + $0x2cc] sm:$0xf]  ;;  %v11004_v47 = vor.u32 %v12193_v10, %v11001_v48  ;;  %v11359_v9 = vld [vmem:[#allocation4 + $0x390] sm:$0xf]  ;;  %v11396_v35 = vor.u32 %v12290_v61, %v11393_v5 }
 0x75b   :  { %v11257_v0 = vld [vmem:[#allocation4 + $0x2e8] sm:$0xf0]  ;;  %v11256_v3 = vor.u32 %v12261_v41, %v11255_v34  ;;  %v10967_v53 = vld [vmem:[#allocation4 + $0x88] sm:$0xf]  ;;  %v12286_v34 = vld [vmem:[#allocation4 + $0x3ac] sm:$0xf0] }
 0x75c   :  { %7597 = vmatpush.bf16.msra.mxu0 %v11064_v14  ;;  %7623 = vmatpush.bf16.msra.mxu2 %v11068_v27  ;;  %v12189_v42 = vld [vmem:[#allocation4 + $0xa4] sm:$0xf0]  ;;  %v11260_v36 = vor.u32 %v12257_v49, %v11257_v0  ;;  %v12185_v63 = vld [vmem:[#allocation4 + $0x8c] sm:$0xf]  ;;  %v11391_v14 = vld [vmem:[#allocation4 + $0x3d0] sm:$0xf]  ;;  %v11360_v0 = vor.u32 %v12286_v34, %v11359_v9 }
 0x75d   :  { %v11223_v51 = vld [vmem:[#allocation4 + $0x288] sm:$0xf]  ;;  %v10969_v38 = vld [vmem:[#allocation4 + $0xa8] sm:$0xf0]  ;;  %v10968_v18 = vor.u32 %v12189_v42, %v10967_v53  ;;  %v12294_v27 = vld [vmem:[#allocation4 + $0x3ec] sm:$0xf0] }
 0x75e   :  { %7610 = vmatpush.bf16.msra.mxu1 %v11320_v12  ;;  %7636 = vmatpush.bf16.msra.mxu3 %v11324_v17  ;;  %v12253_v6 = vld [vmem:[#allocation4 + $0x2a4] sm:$0xf0]  ;;  %v12249_v50 = vld [vmem:[#allocation4 + $0x28c] sm:$0xf]  ;;  %v10972_v43 = vor.u32 %v12185_v63, %v10969_v38  ;;  %v11392_v39 = vor.u32 %v12294_v27, %v11391_v14  ;;  %v11105_v41 = vld [vmem:[#allocation4 + $0x1b0] sm:$0xf0] }
 0x75f   :  { %v11225_v13 = vld [vmem:[#allocation4 + $0x2a8] sm:$0xf0]  ;;  %v11224_v54 = vor.u32 %v12253_v6, %v11223_v51  ;;  %v10935_v24 = vld [vmem:[#allocation4 + $0x48] sm:$0xf]  ;;  %v12282_v10 = vld [vmem:[#allocation4 + $0x394] sm:$0xf] }
 0x760   :  { %7598 = vmatpush.bf16.msra.mxu0 %v11032_v22  ;;  %7624 = vmatpush.bf16.msra.mxu2 %v11036_v19  ;;  %v12181_v44 = vld [vmem:[#allocation4 + $0x64] sm:$0xf0]  ;;  %v11228_v46 = vor.u32 %v12249_v50, %v11225_v13  ;;  %v12177_v37 = vld [vmem:[#allocation4 + $0x4c] sm:$0xf]  ;;  %v11140_v22 = vor.u32 %v12226_v23, %v11137_v15  ;;  %v12222_v19 = vld [vmem:[#allocation4 + $0x1ac] sm:$0xf0] }
 0x761   :  { %v11191_v57 = vld [vmem:[#allocation4 + $0x248] sm:$0xf]  ;;  %v10937_v40 = vld [vmem:[#allocation4 + $0x68] sm:$0xf0]  ;;  %v10936_v32 = vor.u32 %v12181_v44, %v10935_v24  ;;  %v11361_v48 = vld [vmem:[#allocation4 + $0x3b0] sm:$0xf0] }
 0x762   :  { %7611 = vmatpush.bf16.msra.mxu1 %v11288_v25  ;;  %7637 = vmatpush.bf16.msra.mxu3 %v11292_v1  ;;  %v12245_v31 = vld [vmem:[#allocation4 + $0x264] sm:$0xf0]  ;;  %v12241_v59 = vld [vmem:[#allocation4 + $0x24c] sm:$0xf]  ;;  %v10940_v11 = vor.u32 %v12177_v37, %v10937_v40  ;;  %v11103_v25 = vld [vmem:[#allocation4 + $0x190] sm:$0xf]  ;;  %v11364_v42 = vor.u32 %v12282_v10, %v11361_v48 }
 0x763   :  { %v11193_v33 = vld [vmem:[#allocation4 + $0x268] sm:$0xf0]  ;;  %v10903_v60 = vld [vmem:[#allocation4 + $0x8] sm:$0xf]  ;;  %v11192_v2 = vor.u32 %v12245_v31, %v11191_v57  ;;  %v12218_v1 = vld [vmem:[#allocation4 + $0x194] sm:$0xf]  ;;  %v11104_v49 = vor.u32 %v12222_v19, %v11103_v25 }
 0x764   :  { %7599 = vmatpush.bf16.msra.mxu0 %v11000_v26  ;;  %7625 = vmatpush.bf16.msra.mxu2 %v11004_v47  ;;  %v12173_v28 = vld [vmem:[#allocation4 + $0x24] sm:$0xf0]  ;;  %v12169_v58 = vld [vmem:[#allocation4 + $0xc] sm:$0xf]  ;;  %v11196_v4 = vor.u32 %v12241_v59, %v11193_v33  ;;  %v11108_v26 = vor.u32 %v12218_v1, %v11105_v41  ;;  %v12214_v47 = vld [vmem:[#allocation4 + $0x16c] sm:$0xf0] }
 0x765   :  { %v11159_v62 = vld [vmem:[#allocation4 + $0x208] sm:$0xf]  ;;  %v10905_v55 = vld [vmem:[#allocation4 + $0x28] sm:$0xf0]  ;;  %v10904_v12 = vor.u32 %v12173_v28, %v10903_v60  ;;  %v11327_v53 = vld [vmem:[#allocation4 + $0x350] sm:$0xf] }
 0x766   :  { %7612 = vmatpush.bf16.msra.mxu1 %v11256_v3  ;;  %7638 = vmatpush.bf16.msra.mxu3 %v11260_v36  ;;  %v12237_v30 = vld [vmem:[#allocation4 + $0x224] sm:$0xf0]  ;;  %v12233_v52 = vld [vmem:[#allocation4 + $0x20c] sm:$0xf]  ;;  %v10908_v17 = vor.u32 %v12169_v58, %v10905_v55  ;;  %v11071_v3 = vld [vmem:[#allocation4 + $0x150] sm:$0xf] }
 0x767   :  { %v11161_v56 = vld [vmem:[#allocation4 + $0x228] sm:$0xf0]  ;;  %v11160_v16 = vor.u32 %v12237_v30, %v11159_v62  ;;  %v12278_v51 = vld [vmem:[#allocation4 + $0x36c] sm:$0xf0]  ;;  %v12210_v36 = vld [vmem:[#allocation4 + $0x154] sm:$0xf]  ;;  %v11072_v50 = vor.u32 %v12214_v47, %v11071_v3 }
 0x768   :  { %7600 = vmatpush.bf16.msra.mxu0 %v10968_v18  ;;  %7626 = vmatpush.bf16.msra.mxu2 %v10972_v43  ;;  %v11164_v20 = vor.u32 %v12233_v52, %v11161_v56  ;;  %v11073_v6 = vld [vmem:[#allocation4 + $0x170] sm:$0xf0]  ;;  %v11328_v13 = vor.u32 %v12278_v51, %v11327_v53  ;;  %v12206_v43 = vld [vmem:[#allocation4 + $0x12c] sm:$0xf0] }
 0x769   :  { %v12274_v63 = vld [vmem:[#allocation4 + $0x354] sm:$0xf]  ;;  %v11076_v18 = vor.u32 %v12210_v36, %v11073_v6  ;;  %v11295_v24 = vld [vmem:[#allocation4 + $0x310] sm:$0xf] }
 0x76a   :  { %7613 = vmatpush.bf16.msra.mxu1 %v11224_v54  ;;  %7639 = vmatpush.bf16.msra.mxu3 %v11228_v46  ;;  %v11329_v38 = vld [vmem:[#allocation4 + $0x370] sm:$0xf0]  ;;  %v11039_v54 = vld [vmem:[#allocation4 + $0x110] sm:$0xf] }
 0x76b   :  { %v11332_v44 = vor.u32 %v12274_v63, %v11329_v38  ;;  %v12270_v57 = vld [vmem:[#allocation4 + $0x32c] sm:$0xf0]  ;;  %v12202_v46 = vld [vmem:[#allocation4 + $0x114] sm:$0xf]  ;;  %v11040_v59 = vor.u32 %v12206_v43, %v11039_v54  ;;  %v11143_v63 = vld [vmem:[#allocation4 + $0x1d8] sm:$0xf] }
 0x76c   :  { %7601 = vmatpush.bf16.msra.mxu0 %v10936_v32  ;;  %7627 = vmatpush.bf16.msra.mxu2 %v10940_v11  ;;  %v11041_v31 = vld [vmem:[#allocation4 + $0x130] sm:$0xf0]  ;;  %v11296_v33 = vor.u32 %v12270_v57, %v11295_v24  ;;  %v11007_v60 = vld [vmem:[#allocation4 + $0xd0] sm:$0xf]  ;;  %v12231_v38 = vld [vmem:[#allocation4 + $0x1f4] sm:$0xf0] }
 0x76d   :  { %v12266_v37 = vld [vmem:[#allocation4 + $0x314] sm:$0xf]  ;;  %v11044_v32 = vor.u32 %v12202_v46, %v11041_v31  ;;  %v12198_v28 = vld [vmem:[#allocation4 + $0xec] sm:$0xf0]  ;;  %v12227_v54 = vld [vmem:[#allocation4 + $0x1dc] sm:$0xf] }
 0x76e   :  { %7614 = vmatpush.bf16.msra.mxu1 %v11192_v2  ;;  %7640 = vmatpush.bf16.msra.mxu3 %v11196_v4  ;;  %v11297_v40 = vld [vmem:[#allocation4 + $0x330] sm:$0xf0]  ;;  %v11263_v2 = vld [vmem:[#allocation4 + $0x2d0] sm:$0xf]  ;;  %v11008_v52 = vor.u32 %v12198_v28, %v11007_v60  ;;  %v11145_v43 = vld [vmem:[#allocation4 + $0x1f8] sm:$0xf0] }
 0x76f   :  { %v11300_v11 = vor.u32 %v12266_v37, %v11297_v40  ;;  %v12262_v62 = vld [vmem:[#allocation4 + $0x2ec] sm:$0xf0]  ;;  %v12194_v30 = vld [vmem:[#allocation4 + $0xd4] sm:$0xf]  ;;  %v12291_v57 = vld [vmem:[#allocation4 + $0x3dc] sm:$0xf]  ;;  %v11144_v37 = vor.u32 %v12231_v38, %v11143_v63 }
 0x770   :  { %7602 = vmatpush.bf16.msra.mxu0 %v10904_v12  ;;  %7628 = vmatpush.bf16.msra.mxu2 %v10908_v17  ;;  %v11009_v58 = vld [vmem:[#allocation4 + $0xf0] sm:$0xf0]  ;;  %v11264_v56 = vor.u32 %v12262_v62, %v11263_v2  ;;  %v10975_v29 = vld [vmem:[#allocation4 + $0x90] sm:$0xf]  ;;  %v11401_v46 = vld [vmem:[#allocation4 + $0x3f8] sm:$0xf0] }
 0x771   :  { %v12258_v4 = vld [vmem:[#allocation4 + $0x2d4] sm:$0xf]  ;;  %v11012_v7 = vor.u32 %v12194_v30, %v11009_v58  ;;  %v12190_v14 = vld [vmem:[#allocation4 + $0xac] sm:$0xf0]  ;;  %v11367_v60 = vld [vmem:[#allocation4 + $0x398] sm:$0xf]  ;;  %v11404_v28 = vor.u32 %v12291_v57, %v11401_v46 }
 0x772   :  { %7615 = vmatpush.bf16.msra.mxu1 %v11160_v16  ;;  %7641 = vmatpush.bf16.msra.mxu3 %v11164_v20  ;;  %v11265_v55 = vld [vmem:[#allocation4 + $0x2f0] sm:$0xf0]  ;;  %v11231_v12 = vld [vmem:[#allocation4 + $0x290] sm:$0xf]  ;;  %v10976_v5 = vor.u32 %v12190_v14, %v10975_v29  ;;  %v12287_v2 = vld [vmem:[#allocation4 + $0x3b4] sm:$0xf0] }
 0x773   :  { %7629 = vmatmul.bf16.vlgmr.msra.gmra.mxu2 %v13350_v45  ;;  %7603 = vmatmul.bf16.vlgmr.msra.gmra.mxu0 %v13350_v45  ;;  %v11268_v27 = vor.u32 %v12258_v4, %v11265_v55  ;;  %v12254_v23 = vld [vmem:[#allocation4 + $0x2ac] sm:$0xf0]  ;;  %v12186_v15 = vld [vmem:[#allocation4 + $0x94] sm:$0xf]  ;;  %v11113_v62 = vld [vmem:[#allocation4 + $0x1b8] sm:$0xf0]  ;;  %v11368_v55 = vor.u32 %v12287_v2, %v11367_v60 }
 0x774   :  { %7647 = vmatpush.bf16.msrb.mxu0 %v11136_v21  ;;  %7673 = vmatpush.bf16.msrb.mxu2 %v11140_v22  ;;  %v10977_v16 = vld [vmem:[#allocation4 + $0xb0] sm:$0xf0]  ;;  %v11232_v20 = vor.u32 %v12254_v23, %v11231_v12  ;;  %v12182_v22 = vld [vmem:[#allocation4 + $0x6c] sm:$0xf0]  ;;  %v12283_v30 = vld [vmem:[#allocation4 + $0x39c] sm:$0xf] }
 0x775   :  { %7642 = vmatmul.bf16.vlgmr.msra.gmra.mxu3 %v13355_v8  ;;  %7616 = vmatmul.bf16.vlgmr.msra.gmra.mxu1 %v13355_v8  ;;  %v12250_v17 = vld [vmem:[#allocation4 + $0x294] sm:$0xf]  ;;  %v10980_v21 = vor.u32 %v12186_v15, %v10977_v16  ;;  %v11199_v25 = vld [vmem:[#allocation4 + $0x250] sm:$0xf]  ;;  %v11369_v58 = vld [vmem:[#allocation4 + $0x3b8] sm:$0xf0] }
 0x776   :  { %7660 = vmatpush.bf16.msrb.mxu1 %v11392_v39  ;;  %7686 = vmatpush.bf16.msrb.mxu3 %v11396_v35  ;;  %v11233_v61 = vld [vmem:[#allocation4 + $0x2b0] sm:$0xf0]  ;;  %v10943_v39 = vld [vmem:[#allocation4 + $0x50] sm:$0xf]  ;;  %v11335_v29 = vld [vmem:[#allocation4 + $0x358] sm:$0xf]  ;;  %v11372_v14 = vor.u32 %v12283_v30, %v11369_v58 }
 0x777   :  { %v11236_v19 = vor.u32 %v12250_v17, %v11233_v61  ;;  %v12246_v9 = vld [vmem:[#allocation4 + $0x26c] sm:$0xf0]  ;;  %v12178_v35 = vld [vmem:[#allocation4 + $0x54] sm:$0xf]  ;;  %v10944_v10 = vor.u32 %v12182_v22, %v10943_v39  ;;  %v12279_v12 = vld [vmem:[#allocation4 + $0x374] sm:$0xf0] }
 0x778   :  { %7648 = vmatpush.bf16.msrb.mxu0 %v11104_v49  ;;  %7674 = vmatpush.bf16.msrb.mxu2 %v11108_v26  ;;  %v10945_v34 = vld [vmem:[#allocation4 + $0x70] sm:$0xf0]  ;;  %v10911_v48 = vld [vmem:[#allocation4 + $0x10] sm:$0xf]  ;;  %v11081_v23 = vld [vmem:[#allocation4 + $0x178] sm:$0xf0]  ;;  %v11336_v61 = vor.u32 %v12279_v12, %v11335_v29 }
 0x779   :  { %v12242_v1 = vld [vmem:[#allocation4 + $0x254] sm:$0xf]  ;;  %v12174_v49 = vld [vmem:[#allocation4 + $0x2c] sm:$0xf0]  ;;  %v10948_v26 = vor.u32 %v12178_v35, %v10945_v34  ;;  %v12275_v15 = vld [vmem:[#allocation4 + $0x35c] sm:$0xf] }
 0x77a   :  { %7661 = vmatpush.bf16.msrb.mxu1 %v11360_v0  ;;  %7687 = vmatpush.bf16.msrb.mxu3 %v11364_v42  ;;  %v11201_v41 = vld [vmem:[#allocation4 + $0x270] sm:$0xf0]  ;;  %v11200_v0 = vor.u32 %v12246_v9, %v11199_v25  ;;  %v11167_v3 = vld [vmem:[#allocation4 + $0x210] sm:$0xf]  ;;  %v11337_v16 = vld [vmem:[#allocation4 + $0x378] sm:$0xf0] }
 0x77b   :  { %v12238_v47 = vld [vmem:[#allocation4 + $0x22c] sm:$0xf0]  ;;  %v12170_v53 = vld [vmem:[#allocation4 + $0x14] sm:$0xf]  ;;  %v11204_v42 = vor.u32 %v12242_v1, %v11201_v41  ;;  %v11303_v39 = vld [vmem:[#allocation4 + $0x318] sm:$0xf]  ;;  %v11340_v22 = vor.u32 %v12275_v15, %v11337_v16 }
 0x77c   :  { %7649 = vmatpush.bf16.msrb.mxu0 %v11072_v50  ;;  %7675 = vmatpush.bf16.msrb.mxu2 %v11076_v18  ;;  %v10913_v51 = vld [vmem:[#allocation4 + $0x30] sm:$0xf0]  ;;  %v11399_v50 = vld [vmem:[#allocation4 + $0x3d8] sm:$0xf]  ;;  %v11168_v24 = vor.u32 %v12238_v47, %v11167_v3  ;;  %v11049_v9 = vld [vmem:[#allocation4 + $0x138] sm:$0xf0] }
 0x77d   :  { %v12234_v36 = vld [vmem:[#allocation4 + $0x214] sm:$0xf]  ;;  %v12295_v18 = vld [vmem:[#allocation4 + $0x3f4] sm:$0xf0]  ;;  %v12267_v35 = vld [vmem:[#allocation4 + $0x31c] sm:$0xf] }
 0x77e   :  { %7662 = vmatpush.bf16.msrb.mxu1 %v11328_v13  ;;  %7688 = vmatpush.bf16.msrb.mxu3 %v11332_v44  ;;  %v11169_v6 = vld [vmem:[#allocation4 + $0x230] sm:$0xf0]  ;;  %v10912_v13 = vor.u32 %v12174_v49, %v10911_v48  ;;  %v10916_v44 = vor.u32 %v12170_v53, %v10913_v51  ;;  %v11400_v40 = vor.u32 %v12295_v18, %v11399_v50  ;;  %v12271_v25 = vld [vmem:[#allocation4 + $0x334] sm:$0xf0]  ;;  %v11305_v34 = vld [vmem:[#allocation4 + $0x338] sm:$0xf0] }
 0x77f   :  { %v11172_v31 = vor.u32 %v12234_v36, %v11169_v6  ;;  %v11304_v41 = vor.u32 %v12271_v25, %v11303_v39  ;;  %v11015_v48 = vld [vmem:[#allocation4 + $0xd8] sm:$0xf]  ;;  %v12195_v47 = vld [vmem:[#allocation4 + $0xdc] sm:$0xf] }
 0x780   :  { %7650 = vmatpush.bf16.msrb.mxu0 %v11040_v59  ;;  %7676 = vmatpush.bf16.msrb.mxu2 %v11044_v32  ;;  %v11148_v59 = vor.u32 %v12227_v54, %v11145_v43  ;;  %v12223_v32 = vld [vmem:[#allocation4 + $0x1b4] sm:$0xf0]  ;;  %v11017_v53 = vld [vmem:[#allocation4 + $0xf8] sm:$0xf0] }
 0x781   :  { %v12199_v49 = vld [vmem:[#allocation4 + $0xf4] sm:$0xf0]  ;;  %v11273_v51 = vld [vmem:[#allocation4 + $0x2f8] sm:$0xf0]  ;;  %v11020_v63 = vor.u32 %v12195_v47, %v11017_v53 }
 0x782   :  { %7663 = vmatpush.bf16.msrb.mxu1 %v11296_v33  ;;  %7689 = vmatpush.bf16.msrb.mxu3 %v11300_v11  ;;  %v11111_v33 = vld [vmem:[#allocation4 + $0x198] sm:$0xf]  ;;  %v12219_v11 = vld [vmem:[#allocation4 + $0x19c] sm:$0xf]  ;;  %v11016_v36 = vor.u32 %v12199_v49, %v11015_v48 }
 0x783   :  { %v11112_v4 = vor.u32 %v12223_v32, %v11111_v33  ;;  %v12263_v3 = vld [vmem:[#allocation4 + $0x2f4] sm:$0xf0]  ;;  %v12187_v43 = vld [vmem:[#allocation4 + $0x9c] sm:$0xf] }
 0x784   :  { %7651 = vmatpush.bf16.msrb.mxu0 %v11008_v52  ;;  %7677 = vmatpush.bf16.msrb.mxu2 %v11012_v7  ;;  %v11116_v52 = vor.u32 %v12219_v11, %v11113_v62  ;;  %v12215_v7 = vld [vmem:[#allocation4 + $0x174] sm:$0xf0]  ;;  %v11241_v57 = vld [vmem:[#allocation4 + $0x2b8] sm:$0xf0] }
 0x785   :  { %v10983_v38 = vld [vmem:[#allocation4 + $0x98] sm:$0xf]  ;;  %v10953_v2 = vld [vmem:[#allocation4 + $0x78] sm:$0xf0] }
 0x786   :  { %7664 = vmatpush.bf16.msrb.mxu1 %v11264_v56  ;;  %7690 = vmatpush.bf16.msrb.mxu3 %v11268_v27  ;;  %v11079_v56 = vld [vmem:[#allocation4 + $0x158] sm:$0xf]  ;;  %v12211_v27 = vld [vmem:[#allocation4 + $0x15c] sm:$0xf] }
 0x787   :  { %v11080_v17 = vor.u32 %v12215_v7, %v11079_v56  ;;  %v12191_v50 = vld [vmem:[#allocation4 + $0xb4] sm:$0xf0]  ;;  %v12243_v11 = vld [vmem:[#allocation4 + $0x25c] sm:$0xf] }
 0x788   :  { %7652 = vmatpush.bf16.msrb.mxu0 %v10976_v5  ;;  %7678 = vmatpush.bf16.msrb.mxu2 %v10980_v21  ;;  %v11084_v5 = vor.u32 %v12211_v27, %v11081_v23  ;;  %v12207_v21 = vld [vmem:[#allocation4 + $0x134] sm:$0xf0]  ;;  %v10984_v46 = vor.u32 %v12191_v50, %v10983_v38  ;;  %v11209_v62 = vld [vmem:[#allocation4 + $0x278] sm:$0xf0] }
 0x789   :  { %v12255_v54 = vld [vmem:[#allocation4 + $0x2b4] sm:$0xf0]  ;;  %v11212_v7 = vor.u32 %v12243_v11, %v11209_v62  ;;  %v10921_v12 = vld [vmem:[#allocation4 + $0x38] sm:$0xf0] }
 0x78a   :  { %7665 = vmatpush.bf16.msrb.mxu1 %v11232_v20  ;;  %7691 = vmatpush.bf16.msrb.mxu3 %v11236_v19  ;;  %v11047_v20 = vld [vmem:[#allocation4 + $0x118] sm:$0xf]  ;;  %v12203_v19 = vld [vmem:[#allocation4 + $0x11c] sm:$0xf] }
 0x78b   :  { %v11048_v1 = vor.u32 %v12207_v21, %v11047_v20  ;;  %v11207_v33 = vld [vmem:[#allocation4 + $0x258] sm:$0xf]  ;;  %v12235_v27 = vld [vmem:[#allocation4 + $0x21c] sm:$0xf] }
 0x78c   :  { %7653 = vmatpush.bf16.msrb.mxu0 %v10944_v10  ;;  %7679 = vmatpush.bf16.msrb.mxu2 %v10948_v26  ;;  %v11052_v10 = vor.u32 %v12203_v19, %v11049_v9  ;;  %v11308_v26 = vor.u32 %v12267_v35, %v11305_v34  ;;  %v12247_v60 = vld [vmem:[#allocation4 + $0x274] sm:$0xf0]  ;;  %v11177_v23 = vld [vmem:[#allocation4 + $0x238] sm:$0xf0] }
 0x78d   :  { %v11208_v58 = vor.u32 %v12247_v60, %v11207_v33  ;;  %v11175_v56 = vld [vmem:[#allocation4 + $0x218] sm:$0xf] }
 0x78e   :  { %7666 = vmatpush.bf16.msrb.mxu1 %v11200_v0  ;;  %7692 = vmatpush.bf16.msrb.mxu3 %v11204_v42  ;;  %v11271_v0 = vld [vmem:[#allocation4 + $0x2d8] sm:$0xf]  ;;  %v12259_v42 = vld [vmem:[#allocation4 + $0x2dc] sm:$0xf] }
 0x78f   :  { %v11272_v6 = vor.u32 %v12263_v3, %v11271_v0  ;;  %v11276_v18 = vor.u32 %v12259_v42, %v11273_v51  ;;  %v12239_v29 = vld [vmem:[#allocation4 + $0x234] sm:$0xf0] }
 0x790   :  { %7654 = vmatpush.bf16.msrb.mxu0 %v10912_v13  ;;  %7680 = vmatpush.bf16.msrb.mxu2 %v10916_v44  ;;  %v11239_v13 = vld [vmem:[#allocation4 + $0x298] sm:$0xf]  ;;  %v12251_v44 = vld [vmem:[#allocation4 + $0x29c] sm:$0xf]  ;;  %v11176_v16 = vor.u32 %v12239_v29, %v11175_v56 }
 0x791   :  { %v11244_v32 = vor.u32 %v12251_v44, %v11241_v57 }
 0x792   :  { %7667 = vmatpush.bf16.msrb.mxu1 %v11168_v24  ;;  %7693 = vmatpush.bf16.msrb.mxu3 %v11172_v31  ;;  %v10985_v24 = vld [vmem:[#allocation4 + $0xb8] sm:$0xf0]  ;;  %v11240_v31 = vor.u32 %v12255_v54, %v11239_v13 }
 0x793   :  { %7681 = vmatmul.bf16.vlgmr.msrb.gmra.mxu2 %v13350_v45  ;;  %7655 = vmatmul.bf16.vlgmr.msrb.gmra.mxu0 %v13350_v45 }
 0x794   :  { %7699 = vmatpush.bf16.msra.mxu0 %v11144_v37  ;;  %7725 = vmatpush.bf16.msra.mxu2 %v11148_v59  ;;  %v10988_v37 = vor.u32 %v12187_v43, %v10985_v24  ;;  %v12183_v59 = vld [vmem:[#allocation4 + $0x74] sm:$0xf0] }
 0x795   :  { %7694 = vmatmul.bf16.vlgmr.msrb.gmra.mxu3 %v13355_v8  ;;  %7668 = vmatmul.bf16.vlgmr.msrb.gmra.mxu1 %v13355_v8 }
 0x796   :  { %7712 = vmatpush.bf16.msra.mxu1 %v11400_v40  ;;  %7738 = vmatpush.bf16.msra.mxu3 %v11404_v28  ;;  %v10951_v40 = vld [vmem:[#allocation4 + $0x58] sm:$0xf]  ;;  %v12179_v28 = vld [vmem:[#allocation4 + $0x5c] sm:$0xf] }
 0x797   :  { %v10952_v30 = vor.u32 %v12183_v59, %v10951_v40 }
 0x798   :  { %7700 = vmatpush.bf16.msra.mxu0 %v11112_v4  ;;  %7726 = vmatpush.bf16.msra.mxu2 %v11116_v52  ;;  %v10956_v4 = vor.u32 %v12179_v28, %v10953_v2  ;;  %v12175_v52 = vld [vmem:[#allocation4 + $0x34] sm:$0xf0] }
 0x79a   :  { %7713 = vmatpush.bf16.msra.mxu1 %v11368_v55  ;;  %7739 = vmatpush.bf16.msra.mxu3 %v11372_v14  ;;  %v10919_v55 = vld [vmem:[#allocation4 + $0x18] sm:$0xf]  ;;  %v12171_v14 = vld [vmem:[#allocation4 + $0x1c] sm:$0xf] }
 0x79b   :  { %v10920_v15 = vor.u32 %v12175_v52, %v10919_v55 }
 0x79c   :  { %7701 = vmatpush.bf16.msra.mxu0 %v11080_v17  ;;  %7727 = vmatpush.bf16.msra.mxu2 %v11084_v5  ;;  %v10924_v17 = vor.u32 %v12171_v14, %v10921_v12 }
 0x79e   :  { %7714 = vmatpush.bf16.msra.mxu1 %v11336_v61  ;;  %7740 = vmatpush.bf16.msra.mxu3 %v11340_v22  ;;  %v11180_v61 = vor.u32 %v12235_v27, %v11177_v23 }
 0x7a0   :  { %7702 = vmatpush.bf16.msra.mxu0 %v11048_v1  ;;  %7728 = vmatpush.bf16.msra.mxu2 %v11052_v10 }
 0x7a2   :  { %7715 = vmatpush.bf16.msra.mxu1 %v11304_v41  ;;  %7741 = vmatpush.bf16.msra.mxu3 %v11308_v26 }
 0x7a4   :  { %7703 = vmatpush.bf16.msra.mxu0 %v11016_v36  ;;  %7729 = vmatpush.bf16.msra.mxu2 %v11020_v63 }
 0x7a6   :  { %7716 = vmatpush.bf16.msra.mxu1 %v11272_v6  ;;  %7742 = vmatpush.bf16.msra.mxu3 %v11276_v18 }
 0x7a8   :  { %7704 = vmatpush.bf16.msra.mxu0 %v10984_v46  ;;  %7730 = vmatpush.bf16.msra.mxu2 %v10988_v37 }
 0x7aa   :  { %7717 = vmatpush.bf16.msra.mxu1 %v11240_v31  ;;  %7743 = vmatpush.bf16.msra.mxu3 %v11244_v32 }
 0x7ac   :  { %7705 = vmatpush.bf16.msra.mxu0 %v10952_v30  ;;  %7731 = vmatpush.bf16.msra.mxu2 %v10956_v4 }
 0x7ae   :  { %7718 = vmatpush.bf16.msra.mxu1 %v11208_v58  ;;  %7744 = vmatpush.bf16.msra.mxu3 %v11212_v7 }
 0x7b0   :  { %7706 = vmatpush.bf16.msra.mxu0 %v10920_v15  ;;  %7732 = vmatpush.bf16.msra.mxu2 %v10924_v17 }
 0x7b2   :  { %7719 = vmatpush.bf16.msra.mxu1 %v11176_v16  ;;  %7745 = vmatpush.bf16.msra.mxu3 %v11180_v61 }
 0x7b3   :  { %7707 = vmatmul.bf16.vlgmr.msra.gmra.mxu0 %v13350_v45  ;;  %7733 = vmatmul.bf16.vlgmr.msra.gmra.mxu2 %v13350_v45 }
 0x7b5   :  { %7720 = vmatmul.bf16.vlgmr.msra.gmra.mxu1 %v13355_v8  ;;  %7746 = vmatmul.bf16.vlgmr.msra.gmra.mxu3 %v13355_v8 }
 0x7d0   :  { %v7552_v5 = vpop.f32.mrf.mxu0 }
 0x7d2   :  { %v7565_v20 = vpop.f32.mrf.mxu1 }
 0x7d3   :  { %v7566_v21 = vadd.f32 %v7565_v20, %v7552_v5 }
 0x7d5   :  { %7777 = vst.sshfl [vmem:[#allocation1] sm:$0xff pattern:$0x73625140] %v7566_v21 }
 0x7d6   :  { %v7578_v39 = vpop.f32.mrf.mxu2 }
 0x7d8   :  { %v7591_v22 = vpop.f32.mrf.mxu3  ;;  %v7554_v19 = vpop.f32.mrf.mxu0 }
 0x7d9   :  { %v7592_v25 = vadd.f32 %v7591_v22, %v7578_v39 }
 0x7da   :  { %v7567_v9 = vpop.f32.mrf.mxu1 }
 0x7db   :  { %7778 = vst.sshfl [vmem:[#allocation1 + $0x8] sm:$0xff pattern:$0x73625140] %v7592_v25  ;;  %v7759_v49 = vrot.slane %v7592_v25, 6 }
 0x7dd   :  { %v7765_v53 = vsel %vm361_vm1, %v7566_v21, %v7759_v49 }
 0x7de   :  { %v7580_v35 = vpop.f32.mrf.mxu2 }
 0x7e0   :  { %v7593_v34 = vpop.f32.mrf.mxu3 }
 0x7f0   :  { %v7604_v1 = vpop.f32.mrf.mxu0 }
 0x7f2   :  { %v7617_v41 = vpop.f32.mrf.mxu1 }
 0x7f3   :  { %v7618_v10 = vadd.f32 %v7617_v41, %v7604_v1 }
 0x7f5   :  { %7779 = vst.sshfl [vmem:[#allocation1 + $0x10] sm:$0xff pattern:$0x73625140] %v7618_v10  ;;  %v7760_v8 = vrot.slane %v7618_v10, 4 }
 0x7f6   :  { %v7630_v48 = vpop.f32.mrf.mxu2 }
 0x7f8   :  { %v7643_v45 = vpop.f32.mrf.mxu3  ;;  %v7606_v26 = vpop.f32.mrf.mxu0 }
 0x7f9   :  { %v7644_v0 = vadd.f32 %v7643_v45, %v7630_v48 }
 0x7fa   :  { %v7619_v47 = vpop.f32.mrf.mxu1 }
 0x7fb   :  { %v7761_v3 = vrot.slane %v7644_v0, 2  ;;  %7780 = vst.sshfl [vmem:[#allocation1 + $0x18] sm:$0xff pattern:$0x73625140] %v7644_v0 }
 0x7fd   :  { %v7767_v42 = vsel %vm7766_vm11, %v7760_v8, %v7761_v3 }
 0x7fe   :  { %v7769_v51 = vsel %vm7768_vm12, %v7765_v53, %v7767_v42  ;;  %v7632_v36 = vpop.f32.mrf.mxu2 }
 0x7ff   :  { %7775 = vst [vmem:[%s13409_s13] sm:$0xff] %v7769_v51 }
 0x800   :  { %v7645_v6 = vpop.f32.mrf.mxu3 }
 0x802   :  { %v7786_v63 = vld [vmem:[#allocation1 + $0x1] ss:$4 sm:$0xff] }
 0x803   :  { %7791 = vst [vmem:[%s13409_s13 + $0x10] sm:$0xff] %v7786_v63 }
 0x804   :  { %7793 = vst.sshfl [vmem:[#allocation1] sm:$0xff pattern:$0x73625140] %v7566_v21 }
 0x805   :  { %7794 = vst.sshfl [vmem:[#allocation1 + $0x8] sm:$0xff pattern:$0x73625140] %v7592_v25 }
 0x806   :  { %7795 = vst.sshfl [vmem:[#allocation1 + $0x10] sm:$0xff pattern:$0x73625140] %v7618_v10 }
 0x807   :  { %7796 = vst.sshfl [vmem:[#allocation1 + $0x18] sm:$0xff pattern:$0x73625140] %v7644_v0 }
 0x80e   :  { %v7802_v38 = vld [vmem:[#allocation1 + $0x2] ss:$4 sm:$0xff] }
 0x80f   :  { %7807 = vst [vmem:[%s13409_s13 + $0x20] sm:$0xff] %v7802_v38 }
 0x810   :  { %v7656_v50 = vpop.f32.mrf.mxu0 }
 0x812   :  { %v7669_v13 = vpop.f32.mrf.mxu1 }
 0x813   :  { %v7670_v18 = vadd.f32 %v7669_v13, %v7656_v50 }
 0x815   :  { %7781 = vst.sshfl [vmem:[#allocation1 + $0x20] sm:$0xff pattern:$0x73625140] %v7670_v18 }
 0x816   :  { %v7682_v54 = vpop.f32.mrf.mxu2 }
 0x818   :  { %v7695_v43 = vpop.f32.mrf.mxu3  ;;  %v7658_v44 = vpop.f32.mrf.mxu0 }
 0x819   :  { %v7696_v24 = vadd.f32 %v7695_v43, %v7682_v54 }
 0x81a   :  { %v7671_v57 = vpop.f32.mrf.mxu1 }
 0x81b   :  { %7782 = vst.sshfl [vmem:[#allocation1 + $0x28] sm:$0xff pattern:$0x73625140] %v7696_v24  ;;  %v7762_v28 = vrot.slane %v7696_v24, 6 }
 0x81d   :  { %v7770_v58 = vsel %vm361_vm1, %v7670_v18, %v7762_v28 }
 0x81e   :  { %v7684_v46 = vpop.f32.mrf.mxu2 }
 0x820   :  { %v7697_v31 = vpop.f32.mrf.mxu3 }
 0x830   :  { %v7708_v37 = vpop.f32.mrf.mxu0 }
 0x832   :  { %v7721_v40 = vpop.f32.mrf.mxu1 }
 0x833   :  { %v7722_v59 = vadd.f32 %v7721_v40, %v7708_v37 }
 0x835   :  { %7783 = vst.sshfl [vmem:[#allocation1 + $0x30] sm:$0xff pattern:$0x73625140] %v7722_v59  ;;  %v7763_v2 = vrot.slane %v7722_v59, 4 }
 0x836   :  { %v7734_v33 = vpop.f32.mrf.mxu2 }
 0x838   :  { %v7747_v32 = vpop.f32.mrf.mxu3  ;;  %v7710_v60 = vpop.f32.mrf.mxu0 }
 0x839   :  { %v7748_v11 = vadd.f32 %v7747_v32, %v7734_v33 }
 0x83a   :  { %v7723_v62 = vpop.f32.mrf.mxu1 }
 0x83b   :  { %v7764_v30 = vrot.slane %v7748_v11, 2  ;;  %7784 = vst.sshfl [vmem:[#allocation1 + $0x38] sm:$0xff pattern:$0x73625140] %v7748_v11 }
 0x83d   :  { %v7771_v4 = vsel %vm7766_vm11, %v7763_v2, %v7764_v30 }
 0x83e   :  { %v7772_v55 = vsel %vm7768_vm12, %v7770_v58, %v7771_v4  ;;  %v7736_v52 = vpop.f32.mrf.mxu2 }
 0x83f   :  { %7776 = vst [vmem:[%s13409_s13 + $0x8] sm:$0xff] %v7772_v55 }
 0x840   :  { %v7749_v56 = vpop.f32.mrf.mxu3 }
 0x842   :  { %v7788_v7 = vld [vmem:[#allocation1 + $0x21] ss:$4 sm:$0xff] }
 0x843   :  { %7792 = vst [vmem:[%s13409_s13 + $0x18] sm:$0xff] %v7788_v7 }
 0x844   :  { %7797 = vst.sshfl [vmem:[#allocation1 + $0x20] sm:$0xff pattern:$0x73625140] %v7670_v18 }
 0x845   :  { %7798 = vst.sshfl [vmem:[#allocation1 + $0x28] sm:$0xff pattern:$0x73625140] %v7696_v24 }
 0x846   :  { %7799 = vst.sshfl [vmem:[#allocation1 + $0x30] sm:$0xff pattern:$0x73625140] %v7722_v59 }
 0x847   :  { %7800 = vst.sshfl [vmem:[#allocation1 + $0x38] sm:$0xff pattern:$0x73625140] %v7748_v11 }
 0x84e   :  { %v7804_v29 = vld [vmem:[#allocation1 + $0x22] ss:$4 sm:$0xff] }
 0x84f   :  { %7808 = vst [vmem:[%s13409_s13 + $0x28] sm:$0xff] %v7804_v29 }
 0x850   :  { %7813 = vsyncpa [#allocation7], 1 }
 0x851   :  { %7814 = vsyncpa [#allocation9], 1 }
 0x852   :  { %7815 = vsyncpa [#allocation12], 1 }
 0x853   :  { %7816 = vsyncpa [#allocation15], 1 }
 0x854   :  { %7817 = vsyncmov [#allocation5] }
 0x857   :  { %s7818_s17 = vpop.sfrf %7817 }
 0x858   :  { %p11405_p0 = scmp.ne.s32.totalorder %s7818_s17, 0 }
 0x85a   :  { %7822 = shalt.err (%p11405_p0)  }
 0x85b   :  { %7824 = vsyncmov [#allocation5 + $0x1] }
 0x85e   :  { %s7825_s7 = vpop.sfrf %7824 }
 0x85f   :  { %p11406_p1 = scmp.ne.s32.totalorder %s7825_s7, 0 }
 0x861   :  { %7829 = shalt.err (%p11406_p1)  }
 0x862   :  { %7831 = vsyncmov [#allocation5 + $0x2] }
 0x865   :  { %s7832_s9 = vpop.sfrf %7831 }
 0x866   :  { %p11407_p2 = scmp.ne.s32.totalorder %s7832_s9, 0 }
 0x868   :  { %7836 = shalt.err (%p11407_p2)  }

</bundles_post_ra>
